<compile_context>
chip_gen: v7x
topology: tpu7x:2x2x1
jax: 0.10.0
libtpu: 0.0.40
codegen_flags: <defaults>
</compile_context>

<pallas_src>
import functools

import jax
import jax.numpy as jnp
from jax.experimental import pallas as pl
from jax.experimental.pallas import tpu as pltpu

NUM_CHANNELS = 1


# ---------------------------------------------------------------------------
# Fused conv(kxk, VALID) + bias + 2x2 max-pool + ReLU.  One image per grid step.
# Activation layout: (N, H, C, W) with W on the lane axis.
# ---------------------------------------------------------------------------
def _conv_pool_relu_kernel(x_ref, w_ref, b_ref, o_ref, *, k, groups, Wo):
    # x_ref: (H, Cin, W)   w_ref: (groups, Cout, Kg)   b_ref: (Cout, 1)
    # o_ref: (Ho2, Cout, Wo2)
    Ho2, Cout, Wo2 = o_ref.shape
    taps = (k * k) // groups

    # One-hot column-selection matrices implementing the stride-2 pooling along W.
    col = jax.lax.broadcasted_iota(jnp.int32, (Wo, Wo2), 0)
    two_m = 2 * jax.lax.broadcasted_iota(jnp.int32, (Wo, Wo2), 1)
    s_even = (col == two_m).astype(jnp.float32)
    s_odd = (col == two_m + 1).astype(jnp.float32)
    bias = b_ref[...]                                           # (Cout, 1)

    def conv_row_t(ho):
        # Transposed conv row:  (Cout, Wo) = sum_g  W_g @ P_g(ho)
        acc = jnp.zeros((Cout, Wo), jnp.float32)
        for g in range(groups):
            parts = []
            for t in range(taps):
                f = g * taps + t
                i, j = f // k, f % k
                parts.append(x_ref[ho + i, :, pl.ds(j, Wo)])    # (Cin, Wo)
            p = jnp.concatenate(parts, axis=0)                  # (Kg, Wo)
            acc = acc + jnp.dot(w_ref[g], p, preferred_element_type=jnp.float32)
        return acc

    @pl.loop(0, Ho2)
    def _(hp):
        # Two conv rows feeding this pool row; bias commutes with max.
        r = jnp.maximum(conv_row_t(2 * hp), conv_row_t(2 * hp + 1)) + bias     # (Cout, Wo)
        pooled = jnp.maximum(
            jnp.dot(r, s_even, preferred_element_type=jnp.float32),
            jnp.dot(r, s_odd, preferred_element_type=jnp.float32),
        )                                                                      # (Cout, Wo2)
        o_ref[hp] = jnp.maximum(pooled, 0.0)


def _prep_conv_weight(w, groups):
    # torch (Cout, Cin, k, k) -> (groups, Cout, (k*k*Cin)//groups), K rows ordered (i, j, c).
    Cout, Cin, k, _ = w.shape
    wt = jnp.transpose(w, (2, 3, 1, 0)).reshape(k * k * Cin, Cout)
    kg = (k * k * Cin) // groups
    return jnp.transpose(wt.reshape(groups, kg, Cout), (0, 2, 1))


def conv_pool_relu(x, w, b, *, groups):
    """x: (N, H, Cin, W) f32; w: torch (Cout, Cin, k, k); b: (Cout,).
    Returns relu(maxpool2(conv(x)+b)) in (N, Ho//2, Cout, Wo//2) layout."""
    N, H, Cin, W = x.shape
    Cout, _, k, _ = w.shape
    Ho, Wo = H - k + 1, W - k + 1
    Ho2, Wo2 = Ho // 2, Wo // 2
    wg = _prep_conv_weight(w, groups)
    kg = wg.shape[2]
    bias = b.reshape(Cout, 1).astype(jnp.float32)

    kernel = functools.partial(_conv_pool_relu_kernel, k=k, groups=groups, Wo=Wo)
    return pl.pallas_call(
        kernel,
        out_shape=jax.ShapeDtypeStruct((N, Ho2, Cout, Wo2), jnp.float32),
        grid=(N,),
        in_specs=[
            pl.BlockSpec((None, H, Cin, W), lambda n: (n, 0, 0, 0)),
            pl.BlockSpec((groups, Cout, kg), lambda n: (0, 0, 0)),
            pl.BlockSpec((Cout, 1), lambda n: (0, 0)),
        ],
        out_specs=pl.BlockSpec((None, Ho2, Cout, Wo2), lambda n: (n, 0, 0, 0)),
        compiler_params=pltpu.CompilerParams(dimension_semantics=("parallel",)),
    )(x, wg, bias)


# ---------------------------------------------------------------------------
# Fused fc1 -> relu -> fc2 -> relu -> fc3 (all weights resident in VMEM).
# ---------------------------------------------------------------------------
def _fc3_kernel(x_ref, w1_ref, b1_ref, w2_ref, b2_ref, w3_ref, b3_ref, o_ref):
    h = jnp.dot(x_ref[...], w1_ref[...], preferred_element_type=jnp.float32) + b1_ref[...]
    h = jnp.maximum(h, 0.0)
    # TODO(synk): F.dropout between FC layers is identity here (eval-mode semantics).
    h = jnp.dot(h, w2_ref[...], preferred_element_type=jnp.float32) + b2_ref[...]
    h = jnp.maximum(h, 0.0)
    o_ref[...] = jnp.dot(h, w3_ref[...], preferred_element_type=jnp.float32) + b3_ref[...]


# ---------------------------------------------------------------------------
# Full forward pass
# ---------------------------------------------------------------------------
def cnnet_forward(x_nchw, p):
    N = x_nchw.shape[0]
    x = jnp.transpose(x_nchw, (0, 2, 1, 3))               # NCHW -> (N, H, C, W)

    x = conv_pool_relu(x, p["w1"], p["b1"], groups=1)     # (N, 68, 32, 68)
    # TODO(synk): Dropout2d after conv2 is a training-mode RNG mask; identity here (eval).
    x = conv_pool_relu(x, p["w2"], p["b2"], groups=5)     # (N, 32, 16, 32)
    x = conv_pool_relu(x, p["w3"], p["b3"], groups=1)     # (N, 14,  8, 14)

    _, H3, C3, W3 = x.shape
    x = x.reshape(N, H3 * C3 * W3)                        # flatten in (h, c, w) order

    nf1 = p["fw1"].shape[0]
    # Fold the PyTorch (c, h, w) flatten order into fc1's columns -> our (h, c, w) order.
    w1m = jnp.transpose(p["fw1"].reshape(nf1, C3, H3, W3), (0, 2, 1, 3)).reshape(nf1, -1).T
    w2m = p["fw2"].T
    nout = p["fw3"].shape[0]
    pad = 128 - nout
    w3m = jnp.pad(p["fw3"].T, ((0, 0), (0, pad)))         # (256, 128), zero-padded outputs
    b3m = jnp.pad(p["fb3"], (0, pad)).reshape(1, 128)

    out = pl.pallas_call(
        _fc3_kernel,
        out_shape=jax.ShapeDtypeStruct((N, 128), jnp.float32),
    )(x, w1m, p["fb1"].reshape(1, -1), w2m, p["fb2"].reshape(1, -1), w3m, b3m)
    return out[:, :nout]                                  # (N, 2)


# ---------------------------------------------------------------------------
# Parameter init (torch-style uniform) and a smoke test.
# ---------------------------------------------------------------------------
def init_params(key):
    def uinit(k, shape, fan_in):
        bound = 1.0 / (fan_in ** 0.5)
        return jax.random.uniform(k, shape, jnp.float32, -bound, bound)

    ks = jax.random.split(key, 12)
    p = {}
    # conv weights in torch layout (Cout, Cin, kH, kW)
    p["w1"] = uinit(ks[0], (32, NUM_CHANNELS, 5, 5), NUM_CHANNELS * 25)
    p["b1"] = uinit(ks[1], (32,), NUM_CHANNELS * 25)
    p["w2"] = uinit(ks[2], (16, 32, 5, 5), 32 * 25)
    p["b2"] = uinit(ks[3], (16,), 32 * 25)
    p["w3"] = uinit(ks[4], (8, 16, 5, 5), 16 * 25)
    p["b3"] = uinit(ks[5], (8,), 16 * 25)
    # fc weights in torch layout (out, in)
    p["fw1"] = uinit(ks[6], (512, 1568), 1568)
    p["fb1"] = uinit(ks[7], (512,), 1568)
    p["fw2"] = uinit(ks[8], (256, 512), 512)
    p["fb2"] = uinit(ks[9], (256,), 512)
    p["fw3"] = uinit(ks[10], (2, 256), 256)
    p["fb3"] = uinit(ks[11], (2,), 256)
    return p


if __name__ == "__main__":
    key = jax.random.PRNGKey(0)
    k_x, k_p = jax.random.split(key)
    # batch=2, channels=NUM_CHANNELS, spatial 140x140 (mandated by fc1 = Linear(1568, 512))
    x = jax.random.normal(k_x, (2, NUM_CHANNELS, 140, 140), jnp.float32)
    params = init_params(k_p)

    fwd = jax.jit(cnnet_forward)
    out = fwd(x, params)
    jax.block_until_ready(out)
    assert out.shape == (2, 2) and out.dtype == jnp.float32
    print("KERNEL_OK")
</pallas_src>

<mosaic_0001>
module attributes {stable_mosaic.version = 11 : i64} {
  func.func @_conv_pool_relu_kernel(%arg0: i32, %arg1: memref<1x140x1x140xf32, #tpu.memory_space<vmem>>, %arg2: memref<1x32x25xf32, #tpu.memory_space<vmem>>, %arg3: memref<32x1xf32, #tpu.memory_space<vmem>>, %arg4: memref<1x68x32x68xf32, #tpu.memory_space<vmem>>) attributes {dimension_semantics = [#tpu.dimension_semantics<parallel>], iteration_bounds = array<i64: 2>, scalar_prefetch = 0 : i64, scratch_operands = 0 : i64, tpu.core_type = #tpu.core_type<tc>, window_params = [{transform_indices = @transform_0, window_bounds = array<i64: 1, 140, 1, 140>}, {pipeline_mode = #tpu.pipeline_mode<synchronous>, transform_indices = @transform_1, window_bounds = array<i64: 1, 32, 25>}, {pipeline_mode = #tpu.pipeline_mode<synchronous>, transform_indices = @transform_2, window_bounds = array<i64: 32, 1>}, {transform_indices = @transform_3, window_bounds = array<i64: 1, 68, 32, 68>}]} {
    %0 = tpu.iota {dimensions = array<i32: 0>} : vector<136x68xi32>
    %1 = tpu.iota {dimensions = array<i32: 1>} : vector<136x68xi32>
    %c2_i32 = arith.constant 2 : i32
    %2 = vector.broadcast %c2_i32 : i32 to vector<136x68xi32>
    %3 = arith.muli %2, %1 : vector<136x68xi32>
    %4 = arith.cmpi eq, %0, %3 : vector<136x68xi32>
    %5 = arith.extui %4 : vector<136x68xi1> to vector<136x68xi32>
    %6 = arith.sitofp %5 : vector<136x68xi32> to vector<136x68xf32>
    %c1_i32 = arith.constant 1 : i32
    %7 = vector.broadcast %c1_i32 : i32 to vector<136x68xi32>
    %8 = arith.addi %3, %7 : vector<136x68xi32>
    %9 = arith.cmpi eq, %0, %8 : vector<136x68xi32>
    %10 = arith.extui %9 : vector<136x68xi1> to vector<136x68xi32>
    %11 = arith.sitofp %10 : vector<136x68xi32> to vector<136x68xf32>
    %c0 = arith.constant 0 : index
    %c0_0 = arith.constant 0 : index
    %12 = vector.load %arg3[%c0, %c0_0] : memref<32x1xf32, #tpu.memory_space<vmem>>, vector<32x1xf32>
    %c0_i32 = arith.constant 0 : i32
    %c68_i32 = arith.constant 68 : i32
    %13 = arith.addi %c0_i32, %c68_i32 : i32
    %c1_i32_1 = arith.constant 1 : i32
    scf.for %arg5 = %c0_i32 to %13 step %c1_i32_1  : i32 {
      %c1_i32_3 = arith.constant 1 : i32
      %14 = arith.muli %arg5, %c1_i32_3 : i32
      %c0_i32_4 = arith.constant 0 : i32
      %15 = arith.addi %c0_i32_4, %14 : i32
      %c2_i32_5 = arith.constant 2 : i32
      %16 = arith.muli %c2_i32_5, %15 : i32
      %cst = arith.constant 0.000000e+00 : f32
      %17 = vector.broadcast %cst : f32 to vector<32x136xf32>
      %c0_i32_6 = arith.constant 0 : i32
      %18 = arith.addi %16, %c0_i32_6 : i32
      %c0_7 = arith.constant 0 : index
      %19 = arith.index_cast %18 : i32 to index
      %c0_8 = arith.constant 0 : index
      %c0_9 = arith.constant 0 : index
      %20 = vector.load %arg1[%c0_7, %19, %c0_8, %c0_9] : memref<1x140x1x140xf32, #tpu.memory_space<vmem>>, vector<1x1x1x136xf32>
      %21 = vector.shape_cast %20 : vector<1x1x1x136xf32> to vector<1x136xf32>
      %c0_i32_10 = arith.constant 0 : i32
      %22 = arith.addi %16, %c0_i32_10 : i32
      %c0_11 = arith.constant 0 : index
      %23 = arith.index_cast %22 : i32 to index
      %c0_12 = arith.constant 0 : index
      %c1 = arith.constant 1 : index
      %24 = vector.load %arg1[%c0_11, %23, %c0_12, %c1] : memref<1x140x1x140xf32, #tpu.memory_space<vmem>>, vector<1x1x1x136xf32>
      %25 = vector.shape_cast %24 : vector<1x1x1x136xf32> to vector<1x136xf32>
      %c0_i32_13 = arith.constant 0 : i32
      %26 = arith.addi %16, %c0_i32_13 : i32
      %c0_14 = arith.constant 0 : index
      %27 = arith.index_cast %26 : i32 to index
      %c0_15 = arith.constant 0 : index
      %c2 = arith.constant 2 : index
      %28 = vector.load %arg1[%c0_14, %27, %c0_15, %c2] : memref<1x140x1x140xf32, #tpu.memory_space<vmem>>, vector<1x1x1x136xf32>
      %29 = vector.shape_cast %28 : vector<1x1x1x136xf32> to vector<1x136xf32>
      %c0_i32_16 = arith.constant 0 : i32
      %30 = arith.addi %16, %c0_i32_16 : i32
      %c0_17 = arith.constant 0 : index
      %31 = arith.index_cast %30 : i32 to index
      %c0_18 = arith.constant 0 : index
      %c3 = arith.constant 3 : index
      %32 = vector.load %arg1[%c0_17, %31, %c0_18, %c3] : memref<1x140x1x140xf32, #tpu.memory_space<vmem>>, vector<1x1x1x136xf32>
      %33 = vector.shape_cast %32 : vector<1x1x1x136xf32> to vector<1x136xf32>
      %c0_i32_19 = arith.constant 0 : i32
      %34 = arith.addi %16, %c0_i32_19 : i32
      %c0_20 = arith.constant 0 : index
      %35 = arith.index_cast %34 : i32 to index
      %c0_21 = arith.constant 0 : index
      %c4 = arith.constant 4 : index
      %36 = vector.load %arg1[%c0_20, %35, %c0_21, %c4] : memref<1x140x1x140xf32, #tpu.memory_space<vmem>>, vector<1x1x1x136xf32>
      %37 = vector.shape_cast %36 : vector<1x1x1x136xf32> to vector<1x136xf32>
      %c1_i32_22 = arith.constant 1 : i32
      %38 = arith.addi %16, %c1_i32_22 : i32
      %c0_23 = arith.constant 0 : index
      %39 = arith.index_cast %38 : i32 to index
      %c0_24 = arith.constant 0 : index
      %c0_25 = arith.constant 0 : index
      %40 = vector.load %arg1[%c0_23, %39, %c0_24, %c0_25] : memref<1x140x1x140xf32, #tpu.memory_space<vmem>>, vector<1x1x1x136xf32>
      %41 = vector.shape_cast %40 : vector<1x1x1x136xf32> to vector<1x136xf32>
      %c1_i32_26 = arith.constant 1 : i32
      %42 = arith.addi %16, %c1_i32_26 : i32
      %c0_27 = arith.constant 0 : index
      %43 = arith.index_cast %42 : i32 to index
      %c0_28 = arith.constant 0 : index
      %c1_29 = arith.constant 1 : index
      %44 = vector.load %arg1[%c0_27, %43, %c0_28, %c1_29] : memref<1x140x1x140xf32, #tpu.memory_space<vmem>>, vector<1x1x1x136xf32>
      %45 = vector.shape_cast %44 : vector<1x1x1x136xf32> to vector<1x136xf32>
      %c1_i32_30 = arith.constant 1 : i32
      %46 = arith.addi %16, %c1_i32_30 : i32
      %c0_31 = arith.constant 0 : index
      %47 = arith.index_cast %46 : i32 to index
      %c0_32 = arith.constant 0 : index
      %c2_33 = arith.constant 2 : index
      %48 = vector.load %arg1[%c0_31, %47, %c0_32, %c2_33] : memref<1x140x1x140xf32, #tpu.memory_space<vmem>>, vector<1x1x1x136xf32>
      %49 = vector.shape_cast %48 : vector<1x1x1x136xf32> to vector<1x136xf32>
      %c1_i32_34 = arith.constant 1 : i32
      %50 = arith.addi %16, %c1_i32_34 : i32
      %c0_35 = arith.constant 0 : index
      %51 = arith.index_cast %50 : i32 to index
      %c0_36 = arith.constant 0 : index
      %c3_37 = arith.constant 3 : index
      %52 = vector.load %arg1[%c0_35, %51, %c0_36, %c3_37] : memref<1x140x1x140xf32, #tpu.memory_space<vmem>>, vector<1x1x1x136xf32>
      %53 = vector.shape_cast %52 : vector<1x1x1x136xf32> to vector<1x136xf32>
      %c1_i32_38 = arith.constant 1 : i32
      %54 = arith.addi %16, %c1_i32_38 : i32
      %c0_39 = arith.constant 0 : index
      %55 = arith.index_cast %54 : i32 to index
      %c0_40 = arith.constant 0 : index
      %c4_41 = arith.constant 4 : index
      %56 = vector.load %arg1[%c0_39, %55, %c0_40, %c4_41] : memref<1x140x1x140xf32, #tpu.memory_space<vmem>>, vector<1x1x1x136xf32>
      %57 = vector.shape_cast %56 : vector<1x1x1x136xf32> to vector<1x136xf32>
      %c2_i32_42 = arith.constant 2 : i32
      %58 = arith.addi %16, %c2_i32_42 : i32
      %c0_43 = arith.constant 0 : index
      %59 = arith.index_cast %58 : i32 to index
      %c0_44 = arith.constant 0 : index
      %c0_45 = arith.constant 0 : index
      %60 = vector.load %arg1[%c0_43, %59, %c0_44, %c0_45] : memref<1x140x1x140xf32, #tpu.memory_space<vmem>>, vector<1x1x1x136xf32>
      %61 = vector.shape_cast %60 : vector<1x1x1x136xf32> to vector<1x136xf32>
      %c2_i32_46 = arith.constant 2 : i32
      %62 = arith.addi %16, %c2_i32_46 : i32
      %c0_47 = arith.constant 0 : index
      %63 = arith.index_cast %62 : i32 to index
      %c0_48 = arith.constant 0 : index
      %c1_49 = arith.constant 1 : index
      %64 = vector.load %arg1[%c0_47, %63, %c0_48, %c1_49] : memref<1x140x1x140xf32, #tpu.memory_space<vmem>>, vector<1x1x1x136xf32>
      %65 = vector.shape_cast %64 : vector<1x1x1x136xf32> to vector<1x136xf32>
      %c2_i32_50 = arith.constant 2 : i32
      %66 = arith.addi %16, %c2_i32_50 : i32
      %c0_51 = arith.constant 0 : index
      %67 = arith.index_cast %66 : i32 to index
      %c0_52 = arith.constant 0 : index
      %c2_53 = arith.constant 2 : index
      %68 = vector.load %arg1[%c0_51, %67, %c0_52, %c2_53] : memref<1x140x1x140xf32, #tpu.memory_space<vmem>>, vector<1x1x1x136xf32>
      %69 = vector.shape_cast %68 : vector<1x1x1x136xf32> to vector<1x136xf32>
      %c2_i32_54 = arith.constant 2 : i32
      %70 = arith.addi %16, %c2_i32_54 : i32
      %c0_55 = arith.constant 0 : index
      %71 = arith.index_cast %70 : i32 to index
      %c0_56 = arith.constant 0 : index
      %c3_57 = arith.constant 3 : index
      %72 = vector.load %arg1[%c0_55, %71, %c0_56, %c3_57] : memref<1x140x1x140xf32, #tpu.memory_space<vmem>>, vector<1x1x1x136xf32>
      %73 = vector.shape_cast %72 : vector<1x1x1x136xf32> to vector<1x136xf32>
      %c2_i32_58 = arith.constant 2 : i32
      %74 = arith.addi %16, %c2_i32_58 : i32
      %c0_59 = arith.constant 0 : index
      %75 = arith.index_cast %74 : i32 to index
      %c0_60 = arith.constant 0 : index
      %c4_61 = arith.constant 4 : index
      %76 = vector.load %arg1[%c0_59, %75, %c0_60, %c4_61] : memref<1x140x1x140xf32, #tpu.memory_space<vmem>>, vector<1x1x1x136xf32>
      %77 = vector.shape_cast %76 : vector<1x1x1x136xf32> to vector<1x136xf32>
      %c3_i32 = arith.constant 3 : i32
      %78 = arith.addi %16, %c3_i32 : i32
      %c0_62 = arith.constant 0 : index
      %79 = arith.index_cast %78 : i32 to index
      %c0_63 = arith.constant 0 : index
      %c0_64 = arith.constant 0 : index
      %80 = vector.load %arg1[%c0_62, %79, %c0_63, %c0_64] : memref<1x140x1x140xf32, #tpu.memory_space<vmem>>, vector<1x1x1x136xf32>
      %81 = vector.shape_cast %80 : vector<1x1x1x136xf32> to vector<1x136xf32>
      %c3_i32_65 = arith.constant 3 : i32
      %82 = arith.addi %16, %c3_i32_65 : i32
      %c0_66 = arith.constant 0 : index
      %83 = arith.index_cast %82 : i32 to index
      %c0_67 = arith.constant 0 : index
      %c1_68 = arith.constant 1 : index
      %84 = vector.load %arg1[%c0_66, %83, %c0_67, %c1_68] : memref<1x140x1x140xf32, #tpu.memory_space<vmem>>, vector<1x1x1x136xf32>
      %85 = vector.shape_cast %84 : vector<1x1x1x136xf32> to vector<1x136xf32>
      %c3_i32_69 = arith.constant 3 : i32
      %86 = arith.addi %16, %c3_i32_69 : i32
      %c0_70 = arith.constant 0 : index
      %87 = arith.index_cast %86 : i32 to index
      %c0_71 = arith.constant 0 : index
      %c2_72 = arith.constant 2 : index
      %88 = vector.load %arg1[%c0_70, %87, %c0_71, %c2_72] : memref<1x140x1x140xf32, #tpu.memory_space<vmem>>, vector<1x1x1x136xf32>
      %89 = vector.shape_cast %88 : vector<1x1x1x136xf32> to vector<1x136xf32>
      %c3_i32_73 = arith.constant 3 : i32
      %90 = arith.addi %16, %c3_i32_73 : i32
      %c0_74 = arith.constant 0 : index
      %91 = arith.index_cast %90 : i32 to index
      %c0_75 = arith.constant 0 : index
      %c3_76 = arith.constant 3 : index
      %92 = vector.load %arg1[%c0_74, %91, %c0_75, %c3_76] : memref<1x140x1x140xf32, #tpu.memory_space<vmem>>, vector<1x1x1x136xf32>
      %93 = vector.shape_cast %92 : vector<1x1x1x136xf32> to vector<1x136xf32>
      %c3_i32_77 = arith.constant 3 : i32
      %94 = arith.addi %16, %c3_i32_77 : i32
      %c0_78 = arith.constant 0 : index
      %95 = arith.index_cast %94 : i32 to index
      %c0_79 = arith.constant 0 : index
      %c4_80 = arith.constant 4 : index
      %96 = vector.load %arg1[%c0_78, %95, %c0_79, %c4_80] : memref<1x140x1x140xf32, #tpu.memory_space<vmem>>, vector<1x1x1x136xf32>
      %97 = vector.shape_cast %96 : vector<1x1x1x136xf32> to vector<1x136xf32>
      %c4_i32 = arith.constant 4 : i32
      %98 = arith.addi %16, %c4_i32 : i32
      %c0_81 = arith.constant 0 : index
      %99 = arith.index_cast %98 : i32 to index
      %c0_82 = arith.constant 0 : index
      %c0_83 = arith.constant 0 : index
      %100 = vector.load %arg1[%c0_81, %99, %c0_82, %c0_83] : memref<1x140x1x140xf32, #tpu.memory_space<vmem>>, vector<1x1x1x136xf32>
      %101 = vector.shape_cast %100 : vector<1x1x1x136xf32> to vector<1x136xf32>
      %c4_i32_84 = arith.constant 4 : i32
      %102 = arith.addi %16, %c4_i32_84 : i32
      %c0_85 = arith.constant 0 : index
      %103 = arith.index_cast %102 : i32 to index
      %c0_86 = arith.constant 0 : index
      %c1_87 = arith.constant 1 : index
      %104 = vector.load %arg1[%c0_85, %103, %c0_86, %c1_87] : memref<1x140x1x140xf32, #tpu.memory_space<vmem>>, vector<1x1x1x136xf32>
      %105 = vector.shape_cast %104 : vector<1x1x1x136xf32> to vector<1x136xf32>
      %c4_i32_88 = arith.constant 4 : i32
      %106 = arith.addi %16, %c4_i32_88 : i32
      %c0_89 = arith.constant 0 : index
      %107 = arith.index_cast %106 : i32 to index
      %c0_90 = arith.constant 0 : index
      %c2_91 = arith.constant 2 : index
      %108 = vector.load %arg1[%c0_89, %107, %c0_90, %c2_91] : memref<1x140x1x140xf32, #tpu.memory_space<vmem>>, vector<1x1x1x136xf32>
      %109 = vector.shape_cast %108 : vector<1x1x1x136xf32> to vector<1x136xf32>
      %c4_i32_92 = arith.constant 4 : i32
      %110 = arith.addi %16, %c4_i32_92 : i32
      %c0_93 = arith.constant 0 : index
      %111 = arith.index_cast %110 : i32 to index
      %c0_94 = arith.constant 0 : index
      %c3_95 = arith.constant 3 : index
      %112 = vector.load %arg1[%c0_93, %111, %c0_94, %c3_95] : memref<1x140x1x140xf32, #tpu.memory_space<vmem>>, vector<1x1x1x136xf32>
      %113 = vector.shape_cast %112 : vector<1x1x1x136xf32> to vector<1x136xf32>
      %c4_i32_96 = arith.constant 4 : i32
      %114 = arith.addi %16, %c4_i32_96 : i32
      %c0_97 = arith.constant 0 : index
      %115 = arith.index_cast %114 : i32 to index
      %c0_98 = arith.constant 0 : index
      %c4_99 = arith.constant 4 : index
      %116 = vector.load %arg1[%c0_97, %115, %c0_98, %c4_99] : memref<1x140x1x140xf32, #tpu.memory_space<vmem>>, vector<1x1x1x136xf32>
      %117 = vector.shape_cast %116 : vector<1x1x1x136xf32> to vector<1x136xf32>
      %118 = tpu.concatenate %21, %25, %29, %33, %37, %41, %45, %49, %53, %57, %61, %65, %69, %73, %77, %81 in 0 : vector<1x136xf32>, vector<1x136xf32>, vector<1x136xf32>, vector<1x136xf32>, vector<1x136xf32>, vector<1x136xf32>, vector<1x136xf32>, vector<1x136xf32>, vector<1x136xf32>, vector<1x136xf32>, vector<1x136xf32>, vector<1x136xf32>, vector<1x136xf32>, vector<1x136xf32>, vector<1x136xf32>, vector<1x136xf32> -> vector<16x136xf32>
      %119 = tpu.concatenate %85, %89, %93, %97, %101, %105, %109, %113, %117 in 0 : vector<1x136xf32>, vector<1x136xf32>, vector<1x136xf32>, vector<1x136xf32>, vector<1x136xf32>, vector<1x136xf32>, vector<1x136xf32>, vector<1x136xf32>, vector<1x136xf32> -> vector<9x136xf32>
      %120 = tpu.concatenate %118, %119 in 0 : vector<16x136xf32>, vector<9x136xf32> -> vector<25x136xf32>
      %c0_100 = arith.constant 0 : index
      %c0_101 = arith.constant 0 : index
      %c0_102 = arith.constant 0 : index
      %121 = vector.load %arg2[%c0_100, %c0_101, %c0_102] : memref<1x32x25xf32, #tpu.memory_space<vmem>>, vector<1x32x25xf32>
      %122 = vector.shape_cast %121 : vector<1x32x25xf32> to vector<32x25xf32>
      %cst_103 = arith.constant dense<0.000000e+00> : vector<32x136xf32>
      %123 = tpu.matmul %122, %120, %cst_103 {dimension_numbers = #tpu.dot_dimension_numbers<[1], [0], [0], [1], [0, 0, 1, 1], [], []>} : vector<32x25xf32>, vector<25x136xf32>, vector<32x136xf32> -> vector<32x136xf32>
      %124 = arith.addf %17, %123 : vector<32x136xf32>
      %c2_i32_104 = arith.constant 2 : i32
      %125 = arith.muli %c2_i32_104, %15 : i32
      %c1_i32_105 = arith.constant 1 : i32
      %126 = arith.addi %125, %c1_i32_105 : i32
      %cst_106 = arith.constant 0.000000e+00 : f32
      %127 = vector.broadcast %cst_106 : f32 to vector<32x136xf32>
      %c0_i32_107 = arith.constant 0 : i32
      %128 = arith.addi %126, %c0_i32_107 : i32
      %c0_108 = arith.constant 0 : index
      %129 = arith.index_cast %128 : i32 to index
      %c0_109 = arith.constant 0 : index
      %c0_110 = arith.constant 0 : index
      %130 = vector.load %arg1[%c0_108, %129, %c0_109, %c0_110] : memref<1x140x1x140xf32, #tpu.memory_space<vmem>>, vector<1x1x1x136xf32>
      %131 = vector.shape_cast %130 : vector<1x1x1x136xf32> to vector<1x136xf32>
      %c0_i32_111 = arith.constant 0 : i32
      %132 = arith.addi %126, %c0_i32_111 : i32
      %c0_112 = arith.constant 0 : index
      %133 = arith.index_cast %132 : i32 to index
      %c0_113 = arith.constant 0 : index
      %c1_114 = arith.constant 1 : index
      %134 = vector.load %arg1[%c0_112, %133, %c0_113, %c1_114] : memref<1x140x1x140xf32, #tpu.memory_space<vmem>>, vector<1x1x1x136xf32>
      %135 = vector.shape_cast %134 : vector<1x1x1x136xf32> to vector<1x136xf32>
      %c0_i32_115 = arith.constant 0 : i32
      %136 = arith.addi %126, %c0_i32_115 : i32
      %c0_116 = arith.constant 0 : index
      %137 = arith.index_cast %136 : i32 to index
      %c0_117 = arith.constant 0 : index
      %c2_118 = arith.constant 2 : index
      %138 = vector.load %arg1[%c0_116, %137, %c0_117, %c2_118] : memref<1x140x1x140xf32, #tpu.memory_space<vmem>>, vector<1x1x1x136xf32>
      %139 = vector.shape_cast %138 : vector<1x1x1x136xf32> to vector<1x136xf32>
      %c0_i32_119 = arith.constant 0 : i32
      %140 = arith.addi %126, %c0_i32_119 : i32
      %c0_120 = arith.constant 0 : index
      %141 = arith.index_cast %140 : i32 to index
      %c0_121 = arith.constant 0 : index
      %c3_122 = arith.constant 3 : index
      %142 = vector.load %arg1[%c0_120, %141, %c0_121, %c3_122] : memref<1x140x1x140xf32, #tpu.memory_space<vmem>>, vector<1x1x1x136xf32>
      %143 = vector.shape_cast %142 : vector<1x1x1x136xf32> to vector<1x136xf32>
      %c0_i32_123 = arith.constant 0 : i32
      %144 = arith.addi %126, %c0_i32_123 : i32
      %c0_124 = arith.constant 0 : index
      %145 = arith.index_cast %144 : i32 to index
      %c0_125 = arith.constant 0 : index
      %c4_126 = arith.constant 4 : index
      %146 = vector.load %arg1[%c0_124, %145, %c0_125, %c4_126] : memref<1x140x1x140xf32, #tpu.memory_space<vmem>>, vector<1x1x1x136xf32>
      %147 = vector.shape_cast %146 : vector<1x1x1x136xf32> to vector<1x136xf32>
      %c1_i32_127 = arith.constant 1 : i32
      %148 = arith.addi %126, %c1_i32_127 : i32
      %c0_128 = arith.constant 0 : index
      %149 = arith.index_cast %148 : i32 to index
      %c0_129 = arith.constant 0 : index
      %c0_130 = arith.constant 0 : index
      %150 = vector.load %arg1[%c0_128, %149, %c0_129, %c0_130] : memref<1x140x1x140xf32, #tpu.memory_space<vmem>>, vector<1x1x1x136xf32>
      %151 = vector.shape_cast %150 : vector<1x1x1x136xf32> to vector<1x136xf32>
      %c1_i32_131 = arith.constant 1 : i32
      %152 = arith.addi %126, %c1_i32_131 : i32
      %c0_132 = arith.constant 0 : index
      %153 = arith.index_cast %152 : i32 to index
      %c0_133 = arith.constant 0 : index
      %c1_134 = arith.constant 1 : index
      %154 = vector.load %arg1[%c0_132, %153, %c0_133, %c1_134] : memref<1x140x1x140xf32, #tpu.memory_space<vmem>>, vector<1x1x1x136xf32>
      %155 = vector.shape_cast %154 : vector<1x1x1x136xf32> to vector<1x136xf32>
      %c1_i32_135 = arith.constant 1 : i32
      %156 = arith.addi %126, %c1_i32_135 : i32
      %c0_136 = arith.constant 0 : index
      %157 = arith.index_cast %156 : i32 to index
      %c0_137 = arith.constant 0 : index
      %c2_138 = arith.constant 2 : index
      %158 = vector.load %arg1[%c0_136, %157, %c0_137, %c2_138] : memref<1x140x1x140xf32, #tpu.memory_space<vmem>>, vector<1x1x1x136xf32>
      %159 = vector.shape_cast %158 : vector<1x1x1x136xf32> to vector<1x136xf32>
      %c1_i32_139 = arith.constant 1 : i32
      %160 = arith.addi %126, %c1_i32_139 : i32
      %c0_140 = arith.constant 0 : index
      %161 = arith.index_cast %160 : i32 to index
      %c0_141 = arith.constant 0 : index
      %c3_142 = arith.constant 3 : index
      %162 = vector.load %arg1[%c0_140, %161, %c0_141, %c3_142] : memref<1x140x1x140xf32, #tpu.memory_space<vmem>>, vector<1x1x1x136xf32>
      %163 = vector.shape_cast %162 : vector<1x1x1x136xf32> to vector<1x136xf32>
      %c1_i32_143 = arith.constant 1 : i32
      %164 = arith.addi %126, %c1_i32_143 : i32
      %c0_144 = arith.constant 0 : index
      %165 = arith.index_cast %164 : i32 to index
      %c0_145 = arith.constant 0 : index
      %c4_146 = arith.constant 4 : index
      %166 = vector.load %arg1[%c0_144, %165, %c0_145, %c4_146] : memref<1x140x1x140xf32, #tpu.memory_space<vmem>>, vector<1x1x1x136xf32>
      %167 = vector.shape_cast %166 : vector<1x1x1x136xf32> to vector<1x136xf32>
      %c2_i32_147 = arith.constant 2 : i32
      %168 = arith.addi %126, %c2_i32_147 : i32
      %c0_148 = arith.constant 0 : index
      %169 = arith.index_cast %168 : i32 to index
      %c0_149 = arith.constant 0 : index
      %c0_150 = arith.constant 0 : index
      %170 = vector.load %arg1[%c0_148, %169, %c0_149, %c0_150] : memref<1x140x1x140xf32, #tpu.memory_space<vmem>>, vector<1x1x1x136xf32>
      %171 = vector.shape_cast %170 : vector<1x1x1x136xf32> to vector<1x136xf32>
      %c2_i32_151 = arith.constant 2 : i32
      %172 = arith.addi %126, %c2_i32_151 : i32
      %c0_152 = arith.constant 0 : index
      %173 = arith.index_cast %172 : i32 to index
      %c0_153 = arith.constant 0 : index
      %c1_154 = arith.constant 1 : index
      %174 = vector.load %arg1[%c0_152, %173, %c0_153, %c1_154] : memref<1x140x1x140xf32, #tpu.memory_space<vmem>>, vector<1x1x1x136xf32>
      %175 = vector.shape_cast %174 : vector<1x1x1x136xf32> to vector<1x136xf32>
      %c2_i32_155 = arith.constant 2 : i32
      %176 = arith.addi %126, %c2_i32_155 : i32
      %c0_156 = arith.constant 0 : index
      %177 = arith.index_cast %176 : i32 to index
      %c0_157 = arith.constant 0 : index
      %c2_158 = arith.constant 2 : index
      %178 = vector.load %arg1[%c0_156, %177, %c0_157, %c2_158] : memref<1x140x1x140xf32, #tpu.memory_space<vmem>>, vector<1x1x1x136xf32>
      %179 = vector.shape_cast %178 : vector<1x1x1x136xf32> to vector<1x136xf32>
      %c2_i32_159 = arith.constant 2 : i32
      %180 = arith.addi %126, %c2_i32_159 : i32
      %c0_160 = arith.constant 0 : index
      %181 = arith.index_cast %180 : i32 to index
      %c0_161 = arith.constant 0 : index
      %c3_162 = arith.constant 3 : index
      %182 = vector.load %arg1[%c0_160, %181, %c0_161, %c3_162] : memref<1x140x1x140xf32, #tpu.memory_space<vmem>>, vector<1x1x1x136xf32>
      %183 = vector.shape_cast %182 : vector<1x1x1x136xf32> to vector<1x136xf32>
      %c2_i32_163 = arith.constant 2 : i32
      %184 = arith.addi %126, %c2_i32_163 : i32
      %c0_164 = arith.constant 0 : index
      %185 = arith.index_cast %184 : i32 to index
      %c0_165 = arith.constant 0 : index
      %c4_166 = arith.constant 4 : index
      %186 = vector.load %arg1[%c0_164, %185, %c0_165, %c4_166] : memref<1x140x1x140xf32, #tpu.memory_space<vmem>>, vector<1x1x1x136xf32>
      %187 = vector.shape_cast %186 : vector<1x1x1x136xf32> to vector<1x136xf32>
      %c3_i32_167 = arith.constant 3 : i32
      %188 = arith.addi %126, %c3_i32_167 : i32
      %c0_168 = arith.constant 0 : index
      %189 = arith.index_cast %188 : i32 to index
      %c0_169 = arith.constant 0 : index
      %c0_170 = arith.constant 0 : index
      %190 = vector.load %arg1[%c0_168, %189, %c0_169, %c0_170] : memref<1x140x1x140xf32, #tpu.memory_space<vmem>>, vector<1x1x1x136xf32>
      %191 = vector.shape_cast %190 : vector<1x1x1x136xf32> to vector<1x136xf32>
      %c3_i32_171 = arith.constant 3 : i32
      %192 = arith.addi %126, %c3_i32_171 : i32
      %c0_172 = arith.constant 0 : index
      %193 = arith.index_cast %192 : i32 to index
      %c0_173 = arith.constant 0 : index
      %c1_174 = arith.constant 1 : index
      %194 = vector.load %arg1[%c0_172, %193, %c0_173, %c1_174] : memref<1x140x1x140xf32, #tpu.memory_space<vmem>>, vector<1x1x1x136xf32>
      %195 = vector.shape_cast %194 : vector<1x1x1x136xf32> to vector<1x136xf32>
      %c3_i32_175 = arith.constant 3 : i32
      %196 = arith.addi %126, %c3_i32_175 : i32
      %c0_176 = arith.constant 0 : index
      %197 = arith.index_cast %196 : i32 to index
      %c0_177 = arith.constant 0 : index
      %c2_178 = arith.constant 2 : index
      %198 = vector.load %arg1[%c0_176, %197, %c0_177, %c2_178] : memref<1x140x1x140xf32, #tpu.memory_space<vmem>>, vector<1x1x1x136xf32>
      %199 = vector.shape_cast %198 : vector<1x1x1x136xf32> to vector<1x136xf32>
      %c3_i32_179 = arith.constant 3 : i32
      %200 = arith.addi %126, %c3_i32_179 : i32
      %c0_180 = arith.constant 0 : index
      %201 = arith.index_cast %200 : i32 to index
      %c0_181 = arith.constant 0 : index
      %c3_182 = arith.constant 3 : index
      %202 = vector.load %arg1[%c0_180, %201, %c0_181, %c3_182] : memref<1x140x1x140xf32, #tpu.memory_space<vmem>>, vector<1x1x1x136xf32>
      %203 = vector.shape_cast %202 : vector<1x1x1x136xf32> to vector<1x136xf32>
      %c3_i32_183 = arith.constant 3 : i32
      %204 = arith.addi %126, %c3_i32_183 : i32
      %c0_184 = arith.constant 0 : index
      %205 = arith.index_cast %204 : i32 to index
      %c0_185 = arith.constant 0 : index
      %c4_186 = arith.constant 4 : index
      %206 = vector.load %arg1[%c0_184, %205, %c0_185, %c4_186] : memref<1x140x1x140xf32, #tpu.memory_space<vmem>>, vector<1x1x1x136xf32>
      %207 = vector.shape_cast %206 : vector<1x1x1x136xf32> to vector<1x136xf32>
      %c4_i32_187 = arith.constant 4 : i32
      %208 = arith.addi %126, %c4_i32_187 : i32
      %c0_188 = arith.constant 0 : index
      %209 = arith.index_cast %208 : i32 to index
      %c0_189 = arith.constant 0 : index
      %c0_190 = arith.constant 0 : index
      %210 = vector.load %arg1[%c0_188, %209, %c0_189, %c0_190] : memref<1x140x1x140xf32, #tpu.memory_space<vmem>>, vector<1x1x1x136xf32>
      %211 = vector.shape_cast %210 : vector<1x1x1x136xf32> to vector<1x136xf32>
      %c4_i32_191 = arith.constant 4 : i32
      %212 = arith.addi %126, %c4_i32_191 : i32
      %c0_192 = arith.constant 0 : index
      %213 = arith.index_cast %212 : i32 to index
      %c0_193 = arith.constant 0 : index
      %c1_194 = arith.constant 1 : index
      %214 = vector.load %arg1[%c0_192, %213, %c0_193, %c1_194] : memref<1x140x1x140xf32, #tpu.memory_space<vmem>>, vector<1x1x1x136xf32>
      %215 = vector.shape_cast %214 : vector<1x1x1x136xf32> to vector<1x136xf32>
      %c4_i32_195 = arith.constant 4 : i32
      %216 = arith.addi %126, %c4_i32_195 : i32
      %c0_196 = arith.constant 0 : index
      %217 = arith.index_cast %216 : i32 to index
      %c0_197 = arith.constant 0 : index
      %c2_198 = arith.constant 2 : index
      %218 = vector.load %arg1[%c0_196, %217, %c0_197, %c2_198] : memref<1x140x1x140xf32, #tpu.memory_space<vmem>>, vector<1x1x1x136xf32>
      %219 = vector.shape_cast %218 : vector<1x1x1x136xf32> to vector<1x136xf32>
      %c4_i32_199 = arith.constant 4 : i32
      %220 = arith.addi %126, %c4_i32_199 : i32
      %c0_200 = arith.constant 0 : index
      %221 = arith.index_cast %220 : i32 to index
      %c0_201 = arith.constant 0 : index
      %c3_202 = arith.constant 3 : index
      %222 = vector.load %arg1[%c0_200, %221, %c0_201, %c3_202] : memref<1x140x1x140xf32, #tpu.memory_space<vmem>>, vector<1x1x1x136xf32>
      %223 = vector.shape_cast %222 : vector<1x1x1x136xf32> to vector<1x136xf32>
      %c4_i32_203 = arith.constant 4 : i32
      %224 = arith.addi %126, %c4_i32_203 : i32
      %c0_204 = arith.constant 0 : index
      %225 = arith.index_cast %224 : i32 to index
      %c0_205 = arith.constant 0 : index
      %c4_206 = arith.constant 4 : index
      %226 = vector.load %arg1[%c0_204, %225, %c0_205, %c4_206] : memref<1x140x1x140xf32, #tpu.memory_space<vmem>>, vector<1x1x1x136xf32>
      %227 = vector.shape_cast %226 : vector<1x1x1x136xf32> to vector<1x136xf32>
      %228 = tpu.concatenate %131, %135, %139, %143, %147, %151, %155, %159, %163, %167, %171, %175, %179, %183, %187, %191 in 0 : vector<1x136xf32>, vector<1x136xf32>, vector<1x136xf32>, vector<1x136xf32>, vector<1x136xf32>, vector<1x136xf32>, vector<1x136xf32>, vector<1x136xf32>, vector<1x136xf32>, vector<1x136xf32>, vector<1x136xf32>, vector<1x136xf32>, vector<1x136xf32>, vector<1x136xf32>, vector<1x136xf32>, vector<1x136xf32> -> vector<16x136xf32>
      %229 = tpu.concatenate %195, %199, %203, %207, %211, %215, %219, %223, %227 in 0 : vector<1x136xf32>, vector<1x136xf32>, vector<1x136xf32>, vector<1x136xf32>, vector<1x136xf32>, vector<1x136xf32>, vector<1x136xf32>, vector<1x136xf32>, vector<1x136xf32> -> vector<9x136xf32>
      %230 = tpu.concatenate %228, %229 in 0 : vector<16x136xf32>, vector<9x136xf32> -> vector<25x136xf32>
      %c0_207 = arith.constant 0 : index
      %c0_208 = arith.constant 0 : index
      %c0_209 = arith.constant 0 : index
      %231 = vector.load %arg2[%c0_207, %c0_208, %c0_209] : memref<1x32x25xf32, #tpu.memory_space<vmem>>, vector<1x32x25xf32>
      %232 = vector.shape_cast %231 : vector<1x32x25xf32> to vector<32x25xf32>
      %cst_210 = arith.constant dense<0.000000e+00> : vector<32x136xf32>
      %233 = tpu.matmul %232, %230, %cst_210 {dimension_numbers = #tpu.dot_dimension_numbers<[1], [0], [0], [1], [0, 0, 1, 1], [], []>} : vector<32x25xf32>, vector<25x136xf32>, vector<32x136xf32> -> vector<32x136xf32>
      %234 = arith.addf %127, %233 : vector<32x136xf32>
      %235 = arith.maximumf %124, %234 : vector<32x136xf32>
      %236 = vector.broadcast %12 : vector<32x1xf32> to vector<32x136xf32>
      %237 = arith.addf %235, %236 : vector<32x136xf32>
      %cst_211 = arith.constant dense<0.000000e+00> : vector<32x68xf32>
      %238 = tpu.matmul %237, %6, %cst_211 {dimension_numbers = #tpu.dot_dimension_numbers<[1], [0], [0], [1], [0, 0, 1, 1], [], []>} : vector<32x136xf32>, vector<136x68xf32>, vector<32x68xf32> -> vector<32x68xf32>
      %cst_212 = arith.constant dense<0.000000e+00> : vector<32x68xf32>
      %239 = tpu.matmul %237, %11, %cst_212 {dimension_numbers = #tpu.dot_dimension_numbers<[1], [0], [0], [1], [0, 0, 1, 1], [], []>} : vector<32x136xf32>, vector<136x68xf32>, vector<32x68xf32> -> vector<32x68xf32>
      %240 = arith.maximumf %238, %239 : vector<32x68xf32>
      %cst_213 = arith.constant 0.000000e+00 : f32
      %241 = vector.broadcast %cst_213 : f32 to vector<32x68xf32>
      %242 = arith.maximumf %240, %241 : vector<32x68xf32>
      %c0_214 = arith.constant 0 : index
      %243 = arith.index_cast %15 : i32 to index
      %c0_215 = arith.constant 0 : index
      %c0_216 = arith.constant 0 : index
      %244 = vector.load %arg4[%c0_214, %243, %c0_215, %c0_216] : memref<1x68x32x68xf32, #tpu.memory_space<vmem>>, vector<1x1x32x68xf32>
      %245 = vector.shape_cast %244 : vector<1x1x32x68xf32> to vector<32x68xf32>
      %246 = vector.shape_cast %242 : vector<32x68xf32> to vector<1x1x32x68xf32>
      tpu.vector_store %arg4[%c0_214, %243, %c0_215, %c0_216], %246 {strides = array<i32>} : memref<1x68x32x68xf32, #tpu.memory_space<vmem>>, vector<1x1x32x68xf32>,
    }
    %c68_i32_2 = arith.constant 68 : i32
    return
  }
  func.func @transform_0(%arg0: i32) -> (i32, i32, i32, i32) {
    %c0_i32 = arith.constant 0 : i32
    %c0_i32_0 = arith.constant 0 : i32
    %c0_i32_1 = arith.constant 0 : i32
    %c0_i32_2 = arith.constant 0 : i32
    return %arg0, %c0_i32, %c0_i32_0, %c0_i32_1 : i32, i32, i32, i32
  }
  func.func @transform_1(%arg0: i32) -> (i32, i32, i32) {
    %c0_i32 = arith.constant 0 : i32
    %c0_i32_0 = arith.constant 0 : i32
    %c0_i32_1 = arith.constant 0 : i32
    %c0_i32_2 = arith.constant 0 : i32
    return %c0_i32, %c0_i32_0, %c0_i32_1 : i32, i32, i32
  }
  func.func @transform_2(%arg0: i32) -> (i32, i32) {
    %c0_i32 = arith.constant 0 : i32
    %c0_i32_0 = arith.constant 0 : i32
    %c0_i32_1 = arith.constant 0 : i32
    return %c0_i32, %c0_i32_0 : i32, i32
  }
  func.func @transform_3(%arg0: i32) -> (i32, i32, i32, i32) {
    %c0_i32 = arith.constant 0 : i32
    %c0_i32_0 = arith.constant 0 : i32
    %c0_i32_1 = arith.constant 0 : i32
    %c0_i32_2 = arith.constant 0 : i32
    return %arg0, %c0_i32, %c0_i32_0, %c0_i32_1 : i32, i32, i32, i32
  }
}

module attributes {stable_mosaic.version = 11 : i64} {
  func.func @_conv_pool_relu_kernel(%arg0: i32, %arg1: memref<1x68x32x68xf32, #tpu.memory_space<vmem>>, %arg2: memref<5x16x160xf32, #tpu.memory_space<vmem>>, %arg3: memref<16x1xf32, #tpu.memory_space<vmem>>, %arg4: memref<1x32x16x32xf32, #tpu.memory_space<vmem>>) attributes {dimension_semantics = [#tpu.dimension_semantics<parallel>], iteration_bounds = array<i64: 2>, scalar_prefetch = 0 : i64, scratch_operands = 0 : i64, tpu.core_type = #tpu.core_type<tc>, window_params = [{transform_indices = @transform_0, window_bounds = array<i64: 1, 68, 32, 68>}, {pipeline_mode = #tpu.pipeline_mode<synchronous>, transform_indices = @transform_1, window_bounds = array<i64: 5, 16, 160>}, {pipeline_mode = #tpu.pipeline_mode<synchronous>, transform_indices = @transform_2, window_bounds = array<i64: 16, 1>}, {transform_indices = @transform_3, window_bounds = array<i64: 1, 32, 16, 32>}]} {
    %0 = tpu.iota {dimensions = array<i32: 0>} : vector<64x32xi32>
    %1 = tpu.iota {dimensions = array<i32: 1>} : vector<64x32xi32>
    %c2_i32 = arith.constant 2 : i32
    %2 = vector.broadcast %c2_i32 : i32 to vector<64x32xi32>
    %3 = arith.muli %2, %1 : vector<64x32xi32>
    %4 = arith.cmpi eq, %0, %3 : vector<64x32xi32>
    %5 = arith.extui %4 : vector<64x32xi1> to vector<64x32xi32>
    %6 = arith.sitofp %5 : vector<64x32xi32> to vector<64x32xf32>
    %c1_i32 = arith.constant 1 : i32
    %7 = vector.broadcast %c1_i32 : i32 to vector<64x32xi32>
    %8 = arith.addi %3, %7 : vector<64x32xi32>
    %9 = arith.cmpi eq, %0, %8 : vector<64x32xi32>
    %10 = arith.extui %9 : vector<64x32xi1> to vector<64x32xi32>
    %11 = arith.sitofp %10 : vector<64x32xi32> to vector<64x32xf32>
    %c0 = arith.constant 0 : index
    %c0_0 = arith.constant 0 : index
    %12 = vector.load %arg3[%c0, %c0_0] : memref<16x1xf32, #tpu.memory_space<vmem>>, vector<16x1xf32>
    %c0_i32 = arith.constant 0 : i32
    %c32_i32 = arith.constant 32 : i32
    %13 = arith.addi %c0_i32, %c32_i32 : i32
    %c1_i32_1 = arith.constant 1 : i32
    scf.for %arg5 = %c0_i32 to %13 step %c1_i32_1  : i32 {
      %c1_i32_3 = arith.constant 1 : i32
      %14 = arith.muli %arg5, %c1_i32_3 : i32
      %c0_i32_4 = arith.constant 0 : i32
      %15 = arith.addi %c0_i32_4, %14 : i32
      %c2_i32_5 = arith.constant 2 : i32
      %16 = arith.muli %c2_i32_5, %15 : i32
      %cst = arith.constant 0.000000e+00 : f32
      %17 = vector.broadcast %cst : f32 to vector<16x64xf32>
      %c0_i32_6 = arith.constant 0 : i32
      %18 = arith.addi %16, %c0_i32_6 : i32
      %c0_7 = arith.constant 0 : index
      %19 = arith.index_cast %18 : i32 to index
      %c0_8 = arith.constant 0 : index
      %c0_9 = arith.constant 0 : index
      %20 = vector.load %arg1[%c0_7, %19, %c0_8, %c0_9] : memref<1x68x32x68xf32, #tpu.memory_space<vmem>>, vector<1x1x32x64xf32>
      %21 = vector.shape_cast %20 : vector<1x1x32x64xf32> to vector<32x64xf32>
      %c0_i32_10 = arith.constant 0 : i32
      %22 = arith.addi %16, %c0_i32_10 : i32
      %c0_11 = arith.constant 0 : index
      %23 = arith.index_cast %22 : i32 to index
      %c0_12 = arith.constant 0 : index
      %c1 = arith.constant 1 : index
      %24 = vector.load %arg1[%c0_11, %23, %c0_12, %c1] : memref<1x68x32x68xf32, #tpu.memory_space<vmem>>, vector<1x1x32x64xf32>
      %25 = vector.shape_cast %24 : vector<1x1x32x64xf32> to vector<32x64xf32>
      %c0_i32_13 = arith.constant 0 : i32
      %26 = arith.addi %16, %c0_i32_13 : i32
      %c0_14 = arith.constant 0 : index
      %27 = arith.index_cast %26 : i32 to index
      %c0_15 = arith.constant 0 : index
      %c2 = arith.constant 2 : index
      %28 = vector.load %arg1[%c0_14, %27, %c0_15, %c2] : memref<1x68x32x68xf32, #tpu.memory_space<vmem>>, vector<1x1x32x64xf32>
      %29 = vector.shape_cast %28 : vector<1x1x32x64xf32> to vector<32x64xf32>
      %c0_i32_16 = arith.constant 0 : i32
      %30 = arith.addi %16, %c0_i32_16 : i32
      %c0_17 = arith.constant 0 : index
      %31 = arith.index_cast %30 : i32 to index
      %c0_18 = arith.constant 0 : index
      %c3 = arith.constant 3 : index
      %32 = vector.load %arg1[%c0_17, %31, %c0_18, %c3] : memref<1x68x32x68xf32, #tpu.memory_space<vmem>>, vector<1x1x32x64xf32>
      %33 = vector.shape_cast %32 : vector<1x1x32x64xf32> to vector<32x64xf32>
      %c0_i32_19 = arith.constant 0 : i32
      %34 = arith.addi %16, %c0_i32_19 : i32
      %c0_20 = arith.constant 0 : index
      %35 = arith.index_cast %34 : i32 to index
      %c0_21 = arith.constant 0 : index
      %c4 = arith.constant 4 : index
      %36 = vector.load %arg1[%c0_20, %35, %c0_21, %c4] : memref<1x68x32x68xf32, #tpu.memory_space<vmem>>, vector<1x1x32x64xf32>
      %37 = vector.shape_cast %36 : vector<1x1x32x64xf32> to vector<32x64xf32>
      %38 = tpu.concatenate %21, %25, %29, %33, %37 in 0 : vector<32x64xf32>, vector<32x64xf32>, vector<32x64xf32>, vector<32x64xf32>, vector<32x64xf32> -> vector<160x64xf32>
      %c0_22 = arith.constant 0 : index
      %c0_23 = arith.constant 0 : index
      %c0_24 = arith.constant 0 : index
      %39 = vector.load %arg2[%c0_22, %c0_23, %c0_24] : memref<5x16x160xf32, #tpu.memory_space<vmem>>, vector<1x16x160xf32>
      %40 = vector.shape_cast %39 : vector<1x16x160xf32> to vector<16x160xf32>
      %cst_25 = arith.constant dense<0.000000e+00> : vector<16x64xf32>
      %41 = tpu.matmul %40, %38, %cst_25 {dimension_numbers = #tpu.dot_dimension_numbers<[1], [0], [0], [1], [0, 0, 1, 1], [], []>} : vector<16x160xf32>, vector<160x64xf32>, vector<16x64xf32> -> vector<16x64xf32>
      %42 = arith.addf %17, %41 : vector<16x64xf32>
      %c1_i32_26 = arith.constant 1 : i32
      %43 = arith.addi %16, %c1_i32_26 : i32
      %c0_27 = arith.constant 0 : index
      %44 = arith.index_cast %43 : i32 to index
      %c0_28 = arith.constant 0 : index
      %c0_29 = arith.constant 0 : index
      %45 = vector.load %arg1[%c0_27, %44, %c0_28, %c0_29] : memref<1x68x32x68xf32, #tpu.memory_space<vmem>>, vector<1x1x32x64xf32>
      %46 = vector.shape_cast %45 : vector<1x1x32x64xf32> to vector<32x64xf32>
      %c1_i32_30 = arith.constant 1 : i32
      %47 = arith.addi %16, %c1_i32_30 : i32
      %c0_31 = arith.constant 0 : index
      %48 = arith.index_cast %47 : i32 to index
      %c0_32 = arith.constant 0 : index
      %c1_33 = arith.constant 1 : index
      %49 = vector.load %arg1[%c0_31, %48, %c0_32, %c1_33] : memref<1x68x32x68xf32, #tpu.memory_space<vmem>>, vector<1x1x32x64xf32>
      %50 = vector.shape_cast %49 : vector<1x1x32x64xf32> to vector<32x64xf32>
      %c1_i32_34 = arith.constant 1 : i32
      %51 = arith.addi %16, %c1_i32_34 : i32
      %c0_35 = arith.constant 0 : index
      %52 = arith.index_cast %51 : i32 to index
      %c0_36 = arith.constant 0 : index
      %c2_37 = arith.constant 2 : index
      %53 = vector.load %arg1[%c0_35, %52, %c0_36, %c2_37] : memref<1x68x32x68xf32, #tpu.memory_space<vmem>>, vector<1x1x32x64xf32>
      %54 = vector.shape_cast %53 : vector<1x1x32x64xf32> to vector<32x64xf32>
      %c1_i32_38 = arith.constant 1 : i32
      %55 = arith.addi %16, %c1_i32_38 : i32
      %c0_39 = arith.constant 0 : index
      %56 = arith.index_cast %55 : i32 to index
      %c0_40 = arith.constant 0 : index
      %c3_41 = arith.constant 3 : index
      %57 = vector.load %arg1[%c0_39, %56, %c0_40, %c3_41] : memref<1x68x32x68xf32, #tpu.memory_space<vmem>>, vector<1x1x32x64xf32>
      %58 = vector.shape_cast %57 : vector<1x1x32x64xf32> to vector<32x64xf32>
      %c1_i32_42 = arith.constant 1 : i32
      %59 = arith.addi %16, %c1_i32_42 : i32
      %c0_43 = arith.constant 0 : index
      %60 = arith.index_cast %59 : i32 to index
      %c0_44 = arith.constant 0 : index
      %c4_45 = arith.constant 4 : index
      %61 = vector.load %arg1[%c0_43, %60, %c0_44, %c4_45] : memref<1x68x32x68xf32, #tpu.memory_space<vmem>>, vector<1x1x32x64xf32>
      %62 = vector.shape_cast %61 : vector<1x1x32x64xf32> to vector<32x64xf32>
      %63 = tpu.concatenate %46, %50, %54, %58, %62 in 0 : vector<32x64xf32>, vector<32x64xf32>, vector<32x64xf32>, vector<32x64xf32>, vector<32x64xf32> -> vector<160x64xf32>
      %c1_46 = arith.constant 1 : index
      %c0_47 = arith.constant 0 : index
      %c0_48 = arith.constant 0 : index
      %64 = vector.load %arg2[%c1_46, %c0_47, %c0_48] : memref<5x16x160xf32, #tpu.memory_space<vmem>>, vector<1x16x160xf32>
      %65 = vector.shape_cast %64 : vector<1x16x160xf32> to vector<16x160xf32>
      %cst_49 = arith.constant dense<0.000000e+00> : vector<16x64xf32>
      %66 = tpu.matmul %65, %63, %cst_49 {dimension_numbers = #tpu.dot_dimension_numbers<[1], [0], [0], [1], [0, 0, 1, 1], [], []>} : vector<16x160xf32>, vector<160x64xf32>, vector<16x64xf32> -> vector<16x64xf32>
      %67 = arith.addf %42, %66 : vector<16x64xf32>
      %c2_i32_50 = arith.constant 2 : i32
      %68 = arith.addi %16, %c2_i32_50 : i32
      %c0_51 = arith.constant 0 : index
      %69 = arith.index_cast %68 : i32 to index
      %c0_52 = arith.constant 0 : index
      %c0_53 = arith.constant 0 : index
      %70 = vector.load %arg1[%c0_51, %69, %c0_52, %c0_53] : memref<1x68x32x68xf32, #tpu.memory_space<vmem>>, vector<1x1x32x64xf32>
      %71 = vector.shape_cast %70 : vector<1x1x32x64xf32> to vector<32x64xf32>
      %c2_i32_54 = arith.constant 2 : i32
      %72 = arith.addi %16, %c2_i32_54 : i32
      %c0_55 = arith.constant 0 : index
      %73 = arith.index_cast %72 : i32 to index
      %c0_56 = arith.constant 0 : index
      %c1_57 = arith.constant 1 : index
      %74 = vector.load %arg1[%c0_55, %73, %c0_56, %c1_57] : memref<1x68x32x68xf32, #tpu.memory_space<vmem>>, vector<1x1x32x64xf32>
      %75 = vector.shape_cast %74 : vector<1x1x32x64xf32> to vector<32x64xf32>
      %c2_i32_58 = arith.constant 2 : i32
      %76 = arith.addi %16, %c2_i32_58 : i32
      %c0_59 = arith.constant 0 : index
      %77 = arith.index_cast %76 : i32 to index
      %c0_60 = arith.constant 0 : index
      %c2_61 = arith.constant 2 : index
      %78 = vector.load %arg1[%c0_59, %77, %c0_60, %c2_61] : memref<1x68x32x68xf32, #tpu.memory_space<vmem>>, vector<1x1x32x64xf32>
      %79 = vector.shape_cast %78 : vector<1x1x32x64xf32> to vector<32x64xf32>
      %c2_i32_62 = arith.constant 2 : i32
      %80 = arith.addi %16, %c2_i32_62 : i32
      %c0_63 = arith.constant 0 : index
      %81 = arith.index_cast %80 : i32 to index
      %c0_64 = arith.constant 0 : index
      %c3_65 = arith.constant 3 : index
      %82 = vector.load %arg1[%c0_63, %81, %c0_64, %c3_65] : memref<1x68x32x68xf32, #tpu.memory_space<vmem>>, vector<1x1x32x64xf32>
      %83 = vector.shape_cast %82 : vector<1x1x32x64xf32> to vector<32x64xf32>
      %c2_i32_66 = arith.constant 2 : i32
      %84 = arith.addi %16, %c2_i32_66 : i32
      %c0_67 = arith.constant 0 : index
      %85 = arith.index_cast %84 : i32 to index
      %c0_68 = arith.constant 0 : index
      %c4_69 = arith.constant 4 : index
      %86 = vector.load %arg1[%c0_67, %85, %c0_68, %c4_69] : memref<1x68x32x68xf32, #tpu.memory_space<vmem>>, vector<1x1x32x64xf32>
      %87 = vector.shape_cast %86 : vector<1x1x32x64xf32> to vector<32x64xf32>
      %88 = tpu.concatenate %71, %75, %79, %83, %87 in 0 : vector<32x64xf32>, vector<32x64xf32>, vector<32x64xf32>, vector<32x64xf32>, vector<32x64xf32> -> vector<160x64xf32>
      %c2_70 = arith.constant 2 : index
      %c0_71 = arith.constant 0 : index
      %c0_72 = arith.constant 0 : index
      %89 = vector.load %arg2[%c2_70, %c0_71, %c0_72] : memref<5x16x160xf32, #tpu.memory_space<vmem>>, vector<1x16x160xf32>
      %90 = vector.shape_cast %89 : vector<1x16x160xf32> to vector<16x160xf32>
      %cst_73 = arith.constant dense<0.000000e+00> : vector<16x64xf32>
      %91 = tpu.matmul %90, %88, %cst_73 {dimension_numbers = #tpu.dot_dimension_numbers<[1], [0], [0], [1], [0, 0, 1, 1], [], []>} : vector<16x160xf32>, vector<160x64xf32>, vector<16x64xf32> -> vector<16x64xf32>
      %92 = arith.addf %67, %91 : vector<16x64xf32>
      %c3_i32 = arith.constant 3 : i32
      %93 = arith.addi %16, %c3_i32 : i32
      %c0_74 = arith.constant 0 : index
      %94 = arith.index_cast %93 : i32 to index
      %c0_75 = arith.constant 0 : index
      %c0_76 = arith.constant 0 : index
      %95 = vector.load %arg1[%c0_74, %94, %c0_75, %c0_76] : memref<1x68x32x68xf32, #tpu.memory_space<vmem>>, vector<1x1x32x64xf32>
      %96 = vector.shape_cast %95 : vector<1x1x32x64xf32> to vector<32x64xf32>
      %c3_i32_77 = arith.constant 3 : i32
      %97 = arith.addi %16, %c3_i32_77 : i32
      %c0_78 = arith.constant 0 : index
      %98 = arith.index_cast %97 : i32 to index
      %c0_79 = arith.constant 0 : index
      %c1_80 = arith.constant 1 : index
      %99 = vector.load %arg1[%c0_78, %98, %c0_79, %c1_80] : memref<1x68x32x68xf32, #tpu.memory_space<vmem>>, vector<1x1x32x64xf32>
      %100 = vector.shape_cast %99 : vector<1x1x32x64xf32> to vector<32x64xf32>
      %c3_i32_81 = arith.constant 3 : i32
      %101 = arith.addi %16, %c3_i32_81 : i32
      %c0_82 = arith.constant 0 : index
      %102 = arith.index_cast %101 : i32 to index
      %c0_83 = arith.constant 0 : index
      %c2_84 = arith.constant 2 : index
      %103 = vector.load %arg1[%c0_82, %102, %c0_83, %c2_84] : memref<1x68x32x68xf32, #tpu.memory_space<vmem>>, vector<1x1x32x64xf32>
      %104 = vector.shape_cast %103 : vector<1x1x32x64xf32> to vector<32x64xf32>
      %c3_i32_85 = arith.constant 3 : i32
      %105 = arith.addi %16, %c3_i32_85 : i32
      %c0_86 = arith.constant 0 : index
      %106 = arith.index_cast %105 : i32 to index
      %c0_87 = arith.constant 0 : index
      %c3_88 = arith.constant 3 : index
      %107 = vector.load %arg1[%c0_86, %106, %c0_87, %c3_88] : memref<1x68x32x68xf32, #tpu.memory_space<vmem>>, vector<1x1x32x64xf32>
      %108 = vector.shape_cast %107 : vector<1x1x32x64xf32> to vector<32x64xf32>
      %c3_i32_89 = arith.constant 3 : i32
      %109 = arith.addi %16, %c3_i32_89 : i32
      %c0_90 = arith.constant 0 : index
      %110 = arith.index_cast %109 : i32 to index
      %c0_91 = arith.constant 0 : index
      %c4_92 = arith.constant 4 : index
      %111 = vector.load %arg1[%c0_90, %110, %c0_91, %c4_92] : memref<1x68x32x68xf32, #tpu.memory_space<vmem>>, vector<1x1x32x64xf32>
      %112 = vector.shape_cast %111 : vector<1x1x32x64xf32> to vector<32x64xf32>
      %113 = tpu.concatenate %96, %100, %104, %108, %112 in 0 : vector<32x64xf32>, vector<32x64xf32>, vector<32x64xf32>, vector<32x64xf32>, vector<32x64xf32> -> vector<160x64xf32>
      %c3_93 = arith.constant 3 : index
      %c0_94 = arith.constant 0 : index
      %c0_95 = arith.constant 0 : index
      %114 = vector.load %arg2[%c3_93, %c0_94, %c0_95] : memref<5x16x160xf32, #tpu.memory_space<vmem>>, vector<1x16x160xf32>
      %115 = vector.shape_cast %114 : vector<1x16x160xf32> to vector<16x160xf32>
      %cst_96 = arith.constant dense<0.000000e+00> : vector<16x64xf32>
      %116 = tpu.matmul %115, %113, %cst_96 {dimension_numbers = #tpu.dot_dimension_numbers<[1], [0], [0], [1], [0, 0, 1, 1], [], []>} : vector<16x160xf32>, vector<160x64xf32>, vector<16x64xf32> -> vector<16x64xf32>
      %117 = arith.addf %92, %116 : vector<16x64xf32>
      %c4_i32 = arith.constant 4 : i32
      %118 = arith.addi %16, %c4_i32 : i32
      %c0_97 = arith.constant 0 : index
      %119 = arith.index_cast %118 : i32 to index
      %c0_98 = arith.constant 0 : index
      %c0_99 = arith.constant 0 : index
      %120 = vector.load %arg1[%c0_97, %119, %c0_98, %c0_99] : memref<1x68x32x68xf32, #tpu.memory_space<vmem>>, vector<1x1x32x64xf32>
      %121 = vector.shape_cast %120 : vector<1x1x32x64xf32> to vector<32x64xf32>
      %c4_i32_100 = arith.constant 4 : i32
      %122 = arith.addi %16, %c4_i32_100 : i32
      %c0_101 = arith.constant 0 : index
      %123 = arith.index_cast %122 : i32 to index
      %c0_102 = arith.constant 0 : index
      %c1_103 = arith.constant 1 : index
      %124 = vector.load %arg1[%c0_101, %123, %c0_102, %c1_103] : memref<1x68x32x68xf32, #tpu.memory_space<vmem>>, vector<1x1x32x64xf32>
      %125 = vector.shape_cast %124 : vector<1x1x32x64xf32> to vector<32x64xf32>
      %c4_i32_104 = arith.constant 4 : i32
      %126 = arith.addi %16, %c4_i32_104 : i32
      %c0_105 = arith.constant 0 : index
      %127 = arith.index_cast %126 : i32 to index
      %c0_106 = arith.constant 0 : index
      %c2_107 = arith.constant 2 : index
      %128 = vector.load %arg1[%c0_105, %127, %c0_106, %c2_107] : memref<1x68x32x68xf32, #tpu.memory_space<vmem>>, vector<1x1x32x64xf32>
      %129 = vector.shape_cast %128 : vector<1x1x32x64xf32> to vector<32x64xf32>
      %c4_i32_108 = arith.constant 4 : i32
      %130 = arith.addi %16, %c4_i32_108 : i32
      %c0_109 = arith.constant 0 : index
      %131 = arith.index_cast %130 : i32 to index
      %c0_110 = arith.constant 0 : index
      %c3_111 = arith.constant 3 : index
      %132 = vector.load %arg1[%c0_109, %131, %c0_110, %c3_111] : memref<1x68x32x68xf32, #tpu.memory_space<vmem>>, vector<1x1x32x64xf32>
      %133 = vector.shape_cast %132 : vector<1x1x32x64xf32> to vector<32x64xf32>
      %c4_i32_112 = arith.constant 4 : i32
      %134 = arith.addi %16, %c4_i32_112 : i32
      %c0_113 = arith.constant 0 : index
      %135 = arith.index_cast %134 : i32 to index
      %c0_114 = arith.constant 0 : index
      %c4_115 = arith.constant 4 : index
      %136 = vector.load %arg1[%c0_113, %135, %c0_114, %c4_115] : memref<1x68x32x68xf32, #tpu.memory_space<vmem>>, vector<1x1x32x64xf32>
      %137 = vector.shape_cast %136 : vector<1x1x32x64xf32> to vector<32x64xf32>
      %138 = tpu.concatenate %121, %125, %129, %133, %137 in 0 : vector<32x64xf32>, vector<32x64xf32>, vector<32x64xf32>, vector<32x64xf32>, vector<32x64xf32> -> vector<160x64xf32>
      %c4_116 = arith.constant 4 : index
      %c0_117 = arith.constant 0 : index
      %c0_118 = arith.constant 0 : index
      %139 = vector.load %arg2[%c4_116, %c0_117, %c0_118] : memref<5x16x160xf32, #tpu.memory_space<vmem>>, vector<1x16x160xf32>
      %140 = vector.shape_cast %139 : vector<1x16x160xf32> to vector<16x160xf32>
      %cst_119 = arith.constant dense<0.000000e+00> : vector<16x64xf32>
      %141 = tpu.matmul %140, %138, %cst_119 {dimension_numbers = #tpu.dot_dimension_numbers<[1], [0], [0], [1], [0, 0, 1, 1], [], []>} : vector<16x160xf32>, vector<160x64xf32>, vector<16x64xf32> -> vector<16x64xf32>
      %142 = arith.addf %117, %141 : vector<16x64xf32>
      %c2_i32_120 = arith.constant 2 : i32
      %143 = arith.muli %c2_i32_120, %15 : i32
      %c1_i32_121 = arith.constant 1 : i32
      %144 = arith.addi %143, %c1_i32_121 : i32
      %cst_122 = arith.constant 0.000000e+00 : f32
      %145 = vector.broadcast %cst_122 : f32 to vector<16x64xf32>
      %c0_i32_123 = arith.constant 0 : i32
      %146 = arith.addi %144, %c0_i32_123 : i32
      %c0_124 = arith.constant 0 : index
      %147 = arith.index_cast %146 : i32 to index
      %c0_125 = arith.constant 0 : index
      %c0_126 = arith.constant 0 : index
      %148 = vector.load %arg1[%c0_124, %147, %c0_125, %c0_126] : memref<1x68x32x68xf32, #tpu.memory_space<vmem>>, vector<1x1x32x64xf32>
      %149 = vector.shape_cast %148 : vector<1x1x32x64xf32> to vector<32x64xf32>
      %c0_i32_127 = arith.constant 0 : i32
      %150 = arith.addi %144, %c0_i32_127 : i32
      %c0_128 = arith.constant 0 : index
      %151 = arith.index_cast %150 : i32 to index
      %c0_129 = arith.constant 0 : index
      %c1_130 = arith.constant 1 : index
      %152 = vector.load %arg1[%c0_128, %151, %c0_129, %c1_130] : memref<1x68x32x68xf32, #tpu.memory_space<vmem>>, vector<1x1x32x64xf32>
      %153 = vector.shape_cast %152 : vector<1x1x32x64xf32> to vector<32x64xf32>
      %c0_i32_131 = arith.constant 0 : i32
      %154 = arith.addi %144, %c0_i32_131 : i32
      %c0_132 = arith.constant 0 : index
      %155 = arith.index_cast %154 : i32 to index
      %c0_133 = arith.constant 0 : index
      %c2_134 = arith.constant 2 : index
      %156 = vector.load %arg1[%c0_132, %155, %c0_133, %c2_134] : memref<1x68x32x68xf32, #tpu.memory_space<vmem>>, vector<1x1x32x64xf32>
      %157 = vector.shape_cast %156 : vector<1x1x32x64xf32> to vector<32x64xf32>
      %c0_i32_135 = arith.constant 0 : i32
      %158 = arith.addi %144, %c0_i32_135 : i32
      %c0_136 = arith.constant 0 : index
      %159 = arith.index_cast %158 : i32 to index
      %c0_137 = arith.constant 0 : index
      %c3_138 = arith.constant 3 : index
      %160 = vector.load %arg1[%c0_136, %159, %c0_137, %c3_138] : memref<1x68x32x68xf32, #tpu.memory_space<vmem>>, vector<1x1x32x64xf32>
      %161 = vector.shape_cast %160 : vector<1x1x32x64xf32> to vector<32x64xf32>
      %c0_i32_139 = arith.constant 0 : i32
      %162 = arith.addi %144, %c0_i32_139 : i32
      %c0_140 = arith.constant 0 : index
      %163 = arith.index_cast %162 : i32 to index
      %c0_141 = arith.constant 0 : index
      %c4_142 = arith.constant 4 : index
      %164 = vector.load %arg1[%c0_140, %163, %c0_141, %c4_142] : memref<1x68x32x68xf32, #tpu.memory_space<vmem>>, vector<1x1x32x64xf32>
      %165 = vector.shape_cast %164 : vector<1x1x32x64xf32> to vector<32x64xf32>
      %166 = tpu.concatenate %149, %153, %157, %161, %165 in 0 : vector<32x64xf32>, vector<32x64xf32>, vector<32x64xf32>, vector<32x64xf32>, vector<32x64xf32> -> vector<160x64xf32>
      %c0_143 = arith.constant 0 : index
      %c0_144 = arith.constant 0 : index
      %c0_145 = arith.constant 0 : index
      %167 = vector.load %arg2[%c0_143, %c0_144, %c0_145] : memref<5x16x160xf32, #tpu.memory_space<vmem>>, vector<1x16x160xf32>
      %168 = vector.shape_cast %167 : vector<1x16x160xf32> to vector<16x160xf32>
      %cst_146 = arith.constant dense<0.000000e+00> : vector<16x64xf32>
      %169 = tpu.matmul %168, %166, %cst_146 {dimension_numbers = #tpu.dot_dimension_numbers<[1], [0], [0], [1], [0, 0, 1, 1], [], []>} : vector<16x160xf32>, vector<160x64xf32>, vector<16x64xf32> -> vector<16x64xf32>
      %170 = arith.addf %145, %169 : vector<16x64xf32>
      %c1_i32_147 = arith.constant 1 : i32
      %171 = arith.addi %144, %c1_i32_147 : i32
      %c0_148 = arith.constant 0 : index
      %172 = arith.index_cast %171 : i32 to index
      %c0_149 = arith.constant 0 : index
      %c0_150 = arith.constant 0 : index
      %173 = vector.load %arg1[%c0_148, %172, %c0_149, %c0_150] : memref<1x68x32x68xf32, #tpu.memory_space<vmem>>, vector<1x1x32x64xf32>
      %174 = vector.shape_cast %173 : vector<1x1x32x64xf32> to vector<32x64xf32>
      %c1_i32_151 = arith.constant 1 : i32
      %175 = arith.addi %144, %c1_i32_151 : i32
      %c0_152 = arith.constant 0 : index
      %176 = arith.index_cast %175 : i32 to index
      %c0_153 = arith.constant 0 : index
      %c1_154 = arith.constant 1 : index
      %177 = vector.load %arg1[%c0_152, %176, %c0_153, %c1_154] : memref<1x68x32x68xf32, #tpu.memory_space<vmem>>, vector<1x1x32x64xf32>
      %178 = vector.shape_cast %177 : vector<1x1x32x64xf32> to vector<32x64xf32>
      %c1_i32_155 = arith.constant 1 : i32
      %179 = arith.addi %144, %c1_i32_155 : i32
      %c0_156 = arith.constant 0 : index
      %180 = arith.index_cast %179 : i32 to index
      %c0_157 = arith.constant 0 : index
      %c2_158 = arith.constant 2 : index
      %181 = vector.load %arg1[%c0_156, %180, %c0_157, %c2_158] : memref<1x68x32x68xf32, #tpu.memory_space<vmem>>, vector<1x1x32x64xf32>
      %182 = vector.shape_cast %181 : vector<1x1x32x64xf32> to vector<32x64xf32>
      %c1_i32_159 = arith.constant 1 : i32
      %183 = arith.addi %144, %c1_i32_159 : i32
      %c0_160 = arith.constant 0 : index
      %184 = arith.index_cast %183 : i32 to index
      %c0_161 = arith.constant 0 : index
      %c3_162 = arith.constant 3 : index
      %185 = vector.load %arg1[%c0_160, %184, %c0_161, %c3_162] : memref<1x68x32x68xf32, #tpu.memory_space<vmem>>, vector<1x1x32x64xf32>
      %186 = vector.shape_cast %185 : vector<1x1x32x64xf32> to vector<32x64xf32>
      %c1_i32_163 = arith.constant 1 : i32
      %187 = arith.addi %144, %c1_i32_163 : i32
      %c0_164 = arith.constant 0 : index
      %188 = arith.index_cast %187 : i32 to index
      %c0_165 = arith.constant 0 : index
      %c4_166 = arith.constant 4 : index
      %189 = vector.load %arg1[%c0_164, %188, %c0_165, %c4_166] : memref<1x68x32x68xf32, #tpu.memory_space<vmem>>, vector<1x1x32x64xf32>
      %190 = vector.shape_cast %189 : vector<1x1x32x64xf32> to vector<32x64xf32>
      %191 = tpu.concatenate %174, %178, %182, %186, %190 in 0 : vector<32x64xf32>, vector<32x64xf32>, vector<32x64xf32>, vector<32x64xf32>, vector<32x64xf32> -> vector<160x64xf32>
      %c1_167 = arith.constant 1 : index
      %c0_168 = arith.constant 0 : index
      %c0_169 = arith.constant 0 : index
      %192 = vector.load %arg2[%c1_167, %c0_168, %c0_169] : memref<5x16x160xf32, #tpu.memory_space<vmem>>, vector<1x16x160xf32>
      %193 = vector.shape_cast %192 : vector<1x16x160xf32> to vector<16x160xf32>
      %cst_170 = arith.constant dense<0.000000e+00> : vector<16x64xf32>
      %194 = tpu.matmul %193, %191, %cst_170 {dimension_numbers = #tpu.dot_dimension_numbers<[1], [0], [0], [1], [0, 0, 1, 1], [], []>} : vector<16x160xf32>, vector<160x64xf32>, vector<16x64xf32> -> vector<16x64xf32>
      %195 = arith.addf %170, %194 : vector<16x64xf32>
      %c2_i32_171 = arith.constant 2 : i32
      %196 = arith.addi %144, %c2_i32_171 : i32
      %c0_172 = arith.constant 0 : index
      %197 = arith.index_cast %196 : i32 to index
      %c0_173 = arith.constant 0 : index
      %c0_174 = arith.constant 0 : index
      %198 = vector.load %arg1[%c0_172, %197, %c0_173, %c0_174] : memref<1x68x32x68xf32, #tpu.memory_space<vmem>>, vector<1x1x32x64xf32>
      %199 = vector.shape_cast %198 : vector<1x1x32x64xf32> to vector<32x64xf32>
      %c2_i32_175 = arith.constant 2 : i32
      %200 = arith.addi %144, %c2_i32_175 : i32
      %c0_176 = arith.constant 0 : index
      %201 = arith.index_cast %200 : i32 to index
      %c0_177 = arith.constant 0 : index
      %c1_178 = arith.constant 1 : index
      %202 = vector.load %arg1[%c0_176, %201, %c0_177, %c1_178] : memref<1x68x32x68xf32, #tpu.memory_space<vmem>>, vector<1x1x32x64xf32>
      %203 = vector.shape_cast %202 : vector<1x1x32x64xf32> to vector<32x64xf32>
      %c2_i32_179 = arith.constant 2 : i32
      %204 = arith.addi %144, %c2_i32_179 : i32
      %c0_180 = arith.constant 0 : index
      %205 = arith.index_cast %204 : i32 to index
      %c0_181 = arith.constant 0 : index
      %c2_182 = arith.constant 2 : index
      %206 = vector.load %arg1[%c0_180, %205, %c0_181, %c2_182] : memref<1x68x32x68xf32, #tpu.memory_space<vmem>>, vector<1x1x32x64xf32>
      %207 = vector.shape_cast %206 : vector<1x1x32x64xf32> to vector<32x64xf32>
      %c2_i32_183 = arith.constant 2 : i32
      %208 = arith.addi %144, %c2_i32_183 : i32
      %c0_184 = arith.constant 0 : index
      %209 = arith.index_cast %208 : i32 to index
      %c0_185 = arith.constant 0 : index
      %c3_186 = arith.constant 3 : index
      %210 = vector.load %arg1[%c0_184, %209, %c0_185, %c3_186] : memref<1x68x32x68xf32, #tpu.memory_space<vmem>>, vector<1x1x32x64xf32>
      %211 = vector.shape_cast %210 : vector<1x1x32x64xf32> to vector<32x64xf32>
      %c2_i32_187 = arith.constant 2 : i32
      %212 = arith.addi %144, %c2_i32_187 : i32
      %c0_188 = arith.constant 0 : index
      %213 = arith.index_cast %212 : i32 to index
      %c0_189 = arith.constant 0 : index
      %c4_190 = arith.constant 4 : index
      %214 = vector.load %arg1[%c0_188, %213, %c0_189, %c4_190] : memref<1x68x32x68xf32, #tpu.memory_space<vmem>>, vector<1x1x32x64xf32>
      %215 = vector.shape_cast %214 : vector<1x1x32x64xf32> to vector<32x64xf32>
      %216 = tpu.concatenate %199, %203, %207, %211, %215 in 0 : vector<32x64xf32>, vector<32x64xf32>, vector<32x64xf32>, vector<32x64xf32>, vector<32x64xf32> -> vector<160x64xf32>
      %c2_191 = arith.constant 2 : index
      %c0_192 = arith.constant 0 : index
      %c0_193 = arith.constant 0 : index
      %217 = vector.load %arg2[%c2_191, %c0_192, %c0_193] : memref<5x16x160xf32, #tpu.memory_space<vmem>>, vector<1x16x160xf32>
      %218 = vector.shape_cast %217 : vector<1x16x160xf32> to vector<16x160xf32>
      %cst_194 = arith.constant dense<0.000000e+00> : vector<16x64xf32>
      %219 = tpu.matmul %218, %216, %cst_194 {dimension_numbers = #tpu.dot_dimension_numbers<[1], [0], [0], [1], [0, 0, 1, 1], [], []>} : vector<16x160xf32>, vector<160x64xf32>, vector<16x64xf32> -> vector<16x64xf32>
      %220 = arith.addf %195, %219 : vector<16x64xf32>
      %c3_i32_195 = arith.constant 3 : i32
      %221 = arith.addi %144, %c3_i32_195 : i32
      %c0_196 = arith.constant 0 : index
      %222 = arith.index_cast %221 : i32 to index
      %c0_197 = arith.constant 0 : index
      %c0_198 = arith.constant 0 : index
      %223 = vector.load %arg1[%c0_196, %222, %c0_197, %c0_198] : memref<1x68x32x68xf32, #tpu.memory_space<vmem>>, vector<1x1x32x64xf32>
      %224 = vector.shape_cast %223 : vector<1x1x32x64xf32> to vector<32x64xf32>
      %c3_i32_199 = arith.constant 3 : i32
      %225 = arith.addi %144, %c3_i32_199 : i32
      %c0_200 = arith.constant 0 : index
      %226 = arith.index_cast %225 : i32 to index
      %c0_201 = arith.constant 0 : index
      %c1_202 = arith.constant 1 : index
      %227 = vector.load %arg1[%c0_200, %226, %c0_201, %c1_202] : memref<1x68x32x68xf32, #tpu.memory_space<vmem>>, vector<1x1x32x64xf32>
      %228 = vector.shape_cast %227 : vector<1x1x32x64xf32> to vector<32x64xf32>
      %c3_i32_203 = arith.constant 3 : i32
      %229 = arith.addi %144, %c3_i32_203 : i32
      %c0_204 = arith.constant 0 : index
      %230 = arith.index_cast %229 : i32 to index
      %c0_205 = arith.constant 0 : index
      %c2_206 = arith.constant 2 : index
      %231 = vector.load %arg1[%c0_204, %230, %c0_205, %c2_206] : memref<1x68x32x68xf32, #tpu.memory_space<vmem>>, vector<1x1x32x64xf32>
      %232 = vector.shape_cast %231 : vector<1x1x32x64xf32> to vector<32x64xf32>
      %c3_i32_207 = arith.constant 3 : i32
      %233 = arith.addi %144, %c3_i32_207 : i32
      %c0_208 = arith.constant 0 : index
      %234 = arith.index_cast %233 : i32 to index
      %c0_209 = arith.constant 0 : index
      %c3_210 = arith.constant 3 : index
      %235 = vector.load %arg1[%c0_208, %234, %c0_209, %c3_210] : memref<1x68x32x68xf32, #tpu.memory_space<vmem>>, vector<1x1x32x64xf32>
      %236 = vector.shape_cast %235 : vector<1x1x32x64xf32> to vector<32x64xf32>
      %c3_i32_211 = arith.constant 3 : i32
      %237 = arith.addi %144, %c3_i32_211 : i32
      %c0_212 = arith.constant 0 : index
      %238 = arith.index_cast %237 : i32 to index
      %c0_213 = arith.constant 0 : index
      %c4_214 = arith.constant 4 : index
      %239 = vector.load %arg1[%c0_212, %238, %c0_213, %c4_214] : memref<1x68x32x68xf32, #tpu.memory_space<vmem>>, vector<1x1x32x64xf32>
      %240 = vector.shape_cast %239 : vector<1x1x32x64xf32> to vector<32x64xf32>
      %241 = tpu.concatenate %224, %228, %232, %236, %240 in 0 : vector<32x64xf32>, vector<32x64xf32>, vector<32x64xf32>, vector<32x64xf32>, vector<32x64xf32> -> vector<160x64xf32>
      %c3_215 = arith.constant 3 : index
      %c0_216 = arith.constant 0 : index
      %c0_217 = arith.constant 0 : index
      %242 = vector.load %arg2[%c3_215, %c0_216, %c0_217] : memref<5x16x160xf32, #tpu.memory_space<vmem>>, vector<1x16x160xf32>
      %243 = vector.shape_cast %242 : vector<1x16x160xf32> to vector<16x160xf32>
      %cst_218 = arith.constant dense<0.000000e+00> : vector<16x64xf32>
      %244 = tpu.matmul %243, %241, %cst_218 {dimension_numbers = #tpu.dot_dimension_numbers<[1], [0], [0], [1], [0, 0, 1, 1], [], []>} : vector<16x160xf32>, vector<160x64xf32>, vector<16x64xf32> -> vector<16x64xf32>
      %245 = arith.addf %220, %244 : vector<16x64xf32>
      %c4_i32_219 = arith.constant 4 : i32
      %246 = arith.addi %144, %c4_i32_219 : i32
      %c0_220 = arith.constant 0 : index
      %247 = arith.index_cast %246 : i32 to index
      %c0_221 = arith.constant 0 : index
      %c0_222 = arith.constant 0 : index
      %248 = vector.load %arg1[%c0_220, %247, %c0_221, %c0_222] : memref<1x68x32x68xf32, #tpu.memory_space<vmem>>, vector<1x1x32x64xf32>
      %249 = vector.shape_cast %248 : vector<1x1x32x64xf32> to vector<32x64xf32>
      %c4_i32_223 = arith.constant 4 : i32
      %250 = arith.addi %144, %c4_i32_223 : i32
      %c0_224 = arith.constant 0 : index
      %251 = arith.index_cast %250 : i32 to index
      %c0_225 = arith.constant 0 : index
      %c1_226 = arith.constant 1 : index
      %252 = vector.load %arg1[%c0_224, %251, %c0_225, %c1_226] : memref<1x68x32x68xf32, #tpu.memory_space<vmem>>, vector<1x1x32x64xf32>
      %253 = vector.shape_cast %252 : vector<1x1x32x64xf32> to vector<32x64xf32>
      %c4_i32_227 = arith.constant 4 : i32
      %254 = arith.addi %144, %c4_i32_227 : i32
      %c0_228 = arith.constant 0 : index
      %255 = arith.index_cast %254 : i32 to index
      %c0_229 = arith.constant 0 : index
      %c2_230 = arith.constant 2 : index
      %256 = vector.load %arg1[%c0_228, %255, %c0_229, %c2_230] : memref<1x68x32x68xf32, #tpu.memory_space<vmem>>, vector<1x1x32x64xf32>
      %257 = vector.shape_cast %256 : vector<1x1x32x64xf32> to vector<32x64xf32>
      %c4_i32_231 = arith.constant 4 : i32
      %258 = arith.addi %144, %c4_i32_231 : i32
      %c0_232 = arith.constant 0 : index
      %259 = arith.index_cast %258 : i32 to index
      %c0_233 = arith.constant 0 : index
      %c3_234 = arith.constant 3 : index
      %260 = vector.load %arg1[%c0_232, %259, %c0_233, %c3_234] : memref<1x68x32x68xf32, #tpu.memory_space<vmem>>, vector<1x1x32x64xf32>
      %261 = vector.shape_cast %260 : vector<1x1x32x64xf32> to vector<32x64xf32>
      %c4_i32_235 = arith.constant 4 : i32
      %262 = arith.addi %144, %c4_i32_235 : i32
      %c0_236 = arith.constant 0 : index
      %263 = arith.index_cast %262 : i32 to index
      %c0_237 = arith.constant 0 : index
      %c4_238 = arith.constant 4 : index
      %264 = vector.load %arg1[%c0_236, %263, %c0_237, %c4_238] : memref<1x68x32x68xf32, #tpu.memory_space<vmem>>, vector<1x1x32x64xf32>
      %265 = vector.shape_cast %264 : vector<1x1x32x64xf32> to vector<32x64xf32>
      %266 = tpu.concatenate %249, %253, %257, %261, %265 in 0 : vector<32x64xf32>, vector<32x64xf32>, vector<32x64xf32>, vector<32x64xf32>, vector<32x64xf32> -> vector<160x64xf32>
      %c4_239 = arith.constant 4 : index
      %c0_240 = arith.constant 0 : index
      %c0_241 = arith.constant 0 : index
      %267 = vector.load %arg2[%c4_239, %c0_240, %c0_241] : memref<5x16x160xf32, #tpu.memory_space<vmem>>, vector<1x16x160xf32>
      %268 = vector.shape_cast %267 : vector<1x16x160xf32> to vector<16x160xf32>
      %cst_242 = arith.constant dense<0.000000e+00> : vector<16x64xf32>
      %269 = tpu.matmul %268, %266, %cst_242 {dimension_numbers = #tpu.dot_dimension_numbers<[1], [0], [0], [1], [0, 0, 1, 1], [], []>} : vector<16x160xf32>, vector<160x64xf32>, vector<16x64xf32> -> vector<16x64xf32>
      %270 = arith.addf %245, %269 : vector<16x64xf32>
      %271 = arith.maximumf %142, %270 : vector<16x64xf32>
      %272 = vector.broadcast %12 : vector<16x1xf32> to vector<16x64xf32>
      %273 = arith.addf %271, %272 : vector<16x64xf32>
      %cst_243 = arith.constant dense<0.000000e+00> : vector<16x32xf32>
      %274 = tpu.matmul %273, %6, %cst_243 {dimension_numbers = #tpu.dot_dimension_numbers<[1], [0], [0], [1], [0, 0, 1, 1], [], []>} : vector<16x64xf32>, vector<64x32xf32>, vector<16x32xf32> -> vector<16x32xf32>
      %cst_244 = arith.constant dense<0.000000e+00> : vector<16x32xf32>
      %275 = tpu.matmul %273, %11, %cst_244 {dimension_numbers = #tpu.dot_dimension_numbers<[1], [0], [0], [1], [0, 0, 1, 1], [], []>} : vector<16x64xf32>, vector<64x32xf32>, vector<16x32xf32> -> vector<16x32xf32>
      %276 = arith.maximumf %274, %275 : vector<16x32xf32>
      %cst_245 = arith.constant 0.000000e+00 : f32
      %277 = vector.broadcast %cst_245 : f32 to vector<16x32xf32>
      %278 = arith.maximumf %276, %277 : vector<16x32xf32>
      %c0_246 = arith.constant 0 : index
      %279 = arith.index_cast %15 : i32 to index
      %c0_247 = arith.constant 0 : index
      %c0_248 = arith.constant 0 : index
      %280 = vector.load %arg4[%c0_246, %279, %c0_247, %c0_248] : memref<1x32x16x32xf32, #tpu.memory_space<vmem>>, vector<1x1x16x32xf32>
      %281 = vector.shape_cast %280 : vector<1x1x16x32xf32> to vector<16x32xf32>
      %282 = vector.shape_cast %278 : vector<16x32xf32> to vector<1x1x16x32xf32>
      tpu.vector_store %arg4[%c0_246, %279, %c0_247, %c0_248], %282 {strides = array<i32>} : memref<1x32x16x32xf32, #tpu.memory_space<vmem>>, vector<1x1x16x32xf32>,
    }
    %c32_i32_2 = arith.constant 32 : i32
    return
  }
  func.func @transform_0(%arg0: i32) -> (i32, i32, i32, i32) {
    %c0_i32 = arith.constant 0 : i32
    %c0_i32_0 = arith.constant 0 : i32
    %c0_i32_1 = arith.constant 0 : i32
    %c0_i32_2 = arith.constant 0 : i32
    return %arg0, %c0_i32, %c0_i32_0, %c0_i32_1 : i32, i32, i32, i32
  }
  func.func @transform_1(%arg0: i32) -> (i32, i32, i32) {
    %c0_i32 = arith.constant 0 : i32
    %c0_i32_0 = arith.constant 0 : i32
    %c0_i32_1 = arith.constant 0 : i32
    %c0_i32_2 = arith.constant 0 : i32
    return %c0_i32, %c0_i32_0, %c0_i32_1 : i32, i32, i32
  }
  func.func @transform_2(%arg0: i32) -> (i32, i32) {
    %c0_i32 = arith.constant 0 : i32
    %c0_i32_0 = arith.constant 0 : i32
    %c0_i32_1 = arith.constant 0 : i32
    return %c0_i32, %c0_i32_0 : i32, i32
  }
  func.func @transform_3(%arg0: i32) -> (i32, i32, i32, i32) {
    %c0_i32 = arith.constant 0 : i32
    %c0_i32_0 = arith.constant 0 : i32
    %c0_i32_1 = arith.constant 0 : i32
    %c0_i32_2 = arith.constant 0 : i32
    return %arg0, %c0_i32, %c0_i32_0, %c0_i32_1 : i32, i32, i32, i32
  }
}

module attributes {stable_mosaic.version = 11 : i64} {
  func.func @_conv_pool_relu_kernel(%arg0: i32, %arg1: memref<1x32x16x32xf32, #tpu.memory_space<vmem>>, %arg2: memref<1x8x400xf32, #tpu.memory_space<vmem>>, %arg3: memref<8x1xf32, #tpu.memory_space<vmem>>, %arg4: memref<1x14x8x14xf32, #tpu.memory_space<vmem>>) attributes {dimension_semantics = [#tpu.dimension_semantics<parallel>], iteration_bounds = array<i64: 2>, scalar_prefetch = 0 : i64, scratch_operands = 0 : i64, tpu.core_type = #tpu.core_type<tc>, window_params = [{transform_indices = @transform_0, window_bounds = array<i64: 1, 32, 16, 32>}, {pipeline_mode = #tpu.pipeline_mode<synchronous>, transform_indices = @transform_1, window_bounds = array<i64: 1, 8, 400>}, {pipeline_mode = #tpu.pipeline_mode<synchronous>, transform_indices = @transform_2, window_bounds = array<i64: 8, 1>}, {transform_indices = @transform_3, window_bounds = array<i64: 1, 14, 8, 14>}]} {
    %0 = tpu.iota {dimensions = array<i32: 0>} : vector<28x14xi32>
    %1 = tpu.iota {dimensions = array<i32: 1>} : vector<28x14xi32>
    %c2_i32 = arith.constant 2 : i32
    %2 = vector.broadcast %c2_i32 : i32 to vector<28x14xi32>
    %3 = arith.muli %2, %1 : vector<28x14xi32>
    %4 = arith.cmpi eq, %0, %3 : vector<28x14xi32>
    %5 = arith.extui %4 : vector<28x14xi1> to vector<28x14xi32>
    %6 = arith.sitofp %5 : vector<28x14xi32> to vector<28x14xf32>
    %c1_i32 = arith.constant 1 : i32
    %7 = vector.broadcast %c1_i32 : i32 to vector<28x14xi32>
    %8 = arith.addi %3, %7 : vector<28x14xi32>
    %9 = arith.cmpi eq, %0, %8 : vector<28x14xi32>
    %10 = arith.extui %9 : vector<28x14xi1> to vector<28x14xi32>
    %11 = arith.sitofp %10 : vector<28x14xi32> to vector<28x14xf32>
    %c0 = arith.constant 0 : index
    %c0_0 = arith.constant 0 : index
    %12 = vector.load %arg3[%c0, %c0_0] : memref<8x1xf32, #tpu.memory_space<vmem>>, vector<8x1xf32>
    %c0_i32 = arith.constant 0 : i32
    %c14_i32 = arith.constant 14 : i32
    %13 = arith.addi %c0_i32, %c14_i32 : i32
    %c1_i32_1 = arith.constant 1 : i32
    scf.for %arg5 = %c0_i32 to %13 step %c1_i32_1  : i32 {
      %c1_i32_3 = arith.constant 1 : i32
      %14 = arith.muli %arg5, %c1_i32_3 : i32
      %c0_i32_4 = arith.constant 0 : i32
      %15 = arith.addi %c0_i32_4, %14 : i32
      %c2_i32_5 = arith.constant 2 : i32
      %16 = arith.muli %c2_i32_5, %15 : i32
      %cst = arith.constant 0.000000e+00 : f32
      %17 = vector.broadcast %cst : f32 to vector<8x28xf32>
      %c0_i32_6 = arith.constant 0 : i32
      %18 = arith.addi %16, %c0_i32_6 : i32
      %c0_7 = arith.constant 0 : index
      %19 = arith.index_cast %18 : i32 to index
      %c0_8 = arith.constant 0 : index
      %c0_9 = arith.constant 0 : index
      %20 = vector.load %arg1[%c0_7, %19, %c0_8, %c0_9] : memref<1x32x16x32xf32, #tpu.memory_space<vmem>>, vector<1x1x16x28xf32>
      %21 = vector.shape_cast %20 : vector<1x1x16x28xf32> to vector<16x28xf32>
      %c0_i32_10 = arith.constant 0 : i32
      %22 = arith.addi %16, %c0_i32_10 : i32
      %c0_11 = arith.constant 0 : index
      %23 = arith.index_cast %22 : i32 to index
      %c0_12 = arith.constant 0 : index
      %c1 = arith.constant 1 : index
      %24 = vector.load %arg1[%c0_11, %23, %c0_12, %c1] : memref<1x32x16x32xf32, #tpu.memory_space<vmem>>, vector<1x1x16x28xf32>
      %25 = vector.shape_cast %24 : vector<1x1x16x28xf32> to vector<16x28xf32>
      %c0_i32_13 = arith.constant 0 : i32
      %26 = arith.addi %16, %c0_i32_13 : i32
      %c0_14 = arith.constant 0 : index
      %27 = arith.index_cast %26 : i32 to index
      %c0_15 = arith.constant 0 : index
      %c2 = arith.constant 2 : index
      %28 = vector.load %arg1[%c0_14, %27, %c0_15, %c2] : memref<1x32x16x32xf32, #tpu.memory_space<vmem>>, vector<1x1x16x28xf32>
      %29 = vector.shape_cast %28 : vector<1x1x16x28xf32> to vector<16x28xf32>
      %c0_i32_16 = arith.constant 0 : i32
      %30 = arith.addi %16, %c0_i32_16 : i32
      %c0_17 = arith.constant 0 : index
      %31 = arith.index_cast %30 : i32 to index
      %c0_18 = arith.constant 0 : index
      %c3 = arith.constant 3 : index
      %32 = vector.load %arg1[%c0_17, %31, %c0_18, %c3] : memref<1x32x16x32xf32, #tpu.memory_space<vmem>>, vector<1x1x16x28xf32>
      %33 = vector.shape_cast %32 : vector<1x1x16x28xf32> to vector<16x28xf32>
      %c0_i32_19 = arith.constant 0 : i32
      %34 = arith.addi %16, %c0_i32_19 : i32
      %c0_20 = arith.constant 0 : index
      %35 = arith.index_cast %34 : i32 to index
      %c0_21 = arith.constant 0 : index
      %c4 = arith.constant 4 : index
      %36 = vector.load %arg1[%c0_20, %35, %c0_21, %c4] : memref<1x32x16x32xf32, #tpu.memory_space<vmem>>, vector<1x1x16x28xf32>
      %37 = vector.shape_cast %36 : vector<1x1x16x28xf32> to vector<16x28xf32>
      %c1_i32_22 = arith.constant 1 : i32
      %38 = arith.addi %16, %c1_i32_22 : i32
      %c0_23 = arith.constant 0 : index
      %39 = arith.index_cast %38 : i32 to index
      %c0_24 = arith.constant 0 : index
      %c0_25 = arith.constant 0 : index
      %40 = vector.load %arg1[%c0_23, %39, %c0_24, %c0_25] : memref<1x32x16x32xf32, #tpu.memory_space<vmem>>, vector<1x1x16x28xf32>
      %41 = vector.shape_cast %40 : vector<1x1x16x28xf32> to vector<16x28xf32>
      %c1_i32_26 = arith.constant 1 : i32
      %42 = arith.addi %16, %c1_i32_26 : i32
      %c0_27 = arith.constant 0 : index
      %43 = arith.index_cast %42 : i32 to index
      %c0_28 = arith.constant 0 : index
      %c1_29 = arith.constant 1 : index
      %44 = vector.load %arg1[%c0_27, %43, %c0_28, %c1_29] : memref<1x32x16x32xf32, #tpu.memory_space<vmem>>, vector<1x1x16x28xf32>
      %45 = vector.shape_cast %44 : vector<1x1x16x28xf32> to vector<16x28xf32>
      %c1_i32_30 = arith.constant 1 : i32
      %46 = arith.addi %16, %c1_i32_30 : i32
      %c0_31 = arith.constant 0 : index
      %47 = arith.index_cast %46 : i32 to index
      %c0_32 = arith.constant 0 : index
      %c2_33 = arith.constant 2 : index
      %48 = vector.load %arg1[%c0_31, %47, %c0_32, %c2_33] : memref<1x32x16x32xf32, #tpu.memory_space<vmem>>, vector<1x1x16x28xf32>
      %49 = vector.shape_cast %48 : vector<1x1x16x28xf32> to vector<16x28xf32>
      %c1_i32_34 = arith.constant 1 : i32
      %50 = arith.addi %16, %c1_i32_34 : i32
      %c0_35 = arith.constant 0 : index
      %51 = arith.index_cast %50 : i32 to index
      %c0_36 = arith.constant 0 : index
      %c3_37 = arith.constant 3 : index
      %52 = vector.load %arg1[%c0_35, %51, %c0_36, %c3_37] : memref<1x32x16x32xf32, #tpu.memory_space<vmem>>, vector<1x1x16x28xf32>
      %53 = vector.shape_cast %52 : vector<1x1x16x28xf32> to vector<16x28xf32>
      %c1_i32_38 = arith.constant 1 : i32
      %54 = arith.addi %16, %c1_i32_38 : i32
      %c0_39 = arith.constant 0 : index
      %55 = arith.index_cast %54 : i32 to index
      %c0_40 = arith.constant 0 : index
      %c4_41 = arith.constant 4 : index
      %56 = vector.load %arg1[%c0_39, %55, %c0_40, %c4_41] : memref<1x32x16x32xf32, #tpu.memory_space<vmem>>, vector<1x1x16x28xf32>
      %57 = vector.shape_cast %56 : vector<1x1x16x28xf32> to vector<16x28xf32>
      %c2_i32_42 = arith.constant 2 : i32
      %58 = arith.addi %16, %c2_i32_42 : i32
      %c0_43 = arith.constant 0 : index
      %59 = arith.index_cast %58 : i32 to index
      %c0_44 = arith.constant 0 : index
      %c0_45 = arith.constant 0 : index
      %60 = vector.load %arg1[%c0_43, %59, %c0_44, %c0_45] : memref<1x32x16x32xf32, #tpu.memory_space<vmem>>, vector<1x1x16x28xf32>
      %61 = vector.shape_cast %60 : vector<1x1x16x28xf32> to vector<16x28xf32>
      %c2_i32_46 = arith.constant 2 : i32
      %62 = arith.addi %16, %c2_i32_46 : i32
      %c0_47 = arith.constant 0 : index
      %63 = arith.index_cast %62 : i32 to index
      %c0_48 = arith.constant 0 : index
      %c1_49 = arith.constant 1 : index
      %64 = vector.load %arg1[%c0_47, %63, %c0_48, %c1_49] : memref<1x32x16x32xf32, #tpu.memory_space<vmem>>, vector<1x1x16x28xf32>
      %65 = vector.shape_cast %64 : vector<1x1x16x28xf32> to vector<16x28xf32>
      %c2_i32_50 = arith.constant 2 : i32
      %66 = arith.addi %16, %c2_i32_50 : i32
      %c0_51 = arith.constant 0 : index
      %67 = arith.index_cast %66 : i32 to index
      %c0_52 = arith.constant 0 : index
      %c2_53 = arith.constant 2 : index
      %68 = vector.load %arg1[%c0_51, %67, %c0_52, %c2_53] : memref<1x32x16x32xf32, #tpu.memory_space<vmem>>, vector<1x1x16x28xf32>
      %69 = vector.shape_cast %68 : vector<1x1x16x28xf32> to vector<16x28xf32>
      %c2_i32_54 = arith.constant 2 : i32
      %70 = arith.addi %16, %c2_i32_54 : i32
      %c0_55 = arith.constant 0 : index
      %71 = arith.index_cast %70 : i32 to index
      %c0_56 = arith.constant 0 : index
      %c3_57 = arith.constant 3 : index
      %72 = vector.load %arg1[%c0_55, %71, %c0_56, %c3_57] : memref<1x32x16x32xf32, #tpu.memory_space<vmem>>, vector<1x1x16x28xf32>
      %73 = vector.shape_cast %72 : vector<1x1x16x28xf32> to vector<16x28xf32>
      %c2_i32_58 = arith.constant 2 : i32
      %74 = arith.addi %16, %c2_i32_58 : i32
      %c0_59 = arith.constant 0 : index
      %75 = arith.index_cast %74 : i32 to index
      %c0_60 = arith.constant 0 : index
      %c4_61 = arith.constant 4 : index
      %76 = vector.load %arg1[%c0_59, %75, %c0_60, %c4_61] : memref<1x32x16x32xf32, #tpu.memory_space<vmem>>, vector<1x1x16x28xf32>
      %77 = vector.shape_cast %76 : vector<1x1x16x28xf32> to vector<16x28xf32>
      %c3_i32 = arith.constant 3 : i32
      %78 = arith.addi %16, %c3_i32 : i32
      %c0_62 = arith.constant 0 : index
      %79 = arith.index_cast %78 : i32 to index
      %c0_63 = arith.constant 0 : index
      %c0_64 = arith.constant 0 : index
      %80 = vector.load %arg1[%c0_62, %79, %c0_63, %c0_64] : memref<1x32x16x32xf32, #tpu.memory_space<vmem>>, vector<1x1x16x28xf32>
      %81 = vector.shape_cast %80 : vector<1x1x16x28xf32> to vector<16x28xf32>
      %c3_i32_65 = arith.constant 3 : i32
      %82 = arith.addi %16, %c3_i32_65 : i32
      %c0_66 = arith.constant 0 : index
      %83 = arith.index_cast %82 : i32 to index
      %c0_67 = arith.constant 0 : index
      %c1_68 = arith.constant 1 : index
      %84 = vector.load %arg1[%c0_66, %83, %c0_67, %c1_68] : memref<1x32x16x32xf32, #tpu.memory_space<vmem>>, vector<1x1x16x28xf32>
      %85 = vector.shape_cast %84 : vector<1x1x16x28xf32> to vector<16x28xf32>
      %c3_i32_69 = arith.constant 3 : i32
      %86 = arith.addi %16, %c3_i32_69 : i32
      %c0_70 = arith.constant 0 : index
      %87 = arith.index_cast %86 : i32 to index
      %c0_71 = arith.constant 0 : index
      %c2_72 = arith.constant 2 : index
      %88 = vector.load %arg1[%c0_70, %87, %c0_71, %c2_72] : memref<1x32x16x32xf32, #tpu.memory_space<vmem>>, vector<1x1x16x28xf32>
      %89 = vector.shape_cast %88 : vector<1x1x16x28xf32> to vector<16x28xf32>
      %c3_i32_73 = arith.constant 3 : i32
      %90 = arith.addi %16, %c3_i32_73 : i32
      %c0_74 = arith.constant 0 : index
      %91 = arith.index_cast %90 : i32 to index
      %c0_75 = arith.constant 0 : index
      %c3_76 = arith.constant 3 : index
      %92 = vector.load %arg1[%c0_74, %91, %c0_75, %c3_76] : memref<1x32x16x32xf32, #tpu.memory_space<vmem>>, vector<1x1x16x28xf32>
      %93 = vector.shape_cast %92 : vector<1x1x16x28xf32> to vector<16x28xf32>
      %c3_i32_77 = arith.constant 3 : i32
      %94 = arith.addi %16, %c3_i32_77 : i32
      %c0_78 = arith.constant 0 : index
      %95 = arith.index_cast %94 : i32 to index
      %c0_79 = arith.constant 0 : index
      %c4_80 = arith.constant 4 : index
      %96 = vector.load %arg1[%c0_78, %95, %c0_79, %c4_80] : memref<1x32x16x32xf32, #tpu.memory_space<vmem>>, vector<1x1x16x28xf32>
      %97 = vector.shape_cast %96 : vector<1x1x16x28xf32> to vector<16x28xf32>
      %c4_i32 = arith.constant 4 : i32
      %98 = arith.addi %16, %c4_i32 : i32
      %c0_81 = arith.constant 0 : index
      %99 = arith.index_cast %98 : i32 to index
      %c0_82 = arith.constant 0 : index
      %c0_83 = arith.constant 0 : index
      %100 = vector.load %arg1[%c0_81, %99, %c0_82, %c0_83] : memref<1x32x16x32xf32, #tpu.memory_space<vmem>>, vector<1x1x16x28xf32>
      %101 = vector.shape_cast %100 : vector<1x1x16x28xf32> to vector<16x28xf32>
      %c4_i32_84 = arith.constant 4 : i32
      %102 = arith.addi %16, %c4_i32_84 : i32
      %c0_85 = arith.constant 0 : index
      %103 = arith.index_cast %102 : i32 to index
      %c0_86 = arith.constant 0 : index
      %c1_87 = arith.constant 1 : index
      %104 = vector.load %arg1[%c0_85, %103, %c0_86, %c1_87] : memref<1x32x16x32xf32, #tpu.memory_space<vmem>>, vector<1x1x16x28xf32>
      %105 = vector.shape_cast %104 : vector<1x1x16x28xf32> to vector<16x28xf32>
      %c4_i32_88 = arith.constant 4 : i32
      %106 = arith.addi %16, %c4_i32_88 : i32
      %c0_89 = arith.constant 0 : index
      %107 = arith.index_cast %106 : i32 to index
      %c0_90 = arith.constant 0 : index
      %c2_91 = arith.constant 2 : index
      %108 = vector.load %arg1[%c0_89, %107, %c0_90, %c2_91] : memref<1x32x16x32xf32, #tpu.memory_space<vmem>>, vector<1x1x16x28xf32>
      %109 = vector.shape_cast %108 : vector<1x1x16x28xf32> to vector<16x28xf32>
      %c4_i32_92 = arith.constant 4 : i32
      %110 = arith.addi %16, %c4_i32_92 : i32
      %c0_93 = arith.constant 0 : index
      %111 = arith.index_cast %110 : i32 to index
      %c0_94 = arith.constant 0 : index
      %c3_95 = arith.constant 3 : index
      %112 = vector.load %arg1[%c0_93, %111, %c0_94, %c3_95] : memref<1x32x16x32xf32, #tpu.memory_space<vmem>>, vector<1x1x16x28xf32>
      %113 = vector.shape_cast %112 : vector<1x1x16x28xf32> to vector<16x28xf32>
      %c4_i32_96 = arith.constant 4 : i32
      %114 = arith.addi %16, %c4_i32_96 : i32
      %c0_97 = arith.constant 0 : index
      %115 = arith.index_cast %114 : i32 to index
      %c0_98 = arith.constant 0 : index
      %c4_99 = arith.constant 4 : index
      %116 = vector.load %arg1[%c0_97, %115, %c0_98, %c4_99] : memref<1x32x16x32xf32, #tpu.memory_space<vmem>>, vector<1x1x16x28xf32>
      %117 = vector.shape_cast %116 : vector<1x1x16x28xf32> to vector<16x28xf32>
      %118 = tpu.concatenate %21, %25, %29, %33, %37, %41, %45, %49, %53, %57, %61, %65, %69, %73, %77, %81 in 0 : vector<16x28xf32>, vector<16x28xf32>, vector<16x28xf32>, vector<16x28xf32>, vector<16x28xf32>, vector<16x28xf32>, vector<16x28xf32>, vector<16x28xf32>, vector<16x28xf32>, vector<16x28xf32>, vector<16x28xf32>, vector<16x28xf32>, vector<16x28xf32>, vector<16x28xf32>, vector<16x28xf32>, vector<16x28xf32> -> vector<256x28xf32>
      %119 = tpu.concatenate %85, %89, %93, %97, %101, %105, %109, %113, %117 in 0 : vector<16x28xf32>, vector<16x28xf32>, vector<16x28xf32>, vector<16x28xf32>, vector<16x28xf32>, vector<16x28xf32>, vector<16x28xf32>, vector<16x28xf32>, vector<16x28xf32> -> vector<144x28xf32>
      %120 = tpu.concatenate %118, %119 in 0 : vector<256x28xf32>, vector<144x28xf32> -> vector<400x28xf32>
      %c0_100 = arith.constant 0 : index
      %c0_101 = arith.constant 0 : index
      %c0_102 = arith.constant 0 : index
      %121 = vector.load %arg2[%c0_100, %c0_101, %c0_102] : memref<1x8x400xf32, #tpu.memory_space<vmem>>, vector<1x8x400xf32>
      %122 = vector.shape_cast %121 : vector<1x8x400xf32> to vector<8x400xf32>
      %cst_103 = arith.constant dense<0.000000e+00> : vector<8x28xf32>
      %123 = tpu.matmul %122, %120, %cst_103 {dimension_numbers = #tpu.dot_dimension_numbers<[1], [0], [0], [1], [0, 0, 1, 1], [], []>} : vector<8x400xf32>, vector<400x28xf32>, vector<8x28xf32> -> vector<8x28xf32>
      %124 = arith.addf %17, %123 : vector<8x28xf32>
      %c2_i32_104 = arith.constant 2 : i32
      %125 = arith.muli %c2_i32_104, %15 : i32
      %c1_i32_105 = arith.constant 1 : i32
      %126 = arith.addi %125, %c1_i32_105 : i32
      %cst_106 = arith.constant 0.000000e+00 : f32
      %127 = vector.broadcast %cst_106 : f32 to vector<8x28xf32>
      %c0_i32_107 = arith.constant 0 : i32
      %128 = arith.addi %126, %c0_i32_107 : i32
      %c0_108 = arith.constant 0 : index
      %129 = arith.index_cast %128 : i32 to index
      %c0_109 = arith.constant 0 : index
      %c0_110 = arith.constant 0 : index
      %130 = vector.load %arg1[%c0_108, %129, %c0_109, %c0_110] : memref<1x32x16x32xf32, #tpu.memory_space<vmem>>, vector<1x1x16x28xf32>
      %131 = vector.shape_cast %130 : vector<1x1x16x28xf32> to vector<16x28xf32>
      %c0_i32_111 = arith.constant 0 : i32
      %132 = arith.addi %126, %c0_i32_111 : i32
      %c0_112 = arith.constant 0 : index
      %133 = arith.index_cast %132 : i32 to index
      %c0_113 = arith.constant 0 : index
      %c1_114 = arith.constant 1 : index
      %134 = vector.load %arg1[%c0_112, %133, %c0_113, %c1_114] : memref<1x32x16x32xf32, #tpu.memory_space<vmem>>, vector<1x1x16x28xf32>
      %135 = vector.shape_cast %134 : vector<1x1x16x28xf32> to vector<16x28xf32>
      %c0_i32_115 = arith.constant 0 : i32
      %136 = arith.addi %126, %c0_i32_115 : i32
      %c0_116 = arith.constant 0 : index
      %137 = arith.index_cast %136 : i32 to index
      %c0_117 = arith.constant 0 : index
      %c2_118 = arith.constant 2 : index
      %138 = vector.load %arg1[%c0_116, %137, %c0_117, %c2_118] : memref<1x32x16x32xf32, #tpu.memory_space<vmem>>, vector<1x1x16x28xf32>
      %139 = vector.shape_cast %138 : vector<1x1x16x28xf32> to vector<16x28xf32>
      %c0_i32_119 = arith.constant 0 : i32
      %140 = arith.addi %126, %c0_i32_119 : i32
      %c0_120 = arith.constant 0 : index
      %141 = arith.index_cast %140 : i32 to index
      %c0_121 = arith.constant 0 : index
      %c3_122 = arith.constant 3 : index
      %142 = vector.load %arg1[%c0_120, %141, %c0_121, %c3_122] : memref<1x32x16x32xf32, #tpu.memory_space<vmem>>, vector<1x1x16x28xf32>
      %143 = vector.shape_cast %142 : vector<1x1x16x28xf32> to vector<16x28xf32>
      %c0_i32_123 = arith.constant 0 : i32
      %144 = arith.addi %126, %c0_i32_123 : i32
      %c0_124 = arith.constant 0 : index
      %145 = arith.index_cast %144 : i32 to index
      %c0_125 = arith.constant 0 : index
      %c4_126 = arith.constant 4 : index
      %146 = vector.load %arg1[%c0_124, %145, %c0_125, %c4_126] : memref<1x32x16x32xf32, #tpu.memory_space<vmem>>, vector<1x1x16x28xf32>
      %147 = vector.shape_cast %146 : vector<1x1x16x28xf32> to vector<16x28xf32>
      %c1_i32_127 = arith.constant 1 : i32
      %148 = arith.addi %126, %c1_i32_127 : i32
      %c0_128 = arith.constant 0 : index
      %149 = arith.index_cast %148 : i32 to index
      %c0_129 = arith.constant 0 : index
      %c0_130 = arith.constant 0 : index
      %150 = vector.load %arg1[%c0_128, %149, %c0_129, %c0_130] : memref<1x32x16x32xf32, #tpu.memory_space<vmem>>, vector<1x1x16x28xf32>
      %151 = vector.shape_cast %150 : vector<1x1x16x28xf32> to vector<16x28xf32>
      %c1_i32_131 = arith.constant 1 : i32
      %152 = arith.addi %126, %c1_i32_131 : i32
      %c0_132 = arith.constant 0 : index
      %153 = arith.index_cast %152 : i32 to index
      %c0_133 = arith.constant 0 : index
      %c1_134 = arith.constant 1 : index
      %154 = vector.load %arg1[%c0_132, %153, %c0_133, %c1_134] : memref<1x32x16x32xf32, #tpu.memory_space<vmem>>, vector<1x1x16x28xf32>
      %155 = vector.shape_cast %154 : vector<1x1x16x28xf32> to vector<16x28xf32>
      %c1_i32_135 = arith.constant 1 : i32
      %156 = arith.addi %126, %c1_i32_135 : i32
      %c0_136 = arith.constant 0 : index
      %157 = arith.index_cast %156 : i32 to index
      %c0_137 = arith.constant 0 : index
      %c2_138 = arith.constant 2 : index
      %158 = vector.load %arg1[%c0_136, %157, %c0_137, %c2_138] : memref<1x32x16x32xf32, #tpu.memory_space<vmem>>, vector<1x1x16x28xf32>
      %159 = vector.shape_cast %158 : vector<1x1x16x28xf32> to vector<16x28xf32>
      %c1_i32_139 = arith.constant 1 : i32
      %160 = arith.addi %126, %c1_i32_139 : i32
      %c0_140 = arith.constant 0 : index
      %161 = arith.index_cast %160 : i32 to index
      %c0_141 = arith.constant 0 : index
      %c3_142 = arith.constant 3 : index
      %162 = vector.load %arg1[%c0_140, %161, %c0_141, %c3_142] : memref<1x32x16x32xf32, #tpu.memory_space<vmem>>, vector<1x1x16x28xf32>
      %163 = vector.shape_cast %162 : vector<1x1x16x28xf32> to vector<16x28xf32>
      %c1_i32_143 = arith.constant 1 : i32
      %164 = arith.addi %126, %c1_i32_143 : i32
      %c0_144 = arith.constant 0 : index
      %165 = arith.index_cast %164 : i32 to index
      %c0_145 = arith.constant 0 : index
      %c4_146 = arith.constant 4 : index
      %166 = vector.load %arg1[%c0_144, %165, %c0_145, %c4_146] : memref<1x32x16x32xf32, #tpu.memory_space<vmem>>, vector<1x1x16x28xf32>
      %167 = vector.shape_cast %166 : vector<1x1x16x28xf32> to vector<16x28xf32>
      %c2_i32_147 = arith.constant 2 : i32
      %168 = arith.addi %126, %c2_i32_147 : i32
      %c0_148 = arith.constant 0 : index
      %169 = arith.index_cast %168 : i32 to index
      %c0_149 = arith.constant 0 : index
      %c0_150 = arith.constant 0 : index
      %170 = vector.load %arg1[%c0_148, %169, %c0_149, %c0_150] : memref<1x32x16x32xf32, #tpu.memory_space<vmem>>, vector<1x1x16x28xf32>
      %171 = vector.shape_cast %170 : vector<1x1x16x28xf32> to vector<16x28xf32>
      %c2_i32_151 = arith.constant 2 : i32
      %172 = arith.addi %126, %c2_i32_151 : i32
      %c0_152 = arith.constant 0 : index
      %173 = arith.index_cast %172 : i32 to index
      %c0_153 = arith.constant 0 : index
      %c1_154 = arith.constant 1 : index
      %174 = vector.load %arg1[%c0_152, %173, %c0_153, %c1_154] : memref<1x32x16x32xf32, #tpu.memory_space<vmem>>, vector<1x1x16x28xf32>
      %175 = vector.shape_cast %174 : vector<1x1x16x28xf32> to vector<16x28xf32>
      %c2_i32_155 = arith.constant 2 : i32
      %176 = arith.addi %126, %c2_i32_155 : i32
      %c0_156 = arith.constant 0 : index
      %177 = arith.index_cast %176 : i32 to index
      %c0_157 = arith.constant 0 : index
      %c2_158 = arith.constant 2 : index
      %178 = vector.load %arg1[%c0_156, %177, %c0_157, %c2_158] : memref<1x32x16x32xf32, #tpu.memory_space<vmem>>, vector<1x1x16x28xf32>
      %179 = vector.shape_cast %178 : vector<1x1x16x28xf32> to vector<16x28xf32>
      %c2_i32_159 = arith.constant 2 : i32
      %180 = arith.addi %126, %c2_i32_159 : i32
      %c0_160 = arith.constant 0 : index
      %181 = arith.index_cast %180 : i32 to index
      %c0_161 = arith.constant 0 : index
      %c3_162 = arith.constant 3 : index
      %182 = vector.load %arg1[%c0_160, %181, %c0_161, %c3_162] : memref<1x32x16x32xf32, #tpu.memory_space<vmem>>, vector<1x1x16x28xf32>
      %183 = vector.shape_cast %182 : vector<1x1x16x28xf32> to vector<16x28xf32>
      %c2_i32_163 = arith.constant 2 : i32
      %184 = arith.addi %126, %c2_i32_163 : i32
      %c0_164 = arith.constant 0 : index
      %185 = arith.index_cast %184 : i32 to index
      %c0_165 = arith.constant 0 : index
      %c4_166 = arith.constant 4 : index
      %186 = vector.load %arg1[%c0_164, %185, %c0_165, %c4_166] : memref<1x32x16x32xf32, #tpu.memory_space<vmem>>, vector<1x1x16x28xf32>
      %187 = vector.shape_cast %186 : vector<1x1x16x28xf32> to vector<16x28xf32>
      %c3_i32_167 = arith.constant 3 : i32
      %188 = arith.addi %126, %c3_i32_167 : i32
      %c0_168 = arith.constant 0 : index
      %189 = arith.index_cast %188 : i32 to index
      %c0_169 = arith.constant 0 : index
      %c0_170 = arith.constant 0 : index
      %190 = vector.load %arg1[%c0_168, %189, %c0_169, %c0_170] : memref<1x32x16x32xf32, #tpu.memory_space<vmem>>, vector<1x1x16x28xf32>
      %191 = vector.shape_cast %190 : vector<1x1x16x28xf32> to vector<16x28xf32>
      %c3_i32_171 = arith.constant 3 : i32
      %192 = arith.addi %126, %c3_i32_171 : i32
      %c0_172 = arith.constant 0 : index
      %193 = arith.index_cast %192 : i32 to index
      %c0_173 = arith.constant 0 : index
      %c1_174 = arith.constant 1 : index
      %194 = vector.load %arg1[%c0_172, %193, %c0_173, %c1_174] : memref<1x32x16x32xf32, #tpu.memory_space<vmem>>, vector<1x1x16x28xf32>
      %195 = vector.shape_cast %194 : vector<1x1x16x28xf32> to vector<16x28xf32>
      %c3_i32_175 = arith.constant 3 : i32
      %196 = arith.addi %126, %c3_i32_175 : i32
      %c0_176 = arith.constant 0 : index
      %197 = arith.index_cast %196 : i32 to index
      %c0_177 = arith.constant 0 : index
      %c2_178 = arith.constant 2 : index
      %198 = vector.load %arg1[%c0_176, %197, %c0_177, %c2_178] : memref<1x32x16x32xf32, #tpu.memory_space<vmem>>, vector<1x1x16x28xf32>
      %199 = vector.shape_cast %198 : vector<1x1x16x28xf32> to vector<16x28xf32>
      %c3_i32_179 = arith.constant 3 : i32
      %200 = arith.addi %126, %c3_i32_179 : i32
      %c0_180 = arith.constant 0 : index
      %201 = arith.index_cast %200 : i32 to index
      %c0_181 = arith.constant 0 : index
      %c3_182 = arith.constant 3 : index
      %202 = vector.load %arg1[%c0_180, %201, %c0_181, %c3_182] : memref<1x32x16x32xf32, #tpu.memory_space<vmem>>, vector<1x1x16x28xf32>
      %203 = vector.shape_cast %202 : vector<1x1x16x28xf32> to vector<16x28xf32>
      %c3_i32_183 = arith.constant 3 : i32
      %204 = arith.addi %126, %c3_i32_183 : i32
      %c0_184 = arith.constant 0 : index
      %205 = arith.index_cast %204 : i32 to index
      %c0_185 = arith.constant 0 : index
      %c4_186 = arith.constant 4 : index
      %206 = vector.load %arg1[%c0_184, %205, %c0_185, %c4_186] : memref<1x32x16x32xf32, #tpu.memory_space<vmem>>, vector<1x1x16x28xf32>
      %207 = vector.shape_cast %206 : vector<1x1x16x28xf32> to vector<16x28xf32>
      %c4_i32_187 = arith.constant 4 : i32
      %208 = arith.addi %126, %c4_i32_187 : i32
      %c0_188 = arith.constant 0 : index
      %209 = arith.index_cast %208 : i32 to index
      %c0_189 = arith.constant 0 : index
      %c0_190 = arith.constant 0 : index
      %210 = vector.load %arg1[%c0_188, %209, %c0_189, %c0_190] : memref<1x32x16x32xf32, #tpu.memory_space<vmem>>, vector<1x1x16x28xf32>
      %211 = vector.shape_cast %210 : vector<1x1x16x28xf32> to vector<16x28xf32>
      %c4_i32_191 = arith.constant 4 : i32
      %212 = arith.addi %126, %c4_i32_191 : i32
      %c0_192 = arith.constant 0 : index
      %213 = arith.index_cast %212 : i32 to index
      %c0_193 = arith.constant 0 : index
      %c1_194 = arith.constant 1 : index
      %214 = vector.load %arg1[%c0_192, %213, %c0_193, %c1_194] : memref<1x32x16x32xf32, #tpu.memory_space<vmem>>, vector<1x1x16x28xf32>
      %215 = vector.shape_cast %214 : vector<1x1x16x28xf32> to vector<16x28xf32>
      %c4_i32_195 = arith.constant 4 : i32
      %216 = arith.addi %126, %c4_i32_195 : i32
      %c0_196 = arith.constant 0 : index
      %217 = arith.index_cast %216 : i32 to index
      %c0_197 = arith.constant 0 : index
      %c2_198 = arith.constant 2 : index
      %218 = vector.load %arg1[%c0_196, %217, %c0_197, %c2_198] : memref<1x32x16x32xf32, #tpu.memory_space<vmem>>, vector<1x1x16x28xf32>
      %219 = vector.shape_cast %218 : vector<1x1x16x28xf32> to vector<16x28xf32>
      %c4_i32_199 = arith.constant 4 : i32
      %220 = arith.addi %126, %c4_i32_199 : i32
      %c0_200 = arith.constant 0 : index
      %221 = arith.index_cast %220 : i32 to index
      %c0_201 = arith.constant 0 : index
      %c3_202 = arith.constant 3 : index
      %222 = vector.load %arg1[%c0_200, %221, %c0_201, %c3_202] : memref<1x32x16x32xf32, #tpu.memory_space<vmem>>, vector<1x1x16x28xf32>
      %223 = vector.shape_cast %222 : vector<1x1x16x28xf32> to vector<16x28xf32>
      %c4_i32_203 = arith.constant 4 : i32
      %224 = arith.addi %126, %c4_i32_203 : i32
      %c0_204 = arith.constant 0 : index
      %225 = arith.index_cast %224 : i32 to index
      %c0_205 = arith.constant 0 : index
      %c4_206 = arith.constant 4 : index
      %226 = vector.load %arg1[%c0_204, %225, %c0_205, %c4_206] : memref<1x32x16x32xf32, #tpu.memory_space<vmem>>, vector<1x1x16x28xf32>
      %227 = vector.shape_cast %226 : vector<1x1x16x28xf32> to vector<16x28xf32>
      %228 = tpu.concatenate %131, %135, %139, %143, %147, %151, %155, %159, %163, %167, %171, %175, %179, %183, %187, %191 in 0 : vector<16x28xf32>, vector<16x28xf32>, vector<16x28xf32>, vector<16x28xf32>, vector<16x28xf32>, vector<16x28xf32>, vector<16x28xf32>, vector<16x28xf32>, vector<16x28xf32>, vector<16x28xf32>, vector<16x28xf32>, vector<16x28xf32>, vector<16x28xf32>, vector<16x28xf32>, vector<16x28xf32>, vector<16x28xf32> -> vector<256x28xf32>
      %229 = tpu.concatenate %195, %199, %203, %207, %211, %215, %219, %223, %227 in 0 : vector<16x28xf32>, vector<16x28xf32>, vector<16x28xf32>, vector<16x28xf32>, vector<16x28xf32>, vector<16x28xf32>, vector<16x28xf32>, vector<16x28xf32>, vector<16x28xf32> -> vector<144x28xf32>
      %230 = tpu.concatenate %228, %229 in 0 : vector<256x28xf32>, vector<144x28xf32> -> vector<400x28xf32>
      %c0_207 = arith.constant 0 : index
      %c0_208 = arith.constant 0 : index
      %c0_209 = arith.constant 0 : index
      %231 = vector.load %arg2[%c0_207, %c0_208, %c0_209] : memref<1x8x400xf32, #tpu.memory_space<vmem>>, vector<1x8x400xf32>
      %232 = vector.shape_cast %231 : vector<1x8x400xf32> to vector<8x400xf32>
      %cst_210 = arith.constant dense<0.000000e+00> : vector<8x28xf32>
      %233 = tpu.matmul %232, %230, %cst_210 {dimension_numbers = #tpu.dot_dimension_numbers<[1], [0], [0], [1], [0, 0, 1, 1], [], []>} : vector<8x400xf32>, vector<400x28xf32>, vector<8x28xf32> -> vector<8x28xf32>
      %234 = arith.addf %127, %233 : vector<8x28xf32>
      %235 = arith.maximumf %124, %234 : vector<8x28xf32>
      %236 = vector.broadcast %12 : vector<8x1xf32> to vector<8x28xf32>
      %237 = arith.addf %235, %236 : vector<8x28xf32>
      %cst_211 = arith.constant dense<0.000000e+00> : vector<8x14xf32>
      %238 = tpu.matmul %237, %6, %cst_211 {dimension_numbers = #tpu.dot_dimension_numbers<[1], [0], [0], [1], [0, 0, 1, 1], [], []>} : vector<8x28xf32>, vector<28x14xf32>, vector<8x14xf32> -> vector<8x14xf32>
      %cst_212 = arith.constant dense<0.000000e+00> : vector<8x14xf32>
      %239 = tpu.matmul %237, %11, %cst_212 {dimension_numbers = #tpu.dot_dimension_numbers<[1], [0], [0], [1], [0, 0, 1, 1], [], []>} : vector<8x28xf32>, vector<28x14xf32>, vector<8x14xf32> -> vector<8x14xf32>
      %240 = arith.maximumf %238, %239 : vector<8x14xf32>
      %cst_213 = arith.constant 0.000000e+00 : f32
      %241 = vector.broadcast %cst_213 : f32 to vector<8x14xf32>
      %242 = arith.maximumf %240, %241 : vector<8x14xf32>
      %c0_214 = arith.constant 0 : index
      %243 = arith.index_cast %15 : i32 to index
      %c0_215 = arith.constant 0 : index
      %c0_216 = arith.constant 0 : index
      %244 = vector.load %arg4[%c0_214, %243, %c0_215, %c0_216] : memref<1x14x8x14xf32, #tpu.memory_space<vmem>>, vector<1x1x8x14xf32>
      %245 = vector.shape_cast %244 : vector<1x1x8x14xf32> to vector<8x14xf32>
      %246 = vector.shape_cast %242 : vector<8x14xf32> to vector<1x1x8x14xf32>
      tpu.vector_store %arg4[%c0_214, %243, %c0_215, %c0_216], %246 {strides = array<i32>} : memref<1x14x8x14xf32, #tpu.memory_space<vmem>>, vector<1x1x8x14xf32>,
    }
    %c14_i32_2 = arith.constant 14 : i32
    return
  }
  func.func @transform_0(%arg0: i32) -> (i32, i32, i32, i32) {
    %c0_i32 = arith.constant 0 : i32
    %c0_i32_0 = arith.constant 0 : i32
    %c0_i32_1 = arith.constant 0 : i32
    %c0_i32_2 = arith.constant 0 : i32
    return %arg0, %c0_i32, %c0_i32_0, %c0_i32_1 : i32, i32, i32, i32
  }
  func.func @transform_1(%arg0: i32) -> (i32, i32, i32) {
    %c0_i32 = arith.constant 0 : i32
    %c0_i32_0 = arith.constant 0 : i32
    %c0_i32_1 = arith.constant 0 : i32
    %c0_i32_2 = arith.constant 0 : i32
    return %c0_i32, %c0_i32_0, %c0_i32_1 : i32, i32, i32
  }
  func.func @transform_2(%arg0: i32) -> (i32, i32) {
    %c0_i32 = arith.constant 0 : i32
    %c0_i32_0 = arith.constant 0 : i32
    %c0_i32_1 = arith.constant 0 : i32
    return %c0_i32, %c0_i32_0 : i32, i32
  }
  func.func @transform_3(%arg0: i32) -> (i32, i32, i32, i32) {
    %c0_i32 = arith.constant 0 : i32
    %c0_i32_0 = arith.constant 0 : i32
    %c0_i32_1 = arith.constant 0 : i32
    %c0_i32_2 = arith.constant 0 : i32
    return %arg0, %c0_i32, %c0_i32_0, %c0_i32_1 : i32, i32, i32, i32
  }
}

module attributes {stable_mosaic.version = 11 : i64} {
  func.func @_fc3_kernel(%arg0: memref<2x1568xf32, #tpu.memory_space<vmem>>, %arg1: memref<1568x512xf32, #tpu.memory_space<vmem>>, %arg2: memref<1x512xf32, #tpu.memory_space<vmem>>, %arg3: memref<512x256xf32, #tpu.memory_space<vmem>>, %arg4: memref<1x256xf32, #tpu.memory_space<vmem>>, %arg5: memref<256x128xf32, #tpu.memory_space<vmem>>, %arg6: memref<1x128xf32, #tpu.memory_space<vmem>>, %arg7: memref<2x128xf32, #tpu.memory_space<vmem>>) attributes {dimension_semantics = [], scalar_prefetch = 0 : i64, scratch_operands = 0 : i64, tpu.core_type = #tpu.core_type<tc>} {
    %c0 = arith.constant 0 : index
    %c0_0 = arith.constant 0 : index
    %0 = vector.load %arg0[%c0, %c0_0] : memref<2x1568xf32, #tpu.memory_space<vmem>>, vector<2x1568xf32>
    %c0_1 = arith.constant 0 : index
    %c0_2 = arith.constant 0 : index
    %1 = vector.load %arg1[%c0_1, %c0_2] : memref<1568x512xf32, #tpu.memory_space<vmem>>, vector<1568x512xf32>
    %cst = arith.constant dense<0.000000e+00> : vector<2x512xf32>
    %2 = tpu.matmul %0, %1, %cst {dimension_numbers = #tpu.dot_dimension_numbers<[1], [0], [0], [1], [0, 0, 1, 1], [], []>} : vector<2x1568xf32>, vector<1568x512xf32>, vector<2x512xf32> -> vector<2x512xf32>
    %c0_3 = arith.constant 0 : index
    %c0_4 = arith.constant 0 : index
    %3 = vector.load %arg2[%c0_3, %c0_4] : memref<1x512xf32, #tpu.memory_space<vmem>>, vector<1x512xf32>
    %4 = vector.broadcast %3 : vector<1x512xf32> to vector<2x512xf32>
    %5 = arith.addf %2, %4 : vector<2x512xf32>
    %cst_5 = arith.constant 0.000000e+00 : f32
    %6 = vector.broadcast %cst_5 : f32 to vector<2x512xf32>
    %7 = arith.maximumf %5, %6 : vector<2x512xf32>
    %c0_6 = arith.constant 0 : index
    %c0_7 = arith.constant 0 : index
    %8 = vector.load %arg3[%c0_6, %c0_7] : memref<512x256xf32, #tpu.memory_space<vmem>>, vector<512x256xf32>
    %cst_8 = arith.constant dense<0.000000e+00> : vector<2x256xf32>
    %9 = tpu.matmul %7, %8, %cst_8 {dimension_numbers = #tpu.dot_dimension_numbers<[1], [0], [0], [1], [0, 0, 1, 1], [], []>} : vector<2x512xf32>, vector<512x256xf32>, vector<2x256xf32> -> vector<2x256xf32>
    %c0_9 = arith.constant 0 : index
    %c0_10 = arith.constant 0 : index
    %10 = vector.load %arg4[%c0_9, %c0_10] : memref<1x256xf32, #tpu.memory_space<vmem>>, vector<1x256xf32>
    %11 = vector.broadcast %10 : vector<1x256xf32> to vector<2x256xf32>
    %12 = arith.addf %9, %11 : vector<2x256xf32>
    %cst_11 = arith.constant 0.000000e+00 : f32
    %13 = vector.broadcast %cst_11 : f32 to vector<2x256xf32>
    %14 = arith.maximumf %12, %13 : vector<2x256xf32>
    %c0_12 = arith.constant 0 : index
    %c0_13 = arith.constant 0 : index
    %15 = vector.load %arg5[%c0_12, %c0_13] : memref<256x128xf32, #tpu.memory_space<vmem>>, vector<256x128xf32>
    %cst_14 = arith.constant dense<0.000000e+00> : vector<2x128xf32>
    %16 = tpu.matmul %14, %15, %cst_14 {dimension_numbers = #tpu.dot_dimension_numbers<[1], [0], [0], [1], [0, 0, 1, 1], [], []>} : vector<2x256xf32>, vector<256x128xf32>, vector<2x128xf32> -> vector<2x128xf32>
    %c0_15 = arith.constant 0 : index
    %c0_16 = arith.constant 0 : index
    %17 = vector.load %arg6[%c0_15, %c0_16] : memref<1x128xf32, #tpu.memory_space<vmem>>, vector<1x128xf32>
    %18 = vector.broadcast %17 : vector<1x128xf32> to vector<2x128xf32>
    %19 = arith.addf %16, %18 : vector<2x128xf32>
    %c0_17 = arith.constant 0 : index
    %c0_18 = arith.constant 0 : index
    %20 = vector.load %arg7[%c0_17, %c0_18] : memref<2x128xf32, #tpu.memory_space<vmem>>, vector<2x128xf32>
    tpu.vector_store %arg7[%c0_17, %c0_18], %19 {strides = array<i32>} : memref<2x128xf32, #tpu.memory_space<vmem>>, vector<2x128xf32>,
    return
  }
}

</mosaic_0001>

<bundles_post_ra>
// kernel: cnnet_forward.4
= control target key start
LH: loop header
LB: loop body
LE: loop exit
PB: predicated region body
PF: predicated region fallthrough
CT: control target
= control target key end

     0   :  { %s1609_s12 = smov 0   ;;  %s2229_s0 = inlined_call_operand.vmem [shape: f32[2,140,1,140], index: 0, kind: input, shape index: {}]   ;;  %s2230_s1 = inlined_call_operand.vmem [shape: f32[1,32,25], index: 1, kind: input, shape index: {}]   ;;  %s2231_s2 = inlined_call_operand.vmem [shape: f32[32,1], index: 2, kind: input, shape index: {}]   ;;  %s2232_s3 = inlined_call_operand.vmem [shape: f32[2,68,32,68], index: 3, kind: output, shape index: {}]  }
   0x1 LB: > { %s1203_s13 = sadd.s32 4294967295, %s1572_s12   ;;  %p1207_p0 = scmp.ge.s32.totalorder %s1572_s12, 1  ;;  %s1572_s12 = sphi %s1609_s12, %s13_s12  }
   0x2   : > { %p136_p1 = scmp.lt.s32.totalorder %s1572_s12, 3 }
   0x4   : > { %p137_p2 = pnand %p1207_p0, %p136_p1 }
   0x5   : > { %p159_p3 = scmp.lt.s32.totalorder (!%p137_p2), %s1203_s13, 1  ;;  %v168_v0 = vlaneseq (!%p137_p2)  ;;  %v1620_v1 = vld [vmem:[%s2231_s2] sm:$0xff] (!%p137_p2)  ;;  %v1625_v2 = vld [vmem:[%s2231_s2 + $0x8] sm:$0xff] (!%p137_p2)  ;;  %v1630_v3 = vld [vmem:[%s2231_s2 + $0x10] sm:$0xff] (!%p137_p2)  ;;  %s1770_s30 = smov (!%p137_p2), 0  }
   0x6   : > { %140 = sbr.rel (%p137_p2) target bundleno = 736 (0x2e0), region = 32  ;;  %2241 = vst [vmem:[#allocation2_spill] sm:$0xff] (!%p137_p2), %v1620_v1  ;;  %v1635_v4 = vld [vmem:[%s2231_s2 + $0x18] sm:$0xff] (!%p137_p2) }
   0x7   : > { %v1637_v5 = vshrl.u32 (!%p137_p2), %v168_v0, 7  ;;  %v187_v6 = vand.u32 (!%p137_p2), 127, %v168_v0 }
   0x9   : > { %v1640_v7 = vadd.s32 (!%p137_p2), 8, %v1637_v5  ;;  %v1648_v8 = vadd.s32 (!%p137_p2), 16, %v1637_v5  ;;  %v1651_v9 = vadd.s32 (!%p137_p2), 24, %v1637_v5  ;;  %v1654_v10 = vadd.s32 (!%p137_p2), 32, %v1637_v5 }
   0xa   : > { %v1657_v11 = vadd.s32 (!%p137_p2), 40, %v1637_v5  ;;  %v1665_v12 = vadd.s32 (!%p137_p2), 48, %v1637_v5  ;;  %v1668_v13 = vadd.s32 (!%p137_p2), 56, %v1637_v5  ;;  %v1671_v14 = vadd.s32 (!%p137_p2), 64, %v1637_v5 }
   0xb   : > { %v1674_v15 = vadd.s32 (!%p137_p2), 72, %v1637_v5  ;;  %v1677_v16 = vadd.s32 (!%p137_p2), 80, %v1637_v5  ;;  %v1680_v17 = vadd.s32 (!%p137_p2), 88, %v1637_v5  ;;  %v1683_v18 = vadd.s32 (!%p137_p2), 96, %v1637_v5 }
   0xc   : > { %v1685_v19 = vmul.u32 (!%p137_p2), 2, %v187_v6  ;;  %v1688_v20 = vadd.s32 (!%p137_p2), 104, %v1637_v5  ;;  %v1691_v21 = vadd.s32 (!%p137_p2), 112, %v1637_v5  ;;  %v1694_v22 = vadd.s32 (!%p137_p2), 120, %v1637_v5 }
   0xd   : > { %s2282_s13 = smov (!%p159_p3, %s1203_s13), 1  ;;  %v1697_v23 = vadd.s32 128, %v1637_v5 }
   0xe   : > { %s1391_s22 = smul.u32 280, %s2282_s13  ;;  %2242 = vst [vmem:[#allocation3_spill] sm:$0xff] %v1691_v21  ;;  %2243 = vst [vmem:[#allocation4_spill] sm:$0xff] %v1694_v22  ;;  %vm189_vm0 = vcmp.eq.s32.totalorder %v1637_v5, %v1685_v19  ;;  %vm190_vm1 = vcmp.eq.s32.totalorder %v1640_v7, %v1685_v19  ;;  %vm191_vm2 = vcmp.eq.s32.totalorder %v1648_v8, %v1685_v19  ;;  %v1734_v24 = vadd.s32 1, %v1685_v19 }
   0xf   : > { %s1392_s23 = smul.u32 2176, %s2282_s13  ;;  %2244 = vst [vmem:[#allocation5_spill] sm:$0xff] %v1697_v23 }
  0x10   : > { %s1645_s26 = scalar_lea.vmem %s2229_s0, %s1391_s22  ;;  %vm241_vm11 = vcmp.eq.s32.totalorder %v1637_v5, %v1734_v24  ;;  %vm242_vm12 = vcmp.eq.s32.totalorder %v1640_v7, %v1734_v24 }
  0x11   : > { %s1662_s29 = scalar_lea.vmem %s2232_s3, %s1392_s23 }
  0x12 LB: >> { %v325_v25 = vsub.s32 0, %v1637_v5  ;;  %v329_v26 = vsub.s32 1, %v1637_v5  ;;  %s1317_s4 = sshll.u32 %s1576_s30, 2  ;;  %s1578_s6 = smov 126   ;;  %vm337_vm6 = vcmask 1039360   ;;  %vm345_vm7 = vcmask 1031168   ;;  %s1576_s30 = sphi %s1770_s30, %s301_s30  }
  0x13   : >> { %s1779_s5 = scalar_lea.vmem %s1645_s26, %s1317_s4  ;;  %s1579_s7 = smov 127   ;;  %vm454_vm8 = vcmask 1040384   ;;  %vm457_vm10 = vcmask 1041408   ;;  %vm460_vm9 = vcmask 1042432   ;;  %vm353_vm15 = vcmask 1022976   ;;  %v2245_v1 = vld [vmem:[#allocation2_spill] sm:$0xff] }
  0x14   : >> { %v1253_v27 = vld [vmem:[%s1779_s5 + $0x6] sm:$0x3]  ;;  %v1256_v28 = vld [vmem:[%s1779_s5 + $0x8] sm:$0x3]  ;;  %v1265_v35 = vld [vmem:[%s1779_s5 + $0xa] sm:$0x3] }
  0x15   : >> { %v1783_v29 = vrot.slane %v1253_v27, %v325_v25  ;;  %v1785_v30 = vrot.slane %v1253_v27, %v329_v26  ;;  %v1787_v31 = vrot.slane %v1256_v28, %v325_v25  ;;  %v1789_v32 = vrot.slane %v1256_v28, %v329_v26  ;;  %s1580_s8 = smov 125   ;;  %v305_v39 = vld [vmem:[%s1779_s5] sm:$0x3]  ;;  %s1581_s9 = smov 1   ;;  %v1247_v42 = vld [vmem:[%s1779_s5 + $0x2] sm:$0x3] }
  0x16   : >> { %v1798_v36 = vrot.slane %v1265_v35, %v325_v25  ;;  %v1802_v37 = vrot.slane %v1265_v35, %v329_v26  ;;  %v1809_v40 = vrot.slane %v305_v39, %v325_v25  ;;  %v1811_v41 = vrot.slane %v305_v39, %v329_v26  ;;  %v1250_v46 = vld [vmem:[%s1779_s5 + $0x4] sm:$0x3]  ;;  %s1582_s10 = smov 124   ;;  %s1314_s20 = sshll.u32 %s1576_s30, 5 }
  0x17   : >> { %v1430_v33 = vpack.i.bf16 %v1785_v30, %v1783_v29  ;;  %v1435_v34 = vpack.i.bf16 %v1789_v32, %v1787_v31  ;;  %v1818_v44 = vrot.slane %v1247_v42, %v325_v25  ;;  %v1820_v45 = vrot.slane %v1247_v42, %v329_v26  ;;  %s1113_s21 = scalar_lea.vmem %s1662_s29, %s1314_s20  ;;  %s301_s30 = sadd.s32 1, %s1576_s30  }
  0x18   : >> { %v1455_v38 = vpack.i.bf16 %v1802_v37, %v1798_v36  ;;  %v1475_v43 = vpack.i.bf16 %v1811_v41, %v1809_v40  ;;  %v1823_v47 = vrot.slane %v1250_v46, %v325_v25  ;;  %v1829_v49 = vrot.slane %v1250_v46, %v329_v26  ;;  %p298_p4 = scmp.ge.s32.totalorder %s301_s30, 68  }
  0x19   : >> { %1431 = vrot.lane.b32.xlu1 %v1430_v33, %s1578_s6  ;;  %1421 = vrot.lane.b32.xlu0 %v1430_v33, %s1579_s7  ;;  %v1480_v48 = vpack.i.bf16 %v1820_v45, %v1818_v44  ;;  %vm463_vm5 = vcmask 1043456   ;;  %vm523_vm4 = vcmask 7168   ;;  %vm466_vm14 = vcmask 1044480  }
  0x1a   : >> { %v1495_v50 = vpack.i.bf16 %v1829_v49, %v1823_v47  ;;  %vm469_vm13 = vcmask 1045504   ;;  %vm472_vm3 = vcmask 1046528  }
  0x1d   : >> { %1436 = vrot.lane.b32.xlu1 %v1435_v34, %s1578_s6  ;;  %1426 = vrot.lane.b32.xlu0 %v1435_v34, %s1579_s7 }
  0x21   : >> { %1446 = vrot.lane.b32.xlu1 %v1435_v34, %s1580_s8  ;;  %1441 = vrot.lane.b32.xlu0 %v1430_v33, %s1580_s8 }
  0x25   : >> { %1456 = vrot.lane.b32.xlu1 %v1455_v38, %s1581_s9  ;;  %1451 = vrot.lane.b32.xlu0 %v1435_v34, %s1581_s9 }
  0x29   : >> { %1466 = vrot.lane.b32.xlu1 %v1455_v38, %s1578_s6  ;;  %1461 = vrot.lane.b32.xlu0 %v1455_v38, %s1579_s7 }
  0x2d   : >> { %1471 = vrot.lane.b32.xlu0 %v1455_v38, %s1580_s8  ;;  %1476 = vrot.lane.b32.xlu1 %v1475_v43, %s1579_s7 }
  0x31   : >> { %1481 = vrot.lane.b32.xlu0 %v1480_v48, %s1579_s7  ;;  %1486 = vrot.lane.b32.xlu1 %v1480_v48, %s1580_s8 }
  0x35   : >> { %1491 = vrot.lane.b32.xlu0 %v1480_v48, %s1582_s10  ;;  %1496 = vrot.lane.b32.xlu1 %v1495_v50, %s1580_s8 }
  0x39   : >> { %1501 = vrot.lane.b32.xlu0 %v1495_v50, %s1582_s10  ;;  %1506 = vrot.lane.b32.xlu1 %v1475_v43, %s1578_s6 }
  0x3d   : >> { %1516 = vrot.lane.b32.xlu1 %v1475_v43, %s1580_s8  ;;  %1511 = vrot.lane.b32.xlu0 %v1480_v48, %s1578_s6 }
  0x41   : >> { %1526 = vrot.lane.b32.xlu1 %v1475_v43, %s1582_s10  ;;  %1521 = vrot.lane.b32.xlu0 %v1495_v50, %s1579_s7 }
  0x45   : >> { %1536 = vrot.lane.b32.xlu1 %v1430_v33, %s1582_s10  ;;  %1531 = vrot.lane.b32.xlu0 %v1495_v50, %s1578_s6 }
  0x8b   : >> { %v1432_v51 = vpop.permute.xlu1 %1431  ;;  %v1422_v52 = vpop.permute.xlu0 %1421 }
  0x8c   : >> { %v1841_v53 = vunpack.i.h.bf16 %v1422_v52  ;;  %v1423_v54 = vunpack.i.l.bf16 %v1422_v52  ;;  %v1843_v55 = vunpack.i.h.bf16 %v1432_v51  ;;  %v1433_v56 = vunpack.i.l.bf16 %v1432_v51 }
  0x8e   : >> { %v1847_v59 = vsel %vm337_vm6, %v1423_v54, %v1841_v53  ;;  %v1851_v62 = vsel %vm345_vm7, %v1433_v56, %v1843_v55  ;;  %v549_v6 = vsel %vm454_vm8, %v1785_v30, %v1841_v53 }
  0x8f   : >> { %v1437_v57 = vpop.permute.xlu1 %1436  ;;  %v1427_v58 = vpop.permute.xlu0 %1426  ;;  %v548_v25 = vsel %vm454_vm8, %v1783_v29, %v1847_v59  ;;  %v551_v51 = vsel %vm457_vm10, %v549_v6, %v1843_v55 }
  0x90   : >> { %v1429_v60 = vunpack.i.h.bf16 %v1427_v58  ;;  %v1428_v61 = vunpack.i.l.bf16 %v1427_v58  ;;  %v1439_v63 = vunpack.i.h.bf16 %v1437_v57  ;;  %v1438_v0 = vunpack.i.l.bf16 %v1437_v57 }
  0x91   : >> { %v550_v56 = vsel %vm457_vm10, %v548_v25, %v1851_v62 }
  0x92   : >> { %v765_v26 = vsel %vm454_vm8, %v1789_v32, %v1429_v60  ;;  %v533_v27 = vsel %vm337_vm6, %v1428_v61, %v1429_v60  ;;  %v540_v42 = vsel %vm345_vm7, %v1438_v0, %v1439_v63 }
  0x93   : >> { %v1447_v28 = vpop.permute.xlu1 %1446  ;;  %v1442_v33 = vpop.permute.xlu0 %1441  ;;  %v764_v43 = vsel %vm454_vm8, %v1787_v31, %v533_v27  ;;  %v767_v50 = vsel %vm457_vm10, %v765_v26, %v1439_v63 }
  0x94   : >> { %v1449_v34 = vunpack.i.h.bf16 %v1447_v28  ;;  %v1448_v35 = vunpack.i.l.bf16 %v1447_v28  ;;  %v1862_v38 = vunpack.i.h.bf16 %v1442_v33  ;;  %v1443_v39 = vunpack.i.l.bf16 %v1442_v33 }
  0x95   : >> { %v766_v6 = vsel %vm457_vm10, %v764_v43, %v540_v42 }
  0x96   : >> { %v1869_v46 = vsel %vm353_vm15, %v1443_v39, %v1862_v38  ;;  %v547_v48 = vsel %vm353_vm15, %v1448_v35, %v1449_v34  ;;  %v769_v33 = vsel %vm460_vm9, %v767_v50, %v1449_v34  ;;  %v553_v35 = vsel %vm460_vm9, %v551_v51, %v1862_v38 }
  0x97   : >> { %v1457_v52 = vpop.permute.xlu1 %1456  ;;  %v1452_v54 = vpop.permute.xlu0 %1451  ;;  %v1540_v57 = vpack.i.bf16 %v1449_v34, %v547_v48  ;;  %v552_v26 = vsel %vm460_vm9, %v550_v56, %v1869_v46 }
  0x98   : >> { %v1459_v58 = vunpack.i.h.bf16 %v1457_v52  ;;  %v1458_v61 = vunpack.i.l.bf16 %v1457_v52  ;;  %v1454_v0 = vunpack.i.h.bf16 %v1452_v54  ;;  %v1453_v28 = vunpack.i.l.bf16 %v1452_v54 }
  0x99   : >> { %1541 = vrot.lane.b32.xlu1 %v1540_v57, %s1579_s7  ;;  %v768_v54 = vsel %vm460_vm9, %v766_v6, %v547_v48 }
  0x9a   : >> { %v740_v39 = vsel %vm523_vm4, %v1458_v61, %v1459_v58  ;;  %v524_v25 = vsel %vm523_vm4, %v1453_v28, %v1454_v0  ;;  %v554_v52 = vsel %vm463_vm5, %v552_v26, %v1453_v28  ;;  %v770_v43 = vsel %vm463_vm5, %v768_v54, %v1458_v61 }
  0x9b   : >> { %v771_v34 = vsel %vm463_vm5, %v769_v33, %v740_v39  ;;  %v555_v50 = vsel %vm463_vm5, %v553_v35, %v524_v25  ;;  %v556_v51 = vsel %vm466_vm14, %v554_v52, %v1787_v31  ;;  %v1467_v56 = vpop.permute.xlu1 %1466  ;;  %v1462_v23 = vpop.permute.xlu0 %1461  ;;  %v772_v61 = vsel %vm466_vm14, %v770_v43, %v1798_v36 }
  0x9c   : >> { %v1469_v57 = vunpack.i.h.bf16 %v1467_v56  ;;  %v1468_v22 = vunpack.i.l.bf16 %v1467_v56  ;;  %v1464_v58 = vunpack.i.h.bf16 %v1462_v23  ;;  %v1463_v21 = vunpack.i.l.bf16 %v1462_v23 }
  0x9d   : >> { %v773_v0 = vsel %vm466_vm14, %v771_v34, %v1802_v37  ;;  %v557_v48 = vsel %vm466_vm14, %v555_v50, %v1789_v32  ;;  %v558_v28 = vsel %vm469_vm13, %v556_v51, %v533_v27  ;;  %v2239_v36 = vmov 0.0  }
  0x9e   : >> { %v756_v33 = vsel %vm345_vm7, %v1468_v22, %v1469_v57  ;;  %v749_v35 = vsel %vm337_vm6, %v1463_v21, %v1464_v58  ;;  %v559_v26 = vsel %vm469_vm13, %v557_v48, %v1429_v60  ;;  %v775_v6 = vsel %vm469_vm13, %v773_v0, %v1464_v58  ;;  %661 = vmatprep.mubr.f32.mxu0 %v2239_v36 }
  0x9f   : >> { %v1472_v23 = vpop.permute.xlu0 %1471  ;;  %v1477_v39 = vpop.permute.xlu1 %1476  ;;  %v560_v37 = vsel %vm472_vm3, %v558_v28, %v540_v42  ;;  %v561_v25 = vsel %vm472_vm3, %v559_v26, %v1439_v63  ;;  %v774_v52 = vsel %vm469_vm13, %v772_v61, %v749_v35  ;;  %v777_v34 = vsel %vm472_vm3, %v775_v6, %v1469_v57  ;;  %860 = vmatprep.mubr.f32.mxu1 %v2239_v36 }
  0xa0   : >> { %v1474_v27 = vunpack.i.h.bf16 %v1472_v23  ;;  %v1473_v54 = vunpack.i.l.bf16 %v1472_v23  ;;  %v1545_v22 = vpack.i.bf16 %v561_v25, %v560_v37  ;;  %v776_v60 = vsel %vm472_vm3, %v774_v52, %v756_v33 }
  0xa1   : >> { %v1479_v51 = vunpack.i.h.bf16 %v1477_v39  ;;  %v1478_v56 = vunpack.i.l.bf16 %v1477_v39  ;;  %v1550_v43 = vpack.i.bf16 %v777_v34, %v776_v60  ;;  %vm361_vm4 = vcmask 1014784  }
  0xa2   : >> { %v763_v21 = vsel %vm353_vm15, %v1473_v54, %v1474_v27  ;;  %1546 = vrot.lane.b32.xlu0 %v1545_v22, %s1579_s7 }
  0xa3   : >> { %v1555_v50 = vpack.i.bf16 %v1474_v27, %v763_v21  ;;  %v1482_v63 = vpop.permute.xlu0 %1481  ;;  %v1487_v42 = vpop.permute.xlu1 %1486  ;;  %v338_v57 = vsel %vm337_vm6, %v1478_v56, %v1479_v51  ;;  %v456_v39 = vsel %vm454_vm8, %v1811_v41, %v1479_v51 }
  0xa4   : >> { %v1914_v58 = vunpack.i.h.bf16 %v1482_v63  ;;  %v1483_v0 = vunpack.i.l.bf16 %v1482_v63  ;;  %v1489_v48 = vunpack.i.h.bf16 %v1487_v42  ;;  %v1488_v28 = vunpack.i.l.bf16 %v1487_v42 }
  0xa5   : >> { %1556 = vrot.lane.b32.xlu1 %v1555_v50, %s1579_s7  ;;  %v455_v52 = vsel %vm454_vm8, %v1809_v40, %v338_v57 }
  0xa6   : >> { %1551 = vrot.lane.b32.xlu0 %v1550_v43, %s1579_s7  ;;  %v1924_v37 = vsel %vm337_vm6, %v1483_v0, %v1914_v58  ;;  %v394_v27 = vsel %vm353_vm15, %v1488_v28, %v1489_v48  ;;  %v698_v40 = vsel %vm454_vm8, %v1820_v45, %v1914_v58 }
  0xa7   : >> { %v1492_v33 = vpop.permute.xlu0 %1491  ;;  %v1497_v35 = vpop.permute.xlu1 %1496  ;;  %v697_v56 = vsel %vm454_vm8, %v1818_v44, %v1924_v37 }
  0xa8   : >> { %v1494_v26 = vunpack.i.h.bf16 %v1492_v33  ;;  %v1493_v61 = vunpack.i.l.bf16 %v1492_v33  ;;  %v1918_v6 = vunpack.i.h.bf16 %v1497_v35  ;;  %v1498_v23 = vunpack.i.l.bf16 %v1497_v35 }
  0xaa   : >> { %v476_v25 = vsel %vm454_vm8, %v1489_v48, %v1494_v26  ;;  %v1931_v54 = vsel %vm361_vm4, %v1493_v61, %v1494_v26  ;;  %v1935_v22 = vsel %vm353_vm15, %v1498_v23, %v1918_v6 }
  0xab   : >> { %v1502_v41 = vpop.permute.xlu0 %1501  ;;  %v1507_v21 = vpop.permute.xlu1 %1506  ;;  %v475_v63 = vsel %vm454_vm8, %v394_v27, %v1931_v54  ;;  %v478_v42 = vsel %vm457_vm10, %v476_v25, %v1829_v49 }
  0xac   : >> { %v1937_v60 = vunpack.i.h.bf16 %v1502_v41  ;;  %v1503_v34 = vunpack.i.l.bf16 %v1502_v41  ;;  %v1509_v50 = vunpack.i.h.bf16 %v1507_v21  ;;  %v1508_v51 = vunpack.i.l.bf16 %v1507_v21 }
  0xae   : >> { %v1951_v43 = vsel %vm361_vm4, %v1503_v34, %v1937_v60  ;;  %v712_v0 = vsel %vm454_vm8, %v1918_v6, %v1937_v60  ;;  %v346_v57 = vsel %vm345_vm7, %v1508_v51, %v1509_v50  ;;  %v459_v28 = vsel %vm457_vm10, %v456_v39, %v1509_v50 }
  0xaf   : >> { %v711_v33 = vsel %vm454_vm8, %v1935_v22, %v1951_v43  ;;  %v714_v35 = vsel %vm457_vm10, %v712_v0, %v1785_v30  ;;  %v458_v61 = vsel %vm457_vm10, %v455_v52, %v346_v57  ;;  %v1517_v23 = vpop.permute.xlu1 %1516  ;;  %v1512_v25 = vpop.permute.xlu0 %1511  ;;  %v1584_v51 = vmov 0  }
  0xb0   : >> { %v713_v41 = vsel %vm457_vm10, %v711_v33, %v1783_v29  ;;  %v1519_v21 = vunpack.i.h.bf16 %v1517_v23  ;;  %v1518_v34 = vunpack.i.l.bf16 %v1517_v23  ;;  %v1966_v36 = vunpack.i.h.bf16 %v1512_v25  ;;  %1560 = vset.pattern.permute.xlu0 %v1584_v51  ;;  %1561 = vset.pattern.permute.xlu1 %v1584_v51 }
  0xb1   : >> { %v1513_v39 = vunpack.i.l.bf16 %v1512_v25  ;;  %v477_v50 = vsel %vm457_vm10, %v475_v63, %v1823_v47  ;;  %v716_v0 = vsel %vm460_vm9, %v714_v35, %v1841_v53  ;;  %v715_v52 = vsel %vm460_vm9, %v713_v41, %v1847_v59  ;;  %895 = vperm.xlu0 %1560, %v2245_v1   ;;  %900 = vperm.xlu1 %1561, %v1625_v2  }
  0xb2   : >> { %v354_v57 = vsel %vm353_vm15, %v1518_v34, %v1519_v21  ;;  %v462_v33 = vsel %vm460_vm9, %v459_v28, %v1519_v21  ;;  %v700_v23 = vsel %vm457_vm10, %v698_v40, %v1966_v36  ;;  %v718_v63 = vsel %vm463_vm5, %v716_v0, %v1843_v55 }
  0xb3   : >> { %v461_v25 = vsel %vm460_vm9, %v458_v61, %v354_v57  ;;  %v387_v53 = vsel %vm345_vm7, %v1513_v39, %v1966_v36  ;;  %v702_v59 = vsel %vm460_vm9, %v700_v23, %v1489_v48  ;;  %v1527_v35 = vpop.permute.xlu1 %1526  ;;  %v1522_v41 = vpop.permute.xlu0 %1521  ;;  %v720_v34 = vsel %vm466_vm14, %v718_v63, %v1862_v38 }
  0xb4   : >> { %v699_v28 = vsel %vm457_vm10, %v697_v56, %v387_v53  ;;  %v1529_v21 = vunpack.i.h.bf16 %v1527_v35  ;;  %v1528_v51 = vunpack.i.l.bf16 %v1527_v35  ;;  %v1524_v40 = vunpack.i.h.bf16 %v1522_v41 }
  0xb5   : >> { %v701_v1 = vsel %vm460_vm9, %v699_v28, %v394_v27  ;;  %v1523_v55 = vunpack.i.l.bf16 %v1522_v41  ;;  %v704_v61 = vsel %vm463_vm5, %v702_v59, %v1494_v26  ;;  %v717_v39 = vsel %vm463_vm5, %v715_v52, %v1851_v62  ;;  %910 = vperm.xlu0 %1560, %v1635_v4   ;;  %905 = vperm.xlu1 %1561, %v1630_v3  }
  0xb6   : >> { %v362_v48 = vsel %vm361_vm4, %v1528_v51, %v1529_v21  ;;  %v465_v38 = vsel %vm463_vm5, %v462_v33, %v1529_v21  ;;  %v480_v56 = vsel %vm460_vm9, %v478_v42, %v1524_v40  ;;  %v706_v0 = vsel %vm466_vm14, %v704_v61, %v1829_v49 }
  0xb7   : >> { %v464_v27 = vsel %vm463_vm5, %v461_v25, %v362_v48  ;;  %v419_v26 = vsel %vm337_vm6, %v1523_v55, %v1524_v40  ;;  %v1537_v57 = vpop.permute.xlu1 %1536  ;;  %v1532_v23 = vpop.permute.xlu0 %1531  ;;  %v708_v62 = vsel %vm469_vm13, %v706_v0, %v1524_v40  ;;  %v703_v52 = vsel %vm463_vm5, %v701_v1, %v1931_v54 }
  0xb8   : >> { %v479_v63 = vsel %vm460_vm9, %v477_v50, %v419_v26  ;;  %v1539_v59 = vunpack.i.h.bf16 %v1537_v57  ;;  %v1538_v33 = vunpack.i.l.bf16 %v1537_v57  ;;  %v1534_v35 = vunpack.i.h.bf16 %v1532_v23 }
  0xb9   : >> { %v1533_v42 = vunpack.i.l.bf16 %v1532_v23  ;;  %v705_v49 = vsel %vm466_vm14, %v703_v52, %v1823_v47  ;;  %v719_v25 = vsel %vm466_vm14, %v717_v39, %v1869_v46  ;;  %v468_v41 = vsel %vm466_vm14, %v465_v38, %v1820_v45 }
  0xba   : >> { %v694_v28 = vsel %vm361_vm4, %v1538_v33, %v1539_v59  ;;  %v482_v21 = vsel %vm463_vm5, %v480_v56, %v1534_v35  ;;  %v710_v1 = vsel %vm472_vm3, %v708_v62, %v1534_v35  ;;  %v722_v54 = vsel %vm469_vm13, %v720_v34, %v1539_v59 }
  0xbb   : >> { %v724_v50 = vsel %vm472_vm3, %v722_v54, %v1789_v32  ;;  %v426_v51 = vsel %vm345_vm7, %v1533_v42, %v1534_v35  ;;  %v707_v47 = vsel %vm469_vm13, %v705_v49, %v419_v26  ;;  %v721_v46 = vsel %vm469_vm13, %v719_v25, %v694_v28 }
  0xbc   : >> { %v1333_v40 = vpack.c.bf16 %v724_v50, %v710_v1  ;;  %v481_v45 = vsel %vm463_vm5, %v479_v63, %v426_v51  ;;  %v709_v55 = vsel %vm472_vm3, %v707_v47, %v426_v51  ;;  %v723_v61 = vsel %vm472_vm3, %v721_v46, %v1787_v31  ;;  %v577_v51 = vld [vmem:[%s2230_s1 + $0x8] sm:$0xff]  ;;  %v578_v46 = vld [vmem:[%s2230_s1 + $0x10] sm:$0xff] }
  0xbd   : >> { %v1335_v39 = vpack.c.bf16 %v723_v61, %v709_v55  ;;  %v471_v34 = vsel %vm469_vm13, %v468_v41, %v1914_v58  ;;  %v484_v32 = vsel %vm466_vm14, %v482_v21, %v1918_v6  ;;  %v467_v48 = vsel %vm466_vm14, %v464_v27, %v1818_v44  ;;  %v576_v41 = vld [vmem:[%s2230_s1] sm:$0xff]  ;;  %v2274_v55 = vld [vmem:[#allocation4_spill] sm:$0xff] }
  0xbe   : >> { %1334 = vmatprep.subr.bf16.mxu1 %v1333_v40  ;;  %v474_v38 = vsel %vm472_vm3, %v471_v34, %v1966_v36  ;;  %v486_v56 = vsel %vm469_vm13, %v484_v32, %v1937_v60  ;;  %v470_v31 = vsel %vm469_vm13, %v467_v48, %v1924_v37  ;;  %v483_v0 = vsel %vm466_vm14, %v481_v45, %v1935_v22  ;;  %v579_v40 = vld [vmem:[%s2230_s1 + $0x18] sm:$0xff]  ;;  %v2272_v45 = vld [vmem:[#allocation3_spill] sm:$0xff] }
  0xbf   : >> { %1336 = vmatpush1.bf16.msra.mxu1 %v1335_v39  ;;  %v488_v58 = vsel %vm472_vm3, %v486_v56, %v1785_v30  ;;  %v473_v6 = vsel %vm472_vm3, %v470_v31, %v387_v53  ;;  %v485_v44 = vsel %vm469_vm13, %v483_v0, %v1951_v43  ;;  %vm1585_vm5 = vmmov 1   ;;  %v2278_v39 = vld [vmem:[#allocation5_spill] sm:$0xff] }
  0xc0   : >> { %v1323_v27 = vpack.c.bf16 %v488_v58, %v474_v38  ;;  %v487_v36 = vsel %vm472_vm3, %v485_v44, %v1783_v29  ;;  %vm2048_vm7 = vmpackc.low %vm454_vm8, %vm1585_vm5  ;;  %vm580_vm3 = vcmask 203776   ;;  %v1586_v1 = vmov 0.0|0.0  }
  0xc1   : >> { %v1325_v60 = vpack.c.bf16 %v487_v36, %v473_v6  ;;  %vm1344_vm8 = vmpackc.low %vm190_vm1, %vm189_vm0  ;;  %v2248_v50 = vmov 0.0   ;;  %v1587_v47 = vmov 1.0|1.0   ;;  %vm2249_vm9 = vcmp.eq.s32.totalorder %v1651_v9, %v1685_v19 }
  0xc2   : >> { %1324 = vmatprep.subr.bf16.mxu0 %v1323_v27  ;;  %vm1347_vm10 = vmpackc.low %vm2249_vm9, %vm191_vm2  ;;  %vm2250_vm13 = vcmp.eq.s32.totalorder %v1648_v8, %v1734_v24  ;;  %vm2251_vm14 = vcmp.eq.s32.totalorder %v1651_v9, %v1734_v24  ;;  %vm2252_vm4 = vcmp.eq.s32.totalorder %v1654_v10, %v1685_v19  ;;  %vm2253_vm5 = vcmp.eq.s32.totalorder %v1657_v11, %v1685_v19 }
  0xc3   : >> { %1326 = vmatpush1.bf16.msra.mxu0 %v1325_v60  ;;  %vm1371_vm15 = vmpackc.low %vm2251_vm14, %vm2250_vm13  ;;  %vm2257_vm13 = vcmp.eq.s32.totalorder %v1668_v13, %v1685_v19  ;;  %v1588_v61 = vmov 1.0  }
 0x10b   : >> { %v1542_v37 = vpop.permute.xlu1 %1541 }
 0x10c   : >> { %v1544_v26 = vunpack.i.h.bf16 %v1542_v37  ;;  %v1543_v57 = vunpack.i.l.bf16 %v1542_v37 }
 0x10e   : >> { %v573_v30 = vsel %vm337_vm6, %v1543_v57, %v1544_v26 }
 0x114   : >> { %v1547_v22 = vpop.permute.xlu0 %1546 }
 0x115   : >> { %v1549_v23 = vunpack.i.h.bf16 %v1547_v22  ;;  %v1548_v62 = vunpack.i.l.bf16 %v1547_v22 }
 0x117   : >> { %v1557_v52 = vpop.permute.xlu1 %1556  ;;  %v572_v29 = vsel %vm337_vm6, %v1548_v62, %v1549_v23  ;;  %v1327_v53 = vpack.c.bf16 %v1544_v26, %v1549_v23 }
 0x118   : >> { %v1559_v63 = vunpack.i.h.bf16 %v1557_v52  ;;  %v1558_v59 = vunpack.i.l.bf16 %v1557_v52  ;;  %v1330_v33 = vpack.c.bf16 %v573_v30, %v572_v29  ;;  %v1552_v35 = vpop.permute.xlu0 %1551 }
 0x119   : >> { %v1554_v42 = vunpack.i.h.bf16 %v1552_v35  ;;  %v1553_v49 = vunpack.i.l.bf16 %v1552_v35  ;;  %1329 = vmatprep.subr.msk.bf16.mxu0 %vm2048_vm7, %v1327_v53 }
 0x11a   : >> { %v789_v25 = vsel %vm337_vm6, %v1558_v59, %v1559_v63  ;;  %1332 = vmatpush1.bf16.msk.msra.mxu0 %vm2048_vm7, %v1330_v33 }
 0x11b   : >> { %v788_v28 = vsel %vm337_vm6, %v1553_v49, %v1554_v42  ;;  %v1337_v21 = vpack.c.bf16 %v1559_v63, %v1554_v42  ;;  %1343 = vmatprep.subr.bf16.mxu0 %v1586_v1  ;;  %vm1368_vm6 = vmpackc.low %vm242_vm12, %vm241_vm11 }
 0x11c   : >> { %v1340_v54 = vpack.c.bf16 %v789_v25, %v788_v28 }
 0x11d   : >> { %1339 = vmatprep.subr.msk.bf16.mxu1 %vm2048_vm7, %v1337_v21  ;;  %1259 = vmatmul.mubr.msk.f32.vlgmr.msra.gmra.mrb[0].mxu0 %vm580_vm3, %v576_v41 }
 0x11e   : >> { %1342 = vmatpush1.bf16.msk.msra.mxu1 %vm2048_vm7, %v1340_v54  ;;  %667 = vmatprep.mubr.f32.mxu0 %v2248_v50  ;;  %vm1350_vm7 = vmpackc.low %vm2253_vm5, %vm2252_vm4  ;;  %vm2259_vm4 = vcmp.eq.s32.totalorder %v1668_v13, %v1734_v24 }
 0x11f   : >> { %1367 = vmatprep.subr.bf16.mxu1 %v1586_v1  ;;  %1345 = vmatpush1.bf16.msk.msra.mxu0 %vm1344_vm8, %v1587_v47  ;;  %vm2254_vm8 = vcmp.eq.s32.totalorder %v1654_v10, %v1734_v24 }
 0x120   : >> { %1346 = vmatprep.subr.bf16.mxu0 %v1586_v1 }
 0x121   : >> { %1268 = vmatmul.mubr.msk.f32.vlgmr.msra.gmra.mrb[0].mxu1 %vm580_vm3, %v576_v41  ;;  %1260 = vmatmul.mubr.msk.f32.gmra.mrb[2].mxu0 %vm580_vm3, %v577_v51 }
 0x122   : >> { %866 = vmatprep.mubr.f32.mxu1 %v2248_v50  ;;  %673 = vmatprep.mubr.f32.mxu0 %v2248_v50 }
 0x123   : >> { %1369 = vmatpush1.bf16.msk.msra.mxu1 %vm1368_vm6, %v1587_v47  ;;  %1348 = vmatpush1.bf16.msk.msra.mxu0 %vm1347_vm10, %v1587_v47  ;;  %vm2255_vm6 = vcmp.eq.s32.totalorder %v1657_v11, %v1734_v24  ;;  %vm2256_vm10 = vcmp.eq.s32.totalorder %v1665_v12, %v1685_v19 }
 0x124   : >> { %1370 = vmatprep.subr.bf16.mxu1 %v1586_v1  ;;  %1349 = vmatprep.subr.bf16.mxu0 %v1586_v1  ;;  %vm1374_vm9 = vmpackc.low %vm2255_vm6, %vm2254_vm8  ;;  %vm2261_vm8 = vcmp.eq.s32.totalorder %v1674_v15, %v1685_v19 }
 0x125   : >> { %1269 = vmatmul.mubr.msk.f32.gmra.mrb[2].mxu1 %vm580_vm3, %v577_v51  ;;  %1261 = vmatmul.mubr.msk.f32.gmra.mrb[4].mxu0 %vm580_vm3, %v578_v46  ;;  %vm1353_vm14 = vmpackc.low %vm2257_vm13, %vm2256_vm10  ;;  %vm2263_vm10 = vcmp.eq.s32.totalorder %v1674_v15, %v1734_v24 }
 0x126   : >> { %872 = vmatprep.mubr.f32.mxu1 %v2248_v50  ;;  %679 = vmatprep.mubr.f32.mxu0 %v2248_v50 }
 0x127   : >> { %1372 = vmatpush1.bf16.msk.msra.mxu1 %vm1371_vm15, %v1587_v47  ;;  %1351 = vmatpush1.bf16.msk.msra.mxu0 %vm1350_vm7, %v1587_v47  ;;  %vm2258_vm15 = vcmp.eq.s32.totalorder %v1665_v12, %v1734_v24  ;;  %vm2260_vm7 = vcmp.eq.s32.totalorder %v1671_v14, %v1685_v19 }
 0x128   : >> { %1373 = vmatprep.subr.bf16.mxu1 %v1586_v1  ;;  %1352 = vmatprep.subr.bf16.mxu0 %v1586_v1  ;;  %vm1377_vm5 = vmpackc.low %vm2259_vm4, %vm2258_vm15  ;;  %vm2265_vm15 = vcmp.eq.s32.totalorder %v1680_v17, %v1685_v19  ;;  %vm2266_vm4 = vcmp.eq.s32.totalorder %v1677_v16, %v1734_v24 }
 0x129   : >> { %1270 = vmatmul.mubr.msk.f32.gmra.mrb[4].mxu1 %vm580_vm3, %v578_v46  ;;  %1262 = vmatmul.mubr.msk.f32.gmra.mrb[6].mxu0 %vm580_vm3, %v579_v40  ;;  %vm1356_vm6 = vmpackc.low %vm2261_vm8, %vm2260_vm7  ;;  %vm2268_vm8 = vcmp.eq.s32.totalorder %v1683_v18, %v1685_v19 }
 0x12a   : >> { %878 = vmatprep.mubr.f32.mxu1 %v2248_v50 }
 0x12b   : >> { %1375 = vmatpush1.bf16.msk.msra.mxu1 %vm1374_vm9, %v1587_v47  ;;  %1354 = vmatpush1.bf16.msk.msra.mxu0 %vm1353_vm14, %v1587_v47  ;;  %vm2262_vm9 = vcmp.eq.s32.totalorder %v1671_v14, %v1734_v24  ;;  %vm2264_vm14 = vcmp.eq.s32.totalorder %v1677_v16, %v1685_v19 }
 0x12c   : >> { %1376 = vmatprep.subr.bf16.mxu1 %v1586_v1  ;;  %1355 = vmatprep.subr.bf16.mxu0 %v1586_v1  ;;  %vm1380_vm13 = vmpackc.low %vm2263_vm10, %vm2262_vm9  ;;  %vm2270_vm10 = vcmp.eq.s32.totalorder %v1683_v18, %v1734_v24 }
 0x12d   : >> { %1271 = vmatmul.mubr.msk.f32.gmra.mrb[6].mxu1 %vm580_vm3, %v579_v40  ;;  %vm1359_vm3 = vmpackc.low %vm2265_vm15, %vm2264_vm14  ;;  %vm2273_vm15 = vcmp.eq.s32.totalorder %v2272_v45, %v1685_v19 }
 0x12f   : >> { %1378 = vmatpush1.bf16.msk.msra.mxu1 %vm1377_vm5, %v1587_v47  ;;  %1357 = vmatpush1.bf16.msk.msra.mxu0 %vm1356_vm6, %v1587_v47  ;;  %vm2267_vm5 = vcmp.eq.s32.totalorder %v1680_v17, %v1734_v24  ;;  %vm2269_vm6 = vcmp.eq.s32.totalorder %v1688_v20, %v1685_v19 }
 0x130   : >> { %1379 = vmatprep.subr.bf16.mxu1 %v1586_v1  ;;  %1358 = vmatprep.subr.bf16.mxu0 %v1586_v1  ;;  %vm1383_vm7 = vmpackc.low %vm2267_vm5, %vm2266_vm4  ;;  %vm2276_vm5 = vcmp.eq.s32.totalorder %v2272_v45, %v1734_v24  ;;  %v896_v6 = vpop.permute.xlu0 %895  ;;  %v901_v44 = vpop.permute.xlu1 %900 }
 0x131   : >> { %vm1362_vm9 = vmpackc.low %vm2269_vm6, %vm2268_vm8  ;;  %vm2279_vm6 = vcmp.eq.s32.totalorder %v2278_v39, %v1685_v19 }
 0x133   : >> { %1381 = vmatpush1.bf16.msk.msra.mxu1 %vm1380_vm13, %v1587_v47  ;;  %1360 = vmatpush1.bf16.msk.msra.mxu0 %vm1359_vm3, %v1587_v47  ;;  %vm2271_vm13 = vcmp.eq.s32.totalorder %v1688_v20, %v1734_v24  ;;  %vm2275_vm3 = vcmp.eq.s32.totalorder %v2274_v55, %v1685_v19 }
 0x134   : >> { %1382 = vmatprep.subr.bf16.mxu1 %v1586_v1  ;;  %1361 = vmatprep.subr.bf16.mxu0 %v1586_v1  ;;  %vm1386_vm14 = vmpackc.low %vm2271_vm13, %vm2270_vm10  ;;  %vm921_vm10 = vcmask 64512   ;;  %v906_v33 = vpop.permute.xlu1 %905  ;;  %v911_v21 = vpop.permute.xlu0 %910  ;;  %vm1114_vm13 = vcmask 556032  }
 0x135   : >> { %vm1365_vm4 = vmpackc.low %vm2275_vm3, %vm2273_vm15 }
 0x137   : >> { %1384 = vmatpush1.bf16.msk.msra.mxu1 %vm1383_vm7, %v1587_v47  ;;  %1363 = vmatpush1.bf16.msk.msra.mxu0 %vm1362_vm9, %v1587_v47  ;;  %vm2277_vm7 = vcmp.eq.s32.totalorder %v2274_v55, %v1734_v24  ;;  %vm2280_vm9 = vcmp.eq.s32.totalorder %v2278_v39, %v1734_v24 }
 0x138   : >> { %1385 = vmatprep.subr.bf16.mxu1 %v1586_v1  ;;  %1364 = vmatprep.subr.bf16.mxu0 %v1586_v1  ;;  %vm1389_vm8 = vmpackc.low %vm2277_vm7, %vm2276_vm5 }
 0x13b   : >> { %1387 = vmatpush1.bf16.msk.msra.mxu1 %vm1386_vm14, %v1587_v47  ;;  %1366 = vmatpush1.bf16.msk.msra.mxu0 %vm1365_vm4, %v1587_v47 }
 0x13c   : >> { %1388 = vmatprep.subr.bf16.mxu1 %v1586_v1  ;;  %966 = vmatprep.subr.mxu0 %v2248_v50 }
 0x13f   : >> { %1390 = vmatpush1.bf16.msk.msra.mxu1 %vm1389_vm8, %v1587_v47  ;;  %1288 = vmatpush1.msk.msra.mxu0 %vm2279_vm6, %v1588_v61 }
 0x140   : >> { %1051 = vmatprep.subr.mxu1 %v2248_v50 }
 0x143   : >> { %1309 = vmatpush1.msk.msra.mxu1 %vm2280_vm9, %v1588_v61 }
 0x1f0   : >> { %v663_v34 = vpop.f32.mrb[0].mxu0 }
 0x1f1   : >> { %v665_v32 = vpop.f32.mrb[1].mxu0 }
 0x1f4   : >> { %v862_v48 = vpop.f32.mrb[0].mxu1  ;;  %v669_v38 = vpop.f32.mrb[2].mxu0 }
 0x1f5   : >> { %v885_v56 = vmax.f32 %v663_v34, %v862_v48  ;;  %v864_v31 = vpop.f32.mrb[1].mxu1  ;;  %v671_v0 = vpop.f32.mrb[3].mxu0 }
 0x1f6   : >> { %v886_v58 = vmax.f32 %v665_v32, %v864_v31 }
 0x1f7   : >> { %v913_v37 = vadd.f32 %v896_v6, %v885_v56 }
 0x1f8   : >> { %v914_v27 = vadd.f32 %v896_v6, %v886_v58  ;;  %v868_v36 = vpop.f32.mrb[2].mxu1  ;;  %v675_v60 = vpop.f32.mrb[4].mxu0 }
 0x1f9   : >> { %v887_v26 = vmax.f32 %v669_v38, %v868_v36  ;;  %v870_v57 = vpop.f32.mrb[3].mxu1  ;;  %v677_v22 = vpop.f32.mrb[5].mxu0 }
 0x1fa   : >> { %v888_v23 = vmax.f32 %v671_v0, %v870_v57  ;;  %1289 = vmatprep.mubr.msk.f32.mxu0 %vm921_vm10, %v914_v27  ;;  %1310 = vmatprep.mubr.msk.f32.mxu1 %vm921_vm10, %v914_v27 }
 0x1fb   : >> { %999 = vmatmul.mubr.f32.vlgmr.msra.gmra.mrb[8].mxu0 %v913_v37  ;;  %1084 = vmatmul.mubr.f32.vlgmr.msra.gmra.mrb[8].mxu1 %v913_v37  ;;  %v915_v43 = vadd.f32 %v901_v44, %v887_v26 }
 0x1fc   : >> { %v916_v62 = vadd.f32 %v901_v44, %v888_v23  ;;  %v874_v30 = vpop.f32.mrb[4].mxu1  ;;  %v681_v52 = vpop.f32.mrb[6].mxu0 }
 0x1fd   : >> { %v889_v29 = vmax.f32 %v675_v60, %v874_v30  ;;  %v876_v53 = vpop.f32.mrb[5].mxu1  ;;  %v683_v63 = vpop.f32.mrb[7].mxu0 }
 0x1fe   : >> { %v890_v59 = vmax.f32 %v677_v22, %v876_v53  ;;  %1290 = vmatprep.mubr.msk.f32.mxu0 %vm921_vm10, %v916_v62  ;;  %1311 = vmatprep.mubr.msk.f32.mxu1 %vm921_vm10, %v916_v62 }
 0x1ff   : >> { %1004 = vmatmul.mubr.f32.gmra.mrb[10].mxu0 %v915_v43  ;;  %1089 = vmatmul.mubr.f32.gmra.mrb[10].mxu1 %v915_v43  ;;  %v917_v49 = vadd.f32 %v906_v33, %v889_v29 }
 0x200   : >> { %v918_v35 = vadd.f32 %v906_v33, %v890_v59  ;;  %v880_v42 = vpop.f32.mrb[6].mxu1 }
 0x201   : >> { %v891_v25 = vmax.f32 %v681_v52, %v880_v42  ;;  %v882_v41 = vpop.f32.mrb[7].mxu1 }
 0x202   : >> { %v892_v28 = vmax.f32 %v683_v63, %v882_v41  ;;  %1291 = vmatprep.mubr.msk.f32.mxu0 %vm921_vm10, %v918_v35  ;;  %1312 = vmatprep.mubr.msk.f32.mxu1 %vm921_vm10, %v918_v35 }
 0x203   : >> { %1009 = vmatmul.mubr.f32.gmra.mrb[12].mxu0 %v917_v49  ;;  %1094 = vmatmul.mubr.f32.gmra.mrb[12].mxu1 %v917_v49  ;;  %v919_v54 = vadd.f32 %v911_v21, %v891_v25 }
 0x204   : >> { %v920_v1 = vadd.f32 %v911_v21, %v892_v28 }
 0x206   : >> { %1292 = vmatprep.mubr.msk.f32.mxu0 %vm921_vm10, %v920_v1  ;;  %1313 = vmatprep.mubr.msk.f32.mxu1 %vm921_vm10, %v920_v1 }
 0x207   : >> { %1014 = vmatmul.mubr.f32.gmra.mrb[14].mxu0 %v919_v54  ;;  %1099 = vmatmul.mubr.f32.gmra.mrb[14].mxu1 %v919_v54 }
 0x2ce   : >> { %v1000_v50 = vpop.f32.mrb[8].mxu0  ;;  %v1085_v51 = vpop.f32.mrb[8].mxu1 }
 0x2cf   : >> { %v1104_v47 = vmax.f32 %v1000_v50, %v1085_v51  ;;  %v1002_v46 = vpop.f32.mrb[9].mxu0  ;;  %v1087_v40 = vpop.f32.mrb[9].mxu1 }
 0x2d1   : >> { %v1108_v61 = vmax.f32 %v1104_v47, 0.0 }
 0x2d2   : >> { %v1005_v34 = vpop.f32.mrb[10].mxu0  ;;  %v1090_v32 = vpop.f32.mrb[10].mxu1 }
 0x2d3   : >> { %1115 = vst.msk [vmem:[%s1113_s21] sm:$0xff] %vm1114_vm13, %v1108_v61  ;;  %v1105_v48 = vmax.f32 %v1005_v34, %v1090_v32  ;;  %v1007_v38 = vpop.f32.mrb[11].mxu0  ;;  %v1092_v56 = vpop.f32.mrb[11].mxu1 }
 0x2d5   : >> { %v1109_v31 = vmax.f32 %v1105_v48, 0.0 }
 0x2d6   : >> { %v1010_v0 = vpop.f32.mrb[12].mxu0  ;;  %v1095_v58 = vpop.f32.mrb[12].mxu1 }
 0x2d7   : >> { %1116 = vst.msk [vmem:[%s1113_s21 + $0x8] sm:$0xff] %vm1114_vm13, %v1109_v31  ;;  %v1106_v6 = vmax.f32 %v1010_v0, %v1095_v58  ;;  %v1012_v44 = vpop.f32.mrb[13].mxu0  ;;  %v1097_v27 = vpop.f32.mrb[13].mxu1 }
 0x2d9   : >> { %v1110_v36 = vmax.f32 %v1106_v6, 0.0  ;;  %300 = sbr.rel (!%p298_p4) target bundleno = 18 (0x12), region = 76 }
 0x2da   : >> { %v1015_v60 = vpop.f32.mrb[14].mxu0  ;;  %v1100_v37 = vpop.f32.mrb[14].mxu1 }
 0x2db   : >> { %1117 = vst.msk [vmem:[%s1113_s21 + $0x10] sm:$0xff] %vm1114_vm13, %v1110_v36  ;;  %v1107_v26 = vmax.f32 %v1015_v60, %v1100_v37  ;;  %v1017_v57 = vpop.f32.mrb[15].mxu0  ;;  %v1102_v22 = vpop.f32.mrb[15].mxu1 }
 0x2dd   : >> { %v1111_v23 = vmax.f32 %v1107_v26, 0.0 }
 0x2df   : >> { %1118 = vst.msk [vmem:[%s1113_s21 + $0x18] sm:$0xff] %vm1114_vm13, %v1111_v23 }
 0x2e0 PF: > { %s13_s12 = sadd.s32 1, %s1572_s12  }
 0x2e1   : > { %p10_p5 = scmp.ge.s32.totalorder %s13_s12, 4  }
 0x2e3   :  { %12 = sbr.rel (!%p10_p5) target bundleno = 1 (0x1), region = 87 }

// kernel: cnnet_forward.5
= control target key start
LH: loop header
LB: loop body
LE: loop exit
PB: predicated region body
PF: predicated region fallthrough
CT: control target
= control target key end

     0   :  { %s2527_s12 = smov 0   ;;  %s3158_s0 = inlined_call_operand.vmem [shape: f32[2,68,32,68], index: 0, kind: input, shape index: {}]   ;;  %s3159_s1 = inlined_call_operand.vmem [shape: f32[5,16,160], index: 1, kind: input, shape index: {}]   ;;  %s3160_s2 = inlined_call_operand.vmem [shape: f32[16,1], index: 2, kind: input, shape index: {}]   ;;  %s3161_s3 = inlined_call_operand.vmem [shape: f32[2,32,16,32], index: 3, kind: output, shape index: {}]  }
   0x1 LB: > { %s1674_s13 = sadd.s32 4294967295, %s2494_s12   ;;  %p1678_p0 = scmp.ge.s32.totalorder %s2494_s12, 1  ;;  %s2494_s12 = sphi %s2527_s12, %s13_s12  }
   0x2   : > { %p137_p1 = scmp.lt.s32.totalorder %s2494_s12, 3 }
   0x4   : > { %p138_p2 = pnand %p1678_p0, %p137_p1 }
   0x5   : > { %p161_p3 = scmp.lt.s32.totalorder (!%p138_p2), %s1674_s13, 1  ;;  %v171_v0 = vlaneseq (!%p138_p2)  ;;  %v2538_v1 = vld [vmem:[%s3160_s2] sm:$0xff] (!%p138_p2)  ;;  %v2543_v2 = vld [vmem:[%s3160_s2 + $0x8] sm:$0xff] (!%p138_p2)  ;;  %s2615_s26 = smov (!%p138_p2), 0  }
   0x6   : > { %141 = sbr.rel (%p138_p2) target bundleno = 774 (0x306), region = 32 }
   0x7   : > { %v2545_v3 = vshrl.u32 (!%p138_p2), %v171_v0, 7  ;;  %v181_v4 = vand.u32 (!%p138_p2), 127, %v171_v0 }
   0x9   : > { %v2548_v5 = vadd.s32 (!%p138_p2), 8, %v2545_v3  ;;  %v2551_v6 = vadd.s32 (!%p138_p2), 16, %v2545_v3  ;;  %v2554_v7 = vadd.s32 (!%p138_p2), 24, %v2545_v3  ;;  %v2557_v8 = vadd.s32 (!%p138_p2), 32, %v2545_v3 }
   0xa   : > { %v2565_v9 = vadd.s32 (!%p138_p2), 40, %v2545_v3  ;;  %v2568_v10 = vadd.s32 (!%p138_p2), 48, %v2545_v3  ;;  %v2571_v11 = vadd.s32 (!%p138_p2), 56, %v2545_v3  ;;  %v2573_v12 = vmul.u32 (!%p138_p2), 2, %v181_v4 }
   0xc   : > { %vm188_vm5 = vcmp.eq.s32.totalorder (!%p138_p2), %v2565_v9, %v2573_v12  ;;  %vm189_vm6 = vcmp.eq.s32.totalorder (!%p138_p2), %v2568_v10, %v2573_v12  ;;  %vm190_vm7 = vcmp.eq.s32.totalorder (!%p138_p2), %v2571_v11, %v2573_v12  ;;  %v2597_v13 = vadd.s32 (!%p138_p2), 1, %v2573_v12 }
   0xd   : > { %s3170_s13 = smov (!%p161_p3, %s1674_s13), 1 }
   0xe   : > { %s2218_s18 = smul.u32 2176, %s3170_s13  ;;  %s1789_s19 = sshll.u32 %s3170_s13, 9  ;;  %vm208_vm8 = vcmp.eq.s32.totalorder %v2545_v3, %v2597_v13  ;;  %vm209_vm9 = vcmp.eq.s32.totalorder %v2548_v5, %v2597_v13  ;;  %vm210_vm10 = vcmp.eq.s32.totalorder %v2551_v6, %v2597_v13  ;;  %vm211_vm11 = vcmp.eq.s32.totalorder %v2554_v7, %v2597_v13 }
   0xf   : > { %s2562_s22 = scalar_lea.vmem %s3161_s3, %s1789_s19  ;;  %vm212_vm12 = vcmp.eq.s32.totalorder %v2557_v8, %v2597_v13  ;;  %vm213_vm13 = vcmp.eq.s32.totalorder %v2565_v9, %v2597_v13 }
  0x10   : > { %s2578_s25 = scalar_lea.vmem %s3158_s0, %s2218_s18 }
  0x11 LB: >> { %v2500_v14 = vmov 0.0|0.0   ;;  %s1790_s27 = sshll.u32 %s2498_s26, 6  ;;  %s2501_s29 = smov 127   ;;  %v1707_v31 = vld [vmem:[%s3159_s1 + $0x28] sm:$0xff]  ;;  %vm367_vm15 = vcmask 261120   ;;  %vm3162_vm0 = vcmp.eq.s32.totalorder %v2545_v3, %v2573_v12  ;;  %vm3163_vm1 = vcmp.eq.s32.totalorder %v2548_v5, %v2573_v12  ;;  %s2498_s26 = sphi %s2615_s26, %s239_s26  }
  0x12   : >> { %1854 = vmatprep.subr.bf16.mxu0 %v2500_v14  ;;  %2004 = vmatprep.subr.bf16.mxu1 %v2500_v14  ;;  %s2624_s28 = scalar_lea.vmem %s2578_s25, %s1790_s27  ;;  %s2502_s30 = smov 126   ;;  %vm2154_vm14 = vmpackc.low %vm3163_vm1, %vm3162_vm0  ;;  %vm3164_vm2 = vcmp.eq.s32.totalorder %v2551_v6, %v2573_v12  ;;  %vm3165_vm3 = vcmp.eq.s32.totalorder %v2554_v7, %v2573_v12  ;;  %vm3166_vm4 = vcmp.eq.s32.totalorder %v2557_v8, %v2573_v12 }
  0x13   : >> { %v1702_v15 = vld [vmem:[%s2624_s28 + $0x20] sm:$0xff]  ;;  %v1703_v16 = vld [vmem:[%s2624_s28 + $0x28] sm:$0xff]  ;;  %v1704_v17 = vld [vmem:[%s2624_s28 + $0x30] sm:$0xff]  ;;  %s2503_s4 = smov 125   ;;  %1710 = vmatprep.mubr.msk.f32.mxu0 %vm367_vm15, %v1707_v31  ;;  %1750 = vmatprep.mubr.msk.f32.mxu1 %vm367_vm15, %v1707_v31  ;;  %s2504_s7 = smov 124  }
  0x14   : >> { %v2242_v18 = vpack.i.bf16 %v1703_v16, %v1702_v15  ;;  %v1705_v19 = vld [vmem:[%s2624_s28 + $0x38] sm:$0xff]  ;;  %v1716_v20 = vld [vmem:[%s2624_s28 + $0x40] sm:$0xff]  ;;  %v1717_v21 = vld [vmem:[%s2624_s28 + $0x48] sm:$0xff]  ;;  %v2638_v27 = vpack.c.bf16 %v1703_v16, %v1702_v15  ;;  %s1786_s27 = sshll.u32 %s2498_s26, 4  ;;  %s239_s26 = sadd.s32 1, %s2498_s26  }
  0x15   : >> { %v2252_v22 = vpack.i.bf16 %v1705_v19, %v1704_v17  ;;  %v1718_v23 = vld [vmem:[%s2624_s28 + $0x50] sm:$0xff]  ;;  %v1719_v24 = vld [vmem:[%s2624_s28 + $0x58] sm:$0xff]  ;;  %v2247_v25 = vpack.i.bf16 %v1717_v21, %v1716_v20  ;;  %v2640_v28 = vpack.c.bf16 %v1717_v21, %v1716_v20  ;;  %v2643_v29 = vpack.c.bf16 %v1705_v19, %v1704_v17  ;;  %v2665_v32 = vld [vmem:[%s2624_s28] sm:$0xff]  ;;  %p236_p4 = scmp.ge.s32.totalorder %s239_s26, 32  }
  0x16   : >> { %2243 = vrot.lane.b32.xlu0 %v2242_v18, %s2501_s29  ;;  %v2257_v26 = vpack.i.bf16 %v1719_v24, %v1718_v23  ;;  %1856 = vmatpush1.bf16.msra.mxu0 %v2638_v27  ;;  %v2649_v30 = vpack.c.bf16 %v1719_v24, %v1718_v23  ;;  %v2668_v33 = vld [vmem:[%s2624_s28 + $0x8] sm:$0xff]  ;;  %v2676_v35 = vld [vmem:[%s2624_s28 + $0x10] sm:$0xff]  ;;  %v2679_v36 = vld [vmem:[%s2624_s28 + $0x18] sm:$0xff] }
  0x17   : >> { %2253 = vrot.lane.b32.xlu1 %v2252_v22, %s2501_s29  ;;  %1857 = vmatprep.subr.bf16.mxu0 %v2500_v14  ;;  %v1885_v34 = vpack.c.bf16 %v2668_v33, %v2665_v32  ;;  %v1888_v37 = vpack.c.bf16 %v2679_v36, %v2676_v35  ;;  %v2322_v38 = vpack.i.bf16 %v2668_v33, %v2665_v32  ;;  %v1728_v40 = vld [vmem:[%s2624_s28 + $0x60] sm:$0xff]  ;;  %v1729_v41 = vld [vmem:[%s2624_s28 + $0x68] sm:$0xff]  ;;  %v2700_v42 = vld [vmem:[%s2624_s28 + $0x70] sm:$0xff] }
  0x18   : >> { %2006 = vmatpush1.bf16.msra.mxu1 %v2640_v28  ;;  %v2327_v39 = vpack.i.bf16 %v2679_v36, %v2676_v35  ;;  %v2703_v43 = vld [vmem:[%s2624_s28 + $0x78] sm:$0xff]  ;;  %v2362_v44 = vpack.i.bf16 %v1729_v41, %v1728_v40  ;;  %v2716_v46 = vld [vmem:[%s2624_s28 + $0x80] sm:$0xff]  ;;  %v2719_v47 = vld [vmem:[%s2624_s28 + $0x88] sm:$0xff]  ;;  %v2735_v52 = vpack.c.bf16 %v1729_v41, %v1728_v40 }
  0x19   : >> { %2007 = vmatprep.subr.bf16.mxu1 %v2500_v14  ;;  %v2367_v45 = vpack.i.bf16 %v2703_v43, %v2700_v42  ;;  %v2722_v48 = vld [vmem:[%s2624_s28 + $0x90] sm:$0xff]  ;;  %v2725_v49 = vld [vmem:[%s2624_s28 + $0x98] sm:$0xff]  ;;  %v2402_v50 = vpack.i.bf16 %v2719_v47, %v2716_v46  ;;  %v2742_v53 = vld [vmem:[%s2624_s28 + $0xa0] sm:$0xff] }
  0x1a   : >> { %2248 = vrot.lane.b32.xlu0 %v2247_v25, %s2501_s29  ;;  %1859 = vmatpush1.bf16.msra.mxu0 %v2643_v29  ;;  %v2407_v51 = vpack.i.bf16 %v2725_v49, %v2722_v48  ;;  %v2745_v54 = vld [vmem:[%s2624_s28 + $0xa8] sm:$0xff]  ;;  %v2748_v55 = vld [vmem:[%s2624_s28 + $0xb0] sm:$0xff]  ;;  %v2751_v56 = vld [vmem:[%s2624_s28 + $0xb8] sm:$0xff]  ;;  %s1587_s28 = scalar_lea.vmem %s2562_s22, %s1786_s27 }
  0x1b   : >> { %2258 = vrot.lane.b32.xlu1 %v2257_v26, %s2501_s29  ;;  %1860 = vmatprep.subr.bf16.mxu0 %v2500_v14  ;;  %v2442_v57 = vpack.i.bf16 %v2745_v54, %v2742_v53  ;;  %v2447_v58 = vpack.i.bf16 %v2751_v56, %v2748_v55  ;;  %v300_v32 = vld [vmem:[%s3159_s1 + $0x8] sm:$0xff]  ;;  %vm2170_vm0 = vmpackc.low %vm209_vm9, %vm208_vm8 }
  0x1c   : >> { %2009 = vmatpush1.bf16.msra.mxu1 %v2649_v30  ;;  %vm2158_vm1 = vmpackc.low %vm3165_vm3, %vm3164_vm2  ;;  %vm3168_vm3 = vcmp.eq.s32.totalorder %v2571_v11, %v2597_v13 }
  0x1d   : >> { %2010 = vmatprep.subr.bf16.mxu1 %v2500_v14  ;;  %vm2178_vm2 = vmpackc.low %vm213_vm13, %vm212_vm12 }
  0x1e   : >> { %2263 = vrot.lane.b32.xlu0 %v2242_v18, %s2502_s30 }
  0x1f   : >> { %2268 = vrot.lane.b32.xlu1 %v2247_v25, %s2502_s30 }
  0x22   : >> { %2273 = vrot.lane.b32.xlu0 %v2252_v22, %s2502_s30 }
  0x23   : >> { %2278 = vrot.lane.b32.xlu1 %v2257_v26, %s2502_s30 }
  0x26   : >> { %2283 = vrot.lane.b32.xlu0 %v2242_v18, %s2503_s4 }
  0x27   : >> { %2288 = vrot.lane.b32.xlu1 %v2247_v25, %s2503_s4 }
  0x2a   : >> { %2293 = vrot.lane.b32.xlu0 %v2252_v22, %s2503_s4 }
  0x2b   : >> { %2298 = vrot.lane.b32.xlu1 %v2257_v26, %s2503_s4 }
  0x2e   : >> { %2303 = vrot.lane.b32.xlu0 %v2242_v18, %s2504_s7 }
  0x2f   : >> { %2308 = vrot.lane.b32.xlu1 %v2247_v25, %s2504_s7 }
  0x32   : >> { %2313 = vrot.lane.b32.xlu0 %v2252_v22, %s2504_s7 }
  0x33   : >> { %2318 = vrot.lane.b32.xlu1 %v2257_v26, %s2504_s7 }
  0x36   : >> { %2323 = vrot.lane.b32.xlu0 %v2322_v38, %s2501_s29 }
  0x37   : >> { %2328 = vrot.lane.b32.xlu1 %v2327_v39, %s2501_s29 }
  0x3a   : >> { %2333 = vrot.lane.b32.xlu0 %v2322_v38, %s2502_s30 }
  0x3b   : >> { %2338 = vrot.lane.b32.xlu1 %v2327_v39, %s2502_s30 }
  0x3e   : >> { %2343 = vrot.lane.b32.xlu0 %v2322_v38, %s2503_s4 }
  0x3f   : >> { %2348 = vrot.lane.b32.xlu1 %v2327_v39, %s2503_s4 }
  0x42   : >> { %2353 = vrot.lane.b32.xlu0 %v2322_v38, %s2504_s7 }
  0x43   : >> { %2358 = vrot.lane.b32.xlu1 %v2327_v39, %s2504_s7 }
  0x46   : >> { %2363 = vrot.lane.b32.xlu0 %v2362_v44, %s2501_s29 }
  0x47   : >> { %2368 = vrot.lane.b32.xlu1 %v2367_v45, %s2501_s29 }
  0x4a   : >> { %2373 = vrot.lane.b32.xlu0 %v2362_v44, %s2502_s30 }
  0x4b   : >> { %2378 = vrot.lane.b32.xlu1 %v2367_v45, %s2502_s30 }
  0x4e   : >> { %2383 = vrot.lane.b32.xlu0 %v2362_v44, %s2503_s4 }
  0x4f   : >> { %2388 = vrot.lane.b32.xlu1 %v2367_v45, %s2503_s4 }
  0x52   : >> { %2393 = vrot.lane.b32.xlu0 %v2362_v44, %s2504_s7 }
  0x53   : >> { %2398 = vrot.lane.b32.xlu1 %v2367_v45, %s2504_s7 }
  0x56   : >> { %2403 = vrot.lane.b32.xlu0 %v2402_v50, %s2501_s29 }
  0x57   : >> { %2408 = vrot.lane.b32.xlu1 %v2407_v51, %s2501_s29 }
  0x5a   : >> { %2413 = vrot.lane.b32.xlu0 %v2402_v50, %s2502_s30 }
  0x5b   : >> { %2418 = vrot.lane.b32.xlu1 %v2407_v51, %s2502_s30 }
  0x5e   : >> { %2423 = vrot.lane.b32.xlu0 %v2402_v50, %s2503_s4 }
  0x5f   : >> { %2428 = vrot.lane.b32.xlu1 %v2407_v51, %s2503_s4 }
  0x62   : >> { %2433 = vrot.lane.b32.xlu0 %v2402_v50, %s2504_s7 }
  0x63   : >> { %2438 = vrot.lane.b32.xlu1 %v2407_v51, %s2504_s7 }
  0x66   : >> { %2443 = vrot.lane.b32.xlu0 %v2442_v57, %s2501_s29 }
  0x67   : >> { %2448 = vrot.lane.b32.xlu1 %v2447_v58, %s2501_s29 }
  0x6a   : >> { %2453 = vrot.lane.b32.xlu0 %v2442_v57, %s2502_s30 }
  0x6b   : >> { %2458 = vrot.lane.b32.xlu1 %v2447_v58, %s2502_s30 }
  0x6e   : >> { %2463 = vrot.lane.b32.xlu0 %v2442_v57, %s2503_s4 }
  0x6f   : >> { %2468 = vrot.lane.b32.xlu1 %v2447_v58, %s2503_s4 }
  0x72   : >> { %2473 = vrot.lane.b32.xlu0 %v2442_v57, %s2504_s7 }
  0x73   : >> { %2478 = vrot.lane.b32.xlu1 %v2447_v58, %s2504_s7 }
  0x88   : >> { %v2244_v59 = vpop.permute.xlu0 %2243 }
  0x89   : >> { %v2246_v60 = vunpack.i.h.bf16 %v2244_v59  ;;  %v2245_v61 = vunpack.i.l.bf16 %v2244_v59  ;;  %v2254_v62 = vpop.permute.xlu1 %2253 }
  0x8a   : >> { %v2256_v63 = vunpack.i.h.bf16 %v2254_v62  ;;  %v2255_v0 = vunpack.i.l.bf16 %v2254_v62 }
  0x8b   : >> { %v2767_v4 = vpack.c.bf16 %v2246_v60, %v2245_v61 }
  0x8c   : >> { %v2249_v15 = vpop.permute.xlu0 %2248  ;;  %v2769_v16 = vpack.c.bf16 %v2256_v63, %v2255_v0 }
  0x8d   : >> { %v2251_v17 = vunpack.i.h.bf16 %v2249_v15  ;;  %v2250_v18 = vunpack.i.l.bf16 %v2249_v15  ;;  %1862 = vmatpush1.bf16.msra.mxu0 %v2767_v4  ;;  %v2259_v19 = vpop.permute.xlu1 %2258 }
  0x8e   : >> { %v2261_v20 = vunpack.i.h.bf16 %v2259_v19  ;;  %v2260_v21 = vunpack.i.l.bf16 %v2259_v19  ;;  %1863 = vmatprep.subr.bf16.mxu0 %v2500_v14 }
  0x8f   : >> { %v2773_v22 = vpack.c.bf16 %v2251_v17, %v2250_v18 }
  0x90   : >> { %v2264_v23 = vpop.permute.xlu0 %2263  ;;  %v2775_v24 = vpack.c.bf16 %v2261_v20, %v2260_v21 }
  0x91   : >> { %v2266_v25 = vunpack.i.h.bf16 %v2264_v23  ;;  %v2265_v26 = vunpack.i.l.bf16 %v2264_v23  ;;  %1865 = vmatpush1.bf16.msra.mxu0 %v2769_v16  ;;  %2012 = vmatpush1.bf16.msra.mxu1 %v2773_v22  ;;  %v2269_v31 = vpop.permute.xlu1 %2268 }
  0x92   : >> { %v2271_v38 = vunpack.i.h.bf16 %v2269_v31  ;;  %v2270_v39 = vunpack.i.l.bf16 %v2269_v31  ;;  %1866 = vmatprep.subr.bf16.mxu0 %v2500_v14  ;;  %2013 = vmatprep.subr.bf16.mxu1 %v2500_v14 }
  0x93   : >> { %v2781_v40 = vpack.c.bf16 %v2266_v25, %v2265_v26 }
  0x94   : >> { %v2274_v41 = vpop.permute.xlu0 %2273  ;;  %v2783_v44 = vpack.c.bf16 %v2271_v38, %v2270_v39 }
  0x95   : >> { %v2276_v45 = vunpack.i.h.bf16 %v2274_v41  ;;  %v2275_v50 = vunpack.i.l.bf16 %v2274_v41  ;;  %1868 = vmatpush1.bf16.msra.mxu0 %v2781_v40  ;;  %2015 = vmatpush1.bf16.msra.mxu1 %v2775_v24  ;;  %v2279_v51 = vpop.permute.xlu1 %2278 }
  0x96   : >> { %v2281_v57 = vunpack.i.h.bf16 %v2279_v51  ;;  %v2280_v58 = vunpack.i.l.bf16 %v2279_v51  ;;  %1869 = vmatprep.subr.bf16.mxu0 %v2500_v14  ;;  %2016 = vmatprep.subr.bf16.mxu1 %v2500_v14 }
  0x97   : >> { %v2789_v59 = vpack.c.bf16 %v2276_v45, %v2275_v50 }
  0x98   : >> { %v2284_v60 = vpop.permute.xlu0 %2283  ;;  %v2791_v61 = vpack.c.bf16 %v2281_v57, %v2280_v58 }
  0x99   : >> { %v2286_v62 = vunpack.i.h.bf16 %v2284_v60  ;;  %v2285_v63 = vunpack.i.l.bf16 %v2284_v60  ;;  %1871 = vmatpush1.bf16.msra.mxu0 %v2789_v59  ;;  %2018 = vmatpush1.bf16.msra.mxu1 %v2783_v44  ;;  %v2289_v0 = vpop.permute.xlu1 %2288 }
  0x9a   : >> { %v2291_v15 = vunpack.i.h.bf16 %v2289_v0  ;;  %v2290_v17 = vunpack.i.l.bf16 %v2289_v0  ;;  %1872 = vmatprep.subr.bf16.mxu0 %v2500_v14  ;;  %2019 = vmatprep.subr.bf16.mxu1 %v2500_v14 }
  0x9b   : >> { %v2797_v18 = vpack.c.bf16 %v2286_v62, %v2285_v63 }
  0x9c   : >> { %v2294_v19 = vpop.permute.xlu0 %2293  ;;  %v2799_v20 = vpack.c.bf16 %v2291_v15, %v2290_v17 }
  0x9d   : >> { %v2296_v21 = vunpack.i.h.bf16 %v2294_v19  ;;  %v2295_v23 = vunpack.i.l.bf16 %v2294_v19  ;;  %1874 = vmatpush1.bf16.msra.mxu0 %v2797_v18  ;;  %2021 = vmatpush1.bf16.msra.mxu1 %v2791_v61  ;;  %v2299_v25 = vpop.permute.xlu1 %2298 }
  0x9e   : >> { %v2301_v26 = vunpack.i.h.bf16 %v2299_v25  ;;  %v2300_v31 = vunpack.i.l.bf16 %v2299_v25  ;;  %1875 = vmatprep.subr.bf16.mxu0 %v2500_v14  ;;  %2022 = vmatprep.subr.bf16.mxu1 %v2500_v14 }
  0x9f   : >> { %v2805_v38 = vpack.c.bf16 %v2296_v21, %v2295_v23 }
  0xa0   : >> { %v2304_v39 = vpop.permute.xlu0 %2303  ;;  %v2807_v41 = vpack.c.bf16 %v2301_v26, %v2300_v31  ;;  %v1706_v26 = vld [vmem:[%s3159_s1 + $0x20] sm:$0xff] }
  0xa1   : >> { %v2306_v45 = vunpack.i.h.bf16 %v2304_v39  ;;  %v2305_v50 = vunpack.i.l.bf16 %v2304_v39  ;;  %1877 = vmatpush1.bf16.msra.mxu0 %v2805_v38  ;;  %2024 = vmatpush1.bf16.msra.mxu1 %v2799_v20  ;;  %v2309_v51 = vpop.permute.xlu1 %2308  ;;  %v1709_v39 = vld [vmem:[%s3159_s1 + $0x38] sm:$0xff] }
  0xa2   : >> { %v2311_v57 = vunpack.i.h.bf16 %v2309_v51  ;;  %v2310_v58 = vunpack.i.l.bf16 %v2309_v51  ;;  %1878 = vmatprep.subr.bf16.mxu0 %v2500_v14  ;;  %2025 = vmatprep.subr.bf16.mxu1 %v2500_v14  ;;  %v1708_v51 = vld [vmem:[%s3159_s1 + $0x30] sm:$0xff] }
  0xa3   : >> { %v2813_v60 = vpack.c.bf16 %v2306_v45, %v2305_v50 }
  0xa4   : >> { %v2314_v62 = vpop.permute.xlu0 %2313  ;;  %v2815_v63 = vpack.c.bf16 %v2311_v57, %v2310_v58 }
  0xa5   : >> { %v2316_v0 = vunpack.i.h.bf16 %v2314_v62  ;;  %v2315_v15 = vunpack.i.l.bf16 %v2314_v62  ;;  %1880 = vmatpush1.bf16.msra.mxu0 %v2813_v60  ;;  %2027 = vmatpush1.bf16.msra.mxu1 %v2807_v41  ;;  %v2319_v17 = vpop.permute.xlu1 %2318 }
  0xa6   : >> { %v2321_v19 = vunpack.i.h.bf16 %v2319_v17  ;;  %v2320_v21 = vunpack.i.l.bf16 %v2319_v17  ;;  %1881 = vmatprep.subr.bf16.mxu0 %v2500_v14  ;;  %2028 = vmatprep.subr.bf16.mxu1 %v2500_v14 }
  0xa7   : >> { %v2821_v23 = vpack.c.bf16 %v2316_v0, %v2315_v15 }
  0xa8   : >> { %v2823_v25 = vpack.c.bf16 %v2321_v19, %v2320_v21  ;;  %v2324_v31 = vpop.permute.xlu0 %2323 }
  0xa9   : >> { %1883 = vmatpush1.bf16.msra.mxu0 %v2821_v23  ;;  %2030 = vmatpush1.bf16.msra.mxu1 %v2815_v63  ;;  %v2326_v45 = vunpack.i.h.bf16 %v2324_v31  ;;  %v2325_v50 = vunpack.i.l.bf16 %v2324_v31  ;;  %v2329_v57 = vpop.permute.xlu1 %2328 }
  0xaa   : >> { %1884 = vmatprep.subr.bf16.mxu0 %v2500_v14  ;;  %2031 = vmatprep.subr.bf16.mxu1 %v2500_v14  ;;  %v2330_v58 = vunpack.i.l.bf16 %v2329_v57 }
  0xab   : >> { %v1891_v33 = vpack.c.bf16 %v2326_v45, %v2325_v50 }
  0xac   : >> { %439 = vmatmul.mubr.f32.vlgmr.msra.gmra.mrb[0].mxu0 %v1706_v26  ;;  %v2334_v62 = vpop.permute.xlu0 %2333 }
  0xad   : >> { %1886 = vmatpush1.bf16.msra.mxu0 %v1885_v34  ;;  %2033 = vmatpush1.bf16.msra.mxu1 %v2823_v25  ;;  %v2331_v34 = vunpack.i.h.bf16 %v2329_v57  ;;  %v2336_v35 = vunpack.i.h.bf16 %v2334_v62  ;;  %v2335_v36 = vunpack.i.l.bf16 %v2334_v62  ;;  %v2505_v62 = vmov 0  }
  0xae   : >> { %2034 = vmatprep.subr.bf16.mxu1 %v2500_v14  ;;  %1887 = vmatprep.subr.bf16.mxu0 %v2500_v14 }
  0xaf   : >> { %1711 = vmatprep.mubr.msk.f32.mxu0 %vm367_vm15, %v1709_v39  ;;  %v1894_v0 = vpack.c.bf16 %v2331_v34, %v2330_v58  ;;  %2482 = vset.pattern.permute.xlu0 %v2505_v62 }
  0xb0   : >> { %1036 = vmatmul.mubr.f32.vlgmr.msra.gmra.mrb[0].mxu1 %v1706_v26  ;;  %444 = vmatmul.mubr.f32.gmra.mrb[2].mxu0 %v1708_v51 }
  0xb1   : >> { %1889 = vmatpush1.bf16.msra.mxu0 %v1888_v37  ;;  %2036 = vmatpush1.bf16.msra.mxu1 %v2638_v27  ;;  %v2339_v27 = vpop.permute.xlu1 %2338  ;;  %v1897_v37 = vpack.c.bf16 %v2336_v35, %v2335_v36  ;;  %v2902_v35 = vpack.c.bf16 %v2703_v43, %v2700_v42 }
  0xb2   : >> { %2037 = vmatprep.subr.bf16.mxu1 %v2500_v14  ;;  %1890 = vmatprep.subr.bf16.mxu0 %v2500_v14  ;;  %v2341_v15 = vunpack.i.h.bf16 %v2339_v27  ;;  %v2340_v17 = vunpack.i.l.bf16 %v2339_v27 }
  0xb3   : >> { %1712 = vmatprep.mubr.msk.f32.mxu0 %vm367_vm15, %v300_v32  ;;  %1751 = vmatprep.mubr.msk.f32.mxu1 %vm367_vm15, %v1709_v39 }
  0xb4   : >> { %1041 = vmatmul.mubr.f32.gmra.mrb[2].mxu1 %v1708_v51  ;;  %v1900_v19 = vpack.c.bf16 %v2341_v15, %v2340_v17  ;;  %1415 = vperm.xlu0 %2482, %v2538_v1  }
  0xb5   : >> { %1892 = vmatpush1.bf16.msra.mxu0 %v1891_v33  ;;  %2039 = vmatpush1.bf16.msra.mxu1 %v2643_v29  ;;  %v2344_v29 = vpop.permute.xlu0 %2343  ;;  %v2349_v31 = vpop.permute.xlu1 %2348 }
  0xb6   : >> { %2040 = vmatprep.subr.bf16.mxu1 %v2500_v14  ;;  %1893 = vmatprep.subr.bf16.mxu0 %v2500_v14  ;;  %v2346_v21 = vunpack.i.h.bf16 %v2344_v29  ;;  %v2345_v26 = vunpack.i.l.bf16 %v2344_v29  ;;  %v2350_v45 = vunpack.i.l.bf16 %v2349_v31 }
  0xb7   : >> { %1752 = vmatprep.mubr.msk.f32.mxu1 %vm367_vm15, %v300_v32  ;;  %2483 = vset.pattern.permute.xlu1 %v2505_v62 }
  0xb8   : >> { %v1903_v39 = vpack.c.bf16 %v2346_v21, %v2345_v26  ;;  %1420 = vperm.xlu1 %2483, %v2543_v2  }
  0xb9   : >> { %1895 = vmatpush1.bf16.msra.mxu0 %v1894_v0  ;;  %2042 = vmatpush1.bf16.msra.mxu1 %v2767_v4  ;;  %v2351_v4 = vunpack.i.h.bf16 %v2349_v31  ;;  %v2354_v50 = vpop.permute.xlu0 %2353  ;;  %v2359_v32 = vpop.permute.xlu1 %2358 }
  0xba   : >> { %2043 = vmatprep.subr.bf16.mxu1 %v2500_v14  ;;  %1896 = vmatprep.subr.bf16.mxu0 %v2500_v14  ;;  %v2355_v57 = vunpack.i.l.bf16 %v2354_v50  ;;  %v2360_v34 = vunpack.i.l.bf16 %v2359_v32 }
  0xbb   : >> { %v1906_v51 = vpack.c.bf16 %v2351_v4, %v2350_v45 }
  0xbd   : >> { %1898 = vmatpush1.bf16.msra.mxu0 %v1897_v37  ;;  %2045 = vmatpush1.bf16.msra.mxu1 %v2769_v16  ;;  %v2356_v16 = vunpack.i.h.bf16 %v2354_v50  ;;  %v2369_v36 = vpop.permute.xlu1 %2368 }
  0xbe   : >> { %2046 = vmatprep.subr.bf16.mxu1 %v2500_v14  ;;  %1899 = vmatprep.subr.bf16.mxu0 %v2500_v14  ;;  %v2371_v42 = vunpack.i.h.bf16 %v2369_v36  ;;  %v2370_v43 = vunpack.i.l.bf16 %v2369_v36 }
  0xbf   : >> { %v1909_v33 = vpack.c.bf16 %v2356_v16, %v2355_v57 }
  0xc0   : >> { %v2917_v37 = vpack.c.bf16 %v2371_v42, %v2370_v43 }
  0xc1   : >> { %1901 = vmatpush1.bf16.msra.mxu0 %v1900_v19  ;;  %2048 = vmatpush1.bf16.msra.mxu1 %v2781_v40  ;;  %v2361_v40 = vunpack.i.h.bf16 %v2359_v32  ;;  %v2379_v17 = vpop.permute.xlu1 %2378 }
  0xc2   : >> { %2049 = vmatprep.subr.bf16.mxu1 %v2500_v14  ;;  %1902 = vmatprep.subr.bf16.mxu0 %v2500_v14  ;;  %v2381_v19 = vunpack.i.h.bf16 %v2379_v17  ;;  %v2380_v21 = vunpack.i.l.bf16 %v2379_v17 }
  0xc3   : >> { %v1912_v58 = vpack.c.bf16 %v2361_v40, %v2360_v34  ;;  %v1720_v34 = vld [vmem:[%s3159_s1 + $0x40] sm:$0xff] }
  0xc4   : >> { %v2929_v26 = vpack.c.bf16 %v2381_v19, %v2380_v21 }
  0xc5   : >> { %1904 = vmatpush1.bf16.msra.mxu0 %v1903_v39  ;;  %2051 = vmatpush1.bf16.msra.mxu1 %v2789_v59  ;;  %v299_v59 = vld [vmem:[%s3159_s1] sm:$0xff] }
  0xc6   : >> { %2052 = vmatprep.subr.bf16.mxu1 %v2500_v14  ;;  %1905 = vmatprep.subr.bf16.mxu0 %v2500_v14 }
  0xc9   : >> { %1907 = vmatpush1.bf16.msra.mxu0 %v1906_v51  ;;  %2054 = vmatpush1.bf16.msra.mxu1 %v2797_v18  ;;  %v302_v18 = vld [vmem:[%s3159_s1 + $0x18] sm:$0xff] }
  0xca   : >> { %2055 = vmatprep.subr.bf16.mxu1 %v2500_v14  ;;  %1908 = vmatprep.subr.bf16.mxu0 %v2500_v14 }
  0xcd   : >> { %1910 = vmatpush1.bf16.msra.mxu0 %v1909_v33  ;;  %2057 = vmatpush1.bf16.msra.mxu1 %v2805_v38  ;;  %v301_v38 = vld [vmem:[%s3159_s1 + $0x10] sm:$0xff] }
  0xce   : >> { %1911 = vmatprep.subr.bf16.mxu0 %v2500_v14  ;;  %2058 = vmatprep.subr.bf16.mxu1 %v2500_v14 }
  0xd1   : >> { %1913 = vmatpush1.bf16.msra.mxu0 %v1912_v58  ;;  %2060 = vmatpush1.bf16.msra.mxu1 %v2813_v60  ;;  %v2364_v60 = vpop.permute.xlu0 %2363  ;;  %v1722_v58 = vld [vmem:[%s3159_s1 + $0x50] sm:$0xff] }
  0xd2   : >> { %1914 = vmatprep.subr.bf16.mxu0 %v2500_v14  ;;  %2061 = vmatprep.subr.bf16.mxu1 %v2500_v14  ;;  %v2365_v0 = vunpack.i.l.bf16 %v2364_v60 }
  0xd4   : >> { %520 = vmatmul.mubr.f32.vlgmr.msra.gmra.mrb[0].mxu0 %v299_v59 }
  0xd5   : >> { %1916 = vmatpush1.bf16.msra.mxu0 %v2640_v28  ;;  %2063 = vmatpush1.bf16.msra.mxu1 %v2821_v23  ;;  %v1721_v28 = vld [vmem:[%s3159_s1 + $0x48] sm:$0xff]  ;;  %v2366_v23 = vunpack.i.h.bf16 %v2364_v60  ;;  %v2374_v27 = vpop.permute.xlu0 %2373 }
  0xd6   : >> { %1917 = vmatprep.subr.bf16.mxu0 %v2500_v14  ;;  %2064 = vmatprep.subr.bf16.mxu1 %v2500_v14  ;;  %v2375_v15 = vunpack.i.l.bf16 %v2374_v27 }
  0xd7   : >> { %1713 = vmatprep.mubr.msk.f32.mxu0 %vm367_vm15, %v302_v18 }
  0xd8   : >> { %1111 = vmatmul.mubr.f32.vlgmr.msra.gmra.mrb[0].mxu1 %v299_v59  ;;  %525 = vmatmul.mubr.f32.gmra.mrb[2].mxu0 %v301_v38 }
  0xd9   : >> { %1919 = vmatpush1.bf16.msra.mxu0 %v2649_v30  ;;  %2066 = vmatpush1.bf16.msra.mxu1 %v2735_v52  ;;  %v2909_v30 = vpack.c.bf16 %v2366_v23, %v2365_v0 }
  0xda   : >> { %2067 = vmatprep.subr.bf16.mxu1 %v2500_v14  ;;  %1920 = vmatprep.subr.bf16.mxu0 %v2500_v14 }
  0xdb   : >> { %1724 = vmatprep.mubr.msk.f32.mxu0 %vm367_vm15, %v1721_v28  ;;  %1753 = vmatprep.mubr.msk.f32.mxu1 %vm367_vm15, %v302_v18  ;;  %v2984_v18 = vpack.c.bf16 %v2725_v49, %v2722_v48 }
  0xdc   : >> { %1116 = vmatmul.mubr.f32.gmra.mrb[2].mxu1 %v301_v38 }
  0xdd   : >> { %1922 = vmatpush1.bf16.msra.mxu0 %v2773_v22  ;;  %2069 = vmatpush1.bf16.msra.mxu1 %v2902_v35  ;;  %v2376_v22 = vunpack.i.h.bf16 %v2374_v27 }
  0xde   : >> { %2070 = vmatprep.subr.bf16.mxu1 %v2500_v14  ;;  %1923 = vmatprep.subr.bf16.mxu0 %v2500_v14 }
  0xdf   : >> { %1754 = vmatprep.mubr.msk.f32.mxu1 %vm367_vm15, %v1721_v28  ;;  %v2923_v29 = vpack.c.bf16 %v2376_v22, %v2375_v15 }
  0xe1   : >> { %1925 = vmatpush1.bf16.msra.mxu0 %v2775_v24  ;;  %2072 = vmatpush1.bf16.msra.mxu1 %v2909_v30  ;;  %v2384_v24 = vpop.permute.xlu0 %2383 }
  0xe2   : >> { %1926 = vmatprep.subr.bf16.mxu0 %v2500_v14  ;;  %2073 = vmatprep.subr.bf16.mxu1 %v2500_v14  ;;  %v2386_v31 = vunpack.i.h.bf16 %v2384_v24  ;;  %v2385_v39 = vunpack.i.l.bf16 %v2384_v24 }
  0xe4   : >> { %v2935_v4 = vpack.c.bf16 %v2386_v31, %v2385_v39 }
  0xe5   : >> { %1928 = vmatpush1.bf16.msra.mxu0 %v2783_v44  ;;  %2075 = vmatpush1.bf16.msra.mxu1 %v2917_v37  ;;  %v2389_v44 = vpop.permute.xlu1 %2388 }
  0xe6   : >> { %1929 = vmatprep.subr.bf16.mxu0 %v2500_v14  ;;  %2076 = vmatprep.subr.bf16.mxu1 %v2500_v14  ;;  %v2391_v45 = vunpack.i.h.bf16 %v2389_v44  ;;  %v2390_v50 = vunpack.i.l.bf16 %v2389_v44 }
  0xe8   : >> { %v2941_v51 = vpack.c.bf16 %v2391_v45, %v2390_v50 }
  0xe9   : >> { %1931 = vmatpush1.bf16.msra.mxu0 %v2791_v61  ;;  %2078 = vmatpush1.bf16.msra.mxu1 %v2923_v29  ;;  %v2394_v61 = vpop.permute.xlu0 %2393 }
  0xea   : >> { %1932 = vmatprep.subr.bf16.mxu0 %v2500_v14  ;;  %2079 = vmatprep.subr.bf16.mxu1 %v2500_v14  ;;  %v2396_v16 = vunpack.i.h.bf16 %v2394_v61  ;;  %v2395_v57 = vunpack.i.l.bf16 %v2394_v61  ;;  %v1732_v61 = vld [vmem:[%s3159_s1 + $0x60] sm:$0xff] }
  0xec   : >> { %v2947_v32 = vpack.c.bf16 %v2396_v16, %v2395_v57  ;;  %v2125_v16 = vpack.c.bf16 %v2745_v54, %v2742_v53  ;;  %v1734_v57 = vld [vmem:[%s3159_s1 + $0x70] sm:$0xff] }
  0xed   : >> { %1934 = vmatpush1.bf16.msra.mxu0 %v2799_v20  ;;  %2081 = vmatpush1.bf16.msra.mxu1 %v2929_v26  ;;  %v2399_v20 = vpop.permute.xlu1 %2398  ;;  %v2404_v59 = vpop.permute.xlu0 %2403 }
  0xee   : >> { %1935 = vmatprep.subr.bf16.mxu0 %v2500_v14  ;;  %2082 = vmatprep.subr.bf16.mxu1 %v2500_v14  ;;  %v2401_v33 = vunpack.i.h.bf16 %v2399_v20  ;;  %v2400_v40 = vunpack.i.l.bf16 %v2399_v20 }
  0xf1   : >> { %1937 = vmatpush1.bf16.msra.mxu0 %v2807_v41  ;;  %2084 = vmatpush1.bf16.msra.mxu1 %v2935_v4  ;;  %v2953_v41 = vpack.c.bf16 %v2401_v33, %v2400_v40  ;;  %v2409_v38 = vpop.permute.xlu1 %2408  ;;  %v2414_v48 = vpop.permute.xlu0 %2413  ;;  %v2128_v33 = vpack.c.bf16 %v2751_v56, %v2748_v55 }
  0xf2   : >> { %1938 = vmatprep.subr.bf16.mxu0 %v2500_v14  ;;  %2085 = vmatprep.subr.bf16.mxu1 %v2500_v14  ;;  %v2411_v62 = vunpack.i.h.bf16 %v2409_v38  ;;  %v2410_v28 = vunpack.i.l.bf16 %v2409_v38  ;;  %v2416_v23 = vunpack.i.h.bf16 %v2414_v48  ;;  %v2415_v0 = vunpack.i.l.bf16 %v2414_v48 }
  0xf4   : >> { %v2997_v49 = vpack.c.bf16 %v2411_v62, %v2410_v28  ;;  %v3003_v36 = vpack.c.bf16 %v2416_v23, %v2415_v0 }
  0xf5   : >> { %1940 = vmatpush1.bf16.msra.mxu0 %v2815_v63  ;;  %2087 = vmatpush1.bf16.msra.mxu1 %v2941_v51  ;;  %v1723_v63 = vld [vmem:[%s3159_s1 + $0x58] sm:$0xff]  ;;  %v2424_v43 = vpop.permute.xlu0 %2423 }
  0xf6   : >> { %1941 = vmatprep.subr.bf16.mxu0 %v2500_v14  ;;  %2088 = vmatprep.subr.bf16.mxu1 %v2500_v14  ;;  %v2425_v22 = vunpack.i.l.bf16 %v2424_v43 }
  0xf9   : >> { %1943 = vmatpush1.bf16.msra.mxu0 %v2823_v25  ;;  %2090 = vmatpush1.bf16.msra.mxu1 %v2947_v32  ;;  %v2969_v25 = vpack.c.bf16 %v2719_v47, %v2716_v46  ;;  %v2406_v46 = vunpack.i.h.bf16 %v2404_v59  ;;  %v2405_v47 = vunpack.i.l.bf16 %v2404_v59  ;;  %v2434_v21 = vpop.permute.xlu0 %2433 }
  0xfa   : >> { %1944 = vmatprep.subr.bf16.mxu0 %v2500_v14  ;;  %2091 = vmatprep.subr.bf16.mxu1 %v2500_v14  ;;  %v2435_v31 = vunpack.i.l.bf16 %v2434_v21 }
  0xfb   : >> { %v2990_v60 = vpack.c.bf16 %v2406_v46, %v2405_v47 }
  0xfc   : >> { %665 = vmatmul.mubr.f32.vlgmr.msra.gmra.mrb[0].mxu0 %v1720_v34 }
  0xfd   : >> { %1946 = vmatpush1.bf16.msra.mxu0 %v2735_v52  ;;  %2093 = vmatpush1.bf16.msra.mxu1 %v2953_v41  ;;  %v1733_v52 = vld [vmem:[%s3159_s1 + $0x68] sm:$0xff]  ;;  %v2444_v20 = vpop.permute.xlu0 %2443 }
  0xfe   : >> { %1947 = vmatprep.subr.bf16.mxu0 %v2500_v14  ;;  %2094 = vmatprep.subr.bf16.mxu1 %v2500_v14  ;;  %v2446_v53 = vunpack.i.h.bf16 %v2444_v20  ;;  %v2445_v54 = vunpack.i.l.bf16 %v2444_v20 }
  0xff   : >> { %1725 = vmatprep.mubr.msk.f32.mxu0 %vm367_vm15, %v1723_v63 }
 0x100   : >> { %1186 = vmatmul.mubr.f32.vlgmr.msra.gmra.mrb[0].mxu1 %v1720_v34  ;;  %670 = vmatmul.mubr.f32.gmra.mrb[2].mxu0 %v1722_v58 }
 0x101   : >> { %1949 = vmatpush1.bf16.msra.mxu0 %v2902_v35  ;;  %2096 = vmatpush1.bf16.msra.mxu1 %v2969_v25  ;;  %v2419_v35 = vpop.permute.xlu1 %2418  ;;  %v2454_v55 = vpop.permute.xlu0 %2453 }
 0x102   : >> { %1950 = vmatprep.subr.bf16.mxu0 %v2500_v14  ;;  %2097 = vmatprep.subr.bf16.mxu1 %v2500_v14  ;;  %v2420_v42 = vunpack.i.l.bf16 %v2419_v35 }
 0x103   : >> { %1736 = vmatprep.mubr.msk.f32.mxu0 %vm367_vm15, %v1733_v52  ;;  %1755 = vmatprep.mubr.msk.f32.mxu1 %vm367_vm15, %v1723_v63 }
 0x104   : >> { %1191 = vmatmul.mubr.f32.gmra.mrb[2].mxu1 %v1722_v58  ;;  %v2455_v58 = vunpack.i.l.bf16 %v2454_v55 }
 0x105   : >> { %1952 = vmatpush1.bf16.msra.mxu0 %v2909_v30  ;;  %2099 = vmatpush1.bf16.msra.mxu1 %v2984_v18  ;;  %v2421_v30 = vunpack.i.h.bf16 %v2419_v35  ;;  %v2429_v15 = vpop.permute.xlu1 %2428 }
 0x106   : >> { %1953 = vmatprep.subr.bf16.mxu0 %v2500_v14  ;;  %2100 = vmatprep.subr.bf16.mxu1 %v2500_v14  ;;  %v2430_v19 = vunpack.i.l.bf16 %v2429_v15 }
 0x107   : >> { %1756 = vmatprep.mubr.msk.f32.mxu1 %vm367_vm15, %v1733_v52  ;;  %v3009_v27 = vpack.c.bf16 %v2421_v30, %v2420_v42 }
 0x109   : >> { %1955 = vmatpush1.bf16.msra.mxu0 %v2917_v37  ;;  %2102 = vmatpush1.bf16.msra.mxu1 %v2990_v60  ;;  %v2426_v37 = vunpack.i.h.bf16 %v2424_v43  ;;  %v2439_v39 = vpop.permute.xlu1 %2438 }
 0x10a   : >> { %1956 = vmatprep.subr.bf16.mxu0 %v2500_v14  ;;  %2103 = vmatprep.subr.bf16.mxu1 %v2500_v14  ;;  %v2440_v45 = vunpack.i.l.bf16 %v2439_v39 }
 0x10b   : >> { %v3015_v17 = vpack.c.bf16 %v2426_v37, %v2425_v22 }
 0x10d   : >> { %1958 = vmatpush1.bf16.msra.mxu0 %v2923_v29  ;;  %2105 = vmatpush1.bf16.msra.mxu1 %v2997_v49  ;;  %v2431_v29 = vunpack.i.h.bf16 %v2429_v15  ;;  %v2449_v40 = vpop.permute.xlu1 %2448  ;;  %v1744_v15 = vld [vmem:[%s3159_s1 + $0x80] sm:$0xff] }
 0x10e   : >> { %1959 = vmatprep.subr.bf16.mxu0 %v2500_v14  ;;  %2106 = vmatprep.subr.bf16.mxu1 %v2500_v14  ;;  %v2451_v34 = vunpack.i.h.bf16 %v2449_v40  ;;  %v2450_v63 = vunpack.i.l.bf16 %v2449_v40 }
 0x10f   : >> { %v3021_v24 = vpack.c.bf16 %v2431_v29, %v2430_v19  ;;  %v2506_v29 = vmov 1.0|1.0  }
 0x110   : >> { %v2134_v56 = vpack.c.bf16 %v2451_v34, %v2450_v63 }
 0x111   : >> { %1961 = vmatpush1.bf16.msra.mxu0 %v2929_v26  ;;  %2108 = vmatpush1.bf16.msra.mxu1 %v3003_v36  ;;  %v2436_v26 = vunpack.i.h.bf16 %v2434_v21  ;;  %v2459_v59 = vpop.permute.xlu1 %2458 }
 0x112   : >> { %1962 = vmatprep.subr.bf16.mxu0 %v2500_v14  ;;  %2109 = vmatprep.subr.bf16.mxu1 %v2500_v14  ;;  %v2461_v46 = vunpack.i.h.bf16 %v2459_v59  ;;  %v2460_v47 = vunpack.i.l.bf16 %v2459_v59 }
 0x113   : >> { %v3027_v44 = vpack.c.bf16 %v2436_v26, %v2435_v31 }
 0x114   : >> { %v2140_v38 = vpack.c.bf16 %v2461_v46, %v2460_v47 }
 0x115   : >> { %1964 = vmatpush1.bf16.msra.mxu0 %v2935_v4  ;;  %2111 = vmatpush1.bf16.msra.mxu1 %v3009_v27  ;;  %v2441_v4 = vunpack.i.h.bf16 %v2439_v39  ;;  %v2469_v28 = vpop.permute.xlu1 %2468 }
 0x116   : >> { %1965 = vmatprep.subr.bf16.mxu0 %v2500_v14  ;;  %2112 = vmatprep.subr.bf16.mxu1 %v2500_v14  ;;  %v2470_v23 = vunpack.i.l.bf16 %v2469_v28 }
 0x117   : >> { %v3033_v50 = vpack.c.bf16 %v2441_v4, %v2440_v45 }
 0x119   : >> { %1967 = vmatpush1.bf16.msra.mxu0 %v2941_v51  ;;  %2114 = vmatpush1.bf16.msra.mxu1 %v3015_v17  ;;  %v1735_v51 = vld [vmem:[%s3159_s1 + $0x78] sm:$0xff]  ;;  %v2479_v42 = vpop.permute.xlu1 %2478 }
 0x11a   : >> { %1968 = vmatprep.subr.bf16.mxu0 %v2500_v14  ;;  %2115 = vmatprep.subr.bf16.mxu1 %v2500_v14  ;;  %v2480_v37 = vunpack.i.l.bf16 %v2479_v42 }
 0x11d   : >> { %1970 = vmatpush1.bf16.msra.mxu0 %v2947_v32  ;;  %2117 = vmatpush1.bf16.msra.mxu1 %v3021_v24  ;;  %v1745_v32 = vld [vmem:[%s3159_s1 + $0x88] sm:$0xff] }
 0x11e   : >> { %1971 = vmatprep.subr.bf16.mxu0 %v2500_v14  ;;  %2118 = vmatprep.subr.bf16.mxu1 %v2500_v14 }
 0x121   : >> { %1973 = vmatpush1.bf16.msra.mxu0 %v2953_v41  ;;  %2120 = vmatpush1.bf16.msra.mxu1 %v3027_v44  ;;  %v2131_v41 = vpack.c.bf16 %v2446_v53, %v2445_v54 }
 0x122   : >> { %1974 = vmatprep.subr.bf16.mxu0 %v2500_v14  ;;  %2121 = vmatprep.subr.bf16.mxu1 %v2500_v14 }
 0x124   : >> { %812 = vmatmul.mubr.f32.vlgmr.msra.gmra.mrb[0].mxu0 %v1732_v61 }
 0x125   : >> { %1976 = vmatpush1.bf16.msra.mxu0 %v2969_v25  ;;  %2123 = vmatpush1.bf16.msra.mxu1 %v3033_v50  ;;  %v2456_v25 = vunpack.i.h.bf16 %v2454_v55 }
 0x126   : >> { %1977 = vmatprep.subr.bf16.mxu0 %v2500_v14  ;;  %2124 = vmatprep.subr.bf16.mxu1 %v2500_v14 }
 0x127   : >> { %1737 = vmatprep.mubr.msk.f32.mxu0 %vm367_vm15, %v1735_v51  ;;  %v2137_v52 = vpack.c.bf16 %v2456_v25, %v2455_v58 }
 0x128   : >> { %1263 = vmatmul.mubr.f32.vlgmr.msra.gmra.mrb[0].mxu1 %v1732_v61  ;;  %817 = vmatmul.mubr.f32.gmra.mrb[2].mxu0 %v1734_v57 }
 0x129   : >> { %1979 = vmatpush1.bf16.msra.mxu0 %v2984_v18  ;;  %2126 = vmatpush1.bf16.msra.mxu1 %v2125_v16  ;;  %v2464_v18 = vpop.permute.xlu0 %2463 }
 0x12a   : >> { %1980 = vmatprep.subr.bf16.mxu0 %v2500_v14  ;;  %2127 = vmatprep.subr.bf16.mxu1 %v2500_v14  ;;  %v2465_v62 = vunpack.i.l.bf16 %v2464_v18 }
 0x12b   : >> { %1748 = vmatprep.mubr.msk.f32.mxu0 %vm367_vm15, %v1745_v32  ;;  %1757 = vmatprep.mubr.msk.f32.mxu1 %vm367_vm15, %v1735_v51 }
 0x12c   : >> { %1268 = vmatmul.mubr.f32.gmra.mrb[2].mxu1 %v1734_v57 }
 0x12d   : >> { %1982 = vmatpush1.bf16.msra.mxu0 %v2990_v60  ;;  %2129 = vmatpush1.bf16.msra.mxu1 %v2128_v33  ;;  %v2466_v60 = vunpack.i.h.bf16 %v2464_v18  ;;  %v2474_v0 = vpop.permute.xlu0 %2473 }
 0x12e   : >> { %1983 = vmatprep.subr.bf16.mxu0 %v2500_v14  ;;  %2130 = vmatprep.subr.bf16.mxu1 %v2500_v14  ;;  %v2475_v30 = vunpack.i.l.bf16 %v2474_v0 }
 0x12f   : >> { %1764 = vmatprep.mubr.msk.f32.mxu1 %vm367_vm15, %v1745_v32  ;;  %v2143_v48 = vpack.c.bf16 %v2466_v60, %v2465_v62 }
 0x131   : >> { %1985 = vmatpush1.bf16.msra.mxu0 %v2997_v49  ;;  %2132 = vmatpush1.bf16.msra.mxu1 %v2131_v41  ;;  %v2471_v49 = vunpack.i.h.bf16 %v2469_v28 }
 0x132   : >> { %1986 = vmatprep.subr.bf16.mxu0 %v2500_v14  ;;  %2133 = vmatprep.subr.bf16.mxu1 %v2500_v14 }
 0x133   : >> { %v2146_v35 = vpack.c.bf16 %v2471_v49, %v2470_v23 }
 0x135   : >> { %1988 = vmatpush1.bf16.msra.mxu0 %v3003_v36  ;;  %2135 = vmatpush1.bf16.msra.mxu1 %v2134_v56  ;;  %v2476_v36 = vunpack.i.h.bf16 %v2474_v0 }
 0x136   : >> { %1989 = vmatprep.subr.bf16.mxu0 %v2500_v14  ;;  %2136 = vmatprep.subr.bf16.mxu1 %v2500_v14 }
 0x137   : >> { %v2149_v43 = vpack.c.bf16 %v2476_v36, %v2475_v30  ;;  %v1421_v61 = vpop.permute.xlu1 %1420 }
 0x139   : >> { %1991 = vmatpush1.bf16.msra.mxu0 %v3009_v27  ;;  %2138 = vmatpush1.bf16.msra.mxu1 %v2137_v52  ;;  %v2481_v27 = vunpack.i.h.bf16 %v2479_v42 }
 0x13a   : >> { %1992 = vmatprep.subr.bf16.mxu0 %v2500_v14  ;;  %2139 = vmatprep.subr.bf16.mxu1 %v2500_v14 }
 0x13b   : >> { %v2152_v22 = vpack.c.bf16 %v2481_v27, %v2480_v37 }
 0x13d   : >> { %1994 = vmatpush1.bf16.msra.mxu0 %v3015_v17  ;;  %2141 = vmatpush1.bf16.msra.mxu1 %v2140_v38  ;;  %v1747_v17 = vld [vmem:[%s3159_s1 + $0x98] sm:$0xff] }
 0x13e   : >> { %1995 = vmatprep.subr.bf16.mxu0 %v2500_v14  ;;  %2142 = vmatprep.subr.bf16.mxu1 %v2500_v14 }
 0x141   : >> { %1997 = vmatpush1.bf16.msra.mxu0 %v3021_v24  ;;  %2144 = vmatpush1.bf16.msra.mxu1 %v2143_v48  ;;  %v1416_v24 = vpop.permute.xlu0 %1415 }
 0x142   : >> { %1998 = vmatprep.subr.bf16.mxu0 %v2500_v14  ;;  %2145 = vmatprep.subr.bf16.mxu1 %v2500_v14 }
 0x145   : >> { %2000 = vmatpush1.bf16.msra.mxu0 %v3027_v44  ;;  %2147 = vmatpush1.bf16.msra.mxu1 %v2146_v35 }
 0x146   : >> { %2001 = vmatprep.subr.bf16.mxu0 %v2500_v14  ;;  %2148 = vmatprep.subr.bf16.mxu1 %v2500_v14 }
 0x149   : >> { %2003 = vmatpush1.bf16.msra.mxu0 %v3033_v50  ;;  %2150 = vmatpush1.bf16.msra.mxu1 %v2149_v43 }
 0x14a   : >> { %2151 = vmatprep.subr.bf16.mxu1 %v2500_v14  ;;  %2155 = vmatprep.subr.msk.bf16.mxu0 %vm2154_vm14, %v2506_v29  ;;  %v1746_v14 = vld [vmem:[%s3159_s1 + $0x90] sm:$0xff] }
 0x14c   : >> { %959 = vmatmul.mubr.f32.vlgmr.msra.gmra.mrb[0].mxu0 %v1744_v15 }
 0x14d   : >> { %2153 = vmatpush1.bf16.msra.mxu1 %v2152_v22  ;;  %1749 = vmatprep.mubr.msk.f32.mxu0 %vm367_vm15, %v1747_v17 }
 0x14e   : >> { %2171 = vmatprep.subr.msk.bf16.mxu1 %vm2170_vm0, %v2506_v29  ;;  %2157 = vmatpush3.bf16.msk.msra.mxu0 %vm2154_vm14, %v2506_v29  ;;  %vm2174_vm14 = vmpackc.low %vm211_vm11, %vm210_vm10 }
 0x14f   : >> { %2159 = vmatprep.subr.msk.bf16.mxu0 %vm2158_vm1, %v2506_v29 }
 0x150   : >> { %964 = vmatmul.mubr.f32.gmra.mrb[2].mxu0 %v1746_v14  ;;  %1399 = vmatmul.mubr.f32.vlgmr.msra.gmra.mrb[0].mxu1 %v1744_v15 }
 0x151   : >> { %1765 = vmatprep.mubr.msk.f32.mxu1 %vm367_vm15, %v1747_v17  ;;  %2173 = vmatpush3.bf16.msk.msra.mxu1 %vm2170_vm0, %v2506_v29  ;;  %vm2162_vm0 = vmpackc.low %vm188_vm5, %vm3166_vm4 }
 0x152   : >> { %2175 = vmatprep.subr.msk.bf16.mxu1 %vm2174_vm14, %v2506_v29  ;;  %2161 = vmatpush3.bf16.msk.msra.mxu0 %vm2158_vm1, %v2506_v29  ;;  %vm2166_vm1 = vmpackc.low %vm190_vm7, %vm189_vm6 }
 0x153   : >> { %2163 = vmatprep.subr.msk.bf16.mxu0 %vm2162_vm0, %v2506_v29 }
 0x154   : >> { %1404 = vmatmul.mubr.f32.gmra.mrb[2].mxu1 %v1746_v14 }
 0x155   : >> { %2177 = vmatpush3.bf16.msk.msra.mxu1 %vm2174_vm14, %v2506_v29  ;;  %vm3167_vm14 = vcmp.eq.s32.totalorder %v2568_v10, %v2597_v13 }
 0x156   : >> { %2179 = vmatprep.subr.msk.bf16.mxu1 %vm2178_vm2, %v2506_v29  ;;  %2165 = vmatpush3.bf16.msk.msra.mxu0 %vm2162_vm0, %v2506_v29  ;;  %vm2182_vm4 = vmpackc.low %vm3168_vm3, %vm3167_vm14 }
 0x157   : >> { %2167 = vmatprep.subr.msk.bf16.mxu0 %vm2166_vm1, %v2506_v29 }
 0x159   : >> { %2181 = vmatpush3.bf16.msk.msra.mxu1 %vm2178_vm2, %v2506_v29  ;;  %vm1425_vm2 = vcmask 523264  }
 0x15a   : >> { %2183 = vmatprep.subr.msk.bf16.mxu1 %vm2182_vm4, %v2506_v29  ;;  %2169 = vmatpush3.bf16.msk.msra.mxu0 %vm2166_vm1, %v2506_v29 }
 0x15d   : >> { %2185 = vmatpush3.bf16.msk.msra.mxu1 %vm2182_vm4, %v2506_v29 }
 0x21f   : >> { %v960_v19 = vpop.f32.mrb[0].mxu0 }
 0x220   : >> { %v962_v21 = vpop.f32.mrb[1].mxu0 }
 0x223   : >> { %v965_v26 = vpop.f32.mrb[2].mxu0  ;;  %v1400_v31 = vpop.f32.mrb[0].mxu1 }
 0x224   : >> { %v1411_v39 = vmax.f32 %v960_v19, %v1400_v31  ;;  %v967_v44 = vpop.f32.mrb[3].mxu0  ;;  %v1402_v4 = vpop.f32.mrb[1].mxu1 }
 0x226   : >> { %v1423_v45 = vadd.f32 %v1416_v24, %v1411_v39 }
 0x227   : >> { %v1405_v50 = vpop.f32.mrb[2].mxu1 }
 0x228   : >> { %v1412_v51 = vmax.f32 %v965_v26, %v1405_v50  ;;  %v1407_v16 = vpop.f32.mrb[3].mxu1  ;;  %1832 = vmatprep.mubr.msk.f32.mxu0 %vm1425_vm2, %v1423_v45  ;;  %1851 = vmatprep.mubr.msk.f32.mxu1 %vm1425_vm2, %v1423_v45 }
 0x22a   : >> { %v1424_v57 = vadd.f32 %v1421_v61, %v1412_v51 }
 0x22c   : >> { %1833 = vmatmul.mubr.msk.f32.vlgmr.msra.gmra.mrb[4].mxu0 %vm1425_vm2, %v1424_v57  ;;  %1852 = vmatmul.mubr.msk.f32.vlgmr.msra.gmra.mrb[4].mxu1 %vm1425_vm2, %v1424_v57 }
 0x2ff   : >> { %v1834_v20 = vpop.f32.mrb[4].mxu0  ;;  %v1853_v32 = vpop.f32.mrb[4].mxu1  ;;  %238 = sbr.rel (!%p236_p4) target bundleno = 17 (0x11), region = 80 }
 0x300   : >> { %v1583_v53 = vmax.f32 %v1834_v20, %v1853_v32  ;;  %v1498_v54 = vpop.f32.mrb[5].mxu0  ;;  %v1573_v33 = vpop.f32.mrb[5].mxu1 }
 0x301   : >> { %v1582_v40 = vmax.f32 %v1498_v54, %v1573_v33 }
 0x302   : >> { %v1585_v41 = vmax.f32 %v1583_v53, 0.0 }
 0x303   : >> { %v1584_v34 = vmax.f32 %v1582_v40, 0.0 }
 0x304   : >> { %1589 = vst.msk [vmem:[%s1587_s28 + $0x8] sm:$0xff] %vm367_vm15, %v1585_v41 }
 0x305   : >> { %1588 = vst.msk [vmem:[%s1587_s28] sm:$0xff] %vm367_vm15, %v1584_v34 }
 0x306 PF: > { %s13_s12 = sadd.s32 1, %s2494_s12  }
 0x307   : > { %p10_p5 = scmp.ge.s32.totalorder %s13_s12, 4  }
 0x309   :  { %12 = sbr.rel (!%p10_p5) target bundleno = 1 (0x1), region = 91 }

// kernel: cnnet_forward.6
= control target key start
LH: loop header
LB: loop body
LE: loop exit
PB: predicated region body
PF: predicated region fallthrough
CT: control target
= control target key end

     0   :  { %s1535_s12 = smov 0   ;;  %s1812_s0 = inlined_call_operand.vmem [shape: f32[2,32,16,32], index: 0, kind: input, shape index: {}]   ;;  %s1813_s1 = inlined_call_operand.vmem [shape: f32[1,8,400], index: 1, kind: input, shape index: {}]   ;;  %s1814_s2 = inlined_call_operand.vmem [shape: f32[8,1], index: 2, kind: input, shape index: {}]   ;;  %s1815_s3 = inlined_call_operand.vmem [shape: f32[2,14,8,14], index: 3, kind: output, shape index: {}]  }
   0x1 LB: > { %s987_s13 = sadd.s32 4294967295, %s1497_s12   ;;  %p991_p0 = scmp.ge.s32.totalorder %s1497_s12, 1  ;;  %s1497_s12 = sphi %s1535_s12, %s13_s12  }
   0x2   : > { %p137_p1 = scmp.lt.s32.totalorder %s1497_s12, 3 }
   0x4   : > { %p138_p2 = pnand %p991_p0, %p137_p1 }
   0x5   : > { %p161_p3 = scmp.lt.s32.totalorder (!%p138_p2), %s987_s13, 1  ;;  %v171_v0 = vlaneseq (!%p138_p2)  ;;  %v1546_v1 = vld [vmem:[%s1814_s2] sm:$0xff] (!%p138_p2)  ;;  %v1503_v8 = vmov (!%p138_p2), 0.0   ;;  %s1590_s24 = smov (!%p138_p2), 0  }
   0x6   : > { %141 = sbr.rel (%p138_p2) target bundleno = 769 (0x301), region = 32 }
   0x7   : > { %v1548_v2 = vshrl.u32 (!%p138_p2), %v171_v0, 7  ;;  %v177_v3 = vand.u32 (!%p138_p2), 127, %v171_v0 }
   0x9   : > { %v1551_v4 = vadd.s32 (!%p138_p2), 8, %v1548_v2  ;;  %v1554_v5 = vadd.s32 (!%p138_p2), 16, %v1548_v2  ;;  %v175_v6 = vadd.s32 (!%p138_p2), 24, %v1548_v2  ;;  %v1557_v7 = vmul.u32 (!%p138_p2), 2, %v177_v3 }
   0xb   : > { %vm179_vm0 = vcmp.eq.s32.totalorder (!%p138_p2), %v1548_v2, %v1557_v7  ;;  %vm180_vm1 = vcmp.eq.s32.totalorder (!%p138_p2), %v1551_v4, %v1557_v7  ;;  %vm181_vm2 = vcmp.eq.s32.totalorder (!%p138_p2), %v1554_v5, %v1557_v7  ;;  %vm182_vm3 = vcmp.eq.s32.totalorder (!%p138_p2), %v175_v6, %v1557_v7 }
   0xc   : > { %v1576_v9 = vsel (!%p138_p2), %vm182_vm3, 1.0, %v1503_v8  ;;  %v1579_v10 = vadd.s32 (!%p138_p2), 1, %v1557_v7 }
   0xd   : > { %s1817_s13 = smov (!%p161_p3, %s987_s13), 1 }
   0xe   : > { %s1040_s16 = sshll.u32 %s1817_s13, 9  ;;  %s1281_s17 = smul.u32 112, %s1817_s13  ;;  %vm192_vm4 = vcmp.eq.s32.totalorder %v1548_v2, %v1579_v10  ;;  %vm193_vm5 = vcmp.eq.s32.totalorder %v1551_v4, %v1579_v10  ;;  %vm194_vm6 = vcmp.eq.s32.totalorder %v1554_v5, %v1579_v10  ;;  %vm195_vm7 = vcmp.eq.s32.totalorder %v175_v6, %v1579_v10 }
   0xf   : > { %s1562_s20 = scalar_lea.vmem %s1812_s0, %s1040_s16  ;;  %v1588_v11 = vsel %vm195_vm7, 1.0, %v1503_v8 }
  0x10   : > { %s1567_s23 = scalar_lea.vmem %s1815_s3, %s1281_s17 }
  0x11 LB: >> { %v1504_v12 = vmov 0.0|0.0   ;;  %s1041_s25 = sshll.u32 %s1501_s24, 5  ;;  %s1505_s27 = smov 127   ;;  %v1697_v8 = vld [vmem:[%s1813_s1 + $0x18] sm:$0xff]  ;;  %vm396_vm8 = vcmask 130048   ;;  %vm1268_vm9 = vmpackc.low %vm180_vm1, %vm179_vm0  ;;  %vm750_vm10 = vcmask 1043456   ;;  %s1501_s24 = sphi %s1590_s24, %s210_s24  }
  0x12   : >> { %1181 = vmatprep.subr.bf16.mxu1 %v1504_v12  ;;  %s1598_s26 = scalar_lea.vmem %s1562_s20, %s1041_s25  ;;  %s1506_s28 = smov 125   ;;  %1021 = vmatprep.mubr.msk.f32.mxu1 %vm396_vm8, %v1697_v8  ;;  %vm1272_vm11 = vmpackc.low %vm750_vm10, %vm181_vm2  ;;  %vm1513_vm12 = vmmov 0   ;;  %vm746_vm13 = vcmask 228352   ;;  %vm901_vm3 = vcmask 113664  }
  0x13   : >> { %v1601_v13 = vld [vmem:[%s1598_s26 + $0x30] sm:$0xff]  ;;  %v1604_v14 = vld [vmem:[%s1598_s26 + $0x38] sm:$0xff]  ;;  %v1607_v15 = vld [vmem:[%s1598_s26 + $0x40] sm:$0xff]  ;;  %s1507_s29 = smov 126   ;;  %s1508_s30 = smov 1  }
  0x14   : >> { %v1611_v16 = vpack.i.bf16 %v1604_v14, %v1601_v13  ;;  %v1614_v17 = vld [vmem:[%s1598_s26 + $0x48] sm:$0xff]  ;;  %v1623_v19 = vld [vmem:[%s1598_s26] sm:$0xff]  ;;  %v1024_v22 = vld [vmem:[%s1598_s26 + $0x50] sm:$0xff]  ;;  %s1509_s4 = smov 124   ;;  %s1037_s14 = sshll.u32 %s1501_s24, 3 }
  0x15   : >> { %v1325_v18 = vpack.i.bf16 %v1614_v17, %v1607_v15  ;;  %v1626_v20 = vld [vmem:[%s1598_s26 + $0x8] sm:$0xff]  ;;  %v1025_v23 = vld [vmem:[%s1598_s26 + $0x58] sm:$0xff]  ;;  %v1639_v25 = vld [vmem:[%s1598_s26 + $0x10] sm:$0xff]  ;;  %s900_s15 = scalar_lea.vmem %s1567_s23, %s1037_s14  ;;  %s210_s24 = sadd.s32 1, %s1501_s24  }
  0x16   : >> { %1311 = vrot.lane.b32.xlu0 %v1611_v16, %s1505_s27  ;;  %1321 = vrot.lane.b32.xlu1 %v1611_v16, %s1506_s28  ;;  %v1630_v21 = vpack.i.bf16 %v1626_v20, %v1623_v19  ;;  %v1345_v24 = vpack.i.bf16 %v1025_v23, %v1024_v22  ;;  %v1642_v26 = vld [vmem:[%s1598_s26 + $0x18] sm:$0xff]  ;;  %v1151_v28 = vpack.c.bf16 %v1626_v20, %v1623_v19  ;;  %v1011_v35 = vld [vmem:[%s1598_s26 + $0x20] sm:$0xff]  ;;  %v1510_v23 = vmov 0   ;;  %vm1275_vm14 = vmpackc.low %vm193_vm5, %vm192_vm4  ;;  %p207_p4 = scmp.ge.s32.totalorder %s210_s24, 14  }
  0x17   : >> { %v1647_v27 = vpack.i.bf16 %v1642_v26, %v1639_v25  ;;  %v1012_v36 = vld [vmem:[%s1598_s26 + $0x28] sm:$0xff]  ;;  %1485 = vset.pattern.permute.xlu1 %v1510_v23  ;;  %1486 = vset.pattern.permute.xlu0 %v1510_v23  ;;  %vm1279_vm15 = vmpackc.low %vm750_vm10, %vm194_vm6 }
  0x18   : >> { %v1395_v43 = vpack.i.bf16 %v1012_v36, %v1011_v35  ;;  %v1699_v19 = vpack.c.bf16 %v1012_v36, %v1011_v35 }
  0x1a   : >> { %1316 = vrot.lane.b32.xlu0 %v1611_v16, %s1507_s29  ;;  %1326 = vrot.lane.b32.xlu1 %v1325_v18, %s1508_s30 }
  0x1e   : >> { %1331 = vrot.lane.b32.xlu0 %v1325_v18, %s1505_s27  ;;  %1336 = vrot.lane.b32.xlu1 %v1325_v18, %s1507_s29 }
  0x22   : >> { %1341 = vrot.lane.b32.xlu0 %v1325_v18, %s1506_s28  ;;  %1346 = vrot.lane.b32.xlu1 %v1345_v24, %s1508_s30 }
  0x26   : >> { %1351 = vrot.lane.b32.xlu0 %v1345_v24, %s1505_s27  ;;  %1356 = vrot.lane.b32.xlu1 %v1647_v27, %s1506_s28 }
  0x2a   : >> { %1361 = vrot.lane.b32.xlu1 %v1345_v24, %s1507_s29  ;;  %1366 = vrot.lane.b32.xlu0 %v1647_v27, %s1509_s4 }
  0x2e   : >> { %1376 = vrot.lane.b32.xlu1 %v1345_v24, %s1506_s28  ;;  %1371 = vrot.lane.b32.xlu0 %v1630_v21, %s1505_s27 }
  0x88   : >> { %v1312_v29 = vpop.permute.xlu0 %1311  ;;  %v1322_v30 = vpop.permute.xlu1 %1321 }
  0x89   : >> { %v1314_v31 = vunpack.i.h.bf16 %v1312_v29  ;;  %v1313_v32 = vunpack.i.l.bf16 %v1312_v29  ;;  %v1324_v33 = vunpack.i.h.bf16 %v1322_v30  ;;  %v1323_v34 = vunpack.i.l.bf16 %v1322_v30  ;;  %1381 = vrot.lane.b32.xlu0 %v1312_v29, %s1505_s27 }
  0x8b   : >> { %v1662_v37 = vpack.c.bf16 %v1314_v31, %v1313_v32  ;;  %v1664_v38 = vpack.c.bf16 %v1324_v33, %v1323_v34 }
  0x8c   : >> { %v1317_v39 = vpop.permute.xlu0 %1316  ;;  %v1327_v40 = vpop.permute.xlu1 %1326 }
  0x8d   : >> { %v1319_v41 = vunpack.i.h.bf16 %v1317_v39  ;;  %v1318_v42 = vunpack.i.l.bf16 %v1317_v39  ;;  %1183 = vmatpush1.bf16.msra.mxu1 %v1662_v37  ;;  %1386 = vrot.lane.b32.xlu1 %v1317_v39, %s1505_s27 }
  0x8e   : >> { %1184 = vmatprep.subr.bf16.mxu1 %v1504_v12  ;;  %1396 = vrot.lane.b32.xlu0 %v1395_v43, %s1505_s27 }
  0x8f   : >> { %v1669_v44 = vpack.c.bf16 %v1319_v41, %v1318_v42 }
  0x90   : >> { %v1332_v45 = vpop.permute.xlu0 %1331  ;;  %v1337_v46 = vpop.permute.xlu1 %1336 }
  0x91   : >> { %v1334_v47 = vunpack.i.h.bf16 %v1332_v45  ;;  %v1333_v48 = vunpack.i.l.bf16 %v1332_v45  ;;  %1391 = vrot.lane.b32.xlu1 %v1630_v21, %s1507_s29 }
  0x92   : >> { %1401 = vrot.lane.b32.xlu0 %v1322_v30, %s1505_s27 }
  0x93   : >> { %v1673_v49 = vpack.c.bf16 %v1334_v47, %v1333_v48 }
  0x94   : >> { %v1342_v50 = vpop.permute.xlu0 %1341  ;;  %v1347_v51 = vpop.permute.xlu1 %1346 }
  0x95   : >> { %1411 = vrot.lane.b32.xlu1 %v1327_v40, %s1505_s27 }
  0x96   : >> { %1406 = vrot.lane.b32.xlu0 %v1630_v21, %s1506_s28 }
  0x98   : >> { %v1352_v52 = vpop.permute.xlu0 %1351  ;;  %v1357_v53 = vpop.permute.xlu1 %1356 }
  0x99   : >> { %v1354_v54 = vunpack.i.h.bf16 %v1352_v52  ;;  %v1353_v55 = vunpack.i.l.bf16 %v1352_v52  ;;  %v1359_v56 = vunpack.i.h.bf16 %v1357_v53  ;;  %v1358_v57 = vunpack.i.l.bf16 %v1357_v53  ;;  %1416 = vrot.lane.b32.xlu1 %v1395_v43, %s1507_s29 }
  0x9a   : >> { %1421 = vrot.lane.b32.xlu0 %v1630_v21, %s1509_s4  ;;  %v1708_v21 = vld [vmem:[%s1813_s1 + $0x8] sm:$0xff] }
  0x9b   : >> { %v1681_v58 = vpack.c.bf16 %v1354_v54, %v1353_v55  ;;  %v1683_v59 = vpack.c.bf16 %v1359_v56, %v1358_v57  ;;  %464 = vmatprep.mubr.f32.mxu0 %v1708_v21 }
  0x9c   : >> { %v1367_v60 = vpop.permute.xlu0 %1366  ;;  %v1362_v20 = vpop.permute.xlu1 %1361 }
  0x9d   : >> { %v1369_v61 = vunpack.i.h.bf16 %v1367_v60  ;;  %v1368_v62 = vunpack.i.l.bf16 %v1367_v60  ;;  %1150 = vmatprep.subr.bf16.mxu0 %v1683_v59  ;;  %1426 = vrot.lane.b32.xlu1 %v1395_v43, %s1506_s28 }
  0x9e   : >> { %1152 = vmatpush3.bf16.msra.mxu0 %v1151_v28  ;;  %1441 = vrot.lane.b32.xlu0 %v1332_v45, %s1505_s27 }
  0x9f   : >> { %v1689_v63 = vpack.c.bf16 %v1369_v61, %v1368_v62 }
  0xa0   : >> { %v1372_v0 = vpop.permute.xlu0 %1371  ;;  %v1377_v22 = vpop.permute.xlu1 %1376 }
  0xa1   : >> { %v1374_v3 = vunpack.i.h.bf16 %v1372_v0  ;;  %v1373_v6 = vunpack.i.l.bf16 %v1372_v0  ;;  %1154 = vmatprep.subr.bf16.mxu0 %v1689_v63  ;;  %1431 = vrot.lane.b32.xlu1 %v1395_v43, %s1509_s4 }
  0xa2   : >> { %1446 = vrot.lane.b32.xlu0 %v1337_v46, %s1505_s27 }
  0xa3   : >> { %v1155_v18 = vpack.c.bf16 %v1374_v3, %v1373_v6 }
  0xa5   : >> { %1156 = vmatpush3.bf16.msra.mxu0 %v1155_v18  ;;  %1436 = vrot.lane.b32.xlu1 %v1647_v27, %s1505_s27 }
  0xa6   : >> { %1158 = vmatprep.subr.bf16.mxu0 %v1699_v19  ;;  %1451 = vrot.lane.b32.xlu0 %v1342_v50, %s1505_s27 }
  0xa9   : >> { %1456 = vrot.lane.b32.xlu1 %v1647_v27, %s1507_s29 }
  0xaa   : >> { %1461 = vrot.lane.b32.xlu0 %v1347_v51, %s1505_s27 }
  0xad   : >> { %1466 = vrot.lane.b32.xlu1 %v1611_v16, %s1509_s4 }
  0xae   : >> { %1471 = vrot.lane.b32.xlu0 %v1352_v52, %s1505_s27 }
  0xb1   : >> { %1476 = vrot.lane.b32.xlu1 %v1362_v20, %s1505_s27 }
  0xb2   : >> { %1481 = vrot.lane.b32.xlu0 %v1377_v22, %s1505_s27 }
  0xb5   : >> { %742 = vperm.xlu1 %1485, %v1546_v1  }
  0xfb   : >> { %v1382_v24 = vpop.permute.xlu0 %1381 }
  0xfc   : >> { %v1384_v28 = vunpack.i.h.bf16 %v1382_v24  ;;  %v1383_v29 = vunpack.i.l.bf16 %v1382_v24 }
  0xfe   : >> { %v1185_v27 = vpack.c.bf16 %v1384_v28, %v1383_v29 }
  0xff   : >> { %v1387_v30 = vpop.permute.xlu1 %1386 }
 0x100   : >> { %v1397_v31 = vpop.permute.xlu0 %1396  ;;  %v1389_v32 = vunpack.i.h.bf16 %v1387_v30  ;;  %v1388_v33 = vunpack.i.l.bf16 %v1387_v30  ;;  %1186 = vmatpush1.bf16.msra.mxu1 %v1185_v27  ;;  %v1171_v27 = vpack.c.bf16 %v1642_v26, %v1639_v25 }
 0x101   : >> { %1187 = vmatprep.subr.bf16.mxu1 %v1504_v12  ;;  %v1399_v34 = vunpack.i.h.bf16 %v1397_v31  ;;  %v1398_v35 = vunpack.i.l.bf16 %v1397_v31 }
 0x102   : >> { %v1188_v16 = vpack.c.bf16 %v1389_v32, %v1388_v33 }
 0x103   : >> { %v1392_v36 = vpop.permute.xlu1 %1391  ;;  %v1726_v47 = vpack.c.bf16 %v1399_v34, %v1398_v35 }
 0x104   : >> { %v1402_v39 = vpop.permute.xlu0 %1401  ;;  %v1394_v40 = vunpack.i.h.bf16 %v1392_v36  ;;  %v1393_v41 = vunpack.i.l.bf16 %v1392_v36  ;;  %1189 = vmatpush1.bf16.msra.mxu1 %v1188_v16 }
 0x105   : >> { %v1404_v42 = vunpack.i.h.bf16 %v1402_v39  ;;  %v1403_v43 = vunpack.i.l.bf16 %v1402_v39  ;;  %1190 = vmatprep.subr.bf16.mxu1 %v1504_v12 }
 0x106   : >> { %v1159_v45 = vpack.c.bf16 %v1394_v40, %v1393_v41 }
 0x107   : >> { %v1191_v46 = vpack.c.bf16 %v1404_v42, %v1403_v43  ;;  %v1412_v48 = vpop.permute.xlu1 %1411 }
 0x108   : >> { %v1407_v50 = vpop.permute.xlu0 %1406  ;;  %v1414_v51 = vunpack.i.h.bf16 %v1412_v48  ;;  %v1413_v52 = vunpack.i.l.bf16 %v1412_v48  ;;  %1160 = vmatpush3.bf16.msra.mxu0 %v1159_v45 }
 0x109   : >> { %v1409_v53 = vunpack.i.h.bf16 %v1407_v50  ;;  %v1408_v54 = vunpack.i.l.bf16 %v1407_v50  ;;  %1192 = vmatpush1.bf16.msra.mxu1 %v1191_v46  ;;  %1162 = vmatprep.subr.bf16.mxu0 %v1726_v47  ;;  %v1177_v46 = vpack.c.bf16 %v1604_v14, %v1601_v13  ;;  %v392_v13 = vld [vmem:[%s1813_s1] sm:$0xff] }
 0x10a   : >> { %1193 = vmatprep.subr.bf16.mxu1 %v1504_v12  ;;  %v1194_v55 = vpack.c.bf16 %v1414_v51, %v1413_v52 }
 0x10b   : >> { %v1163_v56 = vpack.c.bf16 %v1409_v53, %v1408_v54  ;;  %v1417_v57 = vpop.permute.xlu1 %1416  ;;  %v1745_v54 = vld [vmem:[%s1813_s1 + $0x10] sm:$0xff] }
 0x10c   : >> { %v1422_v60 = vpop.permute.xlu0 %1421  ;;  %v1419_v61 = vunpack.i.h.bf16 %v1417_v57  ;;  %v1418_v62 = vunpack.i.l.bf16 %v1417_v57 }
 0x10d   : >> { %v1424_v0 = vunpack.i.h.bf16 %v1422_v60  ;;  %v1423_v3 = vunpack.i.l.bf16 %v1422_v60  ;;  %1195 = vmatpush1.bf16.msra.mxu1 %v1194_v55  ;;  %1164 = vmatpush3.bf16.msra.mxu0 %v1163_v56 }
 0x10e   : >> { %1196 = vmatprep.subr.bf16.mxu1 %v1504_v12  ;;  %v1731_v6 = vpack.c.bf16 %v1419_v61, %v1418_v62 }
 0x10f   : >> { %v1167_v18 = vpack.c.bf16 %v1424_v0, %v1423_v3  ;;  %v1427_v20 = vpop.permute.xlu1 %1426 }
 0x110   : >> { %v1442_v22 = vpop.permute.xlu0 %1441  ;;  %v1429_v23 = vunpack.i.h.bf16 %v1427_v20  ;;  %v1428_v24 = vunpack.i.l.bf16 %v1427_v20  ;;  %1166 = vmatprep.subr.bf16.mxu0 %v1731_v6 }
 0x111   : >> { %v1444_v28 = vunpack.i.h.bf16 %v1442_v22  ;;  %v1443_v29 = vunpack.i.l.bf16 %v1442_v22  ;;  %1198 = vmatpush1.bf16.msra.mxu1 %v1673_v49  ;;  %1168 = vmatpush3.bf16.msra.mxu0 %v1167_v18 }
 0x112   : >> { %1199 = vmatprep.subr.bf16.mxu1 %v1504_v12  ;;  %v1169_v30 = vpack.c.bf16 %v1429_v23, %v1428_v24 }
 0x113   : >> { %v1200_v31 = vpack.c.bf16 %v1444_v28, %v1443_v29  ;;  %v1432_v32 = vpop.permute.xlu1 %1431 }
 0x114   : >> { %v1447_v33 = vpop.permute.xlu0 %1446  ;;  %v1434_v16 = vunpack.i.h.bf16 %v1432_v32  ;;  %v1433_v34 = vunpack.i.l.bf16 %v1432_v32  ;;  %1170 = vmatprep.subr.bf16.mxu0 %v1169_v30 }
 0x115   : >> { %v1449_v35 = vunpack.i.h.bf16 %v1447_v33  ;;  %v1448_v36 = vunpack.i.l.bf16 %v1447_v33  ;;  %1201 = vmatpush1.bf16.msra.mxu1 %v1200_v31  ;;  %1172 = vmatpush3.bf16.msra.mxu0 %v1171_v27 }
 0x116   : >> { %1202 = vmatprep.subr.bf16.mxu1 %v1504_v12  ;;  %v1173_v39 = vpack.c.bf16 %v1434_v16, %v1433_v34 }
 0x117   : >> { %v1203_v40 = vpack.c.bf16 %v1449_v35, %v1448_v36  ;;  %v1437_v41 = vpop.permute.xlu1 %1436 }
 0x118   : >> { %v1452_v42 = vpop.permute.xlu0 %1451  ;;  %v1439_v43 = vunpack.i.h.bf16 %v1437_v41  ;;  %v1438_v45 = vunpack.i.l.bf16 %v1437_v41  ;;  %1174 = vmatprep.subr.bf16.mxu0 %v1173_v39 }
 0x119   : >> { %v1454_v25 = vunpack.i.h.bf16 %v1452_v42  ;;  %v1453_v26 = vunpack.i.l.bf16 %v1452_v42  ;;  %1204 = vmatpush1.bf16.msra.mxu1 %v1203_v40 }
 0x11a   : >> { %1205 = vmatprep.subr.bf16.mxu1 %v1504_v12  ;;  %v1175_v48 = vpack.c.bf16 %v1439_v43, %v1438_v45 }
 0x11b   : >> { %v1206_v50 = vpack.c.bf16 %v1454_v25, %v1453_v26  ;;  %v1457_v51 = vpop.permute.xlu1 %1456 }
 0x11c   : >> { %v1459_v52 = vunpack.i.h.bf16 %v1457_v51  ;;  %v1458_v53 = vunpack.i.l.bf16 %v1457_v51  ;;  %1176 = vmatpush3.bf16.msra.mxu0 %v1175_v48  ;;  %v1462_v14 = vpop.permute.xlu0 %1461 }
 0x11d   : >> { %1207 = vmatpush1.bf16.msra.mxu1 %v1206_v50  ;;  %1178 = vmatprep.subr.bf16.mxu0 %v1177_v46  ;;  %v1463_v56 = vunpack.i.l.bf16 %v1462_v14 }
 0x11e   : >> { %1240 = vmatprep.subr.bf16.mxu1 %v1504_v12  ;;  %v1179_v55 = vpack.c.bf16 %v1459_v52, %v1458_v53 }
 0x11f   : >> { %v1467_v57 = vpop.permute.xlu1 %1466 }
 0x120   : >> { %535 = vmatmul.mubr.f32.vlgmr.msra.gmra.mrb[0].mxu1 %v1745_v54  ;;  %1180 = vmatpush3.bf16.msra.mxu0 %v1179_v55  ;;  %v1469_v62 = vunpack.i.h.bf16 %v1467_v57  ;;  %v1468_v0 = vunpack.i.l.bf16 %v1467_v57 }
 0x121   : >> { %1242 = vmatpush1.bf16.msra.mxu1 %v1673_v49  ;;  %1209 = vmatprep.subr.bf16.mxu0 %v1169_v30  ;;  %v1464_v49 = vunpack.i.h.bf16 %v1462_v14 }
 0x122   : >> { %1243 = vmatprep.subr.bf16.mxu1 %v1504_v12  ;;  %1026 = vmatprep.mubr.msk.f32.mxu1 %vm396_vm8, %v1697_v8  ;;  %v1472_v8 = vpop.permute.xlu0 %1471  ;;  %v1232_v22 = vpack.c.bf16 %v1469_v62, %v1468_v0 }
 0x123   : >> { %465 = vmatmul.mubr.f32.vlgmr.msra.gmra.mrb[0].mxu0 %v392_v13  ;;  %v1253_v60 = vpack.c.bf16 %v1464_v49, %v1463_v56  ;;  %v1473_v61 = vunpack.i.l.bf16 %v1472_v8  ;;  %v1477_v3 = vpop.permute.xlu1 %1476 }
 0x124   : >> { %1211 = vmatpush3.bf16.msra.mxu0 %v1171_v27  ;;  %663 = vmatprep.mubr.f32.mxu0 %v1708_v21  ;;  %v1474_v21 = vunpack.i.h.bf16 %v1472_v8  ;;  %v1479_v18 = vunpack.i.h.bf16 %v1477_v3  ;;  %v1478_v20 = vunpack.i.l.bf16 %v1477_v3 }
 0x125   : >> { %1245 = vmatpush1.bf16.msra.mxu1 %v1200_v31  ;;  %1213 = vmatprep.subr.bf16.mxu0 %v1173_v39 }
 0x126   : >> { %1246 = vmatprep.subr.bf16.mxu1 %v1504_v12 }
 0x128   : >> { %1215 = vmatpush3.bf16.msra.mxu0 %v1175_v48 }
 0x129   : >> { %1248 = vmatpush1.bf16.msra.mxu1 %v1203_v40  ;;  %1217 = vmatprep.subr.bf16.mxu0 %v1177_v46 }
 0x12a   : >> { %1249 = vmatprep.subr.bf16.mxu1 %v1504_v12 }
 0x12c   : >> { %1219 = vmatpush3.bf16.msra.mxu0 %v1179_v55 }
 0x12d   : >> { %1251 = vmatpush1.bf16.msra.mxu1 %v1206_v50  ;;  %1221 = vmatprep.subr.bf16.mxu0 %v1662_v37  ;;  %v1259_v37 = vpack.c.bf16 %v1474_v21, %v1473_v61 }
 0x12e   : >> { %1252 = vmatprep.subr.bf16.mxu1 %v1504_v12 }
 0x130   : >> { %1223 = vmatpush3.bf16.msra.mxu0 %v1683_v59  ;;  %v1482_v59 = vpop.permute.xlu0 %1481 }
 0x131   : >> { %1254 = vmatpush1.bf16.msra.mxu1 %v1253_v60  ;;  %1225 = vmatprep.subr.bf16.mxu0 %v1669_v44  ;;  %v1262_v44 = vpack.c.bf16 %v1479_v18, %v1478_v20  ;;  %v1484_v23 = vunpack.i.h.bf16 %v1482_v59  ;;  %v1483_v24 = vunpack.i.l.bf16 %v1482_v59 }
 0x132   : >> { %1255 = vmatprep.subr.bf16.mxu1 %v1504_v12 }
 0x134   : >> { %1227 = vmatpush3.bf16.msra.mxu0 %v1689_v63  ;;  %v1265_v63 = vpack.c.bf16 %v1484_v23, %v1483_v24  ;;  %v743_v36 = vpop.permute.xlu1 %742 }
 0x135   : >> { %1257 = vmatpush1.bf16.msra.mxu1 %v1681_v58  ;;  %1229 = vmatprep.subr.bf16.mxu0 %v1664_v38  ;;  %v1236_v58 = vpack.c.bf16 %v1614_v17, %v1607_v15  ;;  %v1511_v15 = vmov 1.0|1.0   ;;  %v1512_v17 = vmov 1.0  }
 0x136   : >> { %1258 = vmatprep.subr.bf16.mxu1 %v1504_v12  ;;  %v1271_v38 = vpack.c.bf16 %v1576_v9, %v1512_v17  ;;  %v1278_v41 = vpack.c.bf16 %v1588_v11, %v1512_v17 }
 0x138   : >> { %1231 = vmatpush3.bf16.msra.mxu0 %v1699_v19  ;;  %v1514_v19 = vmov 0.0  }
 0x139   : >> { %1260 = vmatpush1.bf16.msra.mxu1 %v1259_v37  ;;  %1233 = vmatprep.subr.bf16.mxu0 %v1232_v22 }
 0x13a   : >> { %1261 = vmatprep.subr.bf16.mxu1 %v1504_v12 }
 0x13c   : >> { %1235 = vmatpush3.bf16.msra.mxu0 %v1726_v47 }
 0x13d   : >> { %1263 = vmatpush1.bf16.msra.mxu1 %v1262_v44  ;;  %1237 = vmatprep.subr.bf16.mxu0 %v1236_v58 }
 0x13e   : >> { %1264 = vmatprep.subr.bf16.mxu1 %v1504_v12 }
 0x140   : >> { %1239 = vmatpush3.bf16.msra.mxu0 %v1731_v6 }
 0x141   : >> { %1266 = vmatpush1.bf16.msra.mxu1 %v1265_v63  ;;  %1267 = vmatprep.subr.bf16.mxu0 %v1504_v12 }
 0x143   : >> { %664 = vmatmul.mubr.f32.vlgmr.msra.gmra.mrb[2].mxu0 %v392_v13 }
 0x144   : >> { %734 = vmatmul.mubr.f32.vlgmr.msra.gmra.mrb[2].mxu1 %v1745_v54  ;;  %1269 = vmatpush3.bf16.msk.msra.mxu0 %vm1268_vm9, %v1511_v15 }
 0x145   : >> { %1270 = vmatprep.subr.bf16.mxu0 %v1504_v12  ;;  %1135 = vmatprep.mubr.msk.f32.mxu0 %vm1513_vm12, %v1514_v19 }
 0x148   : >> { %1273 = vmatpush3.bf16.msk.msra.mxu0 %vm1272_vm11, %v1271_v38 }
 0x149   : >> { %1274 = vmatprep.subr.bf16.mxu0 %v1504_v12 }
 0x1f3   : >> { %v536_v47 = vpop.f32.mrb[0].mxu1 }
 0x1f4   : >> { %v538_v6 = vpop.f32.mrb[1].mxu1 }
 0x1f6   : >> { %v1079_v28 = vpop.f32.mrb[0].mxu0 }
 0x1f7   : >> { %v1080_v29 = vpop.f32.mrb[1].mxu0 }
 0x1f8   : >> { %v1081_v27 = vadd.f32 %v1080_v29, %v1079_v28 }
 0x1fa   : >> { %v537_v30 = vadd.f32 %v1081_v27, %v536_v47 }
 0x216   : >> { %v1114_v31 = vpop.f32.mrb[2].mxu0 }
 0x217   : >> { %v735_v32 = vpop.f32.mrb[2].mxu1  ;;  %v1115_v33 = vpop.f32.mrb[3].mxu0 }
 0x218   : >> { %v737_v16 = vpop.f32.mrb[3].mxu1  ;;  %v1116_v34 = vadd.f32 %v1115_v33, %v1114_v31 }
 0x21a   : >> { %v736_v35 = vadd.f32 %v1116_v34, %v735_v32 }
 0x21c   : >> { %v739_v39 = vmax.f32 %v537_v30, %v736_v35 }
 0x21e   : >> { %v745_v40 = vadd.f32 %v743_v36, %v739_v39 }
 0x220   : >> { %1136 = vmatmul.mubr.msk.f32.vlgmr.msra.gmra.mrb[4].mxu0 %vm746_vm13, %v745_v40 }
 0x221   : >> { %1276 = vmatpush3.bf16.msk.msra.mxu0 %vm1275_vm14, %v1511_v15  ;;  %1146 = vmatprep.mubr.msk.f32.mxu0 %vm1513_vm12, %v1514_v19 }
 0x222   : >> { %1277 = vmatprep.subr.bf16.mxu0 %v1504_v12 }
 0x225   : >> { %1280 = vmatpush3.bf16.msk.msra.mxu0 %vm1279_vm15, %v1278_v41 }
 0x228   : >> { %1147 = vmatmul.mubr.msk.f32.vlgmr.msra.gmra.mrb[6].mxu0 %vm746_vm13, %v745_v40 }
 0x2f3   : >> { %v820_v42 = vpop.f32.mrb[4].mxu0 }
 0x2f4   : >> { %v1137_v43 = vpop.f32.mrb[5].mxu0 }
 0x2fa   : > { %209 = sbr.rel (!%p207_p4) target bundleno = 17 (0x11), region = 76 }
 0x2fb   : >> { %v893_v45 = vpop.f32.mrb[6].mxu0 }
 0x2fc   : >> { %v897_v25 = vmax.f32 %v820_v42, %v893_v45  ;;  %v1148_v26 = vpop.f32.mrb[7].mxu0 }
 0x2fe   : >> { %v898_v46 = vmax.f32 %v897_v25, 0.0 }
 0x300   : >> { %902 = vst.msk [vmem:[%s900_s15] sm:$0xff] %vm901_vm3, %v898_v46 }
 0x301 PF: > { %s13_s12 = sadd.s32 1, %s1497_s12  }
 0x302   : > { %p10_p5 = scmp.ge.s32.totalorder %s13_s12, 4  }
 0x304   :  { %12 = sbr.rel (!%p10_p5) target bundleno = 1 (0x1), region = 87 }

// kernel: cnnet_forward.7
= control target key start
LH: loop header
LB: loop body
LE: loop exit
PB: predicated region body
PF: predicated region fallthrough
CT: control target
= control target key end

     0   :  { %s6386_s0 = inlined_call_operand.vmem [shape: f32[2,1568], index: 0, kind: input, shape index: {}]   ;;  %s6387_s1 = inlined_call_operand.vmem [shape: f32[1568,512], index: 1, kind: input, shape index: {}]   ;;  %s6388_s2 = inlined_call_operand.vmem [shape: f32[1,512], index: 2, kind: input, shape index: {}]   ;;  %s6389_s3 = inlined_call_operand.vmem [shape: f32[512,256], index: 3, kind: input, shape index: {}]   ;;  %s6390_s4 = inlined_call_operand.vmem [shape: f32[1,256], index: 4, kind: input, shape index: {}]   ;;  %s6391_s5 = inlined_call_operand.vmem [shape: f32[256,128], index: 5, kind: input, shape index: {}]   ;;  %s6392_s6 = inlined_call_operand.vmem [shape: f32[1,128], index: 6, kind: input, shape index: {}]   ;;  %s6393_s7 = inlined_call_operand.hbm [shape: f32[2,128], index: 7, kind: output, shape index: {}]  }
   0x1   :  { %v32_v0 = vld [vmem:[%s6387_s1 + $0x8] sm:$0xff]  ;;  %v31_v5 = vld [vmem:[%s6387_s1] sm:$0xff] }
   0x2   :  { %v36_v1 = vld [vmem:[%s6387_s1 + $0x28] sm:$0xff]  ;;  %v35_v6 = vld [vmem:[%s6387_s1 + $0x20] sm:$0xff] }
   0x3   :  { %v160_v2 = vld [vmem:[%s6387_s1 + $0x408] sm:$0xff]  ;;  %v2359_v3 = vpack.c.bf16 %v36_v1, %v32_v0  ;;  %v2361_v8 = vpack.c.bf16 %v35_v6, %v31_v5  ;;  %v159_v9 = vld [vmem:[%s6387_s1 + $0x400] sm:$0xff] }
   0x4   :  { %v164_v4 = vld [vmem:[%s6387_s1 + $0x428] sm:$0xff]  ;;  %v163_v10 = vld [vmem:[%s6387_s1 + $0x420] sm:$0xff] }
   0x5   :  { %v2423_v7 = vpack.c.bf16 %v164_v4, %v160_v2  ;;  %v40_v11 = vld [vmem:[%s6387_s1 + $0x48] sm:$0xff]  ;;  %2360 = vmatprep.subr.bf16.mxu1 %v2359_v3  ;;  %v2425_v12 = vpack.c.bf16 %v163_v10, %v159_v9  ;;  %v39_v18 = vld [vmem:[%s6387_s1 + $0x40] sm:$0xff] }
   0x6   :  { %v44_v13 = vld [vmem:[%s6387_s1 + $0x68] sm:$0xff]  ;;  %2362 = vmatpush1.bf16.msra.mxu1 %v2361_v8  ;;  %v43_v19 = vld [vmem:[%s6387_s1 + $0x60] sm:$0xff] }
   0x7   :  { %v168_v14 = vld [vmem:[%s6387_s1 + $0x448] sm:$0xff]  ;;  %2424 = vmatprep.subr.bf16.mxu0 %v2423_v7  ;;  %v2363_v16 = vpack.c.bf16 %v44_v13, %v40_v11  ;;  %v167_v20 = vld [vmem:[%s6387_s1 + $0x440] sm:$0xff]  ;;  %v2365_v21 = vpack.c.bf16 %v43_v19, %v39_v18 }
   0x8   :  { %v172_v15 = vld [vmem:[%s6387_s1 + $0x468] sm:$0xff]  ;;  %2426 = vmatpush1.bf16.msra.mxu0 %v2425_v12  ;;  %v171_v22 = vld [vmem:[%s6387_s1 + $0x460] sm:$0xff] }
   0x9   :  { %v2427_v17 = vpack.c.bf16 %v172_v15, %v168_v14  ;;  %v48_v23 = vld [vmem:[%s6387_s1 + $0x88] sm:$0xff]  ;;  %2364 = vmatprep.subr.bf16.mxu1 %v2363_v16  ;;  %v2429_v25 = vpack.c.bf16 %v171_v22, %v167_v20  ;;  %v47_v29 = vld [vmem:[%s6387_s1 + $0x80] sm:$0xff] }
   0xa   :  { %v52_v24 = vld [vmem:[%s6387_s1 + $0xa8] sm:$0xff]  ;;  %v51_v31 = vld [vmem:[%s6387_s1 + $0xa0] sm:$0xff]  ;;  %2366 = vmatpush1.bf16.msra.mxu1 %v2365_v21 }
   0xb   :  { %2428 = vmatprep.subr.bf16.mxu0 %v2427_v17  ;;  %v2367_v26 = vpack.c.bf16 %v52_v24, %v48_v23  ;;  %v176_v27 = vld [vmem:[%s6387_s1 + $0x488] sm:$0xff]  ;;  %v175_v32 = vld [vmem:[%s6387_s1 + $0x480] sm:$0xff]  ;;  %v2369_v34 = vpack.c.bf16 %v51_v31, %v47_v29 }
   0xc   :  { %v180_v28 = vld [vmem:[%s6387_s1 + $0x4a8] sm:$0xff]  ;;  %v179_v33 = vld [vmem:[%s6387_s1 + $0x4a0] sm:$0xff]  ;;  %2430 = vmatpush1.bf16.msra.mxu0 %v2429_v25 }
   0xd   :  { %v2431_v30 = vpack.c.bf16 %v180_v28, %v176_v27  ;;  %v56_v35 = vld [vmem:[%s6387_s1 + $0xc8] sm:$0xff]  ;;  %2368 = vmatprep.subr.bf16.mxu1 %v2367_v26  ;;  %v2433_v38 = vpack.c.bf16 %v179_v33, %v175_v32  ;;  %v55_v41 = vld [vmem:[%s6387_s1 + $0xc0] sm:$0xff] }
   0xe   :  { %v60_v36 = vld [vmem:[%s6387_s1 + $0xe8] sm:$0xff]  ;;  %v59_v42 = vld [vmem:[%s6387_s1 + $0xe0] sm:$0xff]  ;;  %2370 = vmatpush1.bf16.msra.mxu1 %v2369_v34 }
   0xf   :  { %v184_v37 = vld [vmem:[%s6387_s1 + $0x4c8] sm:$0xff]  ;;  %v2371_v39 = vpack.c.bf16 %v60_v36, %v56_v35  ;;  %2432 = vmatprep.subr.bf16.mxu0 %v2431_v30  ;;  %v183_v44 = vld [vmem:[%s6387_s1 + $0x4c0] sm:$0xff]  ;;  %v2373_v50 = vpack.c.bf16 %v59_v42, %v55_v41 }
  0x10   :  { %v188_v40 = vld [vmem:[%s6387_s1 + $0x4e8] sm:$0xff]  ;;  %v187_v45 = vld [vmem:[%s6387_s1 + $0x4e0] sm:$0xff]  ;;  %2434 = vmatpush1.bf16.msra.mxu0 %v2433_v38 }
  0x11   :  { %v2435_v43 = vpack.c.bf16 %v188_v40, %v184_v37  ;;  %v64_v46 = vld [vmem:[%s6387_s1 + $0x108] sm:$0xff]  ;;  %2372 = vmatprep.subr.bf16.mxu1 %v2371_v39  ;;  %v2437_v51 = vpack.c.bf16 %v187_v45, %v183_v44  ;;  %v63_v53 = vld [vmem:[%s6387_s1 + $0x100] sm:$0xff] }
  0x12   :  { %v68_v47 = vld [vmem:[%s6387_s1 + $0x128] sm:$0xff]  ;;  %v67_v54 = vld [vmem:[%s6387_s1 + $0x120] sm:$0xff]  ;;  %2374 = vmatpush1.bf16.msra.mxu1 %v2373_v50 }
  0x13   :  { %v192_v48 = vld [vmem:[%s6387_s1 + $0x508] sm:$0xff]  ;;  %v2375_v52 = vpack.c.bf16 %v68_v47, %v64_v46  ;;  %v191_v55 = vld [vmem:[%s6387_s1 + $0x500] sm:$0xff]  ;;  %2436 = vmatprep.subr.bf16.mxu0 %v2435_v43  ;;  %v2377_v62 = vpack.c.bf16 %v67_v54, %v63_v53  ;;  %v817_v46 = vlaneseq  ;;  %v3365_v47 = vmov 1983009808  }
  0x14   :  { %v196_v49 = vld [vmem:[%s6387_s1 + $0x528] sm:$0xff]  ;;  %v195_v57 = vld [vmem:[%s6387_s1 + $0x520] sm:$0xff]  ;;  %2438 = vmatpush1.bf16.msra.mxu0 %v2437_v51 }
  0x15   :  { %v2439_v56 = vpack.c.bf16 %v196_v49, %v192_v48  ;;  %v72_v58 = vld [vmem:[%s6387_s1 + $0x148] sm:$0xff]  ;;  %2376 = vmatprep.subr.bf16.mxu1 %v2375_v52  ;;  %v2441_v63 = vpack.c.bf16 %v195_v57, %v191_v55  ;;  %v71_v1 = vld [vmem:[%s6387_s1 + $0x140] sm:$0xff]  ;;  %v843_v48 = vunpack.c.l.s4 %v3365_v47 }
  0x16   :  { %v76_v59 = vld [vmem:[%s6387_s1 + $0x168] sm:$0xff]  ;;  %v75_v2 = vld [vmem:[%s6387_s1 + $0x160] sm:$0xff]  ;;  %2378 = vmatpush1.bf16.msra.mxu1 %v2377_v62 }
  0x17   :  { %v200_v60 = vld [vmem:[%s6387_s1 + $0x548] sm:$0xff]  ;;  %v2379_v0 = vpack.c.bf16 %v76_v59, %v72_v58  ;;  %v199_v3 = vld [vmem:[%s6387_s1 + $0x540] sm:$0xff]  ;;  %2440 = vmatprep.subr.bf16.mxu0 %v2439_v56  ;;  %v2381_v10 = vpack.c.bf16 %v75_v2, %v71_v1  ;;  %v844_v62 = vunpack.c.0.s8 %v843_v48 }
  0x18   :  { %v204_v61 = vld [vmem:[%s6387_s1 + $0x568] sm:$0xff]  ;;  %v203_v5 = vld [vmem:[%s6387_s1 + $0x560] sm:$0xff]  ;;  %2442 = vmatpush1.bf16.msra.mxu0 %v2441_v63 }
  0x19   :  { %v2443_v4 = vpack.c.bf16 %v204_v61, %v200_v60  ;;  %v80_v6 = vld [vmem:[%s6387_s1 + $0x188] sm:$0xff]  ;;  %2380 = vmatprep.subr.bf16.mxu1 %v2379_v0  ;;  %v2445_v11 = vpack.c.bf16 %v203_v5, %v199_v3  ;;  %v79_v13 = vld [vmem:[%s6387_s1 + $0x180] sm:$0xff]  ;;  %v3660_v61 = vshrl.u32 %v817_v46, 7 }
  0x1a   :  { %v84_v7 = vld [vmem:[%s6387_s1 + $0x1a8] sm:$0xff]  ;;  %v83_v14 = vld [vmem:[%s6387_s1 + $0x1a0] sm:$0xff]  ;;  %2382 = vmatpush1.bf16.msra.mxu1 %v2381_v10 }
  0x1b   :  { %v208_v8 = vld [vmem:[%s6387_s1 + $0x588] sm:$0xff]  ;;  %v2383_v12 = vpack.c.bf16 %v84_v7, %v80_v6  ;;  %v207_v15 = vld [vmem:[%s6387_s1 + $0x580] sm:$0xff]  ;;  %2444 = vmatprep.subr.bf16.mxu0 %v2443_v4  ;;  %v2385_v22 = vpack.c.bf16 %v83_v14, %v79_v13 }
  0x1c   :  { %v212_v9 = vld [vmem:[%s6387_s1 + $0x5a8] sm:$0xff]  ;;  %v211_v17 = vld [vmem:[%s6387_s1 + $0x5a0] sm:$0xff]  ;;  %2446 = vmatpush1.bf16.msra.mxu0 %v2445_v11  ;;  %v3687_v11 = vsub.s32 %v844_v62, %v3660_v61 }
  0x1d   :  { %v2447_v16 = vpack.c.bf16 %v212_v9, %v208_v8  ;;  %v88_v18 = vld [vmem:[%s6387_s1 + $0x1c8] sm:$0xff]  ;;  %2384 = vmatprep.subr.bf16.mxu1 %v2383_v12  ;;  %v2449_v23 = vpack.c.bf16 %v211_v17, %v207_v15  ;;  %v87_v25 = vld [vmem:[%s6387_s1 + $0x1c0] sm:$0xff] }
  0x1e   :  { %v92_v19 = vld [vmem:[%s6387_s1 + $0x1e8] sm:$0xff]  ;;  %v91_v26 = vld [vmem:[%s6387_s1 + $0x1e0] sm:$0xff]  ;;  %2386 = vmatpush1.bf16.msra.mxu1 %v2385_v22 }
  0x1f   :  { %v216_v20 = vld [vmem:[%s6387_s1 + $0x5c8] sm:$0xff]  ;;  %v2387_v24 = vpack.c.bf16 %v92_v19, %v88_v18  ;;  %v215_v27 = vld [vmem:[%s6387_s1 + $0x5c0] sm:$0xff]  ;;  %2448 = vmatprep.subr.bf16.mxu0 %v2447_v16  ;;  %v2389_v34 = vpack.c.bf16 %v91_v26, %v87_v25 }
  0x20   :  { %v220_v21 = vld [vmem:[%s6387_s1 + $0x5e8] sm:$0xff]  ;;  %v219_v29 = vld [vmem:[%s6387_s1 + $0x5e0] sm:$0xff]  ;;  %2450 = vmatpush1.bf16.msra.mxu0 %v2449_v23 }
  0x21   :  { %v2451_v28 = vpack.c.bf16 %v220_v21, %v216_v20  ;;  %v96_v30 = vld [vmem:[%s6387_s1 + $0x208] sm:$0xff]  ;;  %2388 = vmatprep.subr.bf16.mxu1 %v2387_v24  ;;  %v2453_v35 = vpack.c.bf16 %v219_v29, %v215_v27  ;;  %v95_v37 = vld [vmem:[%s6387_s1 + $0x200] sm:$0xff] }
  0x22   :  { %v100_v31 = vld [vmem:[%s6387_s1 + $0x228] sm:$0xff]  ;;  %v99_v38 = vld [vmem:[%s6387_s1 + $0x220] sm:$0xff]  ;;  %2390 = vmatpush1.bf16.msra.mxu1 %v2389_v34 }
  0x23   :  { %v224_v32 = vld [vmem:[%s6387_s1 + $0x608] sm:$0xff]  ;;  %v2391_v36 = vpack.c.bf16 %v100_v31, %v96_v30  ;;  %v223_v39 = vld [vmem:[%s6387_s1 + $0x600] sm:$0xff]  ;;  %2452 = vmatprep.subr.bf16.mxu0 %v2451_v28  ;;  %v2393_v49 = vpack.c.bf16 %v99_v38, %v95_v37 }
  0x24   :  { %v228_v33 = vld [vmem:[%s6387_s1 + $0x628] sm:$0xff]  ;;  %v227_v41 = vld [vmem:[%s6387_s1 + $0x620] sm:$0xff]  ;;  %2454 = vmatpush1.bf16.msra.mxu0 %v2453_v35 }
  0x25   :  { %v2455_v40 = vpack.c.bf16 %v228_v33, %v224_v32  ;;  %v104_v42 = vld [vmem:[%s6387_s1 + $0x248] sm:$0xff]  ;;  %2392 = vmatprep.subr.bf16.mxu1 %v2391_v36  ;;  %v2457_v50 = vpack.c.bf16 %v227_v41, %v223_v39  ;;  %v103_v52 = vld [vmem:[%s6387_s1 + $0x240] sm:$0xff] }
  0x26   :  { %v108_v43 = vld [vmem:[%s6387_s1 + $0x268] sm:$0xff]  ;;  %v107_v53 = vld [vmem:[%s6387_s1 + $0x260] sm:$0xff]  ;;  %2394 = vmatpush1.bf16.msra.mxu1 %v2393_v49 }
  0x27   :  { %v232_v44 = vld [vmem:[%s6387_s1 + $0x648] sm:$0xff]  ;;  %v2395_v51 = vpack.c.bf16 %v108_v43, %v104_v42  ;;  %v231_v54 = vld [vmem:[%s6387_s1 + $0x640] sm:$0xff]  ;;  %2456 = vmatprep.subr.bf16.mxu0 %v2455_v40  ;;  %v2397_v63 = vpack.c.bf16 %v107_v53, %v103_v52 }
  0x28   :  { %v236_v45 = vld [vmem:[%s6387_s1 + $0x668] sm:$0xff]  ;;  %v235_v56 = vld [vmem:[%s6387_s1 + $0x660] sm:$0xff]  ;;  %2458 = vmatpush1.bf16.msra.mxu0 %v2457_v50 }
  0x29   :  { %v2459_v55 = vpack.c.bf16 %v236_v45, %v232_v44  ;;  %v112_v57 = vld [vmem:[%s6387_s1 + $0x288] sm:$0xff]  ;;  %2396 = vmatprep.subr.bf16.mxu1 %v2395_v51  ;;  %v2461_v0 = vpack.c.bf16 %v235_v56, %v231_v54  ;;  %v111_v2 = vld [vmem:[%s6387_s1 + $0x280] sm:$0xff] }
  0x2a   :  { %v116_v58 = vld [vmem:[%s6387_s1 + $0x2a8] sm:$0xff]  ;;  %v115_v3 = vld [vmem:[%s6387_s1 + $0x2a0] sm:$0xff]  ;;  %2398 = vmatpush1.bf16.msra.mxu1 %v2397_v63 }
  0x2b   :  { %v240_v59 = vld [vmem:[%s6387_s1 + $0x688] sm:$0xff]  ;;  %v2399_v1 = vpack.c.bf16 %v116_v58, %v112_v57  ;;  %v239_v4 = vld [vmem:[%s6387_s1 + $0x680] sm:$0xff]  ;;  %2460 = vmatprep.subr.bf16.mxu0 %v2459_v55  ;;  %v2401_v12 = vpack.c.bf16 %v115_v3, %v111_v2 }
  0x2c   :  { %v244_v60 = vld [vmem:[%s6387_s1 + $0x6a8] sm:$0xff]  ;;  %v243_v6 = vld [vmem:[%s6387_s1 + $0x6a0] sm:$0xff]  ;;  %2462 = vmatpush1.bf16.msra.mxu0 %v2461_v0 }
  0x2d   :  { %v2463_v5 = vpack.c.bf16 %v244_v60, %v240_v59  ;;  %v120_v7 = vld [vmem:[%s6387_s1 + $0x2c8] sm:$0xff]  ;;  %v119_v13 = vld [vmem:[%s6387_s1 + $0x2c0] sm:$0xff]  ;;  %2400 = vmatprep.subr.bf16.mxu1 %v2399_v1  ;;  %v2465_v14 = vpack.c.bf16 %v243_v6, %v239_v4 }
  0x2e   :  { %v124_v8 = vld [vmem:[%s6387_s1 + $0x2e8] sm:$0xff]  ;;  %v123_v16 = vld [vmem:[%s6387_s1 + $0x2e0] sm:$0xff]  ;;  %2402 = vmatpush1.bf16.msra.mxu1 %v2401_v12  ;;  %v34_v12 = vld [vmem:[%s6387_s1 + $0x18] sm:$0xff] }
  0x2f   :  { %v248_v9 = vld [vmem:[%s6387_s1 + $0x6c8] sm:$0xff]  ;;  %v2403_v15 = vpack.c.bf16 %v124_v8, %v120_v7  ;;  %v247_v17 = vld [vmem:[%s6387_s1 + $0x6c0] sm:$0xff]  ;;  %2464 = vmatprep.subr.bf16.mxu0 %v2463_v5  ;;  %v2405_v27 = vpack.c.bf16 %v123_v16, %v119_v13  ;;  %v38_v13 = vld [vmem:[%s6387_s1 + $0x38] sm:$0xff] }
  0x30   :  { %v252_v10 = vld [vmem:[%s6387_s1 + $0x6e8] sm:$0xff]  ;;  %v251_v18 = vld [vmem:[%s6387_s1 + $0x6e0] sm:$0xff]  ;;  %2466 = vmatpush1.bf16.msra.mxu0 %v2465_v14 }
  0x31   :  { %v2467_v19 = vpack.c.bf16 %v252_v10, %v248_v9  ;;  %v128_v20 = vld [vmem:[%s6387_s1 + $0x308] sm:$0xff]  ;;  %v27_v22 = vld [vmem:[%s6386_s0] sm:$0xff]  ;;  %v2469_v28 = vpack.c.bf16 %v251_v18, %v247_v17  ;;  %2404 = vmatprep.subr.bf16.mxu1 %v2403_v15  ;;  %v2751_v18 = vpack.c.bf16 %v38_v13, %v34_v12  ;;  %v74_v13 = vld [vmem:[%s6387_s1 + $0x158] sm:$0xff] }
  0x32   :  { %v132_v21 = vld [vmem:[%s6387_s1 + $0x328] sm:$0xff]  ;;  %v3717_v25 = vrot.slane %v27_v22, %v3687_v11  ;;  %v841_v26 = vcombine.high %v27_v22, %v27_v22  ;;  %v127_v30 = vld [vmem:[%s6387_s1 + $0x300] sm:$0xff]  ;;  %2406 = vmatpush1.bf16.msra.mxu1 %v2405_v27 }
  0x33   :  { %v256_v23 = vld [vmem:[%s6387_s1 + $0x708] sm:$0xff]  ;;  %v2407_v29 = vpack.c.bf16 %v132_v21, %v128_v20  ;;  %v131_v31 = vld [vmem:[%s6387_s1 + $0x320] sm:$0xff]  ;;  %2468 = vmatprep.subr.bf16.mxu0 %v2467_v19  ;;  %v33_v20 = vld [vmem:[%s6387_s1 + $0x10] sm:$0xff] }
  0x34   :  { %v260_v24 = vld [vmem:[%s6387_s1 + $0x728] sm:$0xff]  ;;  %v255_v32 = vld [vmem:[%s6387_s1 + $0x700] sm:$0xff]  ;;  %v3730_v33 = vcombine.high %v3717_v25, %v3717_v25  ;;  %v3733_v34 = vrot.slane %v841_v26, %v3687_v11  ;;  %v2409_v42 = vpack.c.bf16 %v131_v31, %v127_v30  ;;  %2470 = vmatpush1.bf16.msra.mxu0 %v2469_v28  ;;  %v37_v21 = vld [vmem:[%s6387_s1 + $0x30] sm:$0xff] }
  0x35   :  { %v2471_v35 = vpack.c.bf16 %v260_v24, %v256_v23  ;;  %v259_v36 = vld [vmem:[%s6387_s1 + $0x720] sm:$0xff]  ;;  %v136_v37 = vld [vmem:[%s6387_s1 + $0x348] sm:$0xff]  ;;  %2408 = vmatprep.subr.bf16.mxu1 %v2407_v29  ;;  %v42_v24 = vld [vmem:[%s6387_s1 + $0x58] sm:$0xff]  ;;  %v2753_v29 = vpack.c.bf16 %v37_v21, %v33_v20 }
  0x36   :  { %v140_v38 = vld [vmem:[%s6387_s1 + $0x368] sm:$0xff]  ;;  %978 = vmatprep.mubr.f32.mxu1 %v3730_v33  ;;  %v3753_v41 = vcombine.high %v3733_v34, %v3733_v34  ;;  %v2473_v43 = vpack.c.bf16 %v259_v36, %v255_v32  ;;  %v135_v45 = vld [vmem:[%s6387_s1 + $0x340] sm:$0xff]  ;;  %2410 = vmatpush1.bf16.msra.mxu1 %v2409_v42  ;;  %v46_v26 = vld [vmem:[%s6387_s1 + $0x78] sm:$0xff] }
  0x37   :  { %v264_v39 = vld [vmem:[%s6387_s1 + $0x748] sm:$0xff]  ;;  %v2411_v44 = vpack.c.bf16 %v140_v38, %v136_v37  ;;  %v139_v46 = vld [vmem:[%s6387_s1 + $0x360] sm:$0xff]  ;;  %2472 = vmatprep.subr.bf16.mxu0 %v2471_v35  ;;  %v2755_v31 = vpack.c.bf16 %v46_v26, %v42_v24  ;;  %v41_v35 = vld [vmem:[%s6387_s1 + $0x50] sm:$0xff] }
  0x38   :  { %v268_v40 = vld [vmem:[%s6387_s1 + $0x768] sm:$0xff]  ;;  %v263_v47 = vld [vmem:[%s6387_s1 + $0x740] sm:$0xff]  ;;  %1049 = vmatprep.mubr.f32.mxu0 %v3753_v41  ;;  %v2413_v54 = vpack.c.bf16 %v139_v46, %v135_v45  ;;  %2474 = vmatpush1.bf16.msra.mxu0 %v2473_v43  ;;  %v45_v36 = vld [vmem:[%s6387_s1 + $0x70] sm:$0xff] }
  0x39   :  { %v2475_v48 = vpack.c.bf16 %v268_v40, %v264_v39  ;;  %v267_v49 = vld [vmem:[%s6387_s1 + $0x760] sm:$0xff]  ;;  %v144_v50 = vld [vmem:[%s6387_s1 + $0x388] sm:$0xff]  ;;  %2412 = vmatprep.subr.bf16.mxu1 %v2411_v44  ;;  %v50_v39 = vld [vmem:[%s6387_s1 + $0x98] sm:$0xff]  ;;  %v2757_v44 = vpack.c.bf16 %v45_v36, %v41_v35 }
  0x3a   :  { %v148_v51 = vld [vmem:[%s6387_s1 + $0x3a8] sm:$0xff]  ;;  %v2477_v55 = vpack.c.bf16 %v267_v49, %v263_v47  ;;  %v143_v57 = vld [vmem:[%s6387_s1 + $0x380] sm:$0xff]  ;;  %2414 = vmatpush1.bf16.msra.mxu1 %v2413_v54  ;;  %v54_v40 = vld [vmem:[%s6387_s1 + $0xb8] sm:$0xff] }
  0x3b   :  { %v272_v52 = vld [vmem:[%s6387_s1 + $0x788] sm:$0xff]  ;;  %v2415_v56 = vpack.c.bf16 %v148_v51, %v144_v50  ;;  %v147_v58 = vld [vmem:[%s6387_s1 + $0x3a0] sm:$0xff]  ;;  %2476 = vmatprep.subr.bf16.mxu0 %v2475_v48  ;;  %v2759_v46 = vpack.c.bf16 %v54_v40, %v50_v39  ;;  %v49_v48 = vld [vmem:[%s6387_s1 + $0x90] sm:$0xff] }
  0x3c   :  { %v276_v53 = vld [vmem:[%s6387_s1 + $0x7a8] sm:$0xff]  ;;  %v271_v59 = vld [vmem:[%s6387_s1 + $0x780] sm:$0xff]  ;;  %v2417_v3 = vpack.c.bf16 %v147_v58, %v143_v57  ;;  %2478 = vmatpush1.bf16.msra.mxu0 %v2477_v55  ;;  %v53_v49 = vld [vmem:[%s6387_s1 + $0xb0] sm:$0xff] }
  0x3d   :  { %v2479_v60 = vpack.c.bf16 %v276_v53, %v272_v52  ;;  %v275_v62 = vld [vmem:[%s6387_s1 + $0x7a0] sm:$0xff]  ;;  %v152_v63 = vld [vmem:[%s6387_s1 + $0x3c8] sm:$0xff]  ;;  %2416 = vmatprep.subr.bf16.mxu1 %v2415_v56  ;;  %v58_v52 = vld [vmem:[%s6387_s1 + $0xd8] sm:$0xff]  ;;  %v2761_v56 = vpack.c.bf16 %v53_v49, %v49_v48 }
  0x3e   :  { %v156_v0 = vld [vmem:[%s6387_s1 + $0x3e8] sm:$0xff]  ;;  %v2481_v4 = vpack.c.bf16 %v275_v62, %v271_v59  ;;  %v151_v6 = vld [vmem:[%s6387_s1 + $0x3c0] sm:$0xff]  ;;  %2418 = vmatpush1.bf16.msra.mxu1 %v2417_v3  ;;  %v62_v53 = vld [vmem:[%s6387_s1 + $0xf8] sm:$0xff] }
  0x3f   :  { %v280_v1 = vld [vmem:[%s6387_s1 + $0x7c8] sm:$0xff]  ;;  %v2419_v5 = vpack.c.bf16 %v156_v0, %v152_v63  ;;  %v155_v7 = vld [vmem:[%s6387_s1 + $0x3e0] sm:$0xff]  ;;  %2480 = vmatprep.subr.bf16.mxu0 %v2479_v60  ;;  %v2763_v58 = vpack.c.bf16 %v62_v53, %v58_v52  ;;  %v61_v60 = vld [vmem:[%s6387_s1 + $0xf0] sm:$0xff] }
  0x40   :  { %v284_v2 = vld [vmem:[%s6387_s1 + $0x7e8] sm:$0xff]  ;;  %v279_v8 = vld [vmem:[%s6387_s1 + $0x7c0] sm:$0xff]  ;;  %v2421_v16 = vpack.c.bf16 %v155_v7, %v151_v6  ;;  %2482 = vmatpush1.bf16.msra.mxu0 %v2481_v4  ;;  %v66_v0 = vld [vmem:[%s6387_s1 + $0x118] sm:$0xff] }
  0x41   :  { %v2483_v9 = vpack.c.bf16 %v284_v2, %v280_v1  ;;  %v283_v10 = vld [vmem:[%s6387_s1 + $0x7e0] sm:$0xff]  ;;  %v288_v14 = vld [vmem:[%s6387_s1 + $0x808] sm:$0xff]  ;;  %2420 = vmatprep.subr.bf16.mxu1 %v2419_v5  ;;  %v70_v1 = vld [vmem:[%s6387_s1 + $0x138] sm:$0xff] }
  0x42   :  { %v292_v15 = vld [vmem:[%s6387_s1 + $0x828] sm:$0xff]  ;;  %v2485_v17 = vpack.c.bf16 %v283_v10, %v279_v8  ;;  %v287_v19 = vld [vmem:[%s6387_s1 + $0x800] sm:$0xff]  ;;  %2422 = vmatpush1.bf16.msra.mxu1 %v2421_v16  ;;  %v2767_v6 = vpack.c.bf16 %v70_v1, %v66_v0  ;;  %v65_v8 = vld [vmem:[%s6387_s1 + $0x110] sm:$0xff] }
  0x43   :  { %2484 = vmatprep.subr.bf16.mxu0 %v2483_v9  ;;  %v2487_v22 = vpack.c.bf16 %v292_v15, %v288_v14  ;;  %v291_v23 = vld [vmem:[%s6387_s1 + $0x820] sm:$0xff]  ;;  %v296_v27 = vld [vmem:[%s6387_s1 + $0x848] sm:$0xff]  ;;  %2752 = vmatprep.subr.bf16.mxu1 %v2751_v18  ;;  %v69_v9 = vld [vmem:[%s6387_s1 + $0x130] sm:$0xff] }
  0x44   :  { %v300_v28 = vld [vmem:[%s6387_s1 + $0x868] sm:$0xff]  ;;  %2486 = vmatpush1.bf16.msra.mxu0 %v2485_v17  ;;  %v2489_v30 = vpack.c.bf16 %v291_v23, %v287_v19  ;;  %v295_v32 = vld [vmem:[%s6387_s1 + $0x840] sm:$0xff]  ;;  %v78_v14 = vld [vmem:[%s6387_s1 + $0x178] sm:$0xff]  ;;  %v2769_v17 = vpack.c.bf16 %v69_v9, %v65_v8 }
  0x45   :  { %2488 = vmatprep.subr.bf16.mxu0 %v2487_v22  ;;  %v2491_v37 = vpack.c.bf16 %v300_v28, %v296_v27  ;;  %v299_v38 = vld [vmem:[%s6387_s1 + $0x860] sm:$0xff]  ;;  %979 = vmatmul.mubr.f32.vlgmr.msra.gmra.mrb[0].mxu1 %v3717_v25  ;;  %v304_v42 = vld [vmem:[%s6387_s1 + $0x888] sm:$0xff]  ;;  %v2771_v19 = vpack.c.bf16 %v78_v14, %v74_v13  ;;  %v73_v21 = vld [vmem:[%s6387_s1 + $0x150] sm:$0xff] }
  0x46   :  { %v308_v43 = vld [vmem:[%s6387_s1 + $0x8a8] sm:$0xff]  ;;  %2754 = vmatpush1.bf16.msra.mxu1 %v2753_v29  ;;  %v2493_v45 = vpack.c.bf16 %v299_v38, %v295_v32  ;;  %v303_v47 = vld [vmem:[%s6387_s1 + $0x880] sm:$0xff]  ;;  %1475 = vmatprep.mubr.f32.mxu1 %v3730_v33  ;;  %v57_v33 = vld [vmem:[%s6387_s1 + $0xd0] sm:$0xff] }
  0x47   :  { %1050 = vmatmul.mubr.f32.vlgmr.msra.gmra.mrb[0].mxu0 %v3733_v34  ;;  %2756 = vmatprep.subr.bf16.mxu1 %v2755_v31  ;;  %v2495_v50 = vpack.c.bf16 %v308_v43, %v304_v42  ;;  %v307_v51 = vld [vmem:[%s6387_s1 + $0x8a0] sm:$0xff]  ;;  %v312_v54 = vld [vmem:[%s6387_s1 + $0x8c8] sm:$0xff]  ;;  %v2765_v4 = vpack.c.bf16 %v61_v60, %v57_v33  ;;  %v77_v22 = vld [vmem:[%s6387_s1 + $0x170] sm:$0xff] }
  0x48   :  { %2490 = vmatpush1.bf16.msra.mxu0 %v2489_v30  ;;  %v316_v55 = vld [vmem:[%s6387_s1 + $0x8e8] sm:$0xff]  ;;  %v2497_v57 = vpack.c.bf16 %v307_v51, %v303_v47  ;;  %v311_v59 = vld [vmem:[%s6387_s1 + $0x8c0] sm:$0xff]  ;;  %v82_v26 = vld [vmem:[%s6387_s1 + $0x198] sm:$0xff]  ;;  %v2773_v30 = vpack.c.bf16 %v77_v22, %v73_v21 }
  0x49   :  { %2492 = vmatprep.subr.bf16.mxu0 %v2491_v37  ;;  %v2499_v62 = vpack.c.bf16 %v316_v55, %v312_v54  ;;  %v315_v63 = vld [vmem:[%s6387_s1 + $0x8e0] sm:$0xff]  ;;  %v320_v2 = vld [vmem:[%s6387_s1 + $0x908] sm:$0xff]  ;;  %v86_v27 = vld [vmem:[%s6387_s1 + $0x1b8] sm:$0xff] }
  0x4a   :  { %2758 = vmatpush1.bf16.msra.mxu1 %v2757_v44  ;;  %v324_v3 = vld [vmem:[%s6387_s1 + $0x928] sm:$0xff]  ;;  %v2501_v5 = vpack.c.bf16 %v315_v63, %v311_v59  ;;  %v319_v7 = vld [vmem:[%s6387_s1 + $0x900] sm:$0xff]  ;;  %v2775_v35 = vpack.c.bf16 %v86_v27, %v82_v26  ;;  %v81_v36 = vld [vmem:[%s6387_s1 + $0x190] sm:$0xff] }
  0x4b   :  { %2760 = vmatprep.subr.bf16.mxu1 %v2759_v46  ;;  %v2503_v10 = vpack.c.bf16 %v324_v3, %v320_v2  ;;  %v323_v12 = vld [vmem:[%s6387_s1 + $0x920] sm:$0xff]  ;;  %v328_v15 = vld [vmem:[%s6387_s1 + $0x948] sm:$0xff]  ;;  %v85_v37 = vld [vmem:[%s6387_s1 + $0x1b0] sm:$0xff] }
  0x4c   :  { %2494 = vmatpush1.bf16.msra.mxu0 %v2493_v45  ;;  %v332_v16 = vld [vmem:[%s6387_s1 + $0x968] sm:$0xff]  ;;  %v2505_v18 = vpack.c.bf16 %v323_v12, %v319_v7  ;;  %v327_v20 = vld [vmem:[%s6387_s1 + $0x940] sm:$0xff]  ;;  %v90_v42 = vld [vmem:[%s6387_s1 + $0x1d8] sm:$0xff]  ;;  %v2777_v47 = vpack.c.bf16 %v85_v37, %v81_v36 }
  0x4d   :  { %2496 = vmatprep.subr.bf16.mxu0 %v2495_v50  ;;  %v2507_v23 = vpack.c.bf16 %v332_v16, %v328_v15  ;;  %v331_v24 = vld [vmem:[%s6387_s1 + $0x960] sm:$0xff]  ;;  %v336_v28 = vld [vmem:[%s6387_s1 + $0x988] sm:$0xff]  ;;  %v94_v43 = vld [vmem:[%s6387_s1 + $0x1f8] sm:$0xff] }
  0x4e   :  { %2762 = vmatpush1.bf16.msra.mxu1 %v2761_v56  ;;  %v340_v29 = vld [vmem:[%s6387_s1 + $0x9a8] sm:$0xff]  ;;  %v335_v31 = vld [vmem:[%s6387_s1 + $0x980] sm:$0xff]  ;;  %v2509_v32 = vpack.c.bf16 %v331_v24, %v327_v20  ;;  %v2779_v50 = vpack.c.bf16 %v94_v43, %v90_v42  ;;  %v89_v52 = vld [vmem:[%s6387_s1 + $0x1d0] sm:$0xff] }
  0x4f   :  { %2764 = vmatprep.subr.bf16.mxu1 %v2763_v58  ;;  %v3987_v38 = vld [vmem:[%s6386_s0 + $0x8] sm:$0xff]  ;;  %v2511_v39 = vpack.c.bf16 %v340_v29, %v336_v28  ;;  %v339_v40 = vld [vmem:[%s6387_s1 + $0x9a0] sm:$0xff]  ;;  %v93_v53 = vld [vmem:[%s6387_s1 + $0x1f0] sm:$0xff] }
  0x50   :  { %2498 = vmatpush1.bf16.msra.mxu0 %v2497_v57  ;;  %v4000_v44 = vrot.slane %v3987_v38, %v3687_v11  ;;  %v344_v45 = vld [vmem:[%s6387_s1 + $0x9c8] sm:$0xff]  ;;  %v2513_v49 = vpack.c.bf16 %v339_v40, %v335_v31  ;;  %v343_v51 = vld [vmem:[%s6387_s1 + $0x9c0] sm:$0xff]  ;;  %v98_v56 = vld [vmem:[%s6387_s1 + $0x218] sm:$0xff]  ;;  %v2781_v33 = vpack.c.bf16 %v93_v53, %v89_v52 }
  0x51   :  { %2500 = vmatprep.subr.bf16.mxu0 %v2499_v62  ;;  %v348_v46 = vld [vmem:[%s6387_s1 + $0x9e8] sm:$0xff]  ;;  %v347_v55 = vld [vmem:[%s6387_s1 + $0x9e0] sm:$0xff]  ;;  %v102_v57 = vld [vmem:[%s6387_s1 + $0x238] sm:$0xff] }
  0x52   :  { %2766 = vmatpush1.bf16.msra.mxu1 %v2765_v4  ;;  %v4010_v48 = vcombine.high %v4000_v44, %v4000_v44  ;;  %v2515_v54 = vpack.c.bf16 %v348_v46, %v344_v45  ;;  %v352_v58 = vld [vmem:[%s6387_s1 + $0xa08] sm:$0xff]  ;;  %v2517_v60 = vpack.c.bf16 %v347_v55, %v343_v51  ;;  %v2783_v62 = vpack.c.bf16 %v102_v57, %v98_v56  ;;  %v351_v63 = vld [vmem:[%s6387_s1 + $0xa00] sm:$0xff]  ;;  %v97_v0 = vld [vmem:[%s6387_s1 + $0x210] sm:$0xff] }
  0x53   :  { %2768 = vmatprep.subr.bf16.mxu1 %v2767_v6  ;;  %v356_v59 = vld [vmem:[%s6387_s1 + $0xa28] sm:$0xff]  ;;  %v101_v1 = vld [vmem:[%s6387_s1 + $0x230] sm:$0xff]  ;;  %v355_v3 = vld [vmem:[%s6387_s1 + $0xa20] sm:$0xff] }
  0x54   :  { %2502 = vmatpush1.bf16.msra.mxu0 %v2501_v5  ;;  %1120 = vmatprep.mubr.f32.mxu0 %v4010_v48  ;;  %v2519_v2 = vpack.c.bf16 %v356_v59, %v352_v58  ;;  %v106_v4 = vld [vmem:[%s6387_s1 + $0x258] sm:$0xff]  ;;  %v360_v6 = vld [vmem:[%s6387_s1 + $0xa48] sm:$0xff]  ;;  %v2785_v8 = vpack.c.bf16 %v101_v1, %v97_v0  ;;  %v2521_v9 = vpack.c.bf16 %v355_v3, %v351_v63  ;;  %v359_v12 = vld [vmem:[%s6387_s1 + $0xa40] sm:$0xff] }
  0x55   :  { %2504 = vmatprep.subr.bf16.mxu0 %v2503_v10  ;;  %v110_v5 = vld [vmem:[%s6387_s1 + $0x278] sm:$0xff]  ;;  %v364_v7 = vld [vmem:[%s6387_s1 + $0xa68] sm:$0xff]  ;;  %v105_v13 = vld [vmem:[%s6387_s1 + $0x250] sm:$0xff] }
  0x56   :  { %2770 = vmatpush1.bf16.msra.mxu1 %v2769_v17  ;;  %v2787_v10 = vpack.c.bf16 %v110_v5, %v106_v4  ;;  %v109_v14 = vld [vmem:[%s6387_s1 + $0x270] sm:$0xff]  ;;  %v2523_v15 = vpack.c.bf16 %v364_v7, %v360_v6  ;;  %v363_v16 = vld [vmem:[%s6387_s1 + $0xa60] sm:$0xff]  ;;  %v114_v17 = vld [vmem:[%s6387_s1 + $0x298] sm:$0xff] }
  0x57   :  { %2772 = vmatprep.subr.bf16.mxu1 %v2771_v19  ;;  %v368_v19 = vld [vmem:[%s6387_s1 + $0xa88] sm:$0xff]  ;;  %v2789_v21 = vpack.c.bf16 %v109_v14, %v105_v13  ;;  %v2525_v22 = vpack.c.bf16 %v363_v16, %v359_v12  ;;  %v367_v24 = vld [vmem:[%s6387_s1 + $0xa80] sm:$0xff]  ;;  %v113_v26 = vld [vmem:[%s6387_s1 + $0x290] sm:$0xff] }
  0x58   :  { %2506 = vmatpush1.bf16.msra.mxu0 %v2505_v18  ;;  %v118_v18 = vld [vmem:[%s6387_s1 + $0x2b8] sm:$0xff]  ;;  %v372_v20 = vld [vmem:[%s6387_s1 + $0xaa8] sm:$0xff]  ;;  %v117_v27 = vld [vmem:[%s6387_s1 + $0x2b0] sm:$0xff] }
  0x59   :  { %2508 = vmatprep.subr.bf16.mxu0 %v2507_v23  ;;  %v2791_v23 = vpack.c.bf16 %v118_v18, %v114_v17  ;;  %v2527_v28 = vpack.c.bf16 %v372_v20, %v368_v19  ;;  %v371_v29 = vld [vmem:[%s6387_s1 + $0xaa0] sm:$0xff]  ;;  %v126_v31 = vld [vmem:[%s6387_s1 + $0x2f8] sm:$0xff]  ;;  %v2793_v36 = vpack.c.bf16 %v117_v27, %v113_v26  ;;  %v121_v42 = vld [vmem:[%s6387_s1 + $0x2d0] sm:$0xff] }
  0x5a   :  { %2774 = vmatpush1.bf16.msra.mxu1 %v2773_v30  ;;  %v122_v30 = vld [vmem:[%s6387_s1 + $0x2d8] sm:$0xff]  ;;  %v2529_v37 = vpack.c.bf16 %v371_v29, %v367_v24  ;;  %v375_v40 = vld [vmem:[%s6387_s1 + $0xac0] sm:$0xff]  ;;  %v125_v43 = vld [vmem:[%s6387_s1 + $0x2f0] sm:$0xff] }
  0x5b   :  { %2776 = vmatprep.subr.bf16.mxu1 %v2775_v35  ;;  %v380_v35 = vld [vmem:[%s6387_s1 + $0xae8] sm:$0xff]  ;;  %v379_v46 = vld [vmem:[%s6387_s1 + $0xae0] sm:$0xff]  ;;  %v2797_v52 = vpack.c.bf16 %v125_v43, %v121_v42  ;;  %v129_v56 = vld [vmem:[%s6387_s1 + $0x310] sm:$0xff] }
  0x5c   :  { %2510 = vmatpush1.bf16.msra.mxu0 %v2509_v32  ;;  %v376_v32 = vld [vmem:[%s6387_s1 + $0xac8] sm:$0xff]  ;;  %v2533_v53 = vpack.c.bf16 %v379_v46, %v375_v40  ;;  %v383_v55 = vld [vmem:[%s6387_s1 + $0xb00] sm:$0xff]  ;;  %v133_v57 = vld [vmem:[%s6387_s1 + $0x330] sm:$0xff] }
  0x5d   :  { %2512 = vmatprep.subr.bf16.mxu0 %v2511_v39  ;;  %v2795_v39 = vpack.c.bf16 %v126_v31, %v122_v30  ;;  %v2531_v45 = vpack.c.bf16 %v380_v35, %v376_v32  ;;  %v388_v51 = vld [vmem:[%s6387_s1 + $0xb28] sm:$0xff]  ;;  %v387_v59 = vld [vmem:[%s6387_s1 + $0xb20] sm:$0xff]  ;;  %v2801_v0 = vpack.c.bf16 %v133_v57, %v129_v56  ;;  %v137_v4 = vld [vmem:[%s6387_s1 + $0x350] sm:$0xff] }
  0x5e   :  { %2778 = vmatpush1.bf16.msra.mxu1 %v2777_v47  ;;  %v130_v47 = vld [vmem:[%s6387_s1 + $0x318] sm:$0xff]  ;;  %v396_v63 = vld [vmem:[%s6387_s1 + $0xb68] sm:$0xff]  ;;  %v2537_v1 = vpack.c.bf16 %v387_v59, %v383_v55  ;;  %v391_v3 = vld [vmem:[%s6387_s1 + $0xb40] sm:$0xff] }
  0x5f   :  { %2780 = vmatprep.subr.bf16.mxu1 %v2779_v50  ;;  %v384_v50 = vld [vmem:[%s6387_s1 + $0xb08] sm:$0xff]  ;;  %v141_v5 = vld [vmem:[%s6387_s1 + $0x370] sm:$0xff]  ;;  %v395_v7 = vld [vmem:[%s6387_s1 + $0xb60] sm:$0xff] }
  0x60   :  { %2514 = vmatpush1.bf16.msra.mxu0 %v2513_v49  ;;  %v134_v49 = vld [vmem:[%s6387_s1 + $0x338] sm:$0xff]  ;;  %v2535_v58 = vpack.c.bf16 %v388_v51, %v384_v50  ;;  %v404_v12 = vld [vmem:[%s6387_s1 + $0xba8] sm:$0xff]  ;;  %v2805_v13 = vpack.c.bf16 %v141_v5, %v137_v4  ;;  %v2541_v14 = vpack.c.bf16 %v395_v7, %v391_v3  ;;  %v399_v16 = vld [vmem:[%s6387_s1 + $0xb80] sm:$0xff] }
  0x61   :  { %2516 = vmatprep.subr.bf16.mxu0 %v2515_v54  ;;  %v2799_v54 = vpack.c.bf16 %v134_v49, %v130_v47  ;;  %v145_v17 = vld [vmem:[%s6387_s1 + $0x390] sm:$0xff]  ;;  %v403_v20 = vld [vmem:[%s6387_s1 + $0xba0] sm:$0xff]  ;;  %v412_v24 = vld [vmem:[%s6387_s1 + $0xbe8] sm:$0xff] }
  0x62   :  { %2782 = vmatpush1.bf16.msra.mxu1 %v2781_v33  ;;  %v138_v33 = vld [vmem:[%s6387_s1 + $0x358] sm:$0xff]  ;;  %v149_v18 = vld [vmem:[%s6387_s1 + $0x3b0] sm:$0xff]  ;;  %v2545_v27 = vpack.c.bf16 %v403_v20, %v399_v16  ;;  %v407_v29 = vld [vmem:[%s6387_s1 + $0xbc0] sm:$0xff] }
  0x63   :  { %2784 = vmatprep.subr.bf16.mxu1 %v2783_v62  ;;  %v392_v62 = vld [vmem:[%s6387_s1 + $0xb48] sm:$0xff]  ;;  %v2809_v26 = vpack.c.bf16 %v149_v18, %v145_v17  ;;  %v153_v30 = vld [vmem:[%s6387_s1 + $0x3d0] sm:$0xff]  ;;  %v411_v35 = vld [vmem:[%s6387_s1 + $0xbe0] sm:$0xff] }
  0x64   :  { %2518 = vmatpush1.bf16.msra.mxu0 %v2517_v60  ;;  %v142_v60 = vld [vmem:[%s6387_s1 + $0x378] sm:$0xff]  ;;  %v2539_v6 = vpack.c.bf16 %v396_v63, %v392_v62  ;;  %v157_v31 = vld [vmem:[%s6387_s1 + $0x3f0] sm:$0xff]  ;;  %v416_v40 = vld [vmem:[%s6387_s1 + $0xc08] sm:$0xff] }
  0x65   :  { %2520 = vmatprep.subr.bf16.mxu0 %v2519_v2  ;;  %v2803_v2 = vpack.c.bf16 %v142_v60, %v138_v33  ;;  %v420_v42 = vld [vmem:[%s6387_s1 + $0xc28] sm:$0xff]  ;;  %v2813_v43 = vpack.c.bf16 %v157_v31, %v153_v30  ;;  %v415_v47 = vld [vmem:[%s6387_s1 + $0xc00] sm:$0xff]  ;;  %v165_v49 = vld [vmem:[%s6387_s1 + $0x430] sm:$0xff] }
  0x66   :  { %2786 = vmatpush1.bf16.msra.mxu1 %v2785_v8  ;;  %v146_v8 = vld [vmem:[%s6387_s1 + $0x398] sm:$0xff]  ;;  %v2551_v50 = vpack.c.bf16 %v420_v42, %v416_v40  ;;  %v419_v51 = vld [vmem:[%s6387_s1 + $0xc20] sm:$0xff]  ;;  %v424_v55 = vld [vmem:[%s6387_s1 + $0xc48] sm:$0xff] }
  0x67   :  { %2788 = vmatprep.subr.bf16.mxu1 %v2787_v10  ;;  %v400_v10 = vld [vmem:[%s6387_s1 + $0xb88] sm:$0xff]  ;;  %v423_v33 = vld [vmem:[%s6387_s1 + $0xc40] sm:$0xff]  ;;  %v169_v60 = vld [vmem:[%s6387_s1 + $0x450] sm:$0xff] }
  0x68   :  { %2522 = vmatpush1.bf16.msra.mxu0 %v2521_v9  ;;  %v150_v9 = vld [vmem:[%s6387_s1 + $0x3b8] sm:$0xff]  ;;  %v2543_v19 = vpack.c.bf16 %v404_v12, %v400_v10  ;;  %v428_v56 = vld [vmem:[%s6387_s1 + $0xc68] sm:$0xff]  ;;  %v173_v62 = vld [vmem:[%s6387_s1 + $0x470] sm:$0xff] }
  0x69   :  { %2524 = vmatprep.subr.bf16.mxu0 %v2523_v15  ;;  %v2807_v15 = vpack.c.bf16 %v150_v9, %v146_v8  ;;  %v2555_v63 = vpack.c.bf16 %v428_v56, %v424_v55  ;;  %v432_v4 = vld [vmem:[%s6387_s1 + $0xc88] sm:$0xff]  ;;  %v177_v9 = vld [vmem:[%s6387_s1 + $0x490] sm:$0xff]  ;;  %v451_v40 = vld [vmem:[%s6387_s1 + $0xd20] sm:$0xff] }
  0x6a   :  { %2790 = vmatpush1.bf16.msra.mxu1 %v2789_v21  ;;  %v154_v21 = vld [vmem:[%s6387_s1 + $0x3d8] sm:$0xff]  ;;  %v436_v5 = vld [vmem:[%s6387_s1 + $0xca8] sm:$0xff]  ;;  %v181_v10 = vld [vmem:[%s6387_s1 + $0x4b0] sm:$0xff] }
  0x6b   :  { %2792 = vmatprep.subr.bf16.mxu1 %v2791_v23  ;;  %v408_v23 = vld [vmem:[%s6387_s1 + $0xbc8] sm:$0xff]  ;;  %v2559_v12 = vpack.c.bf16 %v436_v5, %v432_v4  ;;  %v2825_v18 = vpack.c.bf16 %v181_v10, %v177_v9  ;;  %v202_v42 = vld [vmem:[%s6387_s1 + $0x558] sm:$0xff]  ;;  %v459_v55 = vld [vmem:[%s6387_s1 + $0xd60] sm:$0xff] }
  0x6c   :  { %2526 = vmatpush1.bf16.msra.mxu0 %v2525_v22  ;;  %v158_v22 = vld [vmem:[%s6387_s1 + $0x3f8] sm:$0xff]  ;;  %v2547_v32 = vpack.c.bf16 %v412_v24, %v408_v23  ;;  %v440_v16 = vld [vmem:[%s6387_s1 + $0xcc8] sm:$0xff]  ;;  %v189_v23 = vld [vmem:[%s6387_s1 + $0x4f0] sm:$0xff] }
  0x6d   :  { %2528 = vmatprep.subr.bf16.mxu0 %v2527_v28  ;;  %v2811_v28 = vpack.c.bf16 %v158_v22, %v154_v21  ;;  %v444_v17 = vld [vmem:[%s6387_s1 + $0xce8] sm:$0xff]  ;;  %v439_v21 = vld [vmem:[%s6387_s1 + $0xcc0] sm:$0xff]  ;;  %v185_v22 = vld [vmem:[%s6387_s1 + $0x4d0] sm:$0xff] }
  0x6e   :  { %2794 = vmatpush1.bf16.msra.mxu1 %v2793_v36  ;;  %v162_v36 = vld [vmem:[%s6387_s1 + $0x418] sm:$0xff]  ;;  %v443_v24 = vld [vmem:[%s6387_s1 + $0xce0] sm:$0xff]  ;;  %v2829_v30 = vpack.c.bf16 %v189_v23, %v185_v22 }
  0x6f   :  { %2796 = vmatprep.subr.bf16.mxu1 %v2795_v39  ;;  %v858_v39 = vcombine.high %v3987_v38, %v3987_v38  ;;  %v161_v38 = vld [vmem:[%s6387_s1 + $0x410] sm:$0xff]  ;;  %v2565_v31 = vpack.c.bf16 %v443_v24, %v439_v21  ;;  %v210_v56 = vld [vmem:[%s6387_s1 + $0x598] sm:$0xff]  ;;  %v467_v4 = vld [vmem:[%s6387_s1 + $0xda0] sm:$0xff] }
  0x70   :  { %2530 = vmatpush1.bf16.msra.mxu0 %v2529_v37  ;;  %v166_v37 = vld [vmem:[%s6387_s1 + $0x438] sm:$0xff]  ;;  %v2817_v57 = vpack.c.bf16 %v165_v49, %v161_v38  ;;  %v225_v24 = vld [vmem:[%s6387_s1 + $0x610] sm:$0xff] }
  0x71   :  { %2532 = vmatprep.subr.bf16.mxu0 %v2531_v45  ;;  %v2549_v45 = vpack.c.bf16 %v411_v35, %v407_v29  ;;  %v2815_v46 = vpack.c.bf16 %v166_v37, %v162_v36  ;;  %v452_v29 = vld [vmem:[%s6387_s1 + $0xd28] sm:$0xff]  ;;  %v447_v35 = vld [vmem:[%s6387_s1 + $0xd00] sm:$0xff]  ;;  %v193_v36 = vld [vmem:[%s6387_s1 + $0x510] sm:$0xff] }
  0x72   :  { %2798 = vmatpush1.bf16.msra.mxu1 %v2797_v52  ;;  %v170_v52 = vld [vmem:[%s6387_s1 + $0x458] sm:$0xff]  ;;  %v197_v37 = vld [vmem:[%s6387_s1 + $0x530] sm:$0xff]  ;;  %v2569_v38 = vpack.c.bf16 %v451_v40, %v447_v35 }
  0x73   :  { %2800 = vmatprep.subr.bf16.mxu1 %v2799_v54  ;;  %v4250_v54 = vrot.slane %v858_v39, %v3687_v11  ;;  %v218_v5 = vld [vmem:[%s6387_s1 + $0x5d8] sm:$0xff]  ;;  %v233_v40 = vld [vmem:[%s6387_s1 + $0x650] sm:$0xff] }
  0x74   :  { %2534 = vmatpush1.bf16.msra.mxu0 %v2533_v53  ;;  %v174_v53 = vld [vmem:[%s6387_s1 + $0x478] sm:$0xff] }
  0x75   :  { %2536 = vmatprep.subr.bf16.mxu0 %v2535_v58  ;;  %v2553_v58 = vpack.c.bf16 %v419_v51, %v415_v47  ;;  %v2819_v59 = vpack.c.bf16 %v174_v53, %v170_v52  ;;  %v4278_v3 = vcombine.high %v4250_v54, %v4250_v54  ;;  %v2833_v47 = vpack.c.bf16 %v197_v37, %v193_v36  ;;  %v201_v51 = vld [vmem:[%s6387_s1 + $0x550] sm:$0xff] }
  0x76   :  { %2802 = vmatpush1.bf16.msra.mxu1 %v2801_v0  ;;  %v427_v0 = vld [vmem:[%s6387_s1 + $0xc60] sm:$0xff]  ;;  %v205_v52 = vld [vmem:[%s6387_s1 + $0x570] sm:$0xff] }
  0x77   :  { %2804 = vmatprep.subr.bf16.mxu1 %v2803_v2  ;;  %v182_v2 = vld [vmem:[%s6387_s1 + $0x4b8] sm:$0xff]  ;;  %v2557_v7 = vpack.c.bf16 %v427_v0, %v423_v33  ;;  %v2837_v33 = vpack.c.bf16 %v205_v52, %v201_v51  ;;  %v209_v0 = vld [vmem:[%s6387_s1 + $0x590] sm:$0xff] }
  0x78   :  { %2538 = vmatpush1.bf16.msra.mxu0 %v2537_v1  ;;  %v178_v1 = vld [vmem:[%s6387_s1 + $0x498] sm:$0xff] }
  0x79   :  { %2540 = vmatprep.subr.bf16.mxu0 %v2539_v6  ;;  %v2821_v6 = vpack.c.bf16 %v173_v62, %v169_v60  ;;  %v2823_v8 = vpack.c.bf16 %v182_v2, %v178_v1  ;;  %v213_v1 = vld [vmem:[%s6387_s1 + $0x5b0] sm:$0xff] }
  0x7a   :  { %2806 = vmatpush1.bf16.msra.mxu1 %v2805_v13  ;;  %v435_v13 = vld [vmem:[%s6387_s1 + $0xca0] sm:$0xff] }
  0x7b   :  { %2808 = vmatprep.subr.bf16.mxu1 %v2807_v15  ;;  %v190_v15 = vld [vmem:[%s6387_s1 + $0x4f8] sm:$0xff] }
  0x7c   :  { %2542 = vmatpush1.bf16.msra.mxu0 %v2541_v14  ;;  %v186_v14 = vld [vmem:[%s6387_s1 + $0x4d8] sm:$0xff] }
  0x7d   :  { %2544 = vmatprep.subr.bf16.mxu0 %v2543_v19  ;;  %v2827_v20 = vpack.c.bf16 %v190_v15, %v186_v14  ;;  %v221_v14 = vld [vmem:[%s6387_s1 + $0x5f0] sm:$0xff] }
  0x7e   :  { %2810 = vmatpush1.bf16.msra.mxu1 %v2809_v26  ;;  %v194_v26 = vld [vmem:[%s6387_s1 + $0x518] sm:$0xff] }
  0x7f   :  { %2812 = vmatprep.subr.bf16.mxu1 %v2811_v28  ;;  %v448_v28 = vld [vmem:[%s6387_s1 + $0xd08] sm:$0xff] }
  0x80   :  { %2546 = vmatpush1.bf16.msra.mxu0 %v2545_v27  ;;  %v198_v27 = vld [vmem:[%s6387_s1 + $0x538] sm:$0xff]  ;;  %v2567_v39 = vpack.c.bf16 %v452_v29, %v448_v28  ;;  %v483_v28 = vld [vmem:[%s6387_s1 + $0xe20] sm:$0xff] }
  0x81   :  { %2548 = vmatprep.subr.bf16.mxu0 %v2547_v32  ;;  %v2831_v32 = vpack.c.bf16 %v198_v27, %v194_v26  ;;  %v229_v26 = vld [vmem:[%s6387_s1 + $0x630] sm:$0xff]  ;;  %v234_v29 = vld [vmem:[%s6387_s1 + $0x658] sm:$0xff] }
  0x82   :  { %2814 = vmatpush1.bf16.msra.mxu1 %v2813_v43  ;;  %v206_v43 = vld [vmem:[%s6387_s1 + $0x578] sm:$0xff]  ;;  %v2849_v35 = vpack.c.bf16 %v229_v26, %v225_v24 }
  0x83   :  { %2816 = vmatprep.subr.bf16.mxu1 %v2815_v46  ;;  %v460_v46 = vld [vmem:[%s6387_s1 + $0xd68] sm:$0xff]  ;;  %v2835_v49 = vpack.c.bf16 %v206_v43, %v202_v42  ;;  %v237_v42 = vld [vmem:[%s6387_s1 + $0x670] sm:$0xff] }
  0x84   :  { %2550 = vmatpush1.bf16.msra.mxu0 %v2549_v45  ;;  %v456_v45 = vld [vmem:[%s6387_s1 + $0xd48] sm:$0xff] }
  0x85   :  { %2552 = vmatprep.subr.bf16.mxu0 %v2551_v50  ;;  %1476 = vmatmul.mubr.f32.vlgmr.msra.gmra.mrb[2].mxu1 %v3717_v25  ;;  %v431_v25 = vld [vmem:[%s6387_s1 + $0xc80] sm:$0xff]  ;;  %v2571_v53 = vpack.c.bf16 %v460_v46, %v456_v45  ;;  %v242_v46 = vld [vmem:[%s6387_s1 + $0x698] sm:$0xff] }
  0x86   :  { %2818 = vmatpush1.bf16.msra.mxu1 %v2817_v57  ;;  %1546 = vmatprep.mubr.f32.mxu1 %v3753_v41  ;;  %v2561_v19 = vpack.c.bf16 %v435_v13, %v431_v25  ;;  %v2563_v41 = vpack.c.bf16 %v444_v17, %v440_v16  ;;  %v455_v50 = vld [vmem:[%s6387_s1 + $0xd40] sm:$0xff]  ;;  %v214_v57 = vld [vmem:[%s6387_s1 + $0x5b8] sm:$0xff]  ;;  %v2841_v25 = vpack.c.bf16 %v213_v1, %v209_v0  ;;  %v217_v13 = vld [vmem:[%s6387_s1 + $0x5d0] sm:$0xff] }
  0x87   :  { %1121 = vmatmul.mubr.f32.vlgmr.msra.gmra.mrb[0].mxu0 %v4000_v44  ;;  %2820 = vmatprep.subr.bf16.mxu1 %v2819_v59  ;;  %v468_v59 = vld [vmem:[%s6387_s1 + $0xda8] sm:$0xff]  ;;  %v2573_v60 = vpack.c.bf16 %v459_v55, %v455_v50  ;;  %v2839_v62 = vpack.c.bf16 %v214_v57, %v210_v56  ;;  %v475_v16 = vld [vmem:[%s6387_s1 + $0xde0] sm:$0xff]  ;;  %v226_v17 = vld [vmem:[%s6387_s1 + $0x618] sm:$0xff]  ;;  %v2845_v21 = vpack.c.bf16 %v221_v14, %v217_v13 }
  0x88   :  { %2554 = vmatpush1.bf16.msra.mxu0 %v2553_v58  ;;  %1191 = vmatprep.mubr.f32.mxu0 %v4278_v3  ;;  %v464_v58 = vld [vmem:[%s6387_s1 + $0xd88] sm:$0xff]  ;;  %v491_v45 = vld [vmem:[%s6387_s1 + $0xe60] sm:$0xff]  ;;  %v2853_v50 = vpack.c.bf16 %v237_v42, %v233_v40  ;;  %v241_v55 = vld [vmem:[%s6387_s1 + $0x690] sm:$0xff] }
  0x89   :  { %2556 = vmatprep.subr.bf16.mxu0 %v2555_v63  ;;  %v463_v63 = vld [vmem:[%s6387_s1 + $0xd80] sm:$0xff]  ;;  %v2575_v2 = vpack.c.bf16 %v468_v59, %v464_v58  ;;  %v245_v56 = vld [vmem:[%s6387_s1 + $0x6b0] sm:$0xff]  ;;  %v250_v59 = vld [vmem:[%s6387_s1 + $0x6d8] sm:$0xff] }
  0x8a   :  { %2822 = vmatpush1.bf16.msra.mxu1 %v2821_v6  ;;  %v222_v6 = vld [vmem:[%s6387_s1 + $0x5f8] sm:$0xff]  ;;  %v2577_v9 = vpack.c.bf16 %v467_v4, %v463_v63  ;;  %v499_v58 = vld [vmem:[%s6387_s1 + $0xea0] sm:$0xff]  ;;  %v2857_v63 = vpack.c.bf16 %v245_v56, %v241_v55  ;;  %v249_v4 = vld [vmem:[%s6387_s1 + $0x6d0] sm:$0xff] }
  0x8b   :  { %2824 = vmatprep.subr.bf16.mxu1 %v2823_v8  ;;  %v476_v8 = vld [vmem:[%s6387_s1 + $0xde8] sm:$0xff]  ;;  %v2843_v10 = vpack.c.bf16 %v222_v6, %v218_v5  ;;  %v253_v5 = vld [vmem:[%s6387_s1 + $0x6f0] sm:$0xff] }
  0x8c   :  { %2558 = vmatpush1.bf16.msra.mxu0 %v2557_v7  ;;  %v472_v7 = vld [vmem:[%s6387_s1 + $0xdc8] sm:$0xff] }
  0x8d   :  { %2560 = vmatprep.subr.bf16.mxu0 %v2559_v12  ;;  %v471_v12 = vld [vmem:[%s6387_s1 + $0xdc0] sm:$0xff]  ;;  %v2579_v15 = vpack.c.bf16 %v476_v8, %v472_v7  ;;  %v258_v8 = vld [vmem:[%s6387_s1 + $0x718] sm:$0xff] }
  0x8e   :  { %2826 = vmatpush1.bf16.msra.mxu1 %v2825_v18  ;;  %v230_v18 = vld [vmem:[%s6387_s1 + $0x638] sm:$0xff]  ;;  %v2581_v22 = vpack.c.bf16 %v475_v16, %v471_v12  ;;  %v507_v7 = vld [vmem:[%s6387_s1 + $0xee0] sm:$0xff]  ;;  %v2861_v12 = vpack.c.bf16 %v253_v5, %v249_v4  ;;  %v257_v16 = vld [vmem:[%s6387_s1 + $0x710] sm:$0xff] }
  0x8f   :  { %2828 = vmatprep.subr.bf16.mxu1 %v2827_v20  ;;  %v484_v20 = vld [vmem:[%s6387_s1 + $0xe28] sm:$0xff]  ;;  %v2847_v23 = vpack.c.bf16 %v230_v18, %v226_v17  ;;  %v261_v17 = vld [vmem:[%s6387_s1 + $0x730] sm:$0xff] }
  0x90   :  { %2562 = vmatpush1.bf16.msra.mxu0 %v2561_v19  ;;  %v480_v19 = vld [vmem:[%s6387_s1 + $0xe08] sm:$0xff] }
  0x91   :  { %2564 = vmatprep.subr.bf16.mxu0 %v2563_v41  ;;  %v479_v41 = vld [vmem:[%s6387_s1 + $0xe00] sm:$0xff]  ;;  %v2583_v27 = vpack.c.bf16 %v484_v20, %v480_v19  ;;  %v266_v20 = vld [vmem:[%s6387_s1 + $0x758] sm:$0xff] }
  0x92   :  { %2830 = vmatpush1.bf16.msra.mxu1 %v2829_v30  ;;  %v238_v30 = vld [vmem:[%s6387_s1 + $0x678] sm:$0xff]  ;;  %v2585_v36 = vpack.c.bf16 %v483_v28, %v479_v41  ;;  %v515_v19 = vld [vmem:[%s6387_s1 + $0xf20] sm:$0xff]  ;;  %v2865_v41 = vpack.c.bf16 %v261_v17, %v257_v16  ;;  %v265_v28 = vld [vmem:[%s6387_s1 + $0x750] sm:$0xff] }
  0x93   :  { %2832 = vmatprep.subr.bf16.mxu1 %v2831_v32  ;;  %v492_v32 = vld [vmem:[%s6387_s1 + $0xe68] sm:$0xff]  ;;  %v2851_v37 = vpack.c.bf16 %v238_v30, %v234_v29  ;;  %v269_v29 = vld [vmem:[%s6387_s1 + $0x770] sm:$0xff] }
  0x94   :  { %2566 = vmatpush1.bf16.msra.mxu0 %v2565_v31  ;;  %v488_v31 = vld [vmem:[%s6387_s1 + $0xe48] sm:$0xff] }
  0x95   :  { %2568 = vmatprep.subr.bf16.mxu0 %v2567_v39  ;;  %v487_v39 = vld [vmem:[%s6387_s1 + $0xe40] sm:$0xff]  ;;  %v2587_v43 = vpack.c.bf16 %v492_v32, %v488_v31  ;;  %v274_v32 = vld [vmem:[%s6387_s1 + $0x798] sm:$0xff]  ;;  %v556_v16 = vld [vmem:[%s6387_s1 + $0x1068] sm:$0xff] }
  0x96   :  { %2834 = vmatpush1.bf16.msra.mxu1 %v2833_v47  ;;  %v246_v47 = vld [vmem:[%s6387_s1 + $0x6b8] sm:$0xff]  ;;  %v2589_v51 = vpack.c.bf16 %v491_v45, %v487_v39  ;;  %v523_v31 = vld [vmem:[%s6387_s1 + $0xf60] sm:$0xff]  ;;  %v2869_v39 = vpack.c.bf16 %v269_v29, %v265_v28  ;;  %v273_v45 = vld [vmem:[%s6387_s1 + $0x790] sm:$0xff] }
  0x97   :  { %2836 = vmatprep.subr.bf16.mxu1 %v2835_v49  ;;  %v500_v49 = vld [vmem:[%s6387_s1 + $0xea8] sm:$0xff]  ;;  %v2855_v52 = vpack.c.bf16 %v246_v47, %v242_v46  ;;  %v277_v46 = vld [vmem:[%s6387_s1 + $0x7b0] sm:$0xff] }
  0x98   :  { %2570 = vmatpush1.bf16.msra.mxu0 %v2569_v38  ;;  %v496_v38 = vld [vmem:[%s6387_s1 + $0xe88] sm:$0xff] }
  0x99   :  { %2572 = vmatprep.subr.bf16.mxu0 %v2571_v53  ;;  %v495_v53 = vld [vmem:[%s6387_s1 + $0xe80] sm:$0xff]  ;;  %v2591_v57 = vpack.c.bf16 %v500_v49, %v496_v38  ;;  %v282_v49 = vld [vmem:[%s6387_s1 + $0x7d8] sm:$0xff]  ;;  %v560_v28 = vld [vmem:[%s6387_s1 + $0x1088] sm:$0xff] }
  0x9a   :  { %2838 = vmatpush1.bf16.msra.mxu1 %v2837_v33  ;;  %v254_v33 = vld [vmem:[%s6387_s1 + $0x6f8] sm:$0xff]  ;;  %v2593_v0 = vpack.c.bf16 %v499_v58, %v495_v53  ;;  %v531_v38 = vld [vmem:[%s6387_s1 + $0xfa0] sm:$0xff]  ;;  %v2873_v53 = vpack.c.bf16 %v277_v46, %v273_v45  ;;  %v281_v58 = vld [vmem:[%s6387_s1 + $0x7d0] sm:$0xff] }
  0x9b   :  { %2840 = vmatprep.subr.bf16.mxu1 %v2839_v62  ;;  %v508_v62 = vld [vmem:[%s6387_s1 + $0xee8] sm:$0xff]  ;;  %v2859_v1 = vpack.c.bf16 %v254_v33, %v250_v59  ;;  %v285_v59 = vld [vmem:[%s6387_s1 + $0x7f0] sm:$0xff] }
  0x9c   :  { %2574 = vmatpush1.bf16.msra.mxu0 %v2573_v60  ;;  %v504_v60 = vld [vmem:[%s6387_s1 + $0xec8] sm:$0xff]  ;;  %v2877_v4 = vpack.c.bf16 %v285_v59, %v281_v58 }
  0x9d   :  { %2576 = vmatprep.subr.bf16.mxu0 %v2575_v2  ;;  %v503_v2 = vld [vmem:[%s6387_s1 + $0xec0] sm:$0xff]  ;;  %v2595_v6 = vpack.c.bf16 %v508_v62, %v504_v60  ;;  %v290_v62 = vld [vmem:[%s6387_s1 + $0x818] sm:$0xff]  ;;  %v564_v29 = vld [vmem:[%s6387_s1 + $0x10a8] sm:$0xff] }
  0x9e   :  { %2842 = vmatpush1.bf16.msra.mxu1 %v2841_v25  ;;  %v262_v25 = vld [vmem:[%s6387_s1 + $0x738] sm:$0xff]  ;;  %v2597_v13 = vpack.c.bf16 %v507_v7, %v503_v2  ;;  %v539_v60 = vld [vmem:[%s6387_s1 + $0xfe0] sm:$0xff]  ;;  %v4629_v2 = vld [vmem:[%s6386_s0 + $0x10] sm:$0xff] }
  0x9f   :  { %2844 = vmatprep.subr.bf16.mxu1 %v2843_v10  ;;  %v516_v10 = vld [vmem:[%s6387_s1 + $0xf28] sm:$0xff]  ;;  %v2863_v14 = vpack.c.bf16 %v262_v25, %v258_v8  ;;  %v543_v7 = vld [vmem:[%s6387_s1 + $0x1000] sm:$0xff]  ;;  %v289_v8 = vld [vmem:[%s6387_s1 + $0x810] sm:$0xff] }
  0xa0   :  { %2578 = vmatpush1.bf16.msra.mxu0 %v2577_v9  ;;  %v512_v9 = vld [vmem:[%s6387_s1 + $0xf08] sm:$0xff]  ;;  %v293_v25 = vld [vmem:[%s6387_s1 + $0x830] sm:$0xff] }
  0xa1   :  { %2580 = vmatprep.subr.bf16.mxu0 %v2579_v15  ;;  %v511_v15 = vld [vmem:[%s6387_s1 + $0xf00] sm:$0xff]  ;;  %v2599_v18 = vpack.c.bf16 %v516_v10, %v512_v9  ;;  %v2881_v17 = vpack.c.bf16 %v293_v25, %v289_v8  ;;  %v572_v45 = vld [vmem:[%s6387_s1 + $0x10e8] sm:$0xff] }
  0xa2   :  { %2846 = vmatpush1.bf16.msra.mxu1 %v2845_v21  ;;  %v270_v21 = vld [vmem:[%s6387_s1 + $0x778] sm:$0xff]  ;;  %v2601_v24 = vpack.c.bf16 %v515_v19, %v511_v15  ;;  %v547_v10 = vld [vmem:[%s6387_s1 + $0x1020] sm:$0xff]  ;;  %v552_v15 = vld [vmem:[%s6387_s1 + $0x1048] sm:$0xff] }
  0xa3   :  { %2848 = vmatprep.subr.bf16.mxu1 %v2847_v23  ;;  %v524_v23 = vld [vmem:[%s6387_s1 + $0xf68] sm:$0xff]  ;;  %v2867_v26 = vpack.c.bf16 %v270_v21, %v266_v20  ;;  %v551_v20 = vld [vmem:[%s6387_s1 + $0x1040] sm:$0xff]  ;;  %v297_v21 = vld [vmem:[%s6387_s1 + $0x850] sm:$0xff] }
  0xa4   :  { %2582 = vmatpush1.bf16.msra.mxu0 %v2581_v22  ;;  %v520_v22 = vld [vmem:[%s6387_s1 + $0xf48] sm:$0xff] }
  0xa5   :  { %2584 = vmatprep.subr.bf16.mxu0 %v2583_v27  ;;  %v519_v27 = vld [vmem:[%s6387_s1 + $0xf40] sm:$0xff]  ;;  %v2603_v30 = vpack.c.bf16 %v524_v23, %v520_v22  ;;  %v301_v22 = vld [vmem:[%s6387_s1 + $0x870] sm:$0xff]  ;;  %v2619_v23 = vpack.c.bf16 %v556_v16, %v552_v15 }
  0xa6   :  { %2850 = vmatpush1.bf16.msra.mxu1 %v2849_v35  ;;  %v278_v35 = vld [vmem:[%s6387_s1 + $0x7b8] sm:$0xff]  ;;  %v2605_v40 = vpack.c.bf16 %v523_v31, %v519_v27  ;;  %v587_v16 = vld [vmem:[%s6387_s1 + $0x1160] sm:$0xff] }
  0xa7   :  { %2852 = vmatprep.subr.bf16.mxu1 %v2851_v37  ;;  %v532_v37 = vld [vmem:[%s6387_s1 + $0xfa8] sm:$0xff]  ;;  %v2871_v42 = vpack.c.bf16 %v278_v35, %v274_v32  ;;  %v305_v35 = vld [vmem:[%s6387_s1 + $0x890] sm:$0xff] }
  0xa8   :  { %2586 = vmatpush1.bf16.msra.mxu0 %v2585_v36  ;;  %v528_v36 = vld [vmem:[%s6387_s1 + $0xf88] sm:$0xff] }
  0xa9   :  { %2588 = vmatprep.subr.bf16.mxu0 %v2587_v43  ;;  %v527_v43 = vld [vmem:[%s6387_s1 + $0xf80] sm:$0xff]  ;;  %v2607_v47 = vpack.c.bf16 %v532_v37, %v528_v36  ;;  %v309_v36 = vld [vmem:[%s6387_s1 + $0x8b0] sm:$0xff]  ;;  %v2623_v37 = vpack.c.bf16 %v564_v29, %v560_v28 }
  0xaa   :  { %2854 = vmatpush1.bf16.msra.mxu1 %v2853_v50  ;;  %v286_v50 = vld [vmem:[%s6387_s1 + $0x7f8] sm:$0xff]  ;;  %v2609_v55 = vpack.c.bf16 %v531_v38, %v527_v43  ;;  %v568_v43 = vld [vmem:[%s6387_s1 + $0x10c8] sm:$0xff]  ;;  %v2889_v46 = vpack.c.bf16 %v309_v36, %v305_v35  ;;  %v595_v29 = vld [vmem:[%s6387_s1 + $0x11a0] sm:$0xff] }
  0xab   :  { %2856 = vmatprep.subr.bf16.mxu1 %v2855_v52  ;;  %v540_v52 = vld [vmem:[%s6387_s1 + $0xfe8] sm:$0xff]  ;;  %v2875_v56 = vpack.c.bf16 %v286_v50, %v282_v49  ;;  %v567_v49 = vld [vmem:[%s6387_s1 + $0x10c0] sm:$0xff]  ;;  %v313_v50 = vld [vmem:[%s6387_s1 + $0x8d0] sm:$0xff] }
  0xac   :  { %2590 = vmatpush1.bf16.msra.mxu0 %v2589_v51  ;;  %v536_v51 = vld [vmem:[%s6387_s1 + $0xfc8] sm:$0xff] }
  0xad   :  { %2592 = vmatprep.subr.bf16.mxu0 %v2591_v57  ;;  %v535_v57 = vld [vmem:[%s6387_s1 + $0xfc0] sm:$0xff]  ;;  %v2611_v33 = vpack.c.bf16 %v540_v52, %v536_v51  ;;  %v317_v51 = vld [vmem:[%s6387_s1 + $0x8f0] sm:$0xff] }
  0xae   :  { %2858 = vmatpush1.bf16.msra.mxu1 %v2857_v63  ;;  %v294_v63 = vld [vmem:[%s6387_s1 + $0x838] sm:$0xff]  ;;  %v2613_v5 = vpack.c.bf16 %v539_v60, %v535_v57  ;;  %v571_v52 = vld [vmem:[%s6387_s1 + $0x10e0] sm:$0xff]  ;;  %v580_v57 = vld [vmem:[%s6387_s1 + $0x1128] sm:$0xff]  ;;  %v2893_v58 = vpack.c.bf16 %v317_v51, %v313_v50 }
  0xaf   :  { %2860 = vmatprep.subr.bf16.mxu1 %v2859_v1  ;;  %v548_v1 = vld [vmem:[%s6387_s1 + $0x1028] sm:$0xff]  ;;  %v2629_v59 = vpack.c.bf16 %v571_v52, %v567_v49  ;;  %v575_v60 = vld [vmem:[%s6387_s1 + $0x1100] sm:$0xff] }
  0xb0   :  { %2594 = vmatpush1.bf16.msra.mxu0 %v2593_v0  ;;  %v544_v0 = vld [vmem:[%s6387_s1 + $0x1008] sm:$0xff]  ;;  %v607_v52 = vld [vmem:[%s6387_s1 + $0x1200] sm:$0xff] }
  0xb1   :  { %2596 = vmatprep.subr.bf16.mxu0 %v2595_v6  ;;  %v2879_v6 = vpack.c.bf16 %v294_v63, %v290_v62  ;;  %v2615_v9 = vpack.c.bf16 %v548_v1, %v544_v0  ;;  %v321_v62 = vld [vmem:[%s6387_s1 + $0x910] sm:$0xff]  ;;  %v579_v1 = vld [vmem:[%s6387_s1 + $0x1120] sm:$0xff]  ;;  %v612_v49 = vld [vmem:[%s6387_s1 + $0x1228] sm:$0xff] }
  0xb2   :  { %2862 = vmatpush1.bf16.msra.mxu1 %v2861_v12  ;;  %v298_v12 = vld [vmem:[%s6387_s1 + $0x858] sm:$0xff]  ;;  %v325_v63 = vld [vmem:[%s6387_s1 + $0x930] sm:$0xff]  ;;  %v2633_v25 = vpack.c.bf16 %v579_v1, %v575_v60  ;;  %v620_v60 = vld [vmem:[%s6387_s1 + $0x1268] sm:$0xff] }
  0xb3   :  { %2864 = vmatprep.subr.bf16.mxu1 %v2863_v14  ;;  %v4651_v14 = vrot.slane %v4629_v2, %v3687_v11  ;;  %v2897_v8 = vpack.c.bf16 %v325_v63, %v321_v62  ;;  %v615_v1 = vld [vmem:[%s6387_s1 + $0x1240] sm:$0xff] }
  0xb4   :  { %2598 = vmatpush1.bf16.msra.mxu0 %v2597_v13  ;;  %v302_v13 = vld [vmem:[%s6387_s1 + $0x878] sm:$0xff] }
  0xb5   :  { %2600 = vmatprep.subr.bf16.mxu0 %v2599_v18  ;;  %v2617_v18 = vpack.c.bf16 %v547_v10, %v543_v7  ;;  %v2883_v19 = vpack.c.bf16 %v302_v13, %v298_v12  ;;  %v4679_v27 = vcombine.high %v4651_v14, %v4651_v14  ;;  %v588_v7 = vld [vmem:[%s6387_s1 + $0x1168] sm:$0xff]  ;;  %v583_v10 = vld [vmem:[%s6387_s1 + $0x1140] sm:$0xff]  ;;  %v329_v12 = vld [vmem:[%s6387_s1 + $0x950] sm:$0xff] }
  0xb6   :  { %2866 = vmatpush1.bf16.msra.mxu1 %v2865_v41  ;;  %v555_v41 = vld [vmem:[%s6387_s1 + $0x1060] sm:$0xff]  ;;  %v333_v13 = vld [vmem:[%s6387_s1 + $0x970] sm:$0xff] }
  0xb7   :  { %2868 = vmatprep.subr.bf16.mxu1 %v2867_v26  ;;  %v310_v26 = vld [vmem:[%s6387_s1 + $0x8b8] sm:$0xff]  ;;  %v2621_v31 = vpack.c.bf16 %v555_v41, %v551_v20  ;;  %v596_v20 = vld [vmem:[%s6387_s1 + $0x11a8] sm:$0xff]  ;;  %v591_v41 = vld [vmem:[%s6387_s1 + $0x1180] sm:$0xff] }
  0xb8   :  { %2602 = vmatpush1.bf16.msra.mxu0 %v2601_v24  ;;  %v306_v24 = vld [vmem:[%s6387_s1 + $0x898] sm:$0xff]  ;;  %v2641_v36 = vpack.c.bf16 %v595_v29, %v591_v41  ;;  %v636_v41 = vld [vmem:[%s6387_s1 + $0x12e8] sm:$0xff] }
  0xb9   :  { %2604 = vmatprep.subr.bf16.mxu0 %v2603_v30  ;;  %v2885_v30 = vpack.c.bf16 %v301_v22, %v297_v21  ;;  %v2887_v32 = vpack.c.bf16 %v310_v26, %v306_v24  ;;  %v2901_v21 = vpack.c.bf16 %v333_v13, %v329_v12  ;;  %v2637_v22 = vpack.c.bf16 %v587_v16, %v583_v10  ;;  %v337_v24 = vld [vmem:[%s6387_s1 + $0x990] sm:$0xff]  ;;  %v628_v10 = vld [vmem:[%s6387_s1 + $0x12a8] sm:$0xff]  ;;  %v623_v16 = vld [vmem:[%s6387_s1 + $0x1280] sm:$0xff] }
  0xba   :  { %2870 = vmatpush1.bf16.msra.mxu1 %v2869_v39  ;;  %v563_v39 = vld [vmem:[%s6387_s1 + $0x10a0] sm:$0xff]  ;;  %v341_v26 = vld [vmem:[%s6387_s1 + $0x9b0] sm:$0xff] }
  0xbb   :  { %2872 = vmatprep.subr.bf16.mxu1 %v2871_v42  ;;  %v318_v42 = vld [vmem:[%s6387_s1 + $0x8f8] sm:$0xff]  ;;  %v2905_v35 = vpack.c.bf16 %v341_v26, %v337_v24 }
  0xbc   :  { %2606 = vmatpush1.bf16.msra.mxu0 %v2605_v40  ;;  %v314_v40 = vld [vmem:[%s6387_s1 + $0x8d8] sm:$0xff] }
  0xbd   :  { %2608 = vmatprep.subr.bf16.mxu0 %v2607_v47  ;;  %v2891_v38 = vpack.c.bf16 %v318_v42, %v314_v40  ;;  %v345_v40 = vld [vmem:[%s6387_s1 + $0x9d0] sm:$0xff] }
  0xbe   :  { %2874 = vmatpush1.bf16.msra.mxu1 %v2873_v53  ;;  %v322_v53 = vld [vmem:[%s6387_s1 + $0x918] sm:$0xff]  ;;  %v349_v42 = vld [vmem:[%s6387_s1 + $0x9f0] sm:$0xff] }
  0xbf   :  { %2876 = vmatprep.subr.bf16.mxu1 %v2875_v56  ;;  %v576_v56 = vld [vmem:[%s6387_s1 + $0x1108] sm:$0xff]  ;;  %v2909_v50 = vpack.c.bf16 %v349_v42, %v345_v40 }
  0xc0   :  { %2610 = vmatpush1.bf16.msra.mxu0 %v2609_v55  ;;  %v326_v55 = vld [vmem:[%s6387_s1 + $0x938] sm:$0xff]  ;;  %v2631_v0 = vpack.c.bf16 %v580_v57, %v576_v56  ;;  %v611_v57 = vld [vmem:[%s6387_s1 + $0x1220] sm:$0xff] }
  0xc1   :  { %2612 = vmatprep.subr.bf16.mxu0 %v2611_v33  ;;  %v2895_v33 = vpack.c.bf16 %v326_v55, %v322_v53  ;;  %v353_v53 = vld [vmem:[%s6387_s1 + $0xa10] sm:$0xff]  ;;  %v2649_v63 = vpack.c.bf16 %v611_v57, %v607_v52 }
  0xc2   :  { %2878 = vmatpush1.bf16.msra.mxu1 %v2877_v4  ;;  %v330_v4 = vld [vmem:[%s6387_s1 + $0x958] sm:$0xff]  ;;  %v357_v55 = vld [vmem:[%s6387_s1 + $0xa30] sm:$0xff] }
  0xc3   :  { %2880 = vmatprep.subr.bf16.mxu1 %v2879_v6  ;;  %v584_v6 = vld [vmem:[%s6387_s1 + $0x1148] sm:$0xff]  ;;  %v2913_v62 = vpack.c.bf16 %v357_v55, %v353_v53 }
  0xc4   :  { %2614 = vmatpush1.bf16.msra.mxu0 %v2613_v5  ;;  %v334_v5 = vld [vmem:[%s6387_s1 + $0x978] sm:$0xff]  ;;  %v2635_v15 = vpack.c.bf16 %v588_v7, %v584_v6  ;;  %v619_v7 = vld [vmem:[%s6387_s1 + $0x1260] sm:$0xff] }
  0xc5   :  { %2616 = vmatprep.subr.bf16.mxu0 %v2615_v9  ;;  %1547 = vmatmul.mubr.f32.vlgmr.msra.gmra.mrb[2].mxu1 %v3733_v34  ;;  %v559_v34 = vld [vmem:[%s6387_s1 + $0x1080] sm:$0xff]  ;;  %v2899_v9 = vpack.c.bf16 %v334_v5, %v330_v4  ;;  %v361_v4 = vld [vmem:[%s6387_s1 + $0xa50] sm:$0xff]  ;;  %v2653_v13 = vpack.c.bf16 %v619_v7, %v615_v1 }
  0xc6   :  { %2882 = vmatpush1.bf16.msra.mxu1 %v2881_v17  ;;  %1617 = vmatprep.mubr.f32.mxu1 %v4010_v48  ;;  %v2625_v47 = vpack.c.bf16 %v563_v39, %v559_v34  ;;  %v2627_v48 = vpack.c.bf16 %v572_v45, %v568_v43  ;;  %v338_v17 = vld [vmem:[%s6387_s1 + $0x998] sm:$0xff]  ;;  %v604_v34 = vld [vmem:[%s6387_s1 + $0x11e8] sm:$0xff]  ;;  %v599_v39 = vld [vmem:[%s6387_s1 + $0x11c0] sm:$0xff] }
  0xc7   :  { %1192 = vmatmul.mubr.f32.vlgmr.msra.gmra.mrb[0].mxu0 %v4250_v54  ;;  %2884 = vmatprep.subr.bf16.mxu1 %v2883_v19  ;;  %v592_v19 = vld [vmem:[%s6387_s1 + $0x1188] sm:$0xff]  ;;  %v603_v45 = vld [vmem:[%s6387_s1 + $0x11e0] sm:$0xff]  ;;  %v365_v5 = vld [vmem:[%s6387_s1 + $0xa70] sm:$0xff] }
  0xc8   :  { %2618 = vmatpush1.bf16.msra.mxu0 %v2617_v18  ;;  %1262 = vmatprep.mubr.f32.mxu0 %v4679_v27  ;;  %v342_v18 = vld [vmem:[%s6387_s1 + $0x9b8] sm:$0xff]  ;;  %v2639_v28 = vpack.c.bf16 %v596_v20, %v592_v19  ;;  %v2645_v51 = vpack.c.bf16 %v603_v45, %v599_v39  ;;  %v2917_v12 = vpack.c.bf16 %v365_v5, %v361_v4  ;;  %v627_v20 = vld [vmem:[%s6387_s1 + $0x12a0] sm:$0xff] }
  0xc9   :  { %2620 = vmatprep.subr.bf16.mxu0 %v2619_v23  ;;  %v2903_v23 = vpack.c.bf16 %v342_v18, %v338_v17  ;;  %v369_v17 = vld [vmem:[%s6387_s1 + $0xa90] sm:$0xff] }
  0xca   :  { %2886 = vmatpush1.bf16.msra.mxu1 %v2885_v30  ;;  %v346_v30 = vld [vmem:[%s6387_s1 + $0x9d8] sm:$0xff]  ;;  %v373_v18 = vld [vmem:[%s6387_s1 + $0xab0] sm:$0xff] }
  0xcb   :  { %2888 = vmatprep.subr.bf16.mxu1 %v2887_v32  ;;  %v600_v32 = vld [vmem:[%s6387_s1 + $0x11c8] sm:$0xff] }
  0xcc   :  { %2622 = vmatpush1.bf16.msra.mxu0 %v2621_v31  ;;  %v350_v31 = vld [vmem:[%s6387_s1 + $0x9f8] sm:$0xff]  ;;  %v2643_v43 = vpack.c.bf16 %v604_v34, %v600_v32 }
  0xcd   :  { %2624 = vmatprep.subr.bf16.mxu0 %v2623_v37  ;;  %v2907_v37 = vpack.c.bf16 %v350_v31, %v346_v30 }
  0xce   :  { %2890 = vmatpush1.bf16.msra.mxu1 %v2889_v46  ;;  %v354_v46 = vld [vmem:[%s6387_s1 + $0xa18] sm:$0xff] }
  0xcf   :  { %2892 = vmatprep.subr.bf16.mxu1 %v2891_v38  ;;  %v608_v38 = vld [vmem:[%s6387_s1 + $0x1208] sm:$0xff] }
  0xd0   :  { %2626 = vmatpush1.bf16.msra.mxu0 %v2625_v47  ;;  %v358_v47 = vld [vmem:[%s6387_s1 + $0xa38] sm:$0xff]  ;;  %v2647_v56 = vpack.c.bf16 %v612_v49, %v608_v38 }
  0xd1   :  { %2628 = vmatprep.subr.bf16.mxu0 %v2627_v48  ;;  %v2911_v48 = vpack.c.bf16 %v358_v47, %v354_v46 }
  0xd2   :  { %2894 = vmatpush1.bf16.msra.mxu1 %v2893_v58  ;;  %v362_v58 = vld [vmem:[%s6387_s1 + $0xa58] sm:$0xff] }
  0xd3   :  { %2896 = vmatprep.subr.bf16.mxu1 %v2895_v33  ;;  %v616_v33 = vld [vmem:[%s6387_s1 + $0x1248] sm:$0xff] }
  0xd4   :  { %2630 = vmatpush1.bf16.msra.mxu0 %v2629_v59  ;;  %v366_v59 = vld [vmem:[%s6387_s1 + $0xa78] sm:$0xff]  ;;  %v2651_v6 = vpack.c.bf16 %v620_v60, %v616_v33 }
  0xd5   :  { %2632 = vmatprep.subr.bf16.mxu0 %v2631_v0  ;;  %v2915_v0 = vpack.c.bf16 %v366_v59, %v362_v58 }
  0xd6   :  { %2898 = vmatpush1.bf16.msra.mxu1 %v2897_v8  ;;  %v370_v8 = vld [vmem:[%s6387_s1 + $0xa98] sm:$0xff] }
  0xd7   :  { %2900 = vmatprep.subr.bf16.mxu1 %v2899_v9  ;;  %v624_v9 = vld [vmem:[%s6387_s1 + $0x1288] sm:$0xff] }
  0xd8   :  { %2634 = vmatpush1.bf16.msra.mxu0 %v2633_v25  ;;  %v374_v25 = vld [vmem:[%s6387_s1 + $0xab8] sm:$0xff]  ;;  %v2655_v19 = vpack.c.bf16 %v628_v10, %v624_v9 }
  0xd9   :  { %2636 = vmatprep.subr.bf16.mxu0 %v2635_v15  ;;  %v2919_v15 = vpack.c.bf16 %v374_v25, %v370_v8 }
  0xda   :  { %2902 = vmatpush1.bf16.msra.mxu1 %v2901_v21  ;;  %v378_v21 = vld [vmem:[%s6387_s1 + $0xad8] sm:$0xff] }
  0xdb   :  { %2904 = vmatprep.subr.bf16.mxu1 %v2903_v23  ;;  %v632_v23 = vld [vmem:[%s6387_s1 + $0x12c8] sm:$0xff] }
  0xdc   :  { %2638 = vmatpush1.bf16.msra.mxu0 %v2637_v22  ;;  %v382_v22 = vld [vmem:[%s6387_s1 + $0xaf8] sm:$0xff] }
  0xdd   :  { %2640 = vmatprep.subr.bf16.mxu0 %v2639_v28 }
  0xde   :  { %2906 = vmatpush1.bf16.msra.mxu1 %v2905_v35 }
  0xdf   :  { %2908 = vmatprep.subr.bf16.mxu1 %v2907_v37 }
  0xe0   :  { %2642 = vmatpush1.bf16.msra.mxu0 %v2641_v36 }
  0xe1   :  { %2644 = vmatprep.subr.bf16.mxu0 %v2643_v43 }
  0xe2   :  { %2910 = vmatpush1.bf16.msra.mxu1 %v2909_v50 }
  0xe3   :  { %2912 = vmatprep.subr.bf16.mxu1 %v2911_v48 }
  0xe4   :  { %2646 = vmatpush1.bf16.msra.mxu0 %v2645_v51 }
  0xe5   :  { %2648 = vmatprep.subr.bf16.mxu0 %v2647_v56 }
  0xe6   :  { %2914 = vmatpush1.bf16.msra.mxu1 %v2913_v62 }
  0xe7   :  { %2916 = vmatprep.subr.bf16.mxu1 %v2915_v0 }
  0xe8   :  { %2650 = vmatpush1.bf16.msra.mxu0 %v2649_v63 }
  0xe9   :  { %2652 = vmatprep.subr.bf16.mxu0 %v2651_v6 }
  0xea   :  { %12 = vsyncpa [#allocation3], 0  ;;  %2918 = vmatpush1.bf16.msra.mxu1 %v2917_v12  ;;  %v2921_v24 = vpack.c.bf16 %v373_v18, %v369_v17  ;;  %v2657_v26 = vpack.c.bf16 %v627_v20, %v623_v16  ;;  %v2923_v28 = vpack.c.bf16 %v382_v22, %v378_v21  ;;  %v631_v29 = vld [vmem:[%s6387_s1 + $0x12c0] sm:$0xff]  ;;  %v377_v30 = vld [vmem:[%s6387_s1 + $0xad0] sm:$0xff]  ;;  %v2659_v32 = vpack.c.bf16 %v636_v41, %v632_v23 }
  0xeb   :  { %2920 = vmatprep.subr.bf16.mxu1 %v2919_v15  ;;  %v381_v31 = vld [vmem:[%s6387_s1 + $0xaf0] sm:$0xff]  ;;  %v635_v34 = vld [vmem:[%s6387_s1 + $0x12e0] sm:$0xff]  ;;  %v386_v35 = vld [vmem:[%s6387_s1 + $0xb18] sm:$0xff]  ;;  %vm911_vm0 = vcmask 261120  }
  0xec   :  { %2654 = vmatpush1.bf16.msra.mxu0 %v2653_v13  ;;  %v390_v36 = vld [vmem:[%s6387_s1 + $0xb38] sm:$0xff]  ;;  %v640_v37 = vld [vmem:[%s6387_s1 + $0x1308] sm:$0xff]  ;;  %v2925_v40 = vpack.c.bf16 %v381_v31, %v377_v30  ;;  %v2661_v42 = vpack.c.bf16 %v635_v34, %v631_v29  ;;  %v639_v45 = vld [vmem:[%s6387_s1 + $0x1300] sm:$0xff] }
  0xed   :  { %2656 = vmatprep.subr.bf16.mxu0 %v2655_v19  ;;  %v644_v39 = vld [vmem:[%s6387_s1 + $0x1328] sm:$0xff]  ;;  %v2927_v43 = vpack.c.bf16 %v390_v36, %v386_v35  ;;  %v385_v46 = vld [vmem:[%s6387_s1 + $0xb10] sm:$0xff]  ;;  %v643_v49 = vld [vmem:[%s6387_s1 + $0x1320] sm:$0xff] }
  0xee   :  { %2922 = vmatpush1.bf16.msra.mxu1 %v2921_v24  ;;  %v389_v47 = vld [vmem:[%s6387_s1 + $0xb30] sm:$0xff]  ;;  %v2663_v38 = vpack.c.bf16 %v644_v39, %v640_v37  ;;  %v394_v50 = vld [vmem:[%s6387_s1 + $0xb58] sm:$0xff]  ;;  %v648_v48 = vld [vmem:[%s6387_s1 + $0x1348] sm:$0xff]  ;;  %v2665_v55 = vpack.c.bf16 %v643_v49, %v639_v45 }
  0xef   :  { %2924 = vmatprep.subr.bf16.mxu1 %v2923_v28  ;;  %v398_v51 = vld [vmem:[%s6387_s1 + $0xb78] sm:$0xff]  ;;  %v652_v52 = vld [vmem:[%s6387_s1 + $0x1368] sm:$0xff]  ;;  %v2929_v53 = vpack.c.bf16 %v389_v47, %v385_v46  ;;  %v647_v57 = vld [vmem:[%s6387_s1 + $0x1340] sm:$0xff]  ;;  %v875_v28 = vcombine.high %v4629_v2, %v4629_v2 }
  0xf0   :  { %2658 = vmatpush1.bf16.msra.mxu0 %v2657_v26  ;;  %v2931_v56 = vpack.c.bf16 %v398_v51, %v394_v50  ;;  %v393_v58 = vld [vmem:[%s6387_s1 + $0xb50] sm:$0xff]  ;;  %v2667_v33 = vpack.c.bf16 %v652_v52, %v648_v48  ;;  %v651_v60 = vld [vmem:[%s6387_s1 + $0x1360] sm:$0xff]  ;;  %v402_v62 = vld [vmem:[%s6387_s1 + $0xb98] sm:$0xff] }
  0xf1   :  { %2660 = vmatprep.subr.bf16.mxu0 %v2659_v32  ;;  %v397_v59 = vld [vmem:[%s6387_s1 + $0xb70] sm:$0xff]  ;;  %v406_v63 = vld [vmem:[%s6387_s1 + $0xbb8] sm:$0xff]  ;;  %v656_v0 = vld [vmem:[%s6387_s1 + $0x1388] sm:$0xff]  ;;  %v2669_v5 = vpack.c.bf16 %v651_v60, %v647_v57 }
  0xf2   :  { %2926 = vmatpush1.bf16.msra.mxu1 %v2925_v40  ;;  %v660_v1 = vld [vmem:[%s6387_s1 + $0x13a8] sm:$0xff]  ;;  %v2933_v4 = vpack.c.bf16 %v397_v59, %v393_v58  ;;  %v2935_v6 = vpack.c.bf16 %v406_v63, %v402_v62  ;;  %v655_v7 = vld [vmem:[%s6387_s1 + $0x1380] sm:$0xff]  ;;  %v401_v8 = vld [vmem:[%s6387_s1 + $0xb90] sm:$0xff] }
  0xf3   :  { %2928 = vmatprep.subr.bf16.mxu1 %v2927_v43  ;;  %v405_v25 = vld [vmem:[%s6387_s1 + $0xbb0] sm:$0xff]  ;;  %v2671_v9 = vpack.c.bf16 %v660_v1, %v656_v0  ;;  %v659_v10 = vld [vmem:[%s6387_s1 + $0x13a0] sm:$0xff]  ;;  %v410_v12 = vld [vmem:[%s6387_s1 + $0xbd8] sm:$0xff]  ;;  %v5048_v43 = vrot.slane %v875_v28, %v3687_v11 }
  0xf4   :  { %2662 = vmatpush1.bf16.msra.mxu0 %v2661_v42  ;;  %v414_v13 = vld [vmem:[%s6387_s1 + $0xbf8] sm:$0xff]  ;;  %v664_v15 = vld [vmem:[%s6387_s1 + $0x13c8] sm:$0xff]  ;;  %v2937_v17 = vpack.c.bf16 %v405_v25, %v401_v8  ;;  %v2673_v18 = vpack.c.bf16 %v659_v10, %v655_v7  ;;  %v663_v20 = vld [vmem:[%s6387_s1 + $0x13c0] sm:$0xff] }
  0xf5   :  { %2664 = vmatprep.subr.bf16.mxu0 %v2663_v38  ;;  %v668_v16 = vld [vmem:[%s6387_s1 + $0x13e8] sm:$0xff]  ;;  %v2939_v19 = vpack.c.bf16 %v414_v13, %v410_v12  ;;  %v409_v21 = vld [vmem:[%s6387_s1 + $0xbd0] sm:$0xff]  ;;  %v667_v41 = vld [vmem:[%s6387_s1 + $0x13e0] sm:$0xff] }
  0xf6   :  { %2930 = vmatpush1.bf16.msra.mxu1 %v2929_v53  ;;  %v413_v22 = vld [vmem:[%s6387_s1 + $0xbf0] sm:$0xff]  ;;  %v2675_v23 = vpack.c.bf16 %v668_v16, %v664_v15  ;;  %v418_v24 = vld [vmem:[%s6387_s1 + $0xc18] sm:$0xff]  ;;  %v672_v29 = vld [vmem:[%s6387_s1 + $0x1408] sm:$0xff]  ;;  %v2677_v32 = vpack.c.bf16 %v667_v41, %v663_v20 }
  0xf7   :  { %2932 = vmatprep.subr.bf16.mxu1 %v2931_v56  ;;  %v422_v26 = vld [vmem:[%s6387_s1 + $0xc38] sm:$0xff]  ;;  %v676_v30 = vld [vmem:[%s6387_s1 + $0x1428] sm:$0xff]  ;;  %v2941_v31 = vpack.c.bf16 %v413_v22, %v409_v21  ;;  %v671_v35 = vld [vmem:[%s6387_s1 + $0x1400] sm:$0xff]  ;;  %v5076_v56 = vcombine.high %v5048_v43, %v5048_v43 }
  0xf8   :  { %2666 = vmatpush1.bf16.msra.mxu0 %v2665_v55  ;;  %v2943_v34 = vpack.c.bf16 %v422_v26, %v418_v24  ;;  %v417_v2 = vld [vmem:[%s6387_s1 + $0xc10] sm:$0xff]  ;;  %v2679_v37 = vpack.c.bf16 %v676_v30, %v672_v29  ;;  %v675_v39 = vld [vmem:[%s6387_s1 + $0x1420] sm:$0xff]  ;;  %v426_v40 = vld [vmem:[%s6387_s1 + $0xc58] sm:$0xff] }
  0xf9   :  { %2668 = vmatprep.subr.bf16.mxu0 %v2667_v33  ;;  %v421_v36 = vld [vmem:[%s6387_s1 + $0xc30] sm:$0xff]  ;;  %v430_v42 = vld [vmem:[%s6387_s1 + $0xc78] sm:$0xff]  ;;  %v680_v45 = vld [vmem:[%s6387_s1 + $0x1448] sm:$0xff]  ;;  %v2681_v38 = vpack.c.bf16 %v675_v39, %v671_v35 }
  0xfa   :  { %2934 = vmatpush1.bf16.msra.mxu1 %v2933_v4  ;;  %v684_v46 = vld [vmem:[%s6387_s1 + $0x1468] sm:$0xff]  ;;  %v2945_v47 = vpack.c.bf16 %v421_v36, %v417_v2  ;;  %v2947_v49 = vpack.c.bf16 %v430_v42, %v426_v40  ;;  %v679_v50 = vld [vmem:[%s6387_s1 + $0x1440] sm:$0xff]  ;;  %v425_v11 = vld [vmem:[%s6387_s1 + $0xc50] sm:$0xff] }
  0xfb   :  { %2936 = vmatprep.subr.bf16.mxu1 %v2935_v6  ;;  %v429_v51 = vld [vmem:[%s6387_s1 + $0xc70] sm:$0xff]  ;;  %v2683_v48 = vpack.c.bf16 %v684_v46, %v680_v45  ;;  %v683_v52 = vld [vmem:[%s6387_s1 + $0x1460] sm:$0xff]  ;;  %v434_v53 = vld [vmem:[%s6387_s1 + $0xc98] sm:$0xff] }
  0xfc   :  { %2670 = vmatpush1.bf16.msra.mxu0 %v2669_v5  ;;  %v438_v55 = vld [vmem:[%s6387_s1 + $0xcb8] sm:$0xff]  ;;  %v688_v57 = vld [vmem:[%s6387_s1 + $0x1488] sm:$0xff]  ;;  %v2949_v59 = vpack.c.bf16 %v429_v51, %v425_v11  ;;  %v2685_v33 = vpack.c.bf16 %v683_v52, %v679_v50  ;;  %v433_v62 = vld [vmem:[%s6387_s1 + $0xc90] sm:$0xff] }
  0xfd   :  { %2672 = vmatprep.subr.bf16.mxu0 %v2671_v9  ;;  %v692_v58 = vld [vmem:[%s6387_s1 + $0x14a8] sm:$0xff]  ;;  %v2951_v60 = vpack.c.bf16 %v438_v55, %v434_v53  ;;  %v437_v63 = vld [vmem:[%s6387_s1 + $0xcb0] sm:$0xff]  ;;  %v691_v1 = vld [vmem:[%s6387_s1 + $0x14a0] sm:$0xff] }
  0xfe   :  { %2938 = vmatpush1.bf16.msra.mxu1 %v2937_v17  ;;  %v2687_v0 = vpack.c.bf16 %v692_v58, %v688_v57  ;;  %v442_v4 = vld [vmem:[%s6387_s1 + $0xcd8] sm:$0xff]  ;;  %v696_v6 = vld [vmem:[%s6387_s1 + $0x14c8] sm:$0xff]  ;;  %v2953_v8 = vpack.c.bf16 %v437_v63, %v433_v62  ;;  %v695_v10 = vld [vmem:[%s6387_s1 + $0x14c0] sm:$0xff] }
  0xff   :  { %2940 = vmatprep.subr.bf16.mxu1 %v2939_v19  ;;  %v446_v5 = vld [vmem:[%s6387_s1 + $0xcf8] sm:$0xff]  ;;  %v700_v7 = vld [vmem:[%s6387_s1 + $0x14e8] sm:$0xff]  ;;  %v441_v12 = vld [vmem:[%s6387_s1 + $0xcd0] sm:$0xff] }
 0x100   :  { %2674 = vmatpush1.bf16.msra.mxu0 %v2673_v18  ;;  %v2955_v9 = vpack.c.bf16 %v446_v5, %v442_v4  ;;  %v445_v13 = vld [vmem:[%s6387_s1 + $0xcf0] sm:$0xff]  ;;  %v699_v15 = vld [vmem:[%s6387_s1 + $0x14e0] sm:$0xff]  ;;  %v450_v16 = vld [vmem:[%s6387_s1 + $0xd18] sm:$0xff] }
 0x101   :  { %2676 = vmatprep.subr.bf16.mxu0 %v2675_v23  ;;  %v454_v17 = vld [vmem:[%s6387_s1 + $0xd38] sm:$0xff]  ;;  %v704_v18 = vld [vmem:[%s6387_s1 + $0x1508] sm:$0xff]  ;;  %v2957_v20 = vpack.c.bf16 %v445_v13, %v441_v12  ;;  %v2693_v21 = vpack.c.bf16 %v699_v15, %v695_v10  ;;  %v703_v23 = vld [vmem:[%s6387_s1 + $0x1500] sm:$0xff] }
 0x102   :  { %2942 = vmatpush1.bf16.msra.mxu1 %v2941_v31  ;;  %v708_v19 = vld [vmem:[%s6387_s1 + $0x1528] sm:$0xff]  ;;  %v2959_v22 = vpack.c.bf16 %v454_v17, %v450_v16  ;;  %v449_v41 = vld [vmem:[%s6387_s1 + $0xd10] sm:$0xff]  ;;  %v707_v28 = vld [vmem:[%s6387_s1 + $0x1520] sm:$0xff] }
 0x103   :  { %2944 = vmatprep.subr.bf16.mxu1 %v2943_v34  ;;  %v453_v24 = vld [vmem:[%s6387_s1 + $0xd30] sm:$0xff]  ;;  %v2695_v26 = vpack.c.bf16 %v708_v19, %v704_v18  ;;  %v458_v29 = vld [vmem:[%s6387_s1 + $0xd58] sm:$0xff]  ;;  %v712_v31 = vld [vmem:[%s6387_s1 + $0x1548] sm:$0xff]  ;;  %v2697_v35 = vpack.c.bf16 %v707_v28, %v703_v23 }
 0x104   :  { %2678 = vmatpush1.bf16.msra.mxu0 %v2677_v32  ;;  %v462_v30 = vld [vmem:[%s6387_s1 + $0xd78] sm:$0xff]  ;;  %v716_v32 = vld [vmem:[%s6387_s1 + $0x1568] sm:$0xff]  ;;  %v2961_v34 = vpack.c.bf16 %v453_v24, %v449_v41  ;;  %v711_v36 = vld [vmem:[%s6387_s1 + $0x1540] sm:$0xff] }
 0x105   :  { %2680 = vmatprep.subr.bf16.mxu0 %v2679_v37  ;;  %1618 = vmatmul.mubr.f32.vlgmr.msra.gmra.mrb[2].mxu1 %v4000_v44  ;;  %v687_v44 = vld [vmem:[%s6387_s1 + $0x1480] sm:$0xff]  ;;  %v2963_v2 = vpack.c.bf16 %v462_v30, %v458_v29  ;;  %v457_v37 = vld [vmem:[%s6387_s1 + $0xd50] sm:$0xff]  ;;  %v2699_v40 = vpack.c.bf16 %v716_v32, %v712_v31  ;;  %v466_v45 = vld [vmem:[%s6387_s1 + $0xd98] sm:$0xff] }
 0x106   :  { %2946 = vmatpush1.bf16.msra.mxu1 %v2945_v47  ;;  %1688 = vmatprep.mubr.f32.mxu1 %v4278_v3  ;;  %v2689_v25 = vpack.c.bf16 %v691_v1, %v687_v44  ;;  %v2691_v3 = vpack.c.bf16 %v700_v7, %v696_v6  ;;  %v461_v39 = vld [vmem:[%s6387_s1 + $0xd70] sm:$0xff]  ;;  %v715_v42 = vld [vmem:[%s6387_s1 + $0x1560] sm:$0xff]  ;;  %v470_v46 = vld [vmem:[%s6387_s1 + $0xdb8] sm:$0xff] }
 0x107   :  { %1263 = vmatmul.mubr.f32.vlgmr.msra.gmra.mrb[0].mxu0 %v4651_v14  ;;  %2948 = vmatprep.subr.bf16.mxu1 %v2947_v49  ;;  %v720_v47 = vld [vmem:[%s6387_s1 + $0x1588] sm:$0xff]  ;;  %v2965_v49 = vpack.c.bf16 %v461_v39, %v457_v37  ;;  %v2701_v50 = vpack.c.bf16 %v715_v42, %v711_v36  ;;  %v2967_v11 = vpack.c.bf16 %v470_v46, %v466_v45  ;;  %v719_v51 = vld [vmem:[%s6387_s1 + $0x1580] sm:$0xff]  ;;  %v469_v52 = vld [vmem:[%s6387_s1 + $0xdb0] sm:$0xff] }
 0x108   :  { %2682 = vmatpush1.bf16.msra.mxu0 %v2681_v38  ;;  %1333 = vmatprep.mubr.f32.mxu0 %v5076_v56  ;;  %v724_v38 = vld [vmem:[%s6387_s1 + $0x15a8] sm:$0xff]  ;;  %v723_v57 = vld [vmem:[%s6387_s1 + $0x15a0] sm:$0xff]  ;;  %v474_v58 = vld [vmem:[%s6387_s1 + $0xdd8] sm:$0xff] }
 0x109   :  { %2684 = vmatprep.subr.bf16.mxu0 %v2683_v48  ;;  %v465_v48 = vld [vmem:[%s6387_s1 + $0xd90] sm:$0xff]  ;;  %v2703_v55 = vpack.c.bf16 %v724_v38, %v720_v47  ;;  %v732_v44 = vld [vmem:[%s6387_s1 + $0x15e8] sm:$0xff]  ;;  %v2705_v63 = vpack.c.bf16 %v723_v57, %v719_v51  ;;  %v727_v1 = vld [vmem:[%s6387_s1 + $0x15c0] sm:$0xff] }
 0x10a   :  { %2950 = vmatpush1.bf16.msra.mxu1 %v2949_v59  ;;  %v478_v59 = vld [vmem:[%s6387_s1 + $0xdf8] sm:$0xff]  ;;  %v2969_v62 = vpack.c.bf16 %v469_v52, %v465_v48  ;;  %v473_v4 = vld [vmem:[%s6387_s1 + $0xdd0] sm:$0xff]  ;;  %v731_v7 = vld [vmem:[%s6387_s1 + $0x15e0] sm:$0xff] }
 0x10b   :  { %2952 = vmatprep.subr.bf16.mxu1 %v2951_v60  ;;  %v728_v60 = vld [vmem:[%s6387_s1 + $0x15c8] sm:$0xff]  ;;  %v477_v5 = vld [vmem:[%s6387_s1 + $0xdf0] sm:$0xff]  ;;  %v2709_v13 = vpack.c.bf16 %v731_v7, %v727_v1  ;;  %v735_v15 = vld [vmem:[%s6387_s1 + $0x1600] sm:$0xff] }
 0x10c   :  { %2686 = vmatpush1.bf16.msra.mxu0 %v2685_v33  ;;  %v2707_v6 = vpack.c.bf16 %v732_v44, %v728_v60  ;;  %v740_v10 = vld [vmem:[%s6387_s1 + $0x1628] sm:$0xff]  ;;  %v2973_v12 = vpack.c.bf16 %v477_v5, %v473_v4  ;;  %v481_v16 = vld [vmem:[%s6387_s1 + $0xe10] sm:$0xff]  ;;  %v739_v19 = vld [vmem:[%s6387_s1 + $0x1620] sm:$0xff] }
 0x10d   :  { %2688 = vmatprep.subr.bf16.mxu0 %v2687_v0  ;;  %v2971_v0 = vpack.c.bf16 %v478_v59, %v474_v58  ;;  %v485_v17 = vld [vmem:[%s6387_s1 + $0xe30] sm:$0xff]  ;;  %v748_v23 = vld [vmem:[%s6387_s1 + $0x1668] sm:$0xff]  ;;  %v2713_v24 = vpack.c.bf16 %v739_v19, %v735_v15  ;;  %v743_v28 = vld [vmem:[%s6387_s1 + $0x1640] sm:$0xff] }
 0x10e   :  { %2954 = vmatpush1.bf16.msra.mxu1 %v2953_v8  ;;  %v482_v8 = vld [vmem:[%s6387_s1 + $0xe18] sm:$0xff]  ;;  %v2977_v41 = vpack.c.bf16 %v485_v17, %v481_v16  ;;  %v489_v29 = vld [vmem:[%s6387_s1 + $0xe50] sm:$0xff]  ;;  %v747_v32 = vld [vmem:[%s6387_s1 + $0x1660] sm:$0xff] }
 0x10f   :  { %2956 = vmatprep.subr.bf16.mxu1 %v2955_v9  ;;  %v736_v9 = vld [vmem:[%s6387_s1 + $0x1608] sm:$0xff]  ;;  %v493_v30 = vld [vmem:[%s6387_s1 + $0xe70] sm:$0xff]  ;;  %v2717_v39 = vpack.c.bf16 %v747_v32, %v743_v28  ;;  %v751_v42 = vld [vmem:[%s6387_s1 + $0x1680] sm:$0xff] }
 0x110   :  { %2690 = vmatpush1.bf16.msra.mxu0 %v2689_v25  ;;  %v486_v25 = vld [vmem:[%s6387_s1 + $0xe38] sm:$0xff]  ;;  %v2711_v18 = vpack.c.bf16 %v740_v10, %v736_v9  ;;  %v756_v36 = vld [vmem:[%s6387_s1 + $0x16a8] sm:$0xff]  ;;  %v2981_v37 = vpack.c.bf16 %v493_v30, %v489_v29  ;;  %v497_v45 = vld [vmem:[%s6387_s1 + $0xe90] sm:$0xff] }
 0x111   :  { %2692 = vmatprep.subr.bf16.mxu0 %v2691_v3  ;;  %v2975_v3 = vpack.c.bf16 %v486_v25, %v482_v8  ;;  %v501_v46 = vld [vmem:[%s6387_s1 + $0xeb0] sm:$0xff]  ;;  %v755_v38 = vld [vmem:[%s6387_s1 + $0x16a0] sm:$0xff]  ;;  %v764_v51 = vld [vmem:[%s6387_s1 + $0x16e8] sm:$0xff] }
 0x112   :  { %2958 = vmatpush1.bf16.msra.mxu1 %v2957_v20  ;;  %v490_v20 = vld [vmem:[%s6387_s1 + $0xe58] sm:$0xff]  ;;  %v2985_v48 = vpack.c.bf16 %v501_v46, %v497_v45  ;;  %v2721_v52 = vpack.c.bf16 %v755_v38, %v751_v42  ;;  %v759_v57 = vld [vmem:[%s6387_s1 + $0x16c0] sm:$0xff]  ;;  %v505_v58 = vld [vmem:[%s6387_s1 + $0xed0] sm:$0xff] }
 0x113   :  { %2960 = vmatprep.subr.bf16.mxu1 %v2959_v22  ;;  %v744_v22 = vld [vmem:[%s6387_s1 + $0x1648] sm:$0xff]  ;;  %v509_v59 = vld [vmem:[%s6387_s1 + $0xef0] sm:$0xff]  ;;  %v763_v44 = vld [vmem:[%s6387_s1 + $0x16e0] sm:$0xff] }
 0x114   :  { %2694 = vmatpush1.bf16.msra.mxu0 %v2693_v21  ;;  %v494_v21 = vld [vmem:[%s6387_s1 + $0xe78] sm:$0xff]  ;;  %v2715_v31 = vpack.c.bf16 %v748_v23, %v744_v22  ;;  %v772_v1 = vld [vmem:[%s6387_s1 + $0x1728] sm:$0xff]  ;;  %v2989_v4 = vpack.c.bf16 %v509_v59, %v505_v58  ;;  %v2725_v5 = vpack.c.bf16 %v763_v44, %v759_v57  ;;  %v767_v7 = vld [vmem:[%s6387_s1 + $0x1700] sm:$0xff] }
 0x115   :  { %2696 = vmatprep.subr.bf16.mxu0 %v2695_v26  ;;  %v2979_v26 = vpack.c.bf16 %v494_v21, %v490_v20  ;;  %v513_v8 = vld [vmem:[%s6387_s1 + $0xf10] sm:$0xff]  ;;  %v771_v10 = vld [vmem:[%s6387_s1 + $0x1720] sm:$0xff]  ;;  %v780_v15 = vld [vmem:[%s6387_s1 + $0x1768] sm:$0xff] }
 0x116   :  { %2962 = vmatpush1.bf16.msra.mxu1 %v2961_v34  ;;  %v498_v34 = vld [vmem:[%s6387_s1 + $0xe98] sm:$0xff]  ;;  %v517_v25 = vld [vmem:[%s6387_s1 + $0xf30] sm:$0xff]  ;;  %v2729_v17 = vpack.c.bf16 %v771_v10, %v767_v7  ;;  %v775_v19 = vld [vmem:[%s6387_s1 + $0x1740] sm:$0xff] }
 0x117   :  { %2964 = vmatprep.subr.bf16.mxu1 %v2963_v2  ;;  %v752_v2 = vld [vmem:[%s6387_s1 + $0x1688] sm:$0xff]  ;;  %v2993_v16 = vpack.c.bf16 %v517_v25, %v513_v8  ;;  %v521_v20 = vld [vmem:[%s6387_s1 + $0xf50] sm:$0xff]  ;;  %v779_v23 = vld [vmem:[%s6387_s1 + $0x1760] sm:$0xff] }
 0x118   :  { %2698 = vmatpush1.bf16.msra.mxu0 %v2697_v35  ;;  %v5193_v53 = vpop.f32.mrb[0].mxu1  ;;  %v502_v35 = vld [vmem:[%s6387_s1 + $0xeb8] sm:$0xff]  ;;  %v2719_v47 = vpack.c.bf16 %v756_v36, %v752_v2  ;;  %v525_v21 = vld [vmem:[%s6387_s1 + $0xf70] sm:$0xff]  ;;  %v788_v28 = vld [vmem:[%s6387_s1 + $0x17a8] sm:$0xff]  ;;  %v2733_v30 = vpack.c.bf16 %v779_v23, %v775_v19 }
 0x119   :  { %2700 = vmatprep.subr.bf16.mxu0 %v2699_v40  ;;  %v5204_v33 = vpop.f32.mrb[1].mxu1  ;;  %v2983_v40 = vpack.c.bf16 %v502_v35, %v498_v34  ;;  %v2997_v29 = vpack.c.bf16 %v525_v21, %v521_v20  ;;  %v783_v32 = vld [vmem:[%s6387_s1 + $0x1780] sm:$0xff]  ;;  %v529_v34 = vld [vmem:[%s6387_s1 + $0xf90] sm:$0xff]  ;;  %v796_v42 = vld [vmem:[%s6387_s1 + $0x17e8] sm:$0xff] }
 0x11a   :  { %2966 = vmatpush1.bf16.msra.mxu1 %v2965_v49  ;;  %v506_v49 = vld [vmem:[%s6387_s1 + $0xed8] sm:$0xff]  ;;  %v533_v35 = vld [vmem:[%s6387_s1 + $0xfb0] sm:$0xff]  ;;  %v787_v36 = vld [vmem:[%s6387_s1 + $0x17a0] sm:$0xff] }
 0x11b   :  { %2968 = vmatprep.subr.bf16.mxu1 %v2967_v11  ;;  %v760_v11 = vld [vmem:[%s6387_s1 + $0x16c8] sm:$0xff]  ;;  %v3001_v45 = vpack.c.bf16 %v533_v35, %v529_v34  ;;  %v2737_v46 = vpack.c.bf16 %v787_v36, %v783_v32  ;;  %v791_v38 = vld [vmem:[%s6387_s1 + $0x17c0] sm:$0xff]  ;;  %v806_v19 = vld [vmem:[%s6387_s1 + $0x1838] sm:$0xff] }
 0x11c   :  { %2702 = vmatpush1.bf16.msra.mxu0 %v2701_v50  ;;  %v510_v50 = vld [vmem:[%s6387_s1 + $0xef8] sm:$0xff]  ;;  %v2723_v60 = vpack.c.bf16 %v764_v51, %v760_v11  ;;  %v795_v51 = vld [vmem:[%s6387_s1 + $0x17e0] sm:$0xff]  ;;  %v804_v57 = vld [vmem:[%s6387_s1 + $0x1828] sm:$0xff] }
 0x11d   :  { %2704 = vmatprep.subr.bf16.mxu0 %v2703_v55  ;;  %v2987_v55 = vpack.c.bf16 %v510_v50, %v506_v49  ;;  %v537_v49 = vld [vmem:[%s6387_s1 + $0xfd0] sm:$0xff]  ;;  %v2741_v59 = vpack.c.bf16 %v795_v51, %v791_v38  ;;  %v799_v44 = vld [vmem:[%s6387_s1 + $0x1800] sm:$0xff]  ;;  %v812_v7 = vld [vmem:[%s6387_s1 + $0x1868] sm:$0xff] }
 0x11e   :  { %2970 = vmatpush1.bf16.msra.mxu1 %v2969_v62  ;;  %v514_v62 = vld [vmem:[%s6387_s1 + $0xf18] sm:$0xff]  ;;  %v541_v50 = vld [vmem:[%s6387_s1 + $0xff0] sm:$0xff]  ;;  %v807_v10 = vld [vmem:[%s6387_s1 + $0x1840] sm:$0xff] }
 0x11f   :  { %2972 = vmatprep.subr.bf16.mxu1 %v2971_v0  ;;  %v768_v0 = vld [vmem:[%s6387_s1 + $0x1708] sm:$0xff]  ;;  %v3005_v58 = vpack.c.bf16 %v541_v50, %v537_v49  ;;  %v565_v23 = vld [vmem:[%s6387_s1 + $0x10b0] sm:$0xff]  ;;  %v814_v32 = vld [vmem:[%s6387_s1 + $0x1878] sm:$0xff] }
 0x120   :  { %2706 = vmatpush1.bf16.msra.mxu0 %v2705_v63  ;;  %v518_v63 = vld [vmem:[%s6387_s1 + $0xf38] sm:$0xff]  ;;  %v2727_v9 = vpack.c.bf16 %v772_v1, %v768_v0  ;;  %v803_v1 = vld [vmem:[%s6387_s1 + $0x1820] sm:$0xff]  ;;  %v573_v36 = vld [vmem:[%s6387_s1 + $0x10f0] sm:$0xff] }
 0x121   :  { %2708 = vmatprep.subr.bf16.mxu0 %v2707_v6  ;;  %v2991_v6 = vpack.c.bf16 %v518_v63, %v514_v62  ;;  %v545_v62 = vld [vmem:[%s6387_s1 + $0x1010] sm:$0xff]  ;;  %v2745_v25 = vpack.c.bf16 %v803_v1, %v799_v44  ;;  %v2320_v34 = vld.sshfl [vmem:[%s6386_s0 + $0x18] sm:$0x3 pattern:$0x76325410] }
 0x122   :  { %2974 = vmatpush1.bf16.msra.mxu1 %v2973_v12  ;;  %v522_v12 = vld [vmem:[%s6387_s1 + $0xf58] sm:$0xff]  ;;  %v549_v63 = vld [vmem:[%s6387_s1 + $0x1030] sm:$0xff] }
 0x123   :  { %2976 = vmatprep.subr.bf16.mxu1 %v2975_v3  ;;  %v776_v3 = vld [vmem:[%s6387_s1 + $0x1748] sm:$0xff]  ;;  %v3009_v8 = vpack.c.bf16 %v549_v63, %v545_v62  ;;  %v1915_v38 = vld [vmem:[%s6389_s3 + $0x18] sm:$0xff]  ;;  %v581_v51 = vld [vmem:[%s6387_s1 + $0x1130] sm:$0xff] }
 0x124   :  { %2710 = vmatpush1.bf16.msra.mxu0 %v2709_v13  ;;  %v526_v13 = vld [vmem:[%s6387_s1 + $0xf78] sm:$0xff]  ;;  %v2731_v22 = vpack.c.bf16 %v780_v15, %v776_v3  ;;  %v811_v15 = vld [vmem:[%s6387_s1 + $0x1860] sm:$0xff]  ;;  %v589_v1 = vld [vmem:[%s6387_s1 + $0x1170] sm:$0xff] }
 0x125   :  { %2712 = vmatprep.subr.bf16.mxu0 %v2711_v18  ;;  %v2995_v18 = vpack.c.bf16 %v526_v13, %v522_v12  ;;  %v553_v12 = vld [vmem:[%s6387_s1 + $0x1050] sm:$0xff]  ;;  %v2749_v21 = vpack.c.bf16 %v811_v15, %v807_v10  ;;  %v1919_v44 = vld [vmem:[%s6389_s3 + $0x38] sm:$0xff] }
 0x126   :  { %2978 = vmatpush1.bf16.msra.mxu1 %v2977_v41  ;;  %v530_v41 = vld [vmem:[%s6387_s1 + $0xf98] sm:$0xff]  ;;  %v557_v13 = vld [vmem:[%s6387_s1 + $0x1070] sm:$0xff] }
 0x127   :  { %2980 = vmatprep.subr.bf16.mxu1 %v2979_v26  ;;  %v784_v26 = vld [vmem:[%s6387_s1 + $0x1788] sm:$0xff]  ;;  %v3013_v20 = vpack.c.bf16 %v557_v13, %v553_v12  ;;  %v1923_v10 = vld [vmem:[%s6389_s3 + $0x58] sm:$0xff]  ;;  %v597_v15 = vld [vmem:[%s6387_s1 + $0x11b0] sm:$0xff] }
 0x128   :  { %2714 = vmatpush1.bf16.msra.mxu0 %v2713_v24  ;;  %v534_v24 = vld [vmem:[%s6387_s1 + $0xfb8] sm:$0xff]  ;;  %v2735_v2 = vpack.c.bf16 %v788_v28, %v784_v26 }
 0x129   :  { %2716 = vmatprep.subr.bf16.mxu0 %v2715_v31  ;;  %v2999_v31 = vpack.c.bf16 %v534_v24, %v530_v41  ;;  %v570_v41 = vld [vmem:[%s6387_s1 + $0x10d8] sm:$0xff]  ;;  %v3366_v24 = vmov 0.0  }
 0x12a   :  { %2982 = vmatpush1.bf16.msra.mxu1 %v2981_v37  ;;  %v538_v37 = vld [vmem:[%s6387_s1 + $0xfd8] sm:$0xff] }
 0x12b   :  { %2984 = vmatprep.subr.bf16.mxu1 %v2983_v40  ;;  %v792_v40 = vld [vmem:[%s6387_s1 + $0x17c8] sm:$0xff]  ;;  %v574_v26 = vld [vmem:[%s6387_s1 + $0x10f8] sm:$0xff] }
 0x12c   :  { %2718 = vmatpush1.bf16.msra.mxu0 %v2717_v39  ;;  %v542_v39 = vld [vmem:[%s6387_s1 + $0xff8] sm:$0xff]  ;;  %v2739_v11 = vpack.c.bf16 %v796_v42, %v792_v40 }
 0x12d   :  { %2720 = vmatprep.subr.bf16.mxu0 %v2719_v47  ;;  %v3003_v47 = vpack.c.bf16 %v542_v39, %v538_v37  ;;  %v578_v37 = vld [vmem:[%s6387_s1 + $0x1118] sm:$0xff] }
 0x12e   :  { %2986 = vmatpush1.bf16.msra.mxu1 %v2985_v48  ;;  %v546_v48 = vld [vmem:[%s6387_s1 + $0x1018] sm:$0xff] }
 0x12f   :  { %2988 = vmatprep.subr.bf16.mxu1 %v2987_v55  ;;  %v800_v55 = vld [vmem:[%s6387_s1 + $0x1808] sm:$0xff]  ;;  %v582_v40 = vld [vmem:[%s6387_s1 + $0x1138] sm:$0xff] }
 0x130   :  { %2722 = vmatpush1.bf16.msra.mxu0 %v2721_v52  ;;  %v550_v52 = vld [vmem:[%s6387_s1 + $0x1038] sm:$0xff]  ;;  %v2743_v0 = vpack.c.bf16 %v804_v57, %v800_v55  ;;  %v3023_v50 = vpack.c.bf16 %v582_v40, %v578_v37  ;;  %v609_v37 = vld [vmem:[%s6387_s1 + $0x1210] sm:$0xff] }
 0x131   :  { %2724 = vmatprep.subr.bf16.mxu0 %v2723_v60  ;;  %v3007_v60 = vpack.c.bf16 %v550_v52, %v546_v48  ;;  %v586_v48 = vld [vmem:[%s6387_s1 + $0x1158] sm:$0xff] }
 0x132   :  { %2990 = vmatpush1.bf16.msra.mxu1 %v2989_v4  ;;  %v554_v4 = vld [vmem:[%s6387_s1 + $0x1058] sm:$0xff] }
 0x133   :  { %2992 = vmatprep.subr.bf16.mxu1 %v2991_v6  ;;  %v808_v6 = vld [vmem:[%s6387_s1 + $0x1848] sm:$0xff]  ;;  %v590_v55 = vld [vmem:[%s6387_s1 + $0x1178] sm:$0xff] }
 0x134   :  { %2726 = vmatpush1.bf16.msra.mxu0 %v2725_v5  ;;  %v558_v5 = vld [vmem:[%s6387_s1 + $0x1078] sm:$0xff]  ;;  %v2747_v3 = vpack.c.bf16 %v812_v7, %v808_v6  ;;  %v3027_v63 = vpack.c.bf16 %v590_v55, %v586_v48  ;;  %v617_v48 = vld [vmem:[%s6387_s1 + $0x1250] sm:$0xff] }
 0x135   :  { %2728 = vmatprep.subr.bf16.mxu0 %v2727_v9  ;;  %v3011_v9 = vpack.c.bf16 %v558_v5, %v554_v4  ;;  %v594_v4 = vld [vmem:[%s6387_s1 + $0x1198] sm:$0xff] }
 0x136   :  { %2994 = vmatpush1.bf16.msra.mxu1 %v2993_v16  ;;  %v562_v16 = vld [vmem:[%s6387_s1 + $0x1098] sm:$0xff] }
 0x137   :  { %2996 = vmatprep.subr.bf16.mxu1 %v2995_v18  ;;  %v802_v18 = vld [vmem:[%s6387_s1 + $0x1818] sm:$0xff] }
 0x138   :  { %2730 = vmatpush1.bf16.msra.mxu0 %v2729_v17  ;;  %v566_v17 = vld [vmem:[%s6387_s1 + $0x10b8] sm:$0xff]  ;;  %v3135_v28 = vpack.c.bf16 %v806_v19, %v802_v18 }
 0x139   :  { %2732 = vmatprep.subr.bf16.mxu0 %v2731_v22  ;;  %v3015_v22 = vpack.c.bf16 %v566_v17, %v562_v16  ;;  %v598_v6 = vld [vmem:[%s6387_s1 + $0x11b8] sm:$0xff] }
 0x13a   :  { %2998 = vmatpush1.bf16.msra.mxu1 %v2997_v29  ;;  %v801_v29 = vld [vmem:[%s6387_s1 + $0x1810] sm:$0xff]  ;;  %v3031_v13 = vpack.c.bf16 %v598_v6, %v594_v4  ;;  %v602_v16 = vld [vmem:[%s6387_s1 + $0x11d8] sm:$0xff] }
 0x13b   :  { %3000 = vmatprep.subr.bf16.mxu1 %v2999_v31  ;;  %v810_v31 = vld [vmem:[%s6387_s1 + $0x1858] sm:$0xff]  ;;  %v625_v4 = vld [vmem:[%s6387_s1 + $0x1290] sm:$0xff] }
 0x13c   :  { %2734 = vmatpush1.bf16.msra.mxu0 %v2733_v30  ;;  %v805_v30 = vld [vmem:[%s6387_s1 + $0x1830] sm:$0xff]  ;;  %v3139_v42 = vpack.c.bf16 %v814_v32, %v810_v31  ;;  %v606_v18 = vld [vmem:[%s6387_s1 + $0x11f8] sm:$0xff]  ;;  %v1924_v32 = vld [vmem:[%s6389_s3 + $0x60] sm:$0xff] }
 0x13d   :  { %2736 = vmatprep.subr.bf16.mxu0 %v2735_v2  ;;  %v3019_v2 = vpack.c.bf16 %v574_v26, %v570_v41  ;;  %v3137_v39 = vpack.c.bf16 %v805_v30, %v801_v29  ;;  %v3035_v41 = vpack.c.bf16 %v606_v18, %v602_v16  ;;  %v605_v26 = vld [vmem:[%s6387_s1 + $0x11f0] sm:$0xff]  ;;  %v614_v30 = vld [vmem:[%s6387_s1 + $0x1238] sm:$0xff] }
 0x13e   :  { %3002 = vmatpush1.bf16.msra.mxu1 %v3001_v45  ;;  %v809_v45 = vld [vmem:[%s6387_s1 + $0x1850] sm:$0xff]  ;;  %v618_v40 = vld [vmem:[%s6387_s1 + $0x1258] sm:$0xff] }
 0x13f   :  { %3004 = vmatprep.subr.bf16.mxu1 %v3003_v47  ;;  %v1913_v47 = vld [vmem:[%s6389_s3 + $0x8] sm:$0xff]  ;;  %v626_v55 = vld [vmem:[%s6387_s1 + $0x1298] sm:$0xff]  ;;  %v633_v16 = vld [vmem:[%s6387_s1 + $0x12d0] sm:$0xff] }
 0x140   :  { %2738 = vmatpush1.bf16.msra.mxu0 %v2737_v46  ;;  %v813_v46 = vld [vmem:[%s6387_s1 + $0x1870] sm:$0xff]  ;;  %v3143_v57 = vpack.c.bf16 %v1915_v38, %v1913_v47  ;;  %v1928_v47 = vld [vmem:[%s6389_s3 + $0x80] sm:$0xff]  ;;  %v634_v6 = vld [vmem:[%s6387_s1 + $0x12d8] sm:$0xff] }
 0x141   :  { %2740 = vmatprep.subr.bf16.mxu0 %v2739_v11  ;;  %v577_v11 = vld [vmem:[%s6387_s1 + $0x1110] sm:$0xff]  ;;  %v3141_v52 = vpack.c.bf16 %v813_v46, %v809_v45  ;;  %v622_v45 = vld [vmem:[%s6387_s1 + $0x1278] sm:$0xff] }
 0x142   :  { %3006 = vmatpush1.bf16.msra.mxu1 %v3005_v58  ;;  %v1912_v58 = vld [vmem:[%s6389_s3] sm:$0xff]  ;;  %v3025_v62 = vpack.c.bf16 %v581_v51, %v577_v11  ;;  %v1930_v38 = vld [vmem:[%s6389_s3 + $0x90] sm:$0xff]  ;;  %v3043_v51 = vpack.c.bf16 %v622_v45, %v618_v40  ;;  %v642_v18 = vld [vmem:[%s6387_s1 + $0x1318] sm:$0xff] }
 0x143   :  { %3008 = vmatprep.subr.bf16.mxu1 %v3007_v60  ;;  %v1917_v60 = vld [vmem:[%s6389_s3 + $0x28] sm:$0xff]  ;;  %v649_v40 = vld [vmem:[%s6387_s1 + $0x1350] sm:$0xff]  ;;  %v658_v45 = vld [vmem:[%s6387_s1 + $0x1398] sm:$0xff] }
 0x144   :  { %2742 = vmatpush1.bf16.msra.mxu0 %v2741_v59  ;;  %v1914_v59 = vld [vmem:[%s6389_s3 + $0x10] sm:$0xff]  ;;  %v3147_v7 = vpack.c.bf16 %v1919_v44, %v1917_v60  ;;  %v1932_v60 = vld [vmem:[%s6389_s3 + $0xa0] sm:$0xff] }
 0x145   :  { %2744 = vmatprep.subr.bf16.mxu0 %v2743_v0  ;;  %1689 = vmatmul.mubr.f32.vlgmr.msra.gmra.mrb[2].mxu1 %v4250_v54  ;;  %v561_v54 = vld [vmem:[%s6387_s1 + $0x1090] sm:$0xff]  ;;  %v3145_v5 = vpack.c.bf16 %v1914_v59, %v1912_v58  ;;  %v630_v58 = vld [vmem:[%s6387_s1 + $0x12b8] sm:$0xff] }
 0x146   :  { %3010 = vmatpush1.bf16.msra.mxu1 %v3009_v8  ;;  %1759 = vmatprep.mubr.f32.mxu1 %v4679_v27  ;;  %v3017_v35 = vpack.c.bf16 %v565_v23, %v561_v54  ;;  %v569_v27 = vld [vmem:[%s6387_s1 + $0x10d0] sm:$0xff]  ;;  %v1916_v8 = vld [vmem:[%s6389_s3 + $0x20] sm:$0xff]  ;;  %v1927_v54 = vld [vmem:[%s6389_s3 + $0x78] sm:$0xff] }
 0x147   :  { %1334 = vmatmul.mubr.f32.vlgmr.msra.gmra.mrb[0].mxu0 %v5048_v43  ;;  %3012 = vmatprep.subr.bf16.mxu1 %v3011_v9  ;;  %v3021_v49 = vpack.c.bf16 %v573_v36, %v569_v27  ;;  %v585_v0 = vld [vmem:[%s6387_s1 + $0x1150] sm:$0xff]  ;;  %v1921_v9 = vld [vmem:[%s6389_s3 + $0x48] sm:$0xff] }
 0x148   :  { %2746 = vmatpush1.bf16.msra.mxu0 %v2745_v25  ;;  %1404 = vmatprep.mubr.f32.mxu0 %v3366_v24  ;;  %v1918_v25 = vld [vmem:[%s6389_s3 + $0x30] sm:$0xff]  ;;  %v3029_v12 = vpack.c.bf16 %v589_v1, %v585_v0  ;;  %v3151_v19 = vpack.c.bf16 %v1923_v10, %v1921_v9  ;;  %v3047_v1 = vpack.c.bf16 %v630_v58, %v626_v55  ;;  %v1936_v9 = vld [vmem:[%s6389_s3 + $0xc0] sm:$0xff]  ;;  %v666_v58 = vld [vmem:[%s6387_s1 + $0x13d8] sm:$0xff] }
 0x149   :  { %2748 = vmatprep.subr.bf16.mxu0 %v2747_v3  ;;  %v593_v3 = vld [vmem:[%s6387_s1 + $0x1190] sm:$0xff]  ;;  %v3149_v17 = vpack.c.bf16 %v1918_v25, %v1916_v8  ;;  %v638_v8 = vld [vmem:[%s6387_s1 + $0x12f8] sm:$0xff] }
 0x14a   :  { %3014 = vmatpush1.bf16.msra.mxu1 %v3013_v20  ;;  %v1920_v20 = vld [vmem:[%s6389_s3 + $0x40] sm:$0xff]  ;;  %v3033_v23 = vpack.c.bf16 %v597_v15, %v593_v3  ;;  %v1934_v44 = vld [vmem:[%s6389_s3 + $0xb0] sm:$0xff]  ;;  %v3051_v15 = vpack.c.bf16 %v638_v8, %v634_v6  ;;  %v674_v8 = vld [vmem:[%s6387_s1 + $0x1418] sm:$0xff] }
 0x14b   :  { %3016 = vmatprep.subr.bf16.mxu1 %v3015_v22  ;;  %v1925_v22 = vld [vmem:[%s6389_s3 + $0x68] sm:$0xff]  ;;  %v1938_v10 = vld [vmem:[%s6389_s3 + $0xd0] sm:$0xff] }
 0x14c   :  { %2750 = vmatpush1.bf16.msra.mxu0 %v2749_v21  ;;  %v1922_v21 = vld [vmem:[%s6389_s3 + $0x50] sm:$0xff]  ;;  %v3155_v31 = vpack.c.bf16 %v1927_v54, %v1925_v22  ;;  %v1940_v22 = vld [vmem:[%s6389_s3 + $0xe0] sm:$0xff] }
 0x14d   :  { %3136 = vmatprep.subr.bf16.mxu0 %v3135_v28  ;;  %v610_v28 = vld [vmem:[%s6387_s1 + $0x1218] sm:$0xff]  ;;  %v3153_v29 = vpack.c.bf16 %v1922_v21, %v1920_v20  ;;  %v1942_v54 = vld [vmem:[%s6389_s3 + $0xf0] sm:$0xff] }
 0x14e   :  { %3018 = vmatpush1.bf16.msra.mxu1 %v3017_v35  ;;  %v1929_v35 = vld [vmem:[%s6389_s3 + $0x88] sm:$0xff]  ;;  %v3039_v36 = vpack.c.bf16 %v614_v30, %v610_v28  ;;  %v646_v20 = vld [vmem:[%s6387_s1 + $0x1338] sm:$0xff]  ;;  %v641_v28 = vld [vmem:[%s6387_s1 + $0x1310] sm:$0xff] }
 0x14f   :  { %2321 = vmatmul.mubr.msk.f32.vlgmr.msra.gmra.mrb[0].mxu0 %vm911_vm0, %v2320_v34  ;;  %3020 = vmatprep.subr.bf16.mxu1 %v3019_v2  ;;  %v1931_v2 = vld [vmem:[%s6389_s3 + $0x98] sm:$0xff]  ;;  %v657_v55 = vld [vmem:[%s6387_s1 + $0x1390] sm:$0xff] }
 0x150   :  { %3138 = vmatpush1.bf16.msra.mxu0 %v3137_v39  ;;  %1901 = vmatprep.mubr.f32.mxu0 %v3366_v24  ;;  %v601_v24 = vld [vmem:[%s6387_s1 + $0x11d0] sm:$0xff]  ;;  %v3159_v46 = vpack.c.bf16 %v1931_v2, %v1929_v35  ;;  %v650_v30 = vld [vmem:[%s6387_s1 + $0x1358] sm:$0xff]  ;;  %v1944_v35 = vld [vmem:[%s6389_s3 + $0x100] sm:$0xff] }
 0x151   :  { %3140 = vmatprep.subr.bf16.mxu0 %v3139_v42  ;;  %v3037_v27 = vpack.c.bf16 %v605_v26, %v601_v24  ;;  %v613_v39 = vld [vmem:[%s6387_s1 + $0x1230] sm:$0xff]  ;;  %v3055_v26 = vpack.c.bf16 %v646_v20, %v642_v18  ;;  %v682_v20 = vld [vmem:[%s6387_s1 + $0x1458] sm:$0xff] }
 0x152   :  { %3022 = vmatpush1.bf16.msra.mxu1 %v3021_v49  ;;  %v1933_v49 = vld [vmem:[%s6389_s3 + $0xa8] sm:$0xff]  ;;  %v3041_v11 = vpack.c.bf16 %v613_v39, %v609_v37  ;;  %v1946_v2 = vld [vmem:[%s6389_s3 + $0x110] sm:$0xff] }
 0x153   :  { %3024 = vmatprep.subr.bf16.mxu1 %v3023_v50  ;;  %v1935_v50 = vld [vmem:[%s6389_s3 + $0xb8] sm:$0xff]  ;;  %v665_v6 = vld [vmem:[%s6387_s1 + $0x13d0] sm:$0xff] }
 0x154   :  { %3142 = vmatpush1.bf16.msra.mxu0 %v3141_v52  ;;  %v621_v52 = vld [vmem:[%s6387_s1 + $0x1270] sm:$0xff]  ;;  %v3163_v59 = vpack.c.bf16 %v1935_v50, %v1933_v49  ;;  %v1948_v49 = vld [vmem:[%s6389_s3 + $0x120] sm:$0xff] }
 0x155   :  { %3144 = vmatprep.subr.bf16.mxu0 %v3143_v57  ;;  %v3161_v57 = vpack.c.bf16 %v1930_v38, %v1928_v47  ;;  %v3045_v0 = vpack.c.bf16 %v621_v52, %v617_v48  ;;  %v662_v47 = vld [vmem:[%s6387_s1 + $0x13b8] sm:$0xff]  ;;  %v1950_v50 = vld [vmem:[%s6389_s3 + $0x130] sm:$0xff] }
 0x156   :  { %3026 = vmatpush1.bf16.msra.mxu1 %v3025_v62  ;;  %v1937_v62 = vld [vmem:[%s6389_s3 + $0xc8] sm:$0xff]  ;;  %v3063_v52 = vpack.c.bf16 %v662_v47, %v658_v45  ;;  %v673_v18 = vld [vmem:[%s6387_s1 + $0x1410] sm:$0xff]  ;;  %v698_v47 = vld [vmem:[%s6387_s1 + $0x14d8] sm:$0xff] }
 0x157   :  { %2322 = vmatmul.mubr.msk.f32.vlgmr.msra.gmra.mrb[2].mxu0 %vm911_vm0, %v2320_v34  ;;  %3028 = vmatprep.subr.bf16.mxu1 %v3027_v63  ;;  %v1926_v34 = vld [vmem:[%s6389_s3 + $0x70] sm:$0xff]  ;;  %v1939_v63 = vld [vmem:[%s6389_s3 + $0xd8] sm:$0xff] }
 0x158   :  { %3146 = vmatpush1.bf16.msra.mxu0 %v3145_v5  ;;  %v3157_v42 = vpack.c.bf16 %v1926_v34, %v1924_v32  ;;  %v629_v5 = vld [vmem:[%s6387_s1 + $0x12b0] sm:$0xff]  ;;  %v3167_v25 = vpack.c.bf16 %v1939_v63, %v1937_v62  ;;  %v654_v32 = vld [vmem:[%s6387_s1 + $0x1378] sm:$0xff]  ;;  %v1952_v62 = vld [vmem:[%s6389_s3 + $0x140] sm:$0xff] }
 0x159   :  { %3148 = vmatprep.subr.bf16.mxu0 %v3147_v7  ;;  %v3165_v7 = vpack.c.bf16 %v1934_v44, %v1932_v60  ;;  %v3049_v3 = vpack.c.bf16 %v629_v5, %v625_v4  ;;  %v3059_v39 = vpack.c.bf16 %v654_v32, %v650_v30  ;;  %v670_v60 = vld [vmem:[%s6387_s1 + $0x13f8] sm:$0xff]  ;;  %v1954_v63 = vld [vmem:[%s6389_s3 + $0x150] sm:$0xff] }
 0x15a   :  { %3030 = vmatpush1.bf16.msra.mxu1 %v3029_v12  ;;  %v1941_v12 = vld [vmem:[%s6389_s3 + $0xe8] sm:$0xff]  ;;  %v3067_v5 = vpack.c.bf16 %v670_v60, %v666_v58  ;;  %v681_v30 = vld [vmem:[%s6387_s1 + $0x1450] sm:$0xff]  ;;  %v690_v32 = vld [vmem:[%s6387_s1 + $0x1498] sm:$0xff] }
 0x15b   :  { %3032 = vmatprep.subr.bf16.mxu1 %v3031_v13  ;;  %v1943_v13 = vld [vmem:[%s6389_s3 + $0xf8] sm:$0xff]  ;;  %v689_v45 = vld [vmem:[%s6387_s1 + $0x1490] sm:$0xff] }
 0x15c   :  { %3150 = vmatpush1.bf16.msra.mxu0 %v3149_v17  ;;  %v637_v17 = vld [vmem:[%s6387_s1 + $0x12f0] sm:$0xff]  ;;  %v3171_v21 = vpack.c.bf16 %v1943_v13, %v1941_v12  ;;  %v1956_v12 = vld [vmem:[%s6389_s3 + $0x160] sm:$0xff]  ;;  %v714_v60 = vld [vmem:[%s6387_s1 + $0x1558] sm:$0xff] }
 0x15d   :  { %3152 = vmatprep.subr.bf16.mxu0 %v3151_v19  ;;  %v3169_v19 = vpack.c.bf16 %v1938_v10, %v1936_v9  ;;  %v3053_v24 = vpack.c.bf16 %v637_v17, %v633_v16  ;;  %v678_v9 = vld [vmem:[%s6387_s1 + $0x1438] sm:$0xff]  ;;  %v1958_v13 = vld [vmem:[%s6389_s3 + $0x170] sm:$0xff] }
 0x15e   :  { %3034 = vmatpush1.bf16.msra.mxu1 %v3033_v23  ;;  %v1945_v23 = vld [vmem:[%s6389_s3 + $0x108] sm:$0xff]  ;;  %v3071_v17 = vpack.c.bf16 %v678_v9, %v674_v8  ;;  %v705_v58 = vld [vmem:[%s6387_s1 + $0x1510] sm:$0xff]  ;;  %v730_v9 = vld [vmem:[%s6387_s1 + $0x15d8] sm:$0xff] }
 0x15f   :  { %3036 = vmatprep.subr.bf16.mxu1 %v3035_v41  ;;  %v1947_v41 = vld [vmem:[%s6389_s3 + $0x118] sm:$0xff]  ;;  %v721_v8 = vld [vmem:[%s6387_s1 + $0x1590] sm:$0xff] }
 0x160   :  { %3154 = vmatpush1.bf16.msra.mxu0 %v3153_v29  ;;  %v645_v29 = vld [vmem:[%s6387_s1 + $0x1330] sm:$0xff]  ;;  %v3175_v34 = vpack.c.bf16 %v1947_v41, %v1945_v23  ;;  %v1960_v23 = vld [vmem:[%s6389_s3 + $0x180] sm:$0xff] }
 0x161   :  { %3156 = vmatprep.subr.bf16.mxu0 %v3155_v31  ;;  %v3173_v31 = vpack.c.bf16 %v1942_v54, %v1940_v22  ;;  %v3057_v37 = vpack.c.bf16 %v645_v29, %v641_v28  ;;  %v686_v22 = vld [vmem:[%s6387_s1 + $0x1478] sm:$0xff]  ;;  %v1962_v41 = vld [vmem:[%s6389_s3 + $0x190] sm:$0xff] }
 0x162   :  { %3038 = vmatpush1.bf16.msra.mxu1 %v3037_v27  ;;  %v1949_v27 = vld [vmem:[%s6389_s3 + $0x128] sm:$0xff]  ;;  %v3075_v29 = vpack.c.bf16 %v686_v22, %v682_v20  ;;  %v1970_v20 = vld [vmem:[%s6389_s3 + $0x1d0] sm:$0xff] }
 0x163   :  { %3040 = vmatprep.subr.bf16.mxu1 %v3039_v36  ;;  %v1951_v36 = vld [vmem:[%s6389_s3 + $0x138] sm:$0xff]  ;;  %v737_v22 = vld [vmem:[%s6387_s1 + $0x1610] sm:$0xff] }
 0x164   :  { %3158 = vmatpush1.bf16.msra.mxu0 %v3157_v42  ;;  %v653_v42 = vld [vmem:[%s6387_s1 + $0x1370] sm:$0xff]  ;;  %v3179_v38 = vpack.c.bf16 %v1951_v36, %v1949_v27  ;;  %v1964_v27 = vld [vmem:[%s6389_s3 + $0x1a0] sm:$0xff] }
 0x165   :  { %3160 = vmatprep.subr.bf16.mxu0 %v3159_v46  ;;  %v3177_v46 = vpack.c.bf16 %v1946_v2, %v1944_v35  ;;  %v3061_v48 = vpack.c.bf16 %v653_v42, %v649_v40  ;;  %v694_v35 = vld [vmem:[%s6387_s1 + $0x14b8] sm:$0xff]  ;;  %v1966_v36 = vld [vmem:[%s6389_s3 + $0x1b0] sm:$0xff] }
 0x166   :  { %3042 = vmatpush1.bf16.msra.mxu1 %v3041_v11  ;;  %v1953_v11 = vld [vmem:[%s6389_s3 + $0x148] sm:$0xff]  ;;  %v3079_v42 = vpack.c.bf16 %v694_v35, %v690_v32  ;;  %v1974_v32 = vld [vmem:[%s6389_s3 + $0x1f0] sm:$0xff] }
 0x167   :  { %3044 = vmatprep.subr.bf16.mxu1 %v3043_v51  ;;  %v1955_v51 = vld [vmem:[%s6389_s3 + $0x158] sm:$0xff]  ;;  %v745_v35 = vld [vmem:[%s6387_s1 + $0x1650] sm:$0xff] }
 0x168   :  { %3162 = vmatpush1.bf16.msra.mxu0 %v3161_v57  ;;  %v661_v57 = vld [vmem:[%s6387_s1 + $0x13b0] sm:$0xff]  ;;  %v3183_v44 = vpack.c.bf16 %v1955_v51, %v1953_v11 }
 0x169   :  { %3164 = vmatprep.subr.bf16.mxu0 %v3163_v59  ;;  %v3181_v59 = vpack.c.bf16 %v1950_v50, %v1948_v49  ;;  %v3065_v4 = vpack.c.bf16 %v661_v57, %v657_v55  ;;  %v697_v11 = vld [vmem:[%s6387_s1 + $0x14d0] sm:$0xff] }
 0x16a   :  { %3046 = vmatpush1.bf16.msra.mxu1 %v3045_v0  ;;  %v1957_v0 = vld [vmem:[%s6389_s3 + $0x168] sm:$0xff]  ;;  %v701_v51 = vld [vmem:[%s6387_s1 + $0x14f0] sm:$0xff] }
 0x16b   :  { %3048 = vmatprep.subr.bf16.mxu1 %v3047_v1  ;;  %v1959_v1 = vld [vmem:[%s6389_s3 + $0x178] sm:$0xff]  ;;  %v3085_v55 = vpack.c.bf16 %v701_v51, %v697_v11  ;;  %v761_v11 = vld [vmem:[%s6387_s1 + $0x16d0] sm:$0xff] }
 0x16c   :  { %3166 = vmatpush1.bf16.msra.mxu0 %v3165_v7  ;;  %v669_v7 = vld [vmem:[%s6387_s1 + $0x13f0] sm:$0xff]  ;;  %v3187_v10 = vpack.c.bf16 %v1959_v1, %v1957_v0 }
 0x16d   :  { %3168 = vmatprep.subr.bf16.mxu0 %v3167_v25  ;;  %v3185_v25 = vpack.c.bf16 %v1954_v63, %v1952_v62  ;;  %v3069_v16 = vpack.c.bf16 %v669_v7, %v665_v6  ;;  %v713_v0 = vld [vmem:[%s6387_s1 + $0x1550] sm:$0xff] }
 0x16e   :  { %3050 = vmatpush1.bf16.msra.mxu1 %v3049_v3  ;;  %v1961_v3 = vld [vmem:[%s6389_s3 + $0x188] sm:$0xff]  ;;  %v717_v1 = vld [vmem:[%s6387_s1 + $0x1570] sm:$0xff] }
 0x16f   :  { %3052 = vmatprep.subr.bf16.mxu1 %v3051_v15  ;;  %v1963_v15 = vld [vmem:[%s6389_s3 + $0x198] sm:$0xff]  ;;  %v3093_v6 = vpack.c.bf16 %v717_v1, %v713_v0  ;;  %v765_v51 = vld [vmem:[%s6387_s1 + $0x16f0] sm:$0xff] }
 0x170   :  { %3170 = vmatpush1.bf16.msra.mxu0 %v3169_v19  ;;  %v677_v19 = vld [vmem:[%s6387_s1 + $0x1430] sm:$0xff]  ;;  %v3191_v54 = vpack.c.bf16 %v1963_v15, %v1961_v3 }
 0x171   :  { %3172 = vmatprep.subr.bf16.mxu0 %v3171_v21  ;;  %v3189_v21 = vpack.c.bf16 %v1958_v13, %v1956_v12  ;;  %v3073_v28 = vpack.c.bf16 %v677_v19, %v673_v18  ;;  %v729_v3 = vld [vmem:[%s6387_s1 + $0x15d0] sm:$0xff]  ;;  %v1968_v19 = vld [vmem:[%s6389_s3 + $0x1c0] sm:$0xff] }
 0x172   :  { %3054 = vmatpush1.bf16.msra.mxu1 %v3053_v24  ;;  %v1965_v24 = vld [vmem:[%s6389_s3 + $0x1a8] sm:$0xff]  ;;  %v733_v15 = vld [vmem:[%s6387_s1 + $0x15f0] sm:$0xff] }
 0x173   :  { %3056 = vmatprep.subr.bf16.mxu1 %v3055_v26  ;;  %v1967_v26 = vld [vmem:[%s6389_s3 + $0x1b8] sm:$0xff]  ;;  %v3101_v18 = vpack.c.bf16 %v733_v15, %v729_v3  ;;  %v777_v0 = vld [vmem:[%s6387_s1 + $0x1750] sm:$0xff] }
 0x174   :  { %3174 = vmatpush1.bf16.msra.mxu0 %v3173_v31  ;;  %v685_v31 = vld [vmem:[%s6387_s1 + $0x1470] sm:$0xff]  ;;  %v3195_v2 = vpack.c.bf16 %v1967_v26, %v1965_v24  ;;  %v750_v24 = vld [vmem:[%s6387_s1 + $0x1678] sm:$0xff]  ;;  %v1973_v26 = vld [vmem:[%s6389_s3 + $0x1e8] sm:$0xff] }
 0x175   :  { %3176 = vmatprep.subr.bf16.mxu0 %v3175_v34  ;;  %v3193_v34 = vpack.c.bf16 %v1962_v41, %v1960_v23  ;;  %v3077_v40 = vpack.c.bf16 %v685_v31, %v681_v30  ;;  %v3201_v23 = vpack.c.bf16 %v1970_v20, %v1968_v19  ;;  %v746_v41 = vld [vmem:[%s6387_s1 + $0x1658] sm:$0xff]  ;;  %v1972_v31 = vld [vmem:[%s6389_s3 + $0x1e0] sm:$0xff]  ;;  %v781_v1 = vld [vmem:[%s6387_s1 + $0x1770] sm:$0xff]  ;;  %v823_v19 = vsub.s32 1, %v3660_v61 }
 0x176   :  { %3058 = vmatpush1.bf16.msra.mxu1 %v3057_v37  ;;  %v1969_v37 = vld [vmem:[%s6389_s3 + $0x1c8] sm:$0xff]  ;;  %v793_v3 = vld [vmem:[%s6387_s1 + $0x17d0] sm:$0xff] }
 0x177   :  { %3060 = vmatprep.subr.bf16.mxu1 %v3059_v39  ;;  %v1971_v39 = vld [vmem:[%s6389_s3 + $0x1d8] sm:$0xff]  ;;  %v797_v15 = vld [vmem:[%s6387_s1 + $0x17f0] sm:$0xff] }
 0x178   :  { %3178 = vmatpush1.bf16.msra.mxu0 %v3177_v46  ;;  %v3197_v46 = vpack.c.bf16 %v1966_v36, %v1964_v27  ;;  %v3205_v27 = vpack.c.bf16 %v1974_v32, %v1972_v31  ;;  %v754_v36 = vld [vmem:[%s6387_s1 + $0x1698] sm:$0xff]  ;;  %v2197_v32 = vld [vmem:[%s6391_s5 + $0x8] sm:$0xff] }
 0x179   :  { %3180 = vmatprep.subr.bf16.mxu0 %v3179_v38  ;;  %v3199_v38 = vpack.c.bf16 %v1971_v39, %v1969_v37  ;;  %v758_v37 = vld [vmem:[%s6387_s1 + $0x16b8] sm:$0xff] }
 0x17a   :  { %3062 = vmatpush1.bf16.msra.mxu1 %v3061_v48  ;;  %v706_v48 = vld [vmem:[%s6387_s1 + $0x1518] sm:$0xff] }
 0x17b   :  { %3064 = vmatprep.subr.bf16.mxu1 %v3063_v52  ;;  %v710_v52 = vld [vmem:[%s6387_s1 + $0x1538] sm:$0xff] }
 0x17c   :  { %3182 = vmatpush1.bf16.msra.mxu0 %v3181_v59  ;;  %v3087_v57 = vpack.c.bf16 %v710_v52, %v706_v48  ;;  %v709_v59 = vld [vmem:[%s6387_s1 + $0x1530] sm:$0xff]  ;;  %v770_v48 = vld [vmem:[%s6387_s1 + $0x1718] sm:$0xff] }
 0x17d   :  { %3184 = vmatprep.subr.bf16.mxu0 %v3183_v44  ;;  %v718_v44 = vld [vmem:[%s6387_s1 + $0x1578] sm:$0xff]  ;;  %v3089_v62 = vpack.c.bf16 %v709_v59, %v705_v58  ;;  %v769_v58 = vld [vmem:[%s6387_s1 + $0x1710] sm:$0xff] }
 0x17e   :  { %3066 = vmatpush1.bf16.msra.mxu1 %v3065_v4  ;;  %v3091_v63 = vpack.c.bf16 %v718_v44, %v714_v60  ;;  %v722_v4 = vld [vmem:[%s6387_s1 + $0x1598] sm:$0xff]  ;;  %v773_v59 = vld [vmem:[%s6387_s1 + $0x1730] sm:$0xff] }
 0x17f   :  { %3068 = vmatprep.subr.bf16.mxu1 %v3067_v5  ;;  %v726_v5 = vld [vmem:[%s6387_s1 + $0x15b8] sm:$0xff] }
 0x180   :  { %3186 = vmatpush1.bf16.msra.mxu0 %v3185_v25  ;;  %v3095_v7 = vpack.c.bf16 %v726_v5, %v722_v4  ;;  %v725_v25 = vld [vmem:[%s6387_s1 + $0x15b0] sm:$0xff]  ;;  %v774_v52 = vld [vmem:[%s6387_s1 + $0x1738] sm:$0xff] }
 0x181   :  { %3188 = vmatprep.subr.bf16.mxu0 %v3187_v10  ;;  %v734_v10 = vld [vmem:[%s6387_s1 + $0x15f8] sm:$0xff]  ;;  %v3097_v12 = vpack.c.bf16 %v725_v25, %v721_v8  ;;  %v785_v8 = vld [vmem:[%s6387_s1 + $0x1790] sm:$0xff] }
 0x182   :  { %3070 = vmatpush1.bf16.msra.mxu1 %v3069_v16  ;;  %v3099_v13 = vpack.c.bf16 %v734_v10, %v730_v9  ;;  %v738_v16 = vld [vmem:[%s6387_s1 + $0x1618] sm:$0xff]  ;;  %v789_v25 = vld [vmem:[%s6387_s1 + $0x17b0] sm:$0xff] }
 0x183   :  { %3072 = vmatprep.subr.bf16.mxu1 %v3071_v17  ;;  %v742_v17 = vld [vmem:[%s6387_s1 + $0x1638] sm:$0xff] }
 0x184   :  { %3190 = vmatpush1.bf16.msra.mxu0 %v3189_v21  ;;  %v3103_v21 = vpack.c.bf16 %v742_v17, %v738_v16  ;;  %v778_v60 = vld [vmem:[%s6387_s1 + $0x1758] sm:$0xff]  ;;  %v3133_v16 = vpack.c.bf16 %v797_v15, %v793_v3  ;;  %v819_v17 = vsub.s32 0, %v3660_v61  ;;  %v1993_v15 = vld [vmem:[%s6389_s3 + $0x288] sm:$0xff] }
 0x185   :  { %3192 = vmatprep.subr.bf16.mxu0 %v3191_v54  ;;  %1760 = vmatmul.mubr.f32.vlgmr.msra.gmra.mrb[2].mxu1 %v4651_v14  ;;  %v693_v14 = vld [vmem:[%s6387_s1 + $0x14b0] sm:$0xff]  ;;  %v782_v44 = vld [vmem:[%s6387_s1 + $0x1778] sm:$0xff] }
 0x186   :  { %3074 = vmatpush1.bf16.msra.mxu1 %v3073_v28  ;;  %1830 = vmatprep.mubr.f32.mxu1 %v5076_v56  ;;  %v702_v56 = vld [vmem:[%s6387_s1 + $0x14f8] sm:$0xff]  ;;  %v3081_v49 = vpack.c.bf16 %v693_v14, %v689_v45  ;;  %v741_v54 = vld [vmem:[%s6387_s1 + $0x1630] sm:$0xff] }
 0x187   :  { %3076 = vmatprep.subr.bf16.mxu1 %v3075_v29  ;;  %v3083_v50 = vpack.c.bf16 %v702_v56, %v698_v47  ;;  %v1975_v28 = vld [vmem:[%s6389_s3 + $0x1f8] sm:$0xff]  ;;  %v3105_v29 = vpack.c.bf16 %v741_v54, %v737_v22  ;;  %v757_v45 = vld [vmem:[%s6387_s1 + $0x16b0] sm:$0xff]  ;;  %v1977_v47 = vld [vmem:[%s6389_s3 + $0x208] sm:$0xff] }
 0x188   :  { %3194 = vmatpush1.bf16.msra.mxu0 %v3193_v34  ;;  %v3203_v30 = vpack.c.bf16 %v1975_v28, %v1973_v26  ;;  %v3107_v34 = vpack.c.bf16 %v750_v24, %v746_v41  ;;  %v762_v14 = vld [vmem:[%s6387_s1 + $0x16d8] sm:$0xff]  ;;  %v1978_v54 = vld [vmem:[%s6389_s3 + $0x210] sm:$0xff]  ;;  %v1981_v24 = vld [vmem:[%s6389_s3 + $0x228] sm:$0xff] }
 0x189   :  { %3196 = vmatprep.subr.bf16.mxu0 %v3195_v2  ;;  %v749_v2 = vld [vmem:[%s6387_s1 + $0x1670] sm:$0xff]  ;;  %v1979_v56 = vld [vmem:[%s6389_s3 + $0x218] sm:$0xff]  ;;  %v2213_v28 = vld [vmem:[%s6391_s5 + $0x88] sm:$0xff] }
 0x18a   :  { %3078 = vmatpush1.bf16.msra.mxu1 %v3077_v40  ;;  %v3109_v39 = vpack.c.bf16 %v749_v2, %v745_v35  ;;  %v3111_v40 = vpack.c.bf16 %v758_v37, %v754_v36  ;;  %v786_v4 = vld [vmem:[%s6387_s1 + $0x1798] sm:$0xff]  ;;  %v2198_v37 = vld [vmem:[%s6391_s5 + $0x10] sm:$0xff] }
 0x18b   :  { %3080 = vmatprep.subr.bf16.mxu1 %v3079_v42  ;;  %v753_v42 = vld [vmem:[%s6387_s1 + $0x1690] sm:$0xff]  ;;  %v790_v5 = vld [vmem:[%s6387_s1 + $0x17b8] sm:$0xff] }
 0x18c   :  { %3198 = vmatpush1.bf16.msra.mxu0 %v3197_v46  ;;  %v766_v46 = vld [vmem:[%s6387_s1 + $0x16f8] sm:$0xff] }
 0x18d   :  { %3200 = vmatprep.subr.bf16.mxu0 %v3199_v38  ;;  %v3207_v38 = vpack.c.bf16 %v1979_v56, %v1977_v47  ;;  %v794_v9 = vld [vmem:[%s6387_s1 + $0x17d8] sm:$0xff]  ;;  %v1982_v47 = vld [vmem:[%s6389_s3 + $0x230] sm:$0xff] }
 0x18e   :  { %3082 = vmatpush1.bf16.msra.mxu1 %v3081_v49  ;;  %v3113_v49 = vpack.c.bf16 %v757_v45, %v753_v42  ;;  %v798_v10 = vld [vmem:[%s6387_s1 + $0x17f8] sm:$0xff]  ;;  %v2217_v42 = vld [vmem:[%s6391_s5 + $0xa8] sm:$0xff] }
 0x18f   :  { %3084 = vmatprep.subr.bf16.mxu1 %v3083_v50  ;;  %v3115_v50 = vpack.c.bf16 %v766_v46, %v762_v14  ;;  %v1983_v26 = vld [vmem:[%s6389_s3 + $0x238] sm:$0xff]  ;;  %v1980_v46 = vld [vmem:[%s6389_s3 + $0x220] sm:$0xff] }
 0x190   :  { %3202 = vmatpush1.bf16.msra.mxu0 %v3201_v23  ;;  %v2215_v35 = vld [vmem:[%s6391_s5 + $0x98] sm:$0xff] }
 0x191   :  { %3204 = vmatprep.subr.bf16.mxu0 %v3203_v30 }
 0x192   :  { %3086 = vmatpush1.bf16.msra.mxu1 %v3085_v55  ;;  %v3117_v55 = vpack.c.bf16 %v765_v51, %v761_v11  ;;  %v2200_v51 = vld [vmem:[%s6391_s5 + $0x20] sm:$0xff] }
 0x193   :  { %3088 = vmatprep.subr.bf16.mxu1 %v3087_v57  ;;  %v3119_v57 = vpack.c.bf16 %v774_v52, %v770_v48  ;;  %v2201_v48 = vld [vmem:[%s6391_s5 + $0x28] sm:$0xff]  ;;  %v1987_v52 = vld [vmem:[%s6389_s3 + $0x258] sm:$0xff] }
 0x194   :  { %3206 = vmatpush1.bf16.msra.mxu0 %v3205_v27 }
 0x195   :  { %3208 = vmatprep.subr.bf16.mxu0 %v3207_v38 }
 0x196   :  { %3090 = vmatpush1.bf16.msra.mxu1 %v3089_v62  ;;  %v3121_v62 = vpack.c.bf16 %v773_v59, %v769_v58  ;;  %v3213_v58 = vpack.c.bf16 %v1982_v47, %v1980_v46  ;;  %v1984_v59 = vld [vmem:[%s6389_s3 + $0x240] sm:$0xff]  ;;  %v2002_v47 = vld [vmem:[%s6389_s3 + $0x2d0] sm:$0xff] }
 0x197   :  { %3092 = vmatprep.subr.bf16.mxu1 %v3091_v63  ;;  %v3123_v63 = vpack.c.bf16 %v782_v44, %v778_v60  ;;  %v1986_v60 = vld [vmem:[%s6389_s3 + $0x250] sm:$0xff]  ;;  %v2000_v46 = vld [vmem:[%s6389_s3 + $0x2c0] sm:$0xff] }
 0x19a   :  { %3094 = vmatpush1.bf16.msra.mxu1 %v3093_v6  ;;  %v3125_v6 = vpack.c.bf16 %v781_v1, %v777_v0  ;;  %v1989_v0 = vld [vmem:[%s6389_s3 + $0x268] sm:$0xff] }
 0x19b   :  { %3096 = vmatprep.subr.bf16.mxu1 %v3095_v7  ;;  %v3127_v7 = vpack.c.bf16 %v790_v5, %v786_v4  ;;  %v2202_v5 = vld [vmem:[%s6391_s5 + $0x30] sm:$0xff] }
 0x19e   :  { %3098 = vmatpush1.bf16.msra.mxu1 %v3097_v12  ;;  %v3129_v12 = vpack.c.bf16 %v789_v25, %v785_v8  ;;  %v2220_v8 = vld [vmem:[%s6391_s5 + $0xc0] sm:$0xff]  ;;  %v2221_v25 = vld [vmem:[%s6391_s5 + $0xc8] sm:$0xff] }
 0x19f   :  { %3100 = vmatprep.subr.bf16.mxu1 %v3099_v13  ;;  %v3131_v13 = vpack.c.bf16 %v798_v10, %v794_v9  ;;  %v3217_v9 = vpack.c.bf16 %v1986_v60, %v1984_v59  ;;  %v1988_v10 = vld [vmem:[%s6389_s3 + $0x260] sm:$0xff]  ;;  %v2010_v59 = vld [vmem:[%s6389_s3 + $0x310] sm:$0xff]  ;;  %v2013_v60 = vld [vmem:[%s6389_s3 + $0x328] sm:$0xff] }
 0x1a2   :  { %3102 = vmatpush1.bf16.msra.mxu1 %v3101_v18  ;;  %v6061_v18 = vld [vmem:[%s6388_s2] sm:$0xf] }
 0x1a3   :  { %3104 = vmatprep.subr.bf16.mxu1 %v3103_v21  ;;  %v820_v20 = vrot.slane %v6061_v18, %v819_v17  ;;  %v824_v21 = vrot.slane %v6061_v18, %v823_v19 }
 0x1a5   :  { %v981_v22 = vadd.f32 %v5193_v53, %v820_v20  ;;  %v983_v23 = vadd.f32 %v5204_v33, %v824_v21  ;;  %v2212_v53 = vld [vmem:[%s6391_s5 + $0x80] sm:$0xff]  ;;  %v2205_v21 = vld [vmem:[%s6391_s5 + $0x48] sm:$0xff] }
 0x1a6   :  { %3106 = vmatpush1.bf16.msra.mxu1 %v3105_v29  ;;  %v2196_v33 = vld [vmem:[%s6391_s5] sm:$0xff]  ;;  %v3271_v31 = vpack.c.bf16 %v2213_v28, %v2212_v53  ;;  %v1997_v28 = vld [vmem:[%s6389_s3 + $0x2a8] sm:$0xff] }
 0x1a7   :  { %3108 = vmatprep.subr.bf16.mxu1 %v3107_v34  ;;  %v2214_v34 = vld [vmem:[%s6391_s5 + $0x90] sm:$0xff]  ;;  %v3273_v27 = vpack.c.bf16 %v2197_v32, %v2196_v33  ;;  %v2204_v20 = vld [vmem:[%s6391_s5 + $0x40] sm:$0xff] }
 0x1a8   :  { %v3275_v36 = vpack.c.bf16 %v2215_v35, %v2214_v34  ;;  %v2224_v32 = vld [vmem:[%s6391_s5 + $0xe0] sm:$0xff]  ;;  %v2225_v34 = vld [vmem:[%s6391_s5 + $0xe8] sm:$0xff] }
 0x1aa   :  { %3110 = vmatpush1.bf16.msra.mxu1 %v3109_v39  ;;  %v2199_v39 = vld [vmem:[%s6391_s5 + $0x18] sm:$0xff] }
 0x1ab   :  { %3112 = vmatprep.subr.bf16.mxu1 %v3111_v40  ;;  %v2216_v40 = vld [vmem:[%s6391_s5 + $0xa0] sm:$0xff]  ;;  %v3277_v56 = vpack.c.bf16 %v2199_v39, %v2198_v37  ;;  %v1998_v37 = vld [vmem:[%s6389_s3 + $0x2b0] sm:$0xff]  ;;  %v3295_v39 = vpack.c.bf16 %v2225_v34, %v2224_v32 }
 0x1ac   :  { %v3279_v11 = vpack.c.bf16 %v2217_v42, %v2216_v40  ;;  %v2001_v40 = vld [vmem:[%s6389_s3 + $0x2c8] sm:$0xff]  ;;  %v2003_v42 = vld [vmem:[%s6389_s3 + $0x2d8] sm:$0xff] }
 0x1ae   :  { %3114 = vmatpush1.bf16.msra.mxu1 %v3113_v49  ;;  %v3211_v49 = vpack.c.bf16 %v1983_v26, %v1981_v24  ;;  %v1994_v24 = vld [vmem:[%s6389_s3 + $0x290] sm:$0xff]  ;;  %v3289_v26 = vpack.c.bf16 %v2205_v21, %v2204_v20  ;;  %v2025_v21 = vld [vmem:[%s6389_s3 + $0x388] sm:$0xff] }
 0x1af   :  { %3116 = vmatprep.subr.bf16.mxu1 %v3115_v50  ;;  %v1985_v50 = vld [vmem:[%s6389_s3 + $0x248] sm:$0xff]  ;;  %v2022_v20 = vld [vmem:[%s6389_s3 + $0x370] sm:$0xff] }
 0x1b2   :  { %3118 = vmatpush1.bf16.msra.mxu1 %v3117_v55  ;;  %v2218_v55 = vld [vmem:[%s6391_s5 + $0xb0] sm:$0xff] }
 0x1b3   :  { %3120 = vmatprep.subr.bf16.mxu1 %v3119_v57  ;;  %v2219_v57 = vld [vmem:[%s6391_s5 + $0xb8] sm:$0xff] }
 0x1b4   :  { %v3283_v4 = vpack.c.bf16 %v2219_v57, %v2218_v55 }
 0x1b6   :  { %3122 = vmatpush1.bf16.msra.mxu1 %v3121_v62  ;;  %v3281_v62 = vpack.c.bf16 %v2201_v48, %v2200_v51  ;;  %v2006_v51 = vld [vmem:[%s6389_s3 + $0x2f0] sm:$0xff]  ;;  %v2009_v48 = vld [vmem:[%s6389_s3 + $0x308] sm:$0xff] }
 0x1b7   :  { %3124 = vmatprep.subr.bf16.mxu1 %v3123_v63  ;;  %v3215_v63 = vpack.c.bf16 %v1987_v52, %v1985_v50  ;;  %v2011_v52 = vld [vmem:[%s6389_s3 + $0x318] sm:$0xff] }
 0x1b8   :  { %v3239_v57 = vpack.c.bf16 %v2011_v52, %v2009_v48 }
 0x1ba   :  { %3126 = vmatpush1.bf16.msra.mxu1 %v3125_v6  ;;  %v2203_v6 = vld [vmem:[%s6391_s5 + $0x38] sm:$0xff] }
 0x1bb   :  { %3128 = vmatprep.subr.bf16.mxu1 %v3127_v7  ;;  %v1991_v7 = vld [vmem:[%s6389_s3 + $0x278] sm:$0xff] }
 0x1bc   :  { %v3219_v3 = vpack.c.bf16 %v1991_v7, %v1989_v0  ;;  %v2019_v7 = vld [vmem:[%s6389_s3 + $0x358] sm:$0xff] }
 0x1be   :  { %3130 = vmatpush1.bf16.msra.mxu1 %v3129_v12  ;;  %v1990_v12 = vld [vmem:[%s6389_s3 + $0x270] sm:$0xff] }
 0x1bf   :  { %3132 = vmatprep.subr.bf16.mxu1 %v3131_v13  ;;  %v3285_v13 = vpack.c.bf16 %v2203_v6, %v2202_v5  ;;  %v2014_v5 = vld [vmem:[%s6389_s3 + $0x330] sm:$0xff]  ;;  %v2017_v6 = vld [vmem:[%s6389_s3 + $0x348] sm:$0xff] }
 0x1c2   :  { %3134 = vmatpush1.bf16.msra.mxu1 %v3133_v16  ;;  %v3287_v16 = vpack.c.bf16 %v2221_v25, %v2220_v8  ;;  %v3247_v25 = vpack.c.bf16 %v2019_v7, %v2017_v6 }
 0x1c3   :  { %3272 = vmatprep.subr.bf16.mxu1 %v3271_v31  ;;  %v1999_v31 = vld [vmem:[%s6389_s3 + $0x2b8] sm:$0xff] }
 0x1c5   :  { %1831 = vmatmul.mubr.f32.vlgmr.msra.gmra.mrb[2].mxu1 %v5048_v43  ;;  %v1976_v43 = vld [vmem:[%s6389_s3 + $0x200] sm:$0xff] }
 0x1c6   :  { %v3209_v14 = vpack.c.bf16 %v1978_v54, %v1976_v43  ;;  %3274 = vmatpush3.bf16.msra.mxu1 %v3273_v27  ;;  %v2222_v43 = vld [vmem:[%s6391_s5 + $0xd0] sm:$0xff]  ;;  %v2223_v54 = vld [vmem:[%s6391_s5 + $0xd8] sm:$0xff]  ;;  %v3227_v27 = vpack.c.bf16 %v1999_v31, %v1997_v28 }
 0x1c7   :  { %3276 = vmatprep.subr.bf16.mxu1 %v3275_v36  ;;  %v3291_v33 = vpack.c.bf16 %v2223_v54, %v2222_v43  ;;  %v1996_v36 = vld [vmem:[%s6389_s3 + $0x2a0] sm:$0xff]  ;;  %v2035_v31 = vld [vmem:[%s6389_s3 + $0x3d8] sm:$0xff] }
 0x1ca   :  { %3278 = vmatpush3.bf16.msra.mxu1 %v3277_v56  ;;  %v2005_v56 = vld [vmem:[%s6389_s3 + $0x2e8] sm:$0xff] }
 0x1cb   :  { %3280 = vmatprep.subr.bf16.mxu1 %v3279_v11  ;;  %v2004_v11 = vld [vmem:[%s6389_s3 + $0x2e0] sm:$0xff] }
 0x1cc   :  { %v3237_v55 = vpack.c.bf16 %v2006_v51, %v2004_v11 }
 0x1ce   :  { %3282 = vmatpush3.bf16.msra.mxu1 %v3281_v62  ;;  %v2015_v62 = vld [vmem:[%s6389_s3 + $0x338] sm:$0xff] }
 0x1cf   :  { %3284 = vmatprep.subr.bf16.mxu1 %v3283_v4  ;;  %v3243_v0 = vpack.c.bf16 %v2015_v62, %v2013_v60  ;;  %v2012_v4 = vld [vmem:[%s6389_s3 + $0x320] sm:$0xff]  ;;  %v2210_v60 = vld [vmem:[%s6391_s5 + $0x70] sm:$0xff]  ;;  %v2211_v62 = vld [vmem:[%s6391_s5 + $0x78] sm:$0xff] }
 0x1d0   :  { %v3245_v8 = vpack.c.bf16 %v2014_v5, %v2012_v4 }
 0x1d2   :  { %3286 = vmatpush3.bf16.msra.mxu1 %v3285_v13  ;;  %v2023_v13 = vld [vmem:[%s6389_s3 + $0x378] sm:$0xff] }
 0x1d3   :  { %3288 = vmatprep.subr.bf16.mxu1 %v3287_v16  ;;  %v2020_v16 = vld [vmem:[%s6389_s3 + $0x360] sm:$0xff] }
 0x1d4   :  { %v3253_v43 = vpack.c.bf16 %v2022_v20, %v2020_v16 }
 0x1d6   :  { %3290 = vmatpush3.bf16.msra.mxu1 %v3289_v26  ;;  %v2031_v26 = vld [vmem:[%s6389_s3 + $0x3b8] sm:$0xff] }
 0x1d7   :  { %3292 = vmatprep.subr.bf16.mxu1 %v3291_v33  ;;  %v2028_v33 = vld [vmem:[%s6389_s3 + $0x3a0] sm:$0xff] }
 0x222   :  { %v1406_v41 = vpop.f32.mrb[0].mxu0 }
 0x223   :  { %v3304_v29 = vadd.f32 %v1406_v41, %v981_v22  ;;  %v1408_v30 = vpop.f32.mrb[1].mxu0  ;;  %v1995_v22 = vld [vmem:[%s6389_s3 + $0x298] sm:$0xff]  ;;  %v1992_v41 = vld [vmem:[%s6389_s3 + $0x280] sm:$0xff] }
 0x224   :  { %v3306_v2 = vadd.f32 %v1408_v30, %v983_v23  ;;  %v3221_v23 = vpack.c.bf16 %v1990_v12, %v1988_v10  ;;  %v3223_v53 = vpack.c.bf16 %v1995_v22, %v1993_v15  ;;  %v2207_v30 = vld [vmem:[%s6391_s5 + $0x58] sm:$0xff]  ;;  %v3225_v35 = vpack.c.bf16 %v1994_v24, %v1992_v41  ;;  %v2018_v10 = vld [vmem:[%s6389_s3 + $0x350] sm:$0xff]  ;;  %v2021_v12 = vld [vmem:[%s6389_s3 + $0x368] sm:$0xff] }
 0x225   :  { %v1908_v38 = vmax.f32 %v3304_v29, 0.0  ;;  %v2206_v29 = vld [vmem:[%s6391_s5 + $0x50] sm:$0xff]  ;;  %v3251_v15 = vpack.c.bf16 %v2023_v13, %v2021_v12  ;;  %v2027_v22 = vld [vmem:[%s6389_s3 + $0x398] sm:$0xff]  ;;  %v2029_v24 = vld [vmem:[%s6389_s3 + $0x3a8] sm:$0xff] }
 0x226   :  { %v1909_v45 = vmax.f32 %v3306_v2, 0.0  ;;  %v3293_v2 = vpack.c.bf16 %v2207_v30, %v2206_v29  ;;  %v3255_v54 = vpack.c.bf16 %v2027_v22, %v2025_v21  ;;  %v2026_v41 = vld [vmem:[%s6389_s3 + $0x390] sm:$0xff]  ;;  %v3259_v28 = vpack.c.bf16 %v2031_v26, %v2029_v24  ;;  %v2033_v30 = vld [vmem:[%s6389_s3 + $0x3c8] sm:$0xff] }
 0x227   :  { %v2030_v29 = vld [vmem:[%s6389_s3 + $0x3b0] sm:$0xff]  ;;  %v3263_v34 = vpack.c.bf16 %v2035_v31, %v2033_v30 }
 0x228   :  { %2116 = vmatprep.mubr.f32.mxu0 %v1909_v45  ;;  %v3229_v45 = vpack.c.bf16 %v1998_v37, %v1996_v36  ;;  %3294 = vmatpush3.bf16.msra.mxu1 %v3293_v2  ;;  %v3261_v32 = vpack.c.bf16 %v2030_v29, %v2028_v33  ;;  %v2034_v2 = vld [vmem:[%s6389_s3 + $0x3d0] sm:$0xff]  ;;  %v2039_v36 = vld [vmem:[%s6389_s3 + $0x3f8] sm:$0xff] }
 0x229   :  { %2117 = vmatmul.mubr.f32.vlgmr.msra.gmra.mrb[4].mxu0 %v1908_v38  ;;  %3296 = vmatprep.subr.bf16.mxu1 %v3295_v39  ;;  %v2007_v38 = vld [vmem:[%s6389_s3 + $0x2f8] sm:$0xff] }
 0x22a   :  { %3210 = vmatpush1.bf16.msra.mxu0 %v3209_v14  ;;  %v6144_v44 = vpop.f32.mrb[2].mxu0  ;;  %v3231_v14 = vpack.c.bf16 %v2003_v42, %v2001_v40  ;;  %v3235_v50 = vpack.c.bf16 %v2007_v38, %v2005_v56  ;;  %v2036_v40 = vld [vmem:[%s6389_s3 + $0x3e0] sm:$0xff]  ;;  %v2038_v42 = vld [vmem:[%s6389_s3 + $0x3f0] sm:$0xff] }
 0x22b   :  { %3212 = vmatprep.subr.bf16.mxu0 %v3211_v49  ;;  %v6149_v1 = vpop.f32.mrb[3].mxu0  ;;  %v3233_v49 = vpack.c.bf16 %v2002_v47, %v2000_v46  ;;  %v831_v46 = vsub.s32 3, %v3660_v61 }
 0x22d   :  { %v832_v56 = vrot.slane %v6061_v18, %v831_v46 }
 0x22e   :  { %3214 = vmatpush1.bf16.msra.mxu0 %v3213_v58  ;;  %v2008_v58 = vld [vmem:[%s6389_s3 + $0x300] sm:$0xff] }
 0x22f   :  { %3216 = vmatprep.subr.bf16.mxu0 %v3215_v63  ;;  %v3241_v63 = vpack.c.bf16 %v2010_v59, %v2008_v58 }
 0x232   :  { %3218 = vmatpush1.bf16.msra.mxu0 %v3217_v9  ;;  %v2016_v9 = vld [vmem:[%s6389_s3 + $0x340] sm:$0xff] }
 0x233   :  { %3220 = vmatprep.subr.bf16.mxu0 %v3219_v3  ;;  %v3249_v3 = vpack.c.bf16 %v2018_v10, %v2016_v9 }
 0x236   :  { %3222 = vmatpush1.bf16.msra.mxu0 %v3221_v23  ;;  %v2024_v23 = vld [vmem:[%s6389_s3 + $0x380] sm:$0xff] }
 0x237   :  { %3224 = vmatprep.subr.bf16.mxu0 %v3223_v53  ;;  %v3257_v53 = vpack.c.bf16 %v2026_v41, %v2024_v23 }
 0x23a   :  { %3226 = vmatpush1.bf16.msra.mxu0 %v3225_v35  ;;  %v2032_v35 = vld [vmem:[%s6389_s3 + $0x3c0] sm:$0xff] }
 0x23b   :  { %3228 = vmatprep.subr.bf16.mxu0 %v3227_v27  ;;  %v2037_v27 = vld [vmem:[%s6389_s3 + $0x3e8] sm:$0xff]  ;;  %v3265_v37 = vpack.c.bf16 %v2034_v2, %v2032_v35 }
 0x23c   :  { %v3267_v39 = vpack.c.bf16 %v2039_v36, %v2037_v27 }
 0x23e   :  { %3230 = vmatpush1.bf16.msra.mxu0 %v3229_v45  ;;  %v3269_v45 = vpack.c.bf16 %v2038_v42, %v2036_v40 }
 0x23f   :  { %3232 = vmatprep.subr.bf16.mxu0 %v3231_v14  ;;  %v827_v14 = vsub.s32 2, %v3660_v61 }
 0x241   :  { %v828_v47 = vrot.slane %v6061_v18, %v827_v14  ;;  %v2209_v18 = vld [vmem:[%s6391_s5 + $0x68] sm:$0xff] }
 0x242   :  { %3234 = vmatpush1.bf16.msra.mxu0 %v3233_v49 }
 0x243   :  { %3236 = vmatprep.subr.bf16.mxu0 %v3235_v50 }
 0x246   :  { %3238 = vmatpush1.bf16.msra.mxu0 %v3237_v55 }
 0x247   :  { %3240 = vmatprep.subr.bf16.mxu0 %v3239_v57  ;;  %v2208_v57 = vld [vmem:[%s6391_s5 + $0x60] sm:$0xff] }
 0x248   :  { %v3297_v58 = vpack.c.bf16 %v2209_v18, %v2208_v57 }
 0x24a   :  { %3242 = vmatpush1.bf16.msra.mxu0 %v3241_v63  ;;  %3298 = vmatpush3.bf16.msra.mxu1 %v3297_v58  ;;  %v3301_v63 = vpack.c.bf16 %v2211_v62, %v2210_v60 }
 0x24b   :  { %3244 = vmatprep.subr.bf16.mxu0 %v3243_v0  ;;  %v2040_v0 = vld [vmem:[%s6390_s4] sm:$0x3]  ;;  %s3367_s4 = smov [#allocation2]  }
 0x24c   :  { %v2045_v4 = vrot.slane %v2040_v0, %v819_v17  ;;  %v2049_v5 = vrot.slane %v2040_v0, %v823_v19  ;;  %s2312_s22 = sshll.u32 %s3367_s4, 4  ;;  %s2313_s22 = int_to_ptr.vmem [resolvable:$true] %s2312_s22 }
 0x24d   :  { %s3341_s23 = scalar_lea.vmem %s2313_s22, 32  ;;  %p3346_p1 = scmp.lt.s32.totalorder %s2313_s22, %s2313_s22 }
 0x24e   :  { %3246 = vmatpush1.bf16.msra.mxu0 %v3245_v8  ;;  %p3342_p0 = scmp.ne.s32.totalorder %s2313_s22, %s3341_s23  ;;  %p3347_p2 = scmp.lt.s32.totalorder %s3341_s23, %s3341_s23 }
 0x24f   :  { %3248 = vmatprep.subr.bf16.mxu0 %v3247_v25 }
 0x250   :  { %p3348_p3 = por %p3347_p2, %p3346_p1 }
 0x252   :  { %3250 = vmatpush1.bf16.msra.mxu0 %v3249_v3  ;;  %v2323_v3 = vld [vmem:[%s6392_s6] ss:$0 sm:$0xff]  ;;  %p3349_p4 = pnand %p3348_p3, %p3342_p0 }
 0x253   :  { %3252 = vmatprep.subr.bf16.mxu0 %v3251_v15 }
 0x256   :  { %3254 = vmatpush1.bf16.msra.mxu0 %v3253_v43 }
 0x257   :  { %3256 = vmatprep.subr.bf16.mxu0 %v3255_v54 }
 0x25a   :  { %3258 = vmatpush1.bf16.msra.mxu0 %v3257_v53 }
 0x25b   :  { %3260 = vmatprep.subr.bf16.mxu0 %v3259_v28 }
 0x25e   :  { %3262 = vmatpush1.bf16.msra.mxu0 %v3261_v32 }
 0x25f   :  { %3264 = vmatprep.subr.bf16.mxu0 %v3263_v34 }
 0x262   :  { %3266 = vmatpush1.bf16.msra.mxu0 %v3265_v37 }
 0x263   :  { %3268 = vmatprep.subr.bf16.mxu0 %v3267_v39 }
 0x266   :  { %3270 = vmatpush1.bf16.msra.mxu0 %v3269_v45 }
 0x298   :  { %v1832_v38 = vpop.f32.mrb[2].mxu1 }
 0x299   :  { %v3307_v49 = vadd.f32 %v1832_v38, %v828_v47  ;;  %v1834_v50 = vpop.f32.mrb[3].mxu1 }
 0x29a   :  { %v3309_v11 = vadd.f32 %v1834_v50, %v832_v56 }
 0x29b   :  { %v3308_v51 = vadd.f32 %v3307_v49, %v6144_v44  ;;  %v2226_v44 = vld [vmem:[%s6391_s5 + $0xf0] sm:$0xff] }
 0x29c   :  { %v3310_v48 = vadd.f32 %v3309_v11, %v6149_v1  ;;  %v2227_v1 = vld [vmem:[%s6391_s5 + $0xf8] sm:$0xff] }
 0x29d   :  { %v1910_v55 = vmax.f32 %v3308_v51, 0.0  ;;  %v3299_v59 = vpack.c.bf16 %v2227_v1, %v2226_v44 }
 0x29e   :  { %v1911_v52 = vmax.f32 %v3310_v48, 0.0 }
 0x29f   :  { %3300 = vmatprep.subr.bf16.mxu1 %v3299_v59 }
 0x2a0   :  { %2187 = vmatprep.mubr.f32.mxu0 %v1911_v52  ;;  %3302 = vmatpush3.bf16.msra.mxu1 %v3301_v63 }
 0x2a1   :  { %2188 = vmatmul.mubr.f32.vlgmr.msra.gmra.mrb[4].mxu0 %v1910_v55 }
 0x374   :  { %v2189_v6 = vpop.f32.mrb[4].mxu0 }
 0x375   :  { %v3311_v7 = vadd.f32 %v2189_v6, %v2045_v4  ;;  %v2191_v8 = vpop.f32.mrb[5].mxu0 }
 0x376   :  { %v3312_v25 = vadd.f32 %v2191_v8, %v2049_v5 }
 0x377   :  { %v2194_v10 = vmax.f32 %v3311_v7, 0.0 }
 0x378   :  { %v2195_v9 = vmax.f32 %v3312_v25, 0.0 }
 0x37a   :  { %2299 = vmatprep.mubr.f32.mxu1 %v2195_v9 }
 0x37b   :  { %2300 = vmatmul.mubr.f32.vlgmr.msra.gmra.mrb[4].mxu1 %v2194_v10 }
 0x44e   :  { %v2356_v12 = vpop.f32.mrb[4].mxu1 }
 0x44f   :  { %v2357_v13 = vpop.f32.mrb[5].mxu1 }
 0x450   :  { %v2358_v17 = vadd.f32 %v2357_v13, %v2356_v12 }
 0x452   :  { %v2302_v15 = vadd.f32 %v2358_v17, %v2323_v3 }
 0x454   :  { %2305 = vst [vmem:[#allocation2] sm:$0x3] %v2302_v15 }
 0x455   :  { %3352 = shalt.err (!%p3349_p4)
}
 0x456   :  { %s3353_s26 = scalar_lea.hbm %s6393_s7, 32 }
 0x457   :  { %p3354_p5 = scmp.ne.s32.totalorder %s6393_s7, %s3353_s26  ;;  %p3357_p6 = scmp.lt.u32.totalorder %s3353_s26, %s6393_s7 }
 0x459   :  { %p3359_p7 = pnand %p3357_p6, %p3354_p5 }
 0x45b   :  { %3362 = shalt.err (!%p3359_p7)
}
 0x45c   :  { %2315 = dma.vmem_to_hbm [thread:$0]  %s2313_s22, 32, %s6393_s7, [#allocation3]  }
 0x45d   :  { %3363 = dma.done.wait [#allocation3], 32  }
 0x45e   :  { %3364 = vsyncadd [#allocation3], 4294967264 }
 0x45f   :  { %2319 = vsyncpa [#allocation3], 1 }

</bundles_post_ra>
